<compile_context>
chip_gen: v7x
topology: tpu7x:2x2x1
jax: 0.10.0
libtpu: 0.0.40
codegen_flags: <defaults>
</compile_context>

<pallas_src>
import functools

import jax
import jax.numpy as jnp
from jax.experimental import pallas as pl
from jax.experimental.pallas import tpu as pltpu


VMEM_LIMIT = 32 * 1024 * 1024  # safe on v5e/v6e (128 MiB) and v7x (64 MiB)


# ----------------------------- Pallas kernels ------------------------------ #

def _conv_bn_relu_pool_kernel(x00_ref, x01_ref, x10_ref, x11_ref,
                              w_ref, s_ref, b_ref, o_ref):
    """Four corner patch-matmuls (bf16 -> f32), per-channel affine, 2x2 max, ReLU."""
    w = w_ref[...]
    s = s_ref[...]
    b = b_ref[...]

    def tap(x_ref):
        return jnp.dot(x_ref[...], w, preferred_element_type=jnp.float32) * s + b

    y = tap(x00_ref)
    y = jnp.maximum(y, tap(x01_ref))
    y = jnp.maximum(y, tap(x10_ref))
    y = jnp.maximum(y, tap(x11_ref))
    o_ref[...] = jnp.maximum(y, 0.0).astype(o_ref.dtype)


def _linear_kernel(x_ref, w_ref, s_ref, b_ref, o_ref, *, relu):
    """Single-shot y = maybe_relu((x @ w) * s + b); no scratch, no grid loop."""
    y = jnp.dot(x_ref[...], w_ref[...], preferred_element_type=jnp.float32)
    y = y * s_ref[...] + b_ref[...]
    if relu:
        y = jnp.maximum(y, 0.0)
    o_ref[...] = y.astype(o_ref.dtype)


def _linear_ktiled_kernel(x_ref, w_ref, s_ref, b_ref, o_ref, *, relu):
    """K-tiled matmul; accumulate directly into the resident f32 output block."""
    k = pl.program_id(0)

    @pl.when(k == 0)
    def _():
        o_ref[...] = jnp.zeros_like(o_ref)

    o_ref[...] += jnp.dot(x_ref[...], w_ref[...],
                          preferred_element_type=jnp.float32)

    @pl.when(k == pl.num_programs(0) - 1)
    def _():
        y = o_ref[...] * s_ref[...] + b_ref[...]
        if relu:
            y = jnp.maximum(y, 0.0)
        o_ref[...] = y


# ------------------------------- wrappers ---------------------------------- #

def conv3x3_bn_relu_pool(x_nhwc, w, scale, bias):
    """3x3 stride-1 pad-1 conv + folded-BN affine + ReLU + 2x2/2 maxpool (fused)."""
    N, H, W, C = x_nhwc.shape
    Cout = w.shape[-1]
    H2, W2 = H // 2, W // 2
    M4 = N * H2 * W2
    K = 9 * C

    # One im2col patch matrix per pool-window corner (dy, dx); rows are the
    # pooled output positions (n, h2, w2) in row-major NHWC order.
    # TODO(synk): patch construction (im2col) still runs in XLA; only the
    # matmul + affine + ReLU + pool are inside the Pallas kernel.
    xp = jnp.pad(x_nhwc, ((0, 0), (1, 1), (1, 1), (0, 0)))
    corners = []
    for dy in range(2):
        for dx in range(2):
            taps = [
                xp[:, dy + kh:dy + kh + H - 1:2, dx + kw:dx + kw + W - 1:2, :]
                for kh in range(3) for kw in range(3)
            ]
            pt = jnp.concatenate(taps, axis=-1)          # (N, H2, W2, 9*C)
            corners.append(pt.reshape(M4, K).astype(jnp.bfloat16))

    wm = w.reshape(K, Cout).astype(jnp.bfloat16)         # matches (kh,kw,cin) order
    s2 = scale.reshape(1, Cout).astype(jnp.float32)
    b2 = bias.reshape(1, Cout).astype(jnp.float32)

    tm = 128 if (M4 % 128 == 0 and M4 > 128) else M4
    nm = M4 // tm

    in_block = pl.BlockSpec((tm, K), lambda i: (i, 0))
    out = pl.pallas_call(
        _conv_bn_relu_pool_kernel,
        out_shape=jax.ShapeDtypeStruct((M4, Cout), jnp.float32),
        grid_spec=pltpu.PrefetchScalarGridSpec(
            num_scalar_prefetch=0,
            grid=(nm,),
            in_specs=[in_block, in_block, in_block, in_block,
                      pl.BlockSpec((K, Cout), lambda i: (0, 0)),
                      pl.BlockSpec((1, Cout), lambda i: (0, 0)),
                      pl.BlockSpec((1, Cout), lambda i: (0, 0))],
            out_specs=pl.BlockSpec((tm, Cout), lambda i: (i, 0)),
        ),
        compiler_params=pltpu.CompilerParams(
            dimension_semantics=("parallel",),
            vmem_limit_bytes=VMEM_LIMIT,
        ),
    )(*corners, wm, s2, b2)
    return out.reshape(N, H2, W2, Cout)


def fused_linear(x, w, bias, *, scale=None, relu, tk=2048):
    """y = maybe_relu((x @ w) * scale + bias); bf16 inputs, f32 accumulation."""
    M, K = x.shape
    K2, Nout = w.shape
    assert K == K2
    if scale is None:
        scale = jnp.ones((Nout,), jnp.float32)

    xb = x.astype(jnp.bfloat16)
    wb = w.astype(jnp.bfloat16)
    s2 = scale.reshape(1, Nout).astype(jnp.float32)
    b2 = bias.reshape(1, Nout).astype(jnp.float32)

    if K > tk and K % tk == 0:
        nk = K // tk
        kernel = functools.partial(_linear_ktiled_kernel, relu=relu)
        grid_spec = pltpu.PrefetchScalarGridSpec(
            num_scalar_prefetch=0,
            grid=(nk,),
            in_specs=[
                pl.BlockSpec((M, tk), lambda k: (0, k)),
                pl.BlockSpec((tk, Nout), lambda k: (k, 0)),
                pl.BlockSpec((1, Nout), lambda k: (0, 0)),
                pl.BlockSpec((1, Nout), lambda k: (0, 0)),
            ],
            out_specs=pl.BlockSpec((M, Nout), lambda k: (0, 0)),
        )
    else:
        kernel = functools.partial(_linear_kernel, relu=relu)
        grid_spec = pltpu.PrefetchScalarGridSpec(
            num_scalar_prefetch=0,
            grid=(1,),
            in_specs=[
                pl.BlockSpec((M, K), lambda i: (0, 0)),
                pl.BlockSpec((K, Nout), lambda i: (0, 0)),
                pl.BlockSpec((1, Nout), lambda i: (0, 0)),
                pl.BlockSpec((1, Nout), lambda i: (0, 0)),
            ],
            out_specs=pl.BlockSpec((M, Nout), lambda i: (0, 0)),
        )

    return pl.pallas_call(
        kernel,
        out_shape=jax.ShapeDtypeStruct((M, Nout), jnp.float32),
        grid_spec=grid_spec,
        compiler_params=pltpu.CompilerParams(
            dimension_semantics=("arbitrary",),
            vmem_limit_bytes=VMEM_LIMIT,
        ),
    )(xb, wb, s2, b2)


# ------------------------------- model glue -------------------------------- #

def init_params(key):
    p = {}
    ks = jax.random.split(key, 16)
    i = 0

    def nrm(k, shape, s=0.05):
        return s * jax.random.normal(k, shape, dtype=jnp.float32)

    for li, (ci, co) in enumerate(zip((3, 64, 128), (64, 128, 256)), start=1):
        p[f"conv{li}_w"] = nrm(ks[i], (3, 3, ci, co)); i += 1      # (kh,kw,cin,cout)
        p[f"conv{li}_b"] = nrm(ks[i], (co,)); i += 1
        p[f"bn{li}_gamma"] = jnp.ones((co,), jnp.float32)
        p[f"bn{li}_beta"] = jnp.zeros((co,), jnp.float32)
        p[f"bn{li}_mean"] = jnp.zeros((co,), jnp.float32)          # running stats
        p[f"bn{li}_var"] = jnp.ones((co,), jnp.float32)

    for li, (fi, fo) in enumerate(((256 * 4 * 4, 1024), (1024, 512), (512, 10)),
                                  start=1):
        p[f"fc{li}_w"] = nrm(ks[i], (fi, fo)); i += 1
        p[f"fc{li}_b"] = nrm(ks[i], (fo,)); i += 1
    return p


def cnn_forward(params, x_nchw):
    eps = 1e-5
    x = jnp.transpose(x_nchw, (0, 2, 3, 1)).astype(jnp.float32)    # NCHW -> NHWC

    for li in (1, 2, 3):
        w = params[f"conv{li}_w"]
        cb = params[f"conv{li}_b"]
        g, bt = params[f"bn{li}_gamma"], params[f"bn{li}_beta"]
        rm, rv = params[f"bn{li}_mean"], params[f"bn{li}_var"]
        # Fold eval-mode BatchNorm + conv bias into per-channel affine.
        scale = g / jnp.sqrt(rv + eps)
        bias = bt + (cb - rm) * scale
        x = conv3x3_bn_relu_pool(x, w, scale, bias)

    # Flatten exactly like torch's x.view(-1, 256*4*4) on an NCHW tensor.
    N = x.shape[0]
    flat = jnp.transpose(x, (0, 3, 1, 2)).reshape(N, 256 * 4 * 4)

    # TODO(synk): dropout(p=0.3) is identity and BatchNorm uses running stats
    # (inference mode); training-mode behavior is not reproduced here.
    h = fused_linear(flat, params["fc1_w"], params["fc1_b"], relu=True)   # K=4096 tiled
    h = fused_linear(h, params["fc2_w"], params["fc2_b"], relu=True)

    # fc3: pad output dim 10 -> 128 for lane-dense stores, slice back to 10.
    w3 = jnp.pad(params["fc3_w"], ((0, 0), (0, 118)))
    b3 = jnp.pad(params["fc3_b"], ((0, 118),))
    out = fused_linear(h, w3, b3, relu=False)[:, :10]
    return out


if __name__ == "__main__":
    key = jax.random.PRNGKey(0)
    # Forward implies CIFAR-like 32x32 input (flatten expects 256*4*4 after 3 pools).
    x = jax.random.normal(key, (2, 3, 32, 32), dtype=jnp.float32)
    params = init_params(jax.random.PRNGKey(1))

    fwd = jax.jit(functools.partial(cnn_forward, params))
    out = fwd(x)
    jax.block_until_ready(out)
    assert out.shape == (2, 10) and out.dtype == jnp.float32
    print("KERNEL_OK")
</pallas_src>

<mosaic_0001>
module attributes {stable_mosaic.version = 11 : i64} {
  func.func @_conv_bn_relu_pool_kernel(%arg0: i32, %arg1: memref<128x27xbf16, #tpu.memory_space<vmem>>, %arg2: memref<128x27xbf16, #tpu.memory_space<vmem>>, %arg3: memref<128x27xbf16, #tpu.memory_space<vmem>>, %arg4: memref<128x27xbf16, #tpu.memory_space<vmem>>, %arg5: memref<27x64xbf16, #tpu.memory_space<vmem>>, %arg6: memref<1x64xf32, #tpu.memory_space<vmem>>, %arg7: memref<1x64xf32, #tpu.memory_space<vmem>>, %arg8: memref<128x64xf32, #tpu.memory_space<vmem>>) attributes {dimension_semantics = [#tpu.dimension_semantics<parallel>], iteration_bounds = array<i64: 4>, scalar_prefetch = 0 : i64, scratch_operands = 0 : i64, tpu.core_type = #tpu.core_type<tc>, window_params = [{transform_indices = @transform_0, window_bounds = array<i64: 128, 27>}, {transform_indices = @transform_1, window_bounds = array<i64: 128, 27>}, {transform_indices = @transform_2, window_bounds = array<i64: 128, 27>}, {transform_indices = @transform_3, window_bounds = array<i64: 128, 27>}, {pipeline_mode = #tpu.pipeline_mode<synchronous>, transform_indices = @transform_4, window_bounds = array<i64: 27, 64>}, {pipeline_mode = #tpu.pipeline_mode<synchronous>, transform_indices = @transform_5, window_bounds = array<i64: 1, 64>}, {pipeline_mode = #tpu.pipeline_mode<synchronous>, transform_indices = @transform_6, window_bounds = array<i64: 1, 64>}, {transform_indices = @transform_7, window_bounds = array<i64: 128, 64>}]} {
    %c0 = arith.constant 0 : index
    %c0_0 = arith.constant 0 : index
    %0 = vector.load %arg5[%c0, %c0_0] : memref<27x64xbf16, #tpu.memory_space<vmem>>, vector<27x64xbf16>
    %c0_1 = arith.constant 0 : index
    %c0_2 = arith.constant 0 : index
    %1 = vector.load %arg6[%c0_1, %c0_2] : memref<1x64xf32, #tpu.memory_space<vmem>>, vector<1x64xf32>
    %c0_3 = arith.constant 0 : index
    %c0_4 = arith.constant 0 : index
    %2 = vector.load %arg7[%c0_3, %c0_4] : memref<1x64xf32, #tpu.memory_space<vmem>>, vector<1x64xf32>
    %c0_5 = arith.constant 0 : index
    %c0_6 = arith.constant 0 : index
    %3 = vector.load %arg1[%c0_5, %c0_6] : memref<128x27xbf16, #tpu.memory_space<vmem>>, vector<128x27xbf16>
    %cst = arith.constant dense<0.000000e+00> : vector<128x64xf32>
    %4 = tpu.matmul %3, %0, %cst {dimension_numbers = #tpu.dot_dimension_numbers<[1], [0], [0], [1], [0, 0, 1, 1], [], []>} : vector<128x27xbf16>, vector<27x64xbf16>, vector<128x64xf32> -> vector<128x64xf32>
    %5 = vector.broadcast %1 : vector<1x64xf32> to vector<128x64xf32>
    %6 = arith.mulf %4, %5 : vector<128x64xf32>
    %7 = vector.broadcast %2 : vector<1x64xf32> to vector<128x64xf32>
    %8 = arith.addf %6, %7 : vector<128x64xf32>
    %c0_7 = arith.constant 0 : index
    %c0_8 = arith.constant 0 : index
    %9 = vector.load %arg2[%c0_7, %c0_8] : memref<128x27xbf16, #tpu.memory_space<vmem>>, vector<128x27xbf16>
    %cst_9 = arith.constant dense<0.000000e+00> : vector<128x64xf32>
    %10 = tpu.matmul %9, %0, %cst_9 {dimension_numbers = #tpu.dot_dimension_numbers<[1], [0], [0], [1], [0, 0, 1, 1], [], []>} : vector<128x27xbf16>, vector<27x64xbf16>, vector<128x64xf32> -> vector<128x64xf32>
    %11 = vector.broadcast %1 : vector<1x64xf32> to vector<128x64xf32>
    %12 = arith.mulf %10, %11 : vector<128x64xf32>
    %13 = vector.broadcast %2 : vector<1x64xf32> to vector<128x64xf32>
    %14 = arith.addf %12, %13 : vector<128x64xf32>
    %15 = arith.maximumf %8, %14 : vector<128x64xf32>
    %c0_10 = arith.constant 0 : index
    %c0_11 = arith.constant 0 : index
    %16 = vector.load %arg3[%c0_10, %c0_11] : memref<128x27xbf16, #tpu.memory_space<vmem>>, vector<128x27xbf16>
    %cst_12 = arith.constant dense<0.000000e+00> : vector<128x64xf32>
    %17 = tpu.matmul %16, %0, %cst_12 {dimension_numbers = #tpu.dot_dimension_numbers<[1], [0], [0], [1], [0, 0, 1, 1], [], []>} : vector<128x27xbf16>, vector<27x64xbf16>, vector<128x64xf32> -> vector<128x64xf32>
    %18 = vector.broadcast %1 : vector<1x64xf32> to vector<128x64xf32>
    %19 = arith.mulf %17, %18 : vector<128x64xf32>
    %20 = vector.broadcast %2 : vector<1x64xf32> to vector<128x64xf32>
    %21 = arith.addf %19, %20 : vector<128x64xf32>
    %22 = arith.maximumf %15, %21 : vector<128x64xf32>
    %c0_13 = arith.constant 0 : index
    %c0_14 = arith.constant 0 : index
    %23 = vector.load %arg4[%c0_13, %c0_14] : memref<128x27xbf16, #tpu.memory_space<vmem>>, vector<128x27xbf16>
    %cst_15 = arith.constant dense<0.000000e+00> : vector<128x64xf32>
    %24 = tpu.matmul %23, %0, %cst_15 {dimension_numbers = #tpu.dot_dimension_numbers<[1], [0], [0], [1], [0, 0, 1, 1], [], []>} : vector<128x27xbf16>, vector<27x64xbf16>, vector<128x64xf32> -> vector<128x64xf32>
    %25 = vector.broadcast %1 : vector<1x64xf32> to vector<128x64xf32>
    %26 = arith.mulf %24, %25 : vector<128x64xf32>
    %27 = vector.broadcast %2 : vector<1x64xf32> to vector<128x64xf32>
    %28 = arith.addf %26, %27 : vector<128x64xf32>
    %29 = arith.maximumf %22, %28 : vector<128x64xf32>
    %cst_16 = arith.constant 0.000000e+00 : f32
    %30 = vector.broadcast %cst_16 : f32 to vector<128x64xf32>
    %31 = arith.maximumf %29, %30 : vector<128x64xf32>
    %c0_17 = arith.constant 0 : index
    %c0_18 = arith.constant 0 : index
    %32 = vector.load %arg8[%c0_17, %c0_18] : memref<128x64xf32, #tpu.memory_space<vmem>>, vector<128x64xf32>
    tpu.vector_store %arg8[%c0_17, %c0_18], %31 {strides = array<i32>} : memref<128x64xf32, #tpu.memory_space<vmem>>, vector<128x64xf32>,
    return
  }
  func.func @transform_0(%arg0: i32) -> (i32, i32) {
    %c0_i32 = arith.constant 0 : i32
    %c0_i32_0 = arith.constant 0 : i32
    return %arg0, %c0_i32 : i32, i32
  }
  func.func @transform_1(%arg0: i32) -> (i32, i32) {
    %c0_i32 = arith.constant 0 : i32
    %c0_i32_0 = arith.constant 0 : i32
    return %arg0, %c0_i32 : i32, i32
  }
  func.func @transform_2(%arg0: i32) -> (i32, i32) {
    %c0_i32 = arith.constant 0 : i32
    %c0_i32_0 = arith.constant 0 : i32
    return %arg0, %c0_i32 : i32, i32
  }
  func.func @transform_3(%arg0: i32) -> (i32, i32) {
    %c0_i32 = arith.constant 0 : i32
    %c0_i32_0 = arith.constant 0 : i32
    return %arg0, %c0_i32 : i32, i32
  }
  func.func @transform_4(%arg0: i32) -> (i32, i32) {
    %c0_i32 = arith.constant 0 : i32
    %c0_i32_0 = arith.constant 0 : i32
    %c0_i32_1 = arith.constant 0 : i32
    return %c0_i32, %c0_i32_0 : i32, i32
  }
  func.func @transform_5(%arg0: i32) -> (i32, i32) {
    %c0_i32 = arith.constant 0 : i32
    %c0_i32_0 = arith.constant 0 : i32
    %c0_i32_1 = arith.constant 0 : i32
    return %c0_i32, %c0_i32_0 : i32, i32
  }
  func.func @transform_6(%arg0: i32) -> (i32, i32) {
    %c0_i32 = arith.constant 0 : i32
    %c0_i32_0 = arith.constant 0 : i32
    %c0_i32_1 = arith.constant 0 : i32
    return %c0_i32, %c0_i32_0 : i32, i32
  }
  func.func @transform_7(%arg0: i32) -> (i32, i32) {
    %c0_i32 = arith.constant 0 : i32
    %c0_i32_0 = arith.constant 0 : i32
    return %arg0, %c0_i32 : i32, i32
  }
}

module attributes {stable_mosaic.version = 11 : i64} {
  func.func @_conv_bn_relu_pool_kernel(%arg0: i32, %arg1: memref<128x576xbf16, #tpu.memory_space<vmem>>, %arg2: memref<128x576xbf16, #tpu.memory_space<vmem>>, %arg3: memref<128x576xbf16, #tpu.memory_space<vmem>>, %arg4: memref<128x576xbf16, #tpu.memory_space<vmem>>, %arg5: memref<576x128xbf16, #tpu.memory_space<vmem>>, %arg6: memref<1x128xf32, #tpu.memory_space<vmem>>, %arg7: memref<1x128xf32, #tpu.memory_space<vmem>>, %arg8: memref<128x128xf32, #tpu.memory_space<vmem>>) attributes {dimension_semantics = [#tpu.dimension_semantics<parallel>], iteration_bounds = array<i64: 1>, scalar_prefetch = 0 : i64, scratch_operands = 0 : i64, tpu.core_type = #tpu.core_type<tc>, window_params = [{transform_indices = @transform_0, window_bounds = array<i64: 128, 576>}, {transform_indices = @transform_1, window_bounds = array<i64: 128, 576>}, {transform_indices = @transform_2, window_bounds = array<i64: 128, 576>}, {transform_indices = @transform_3, window_bounds = array<i64: 128, 576>}, {pipeline_mode = #tpu.pipeline_mode<synchronous>, transform_indices = @transform_4, window_bounds = array<i64: 576, 128>}, {pipeline_mode = #tpu.pipeline_mode<synchronous>, transform_indices = @transform_5, window_bounds = array<i64: 1, 128>}, {pipeline_mode = #tpu.pipeline_mode<synchronous>, transform_indices = @transform_6, window_bounds = array<i64: 1, 128>}, {transform_indices = @transform_7, window_bounds = array<i64: 128, 128>}]} {
    %c0 = arith.constant 0 : index
    %c0_0 = arith.constant 0 : index
    %0 = vector.load %arg5[%c0, %c0_0] : memref<576x128xbf16, #tpu.memory_space<vmem>>, vector<576x128xbf16>
    %c0_1 = arith.constant 0 : index
    %c0_2 = arith.constant 0 : index
    %1 = vector.load %arg6[%c0_1, %c0_2] : memref<1x128xf32, #tpu.memory_space<vmem>>, vector<1x128xf32>
    %c0_3 = arith.constant 0 : index
    %c0_4 = arith.constant 0 : index
    %2 = vector.load %arg7[%c0_3, %c0_4] : memref<1x128xf32, #tpu.memory_space<vmem>>, vector<1x128xf32>
    %c0_5 = arith.constant 0 : index
    %c0_6 = arith.constant 0 : index
    %3 = vector.load %arg1[%c0_5, %c0_6] : memref<128x576xbf16, #tpu.memory_space<vmem>>, vector<128x576xbf16>
    %cst = arith.constant dense<0.000000e+00> : vector<128x128xf32>
    %4 = tpu.matmul %3, %0, %cst {dimension_numbers = #tpu.dot_dimension_numbers<[1], [0], [0], [1], [0, 0, 1, 1], [], []>} : vector<128x576xbf16>, vector<576x128xbf16>, vector<128x128xf32> -> vector<128x128xf32>
    %5 = vector.broadcast %1 : vector<1x128xf32> to vector<128x128xf32>
    %6 = arith.mulf %4, %5 : vector<128x128xf32>
    %7 = vector.broadcast %2 : vector<1x128xf32> to vector<128x128xf32>
    %8 = arith.addf %6, %7 : vector<128x128xf32>
    %c0_7 = arith.constant 0 : index
    %c0_8 = arith.constant 0 : index
    %9 = vector.load %arg2[%c0_7, %c0_8] : memref<128x576xbf16, #tpu.memory_space<vmem>>, vector<128x576xbf16>
    %cst_9 = arith.constant dense<0.000000e+00> : vector<128x128xf32>
    %10 = tpu.matmul %9, %0, %cst_9 {dimension_numbers = #tpu.dot_dimension_numbers<[1], [0], [0], [1], [0, 0, 1, 1], [], []>} : vector<128x576xbf16>, vector<576x128xbf16>, vector<128x128xf32> -> vector<128x128xf32>
    %11 = vector.broadcast %1 : vector<1x128xf32> to vector<128x128xf32>
    %12 = arith.mulf %10, %11 : vector<128x128xf32>
    %13 = vector.broadcast %2 : vector<1x128xf32> to vector<128x128xf32>
    %14 = arith.addf %12, %13 : vector<128x128xf32>
    %15 = arith.maximumf %8, %14 : vector<128x128xf32>
    %c0_10 = arith.constant 0 : index
    %c0_11 = arith.constant 0 : index
    %16 = vector.load %arg3[%c0_10, %c0_11] : memref<128x576xbf16, #tpu.memory_space<vmem>>, vector<128x576xbf16>
    %cst_12 = arith.constant dense<0.000000e+00> : vector<128x128xf32>
    %17 = tpu.matmul %16, %0, %cst_12 {dimension_numbers = #tpu.dot_dimension_numbers<[1], [0], [0], [1], [0, 0, 1, 1], [], []>} : vector<128x576xbf16>, vector<576x128xbf16>, vector<128x128xf32> -> vector<128x128xf32>
    %18 = vector.broadcast %1 : vector<1x128xf32> to vector<128x128xf32>
    %19 = arith.mulf %17, %18 : vector<128x128xf32>
    %20 = vector.broadcast %2 : vector<1x128xf32> to vector<128x128xf32>
    %21 = arith.addf %19, %20 : vector<128x128xf32>
    %22 = arith.maximumf %15, %21 : vector<128x128xf32>
    %c0_13 = arith.constant 0 : index
    %c0_14 = arith.constant 0 : index
    %23 = vector.load %arg4[%c0_13, %c0_14] : memref<128x576xbf16, #tpu.memory_space<vmem>>, vector<128x576xbf16>
    %cst_15 = arith.constant dense<0.000000e+00> : vector<128x128xf32>
    %24 = tpu.matmul %23, %0, %cst_15 {dimension_numbers = #tpu.dot_dimension_numbers<[1], [0], [0], [1], [0, 0, 1, 1], [], []>} : vector<128x576xbf16>, vector<576x128xbf16>, vector<128x128xf32> -> vector<128x128xf32>
    %25 = vector.broadcast %1 : vector<1x128xf32> to vector<128x128xf32>
    %26 = arith.mulf %24, %25 : vector<128x128xf32>
    %27 = vector.broadcast %2 : vector<1x128xf32> to vector<128x128xf32>
    %28 = arith.addf %26, %27 : vector<128x128xf32>
    %29 = arith.maximumf %22, %28 : vector<128x128xf32>
    %cst_16 = arith.constant 0.000000e+00 : f32
    %30 = vector.broadcast %cst_16 : f32 to vector<128x128xf32>
    %31 = arith.maximumf %29, %30 : vector<128x128xf32>
    %c0_17 = arith.constant 0 : index
    %c0_18 = arith.constant 0 : index
    %32 = vector.load %arg8[%c0_17, %c0_18] : memref<128x128xf32, #tpu.memory_space<vmem>>, vector<128x128xf32>
    tpu.vector_store %arg8[%c0_17, %c0_18], %31 {strides = array<i32>} : memref<128x128xf32, #tpu.memory_space<vmem>>, vector<128x128xf32>,
    return
  }
  func.func @transform_0(%arg0: i32) -> (i32, i32) {
    %c0_i32 = arith.constant 0 : i32
    %c0_i32_0 = arith.constant 0 : i32
    return %arg0, %c0_i32 : i32, i32
  }
  func.func @transform_1(%arg0: i32) -> (i32, i32) {
    %c0_i32 = arith.constant 0 : i32
    %c0_i32_0 = arith.constant 0 : i32
    return %arg0, %c0_i32 : i32, i32
  }
  func.func @transform_2(%arg0: i32) -> (i32, i32) {
    %c0_i32 = arith.constant 0 : i32
    %c0_i32_0 = arith.constant 0 : i32
    return %arg0, %c0_i32 : i32, i32
  }
  func.func @transform_3(%arg0: i32) -> (i32, i32) {
    %c0_i32 = arith.constant 0 : i32
    %c0_i32_0 = arith.constant 0 : i32
    return %arg0, %c0_i32 : i32, i32
  }
  func.func @transform_4(%arg0: i32) -> (i32, i32) {
    %c0_i32 = arith.constant 0 : i32
    %c0_i32_0 = arith.constant 0 : i32
    %c0_i32_1 = arith.constant 0 : i32
    return %c0_i32, %c0_i32_0 : i32, i32
  }
  func.func @transform_5(%arg0: i32) -> (i32, i32) {
    %c0_i32 = arith.constant 0 : i32
    %c0_i32_0 = arith.constant 0 : i32
    %c0_i32_1 = arith.constant 0 : i32
    return %c0_i32, %c0_i32_0 : i32, i32
  }
  func.func @transform_6(%arg0: i32) -> (i32, i32) {
    %c0_i32 = arith.constant 0 : i32
    %c0_i32_0 = arith.constant 0 : i32
    %c0_i32_1 = arith.constant 0 : i32
    return %c0_i32, %c0_i32_0 : i32, i32
  }
  func.func @transform_7(%arg0: i32) -> (i32, i32) {
    %c0_i32 = arith.constant 0 : i32
    %c0_i32_0 = arith.constant 0 : i32
    return %arg0, %c0_i32 : i32, i32
  }
}

module attributes {stable_mosaic.version = 11 : i64} {
  func.func @_conv_bn_relu_pool_kernel(%arg0: i32, %arg1: memref<32x1152xbf16, #tpu.memory_space<vmem>>, %arg2: memref<32x1152xbf16, #tpu.memory_space<vmem>>, %arg3: memref<32x1152xbf16, #tpu.memory_space<vmem>>, %arg4: memref<32x1152xbf16, #tpu.memory_space<vmem>>, %arg5: memref<1152x256xbf16, #tpu.memory_space<vmem>>, %arg6: memref<1x256xf32, #tpu.memory_space<vmem>>, %arg7: memref<1x256xf32, #tpu.memory_space<vmem>>, %arg8: memref<32x256xf32, #tpu.memory_space<vmem>>) attributes {dimension_semantics = [#tpu.dimension_semantics<parallel>], iteration_bounds = array<i64: 1>, scalar_prefetch = 0 : i64, scratch_operands = 0 : i64, tpu.core_type = #tpu.core_type<tc>, window_params = [{transform_indices = @transform_0, window_bounds = array<i64: 32, 1152>}, {transform_indices = @transform_1, window_bounds = array<i64: 32, 1152>}, {transform_indices = @transform_2, window_bounds = array<i64: 32, 1152>}, {transform_indices = @transform_3, window_bounds = array<i64: 32, 1152>}, {pipeline_mode = #tpu.pipeline_mode<synchronous>, transform_indices = @transform_4, window_bounds = array<i64: 1152, 256>}, {pipeline_mode = #tpu.pipeline_mode<synchronous>, transform_indices = @transform_5, window_bounds = array<i64: 1, 256>}, {pipeline_mode = #tpu.pipeline_mode<synchronous>, transform_indices = @transform_6, window_bounds = array<i64: 1, 256>}, {transform_indices = @transform_7, window_bounds = array<i64: 32, 256>}]} {
    %c0 = arith.constant 0 : index
    %c0_0 = arith.constant 0 : index
    %0 = vector.load %arg5[%c0, %c0_0] : memref<1152x256xbf16, #tpu.memory_space<vmem>>, vector<1152x256xbf16>
    %c0_1 = arith.constant 0 : index
    %c0_2 = arith.constant 0 : index
    %1 = vector.load %arg6[%c0_1, %c0_2] : memref<1x256xf32, #tpu.memory_space<vmem>>, vector<1x256xf32>
    %c0_3 = arith.constant 0 : index
    %c0_4 = arith.constant 0 : index
    %2 = vector.load %arg7[%c0_3, %c0_4] : memref<1x256xf32, #tpu.memory_space<vmem>>, vector<1x256xf32>
    %c0_5 = arith.constant 0 : index
    %c0_6 = arith.constant 0 : index
    %3 = vector.load %arg1[%c0_5, %c0_6] : memref<32x1152xbf16, #tpu.memory_space<vmem>>, vector<32x1152xbf16>
    %cst = arith.constant dense<0.000000e+00> : vector<32x256xf32>
    %4 = tpu.matmul %3, %0, %cst {dimension_numbers = #tpu.dot_dimension_numbers<[1], [0], [0], [1], [0, 0, 1, 1], [], []>} : vector<32x1152xbf16>, vector<1152x256xbf16>, vector<32x256xf32> -> vector<32x256xf32>
    %5 = vector.broadcast %1 : vector<1x256xf32> to vector<32x256xf32>
    %6 = arith.mulf %4, %5 : vector<32x256xf32>
    %7 = vector.broadcast %2 : vector<1x256xf32> to vector<32x256xf32>
    %8 = arith.addf %6, %7 : vector<32x256xf32>
    %c0_7 = arith.constant 0 : index
    %c0_8 = arith.constant 0 : index
    %9 = vector.load %arg2[%c0_7, %c0_8] : memref<32x1152xbf16, #tpu.memory_space<vmem>>, vector<32x1152xbf16>
    %cst_9 = arith.constant dense<0.000000e+00> : vector<32x256xf32>
    %10 = tpu.matmul %9, %0, %cst_9 {dimension_numbers = #tpu.dot_dimension_numbers<[1], [0], [0], [1], [0, 0, 1, 1], [], []>} : vector<32x1152xbf16>, vector<1152x256xbf16>, vector<32x256xf32> -> vector<32x256xf32>
    %11 = vector.broadcast %1 : vector<1x256xf32> to vector<32x256xf32>
    %12 = arith.mulf %10, %11 : vector<32x256xf32>
    %13 = vector.broadcast %2 : vector<1x256xf32> to vector<32x256xf32>
    %14 = arith.addf %12, %13 : vector<32x256xf32>
    %15 = arith.maximumf %8, %14 : vector<32x256xf32>
    %c0_10 = arith.constant 0 : index
    %c0_11 = arith.constant 0 : index
    %16 = vector.load %arg3[%c0_10, %c0_11] : memref<32x1152xbf16, #tpu.memory_space<vmem>>, vector<32x1152xbf16>
    %cst_12 = arith.constant dense<0.000000e+00> : vector<32x256xf32>
    %17 = tpu.matmul %16, %0, %cst_12 {dimension_numbers = #tpu.dot_dimension_numbers<[1], [0], [0], [1], [0, 0, 1, 1], [], []>} : vector<32x1152xbf16>, vector<1152x256xbf16>, vector<32x256xf32> -> vector<32x256xf32>
    %18 = vector.broadcast %1 : vector<1x256xf32> to vector<32x256xf32>
    %19 = arith.mulf %17, %18 : vector<32x256xf32>
    %20 = vector.broadcast %2 : vector<1x256xf32> to vector<32x256xf32>
    %21 = arith.addf %19, %20 : vector<32x256xf32>
    %22 = arith.maximumf %15, %21 : vector<32x256xf32>
    %c0_13 = arith.constant 0 : index
    %c0_14 = arith.constant 0 : index
    %23 = vector.load %arg4[%c0_13, %c0_14] : memref<32x1152xbf16, #tpu.memory_space<vmem>>, vector<32x1152xbf16>
    %cst_15 = arith.constant dense<0.000000e+00> : vector<32x256xf32>
    %24 = tpu.matmul %23, %0, %cst_15 {dimension_numbers = #tpu.dot_dimension_numbers<[1], [0], [0], [1], [0, 0, 1, 1], [], []>} : vector<32x1152xbf16>, vector<1152x256xbf16>, vector<32x256xf32> -> vector<32x256xf32>
    %25 = vector.broadcast %1 : vector<1x256xf32> to vector<32x256xf32>
    %26 = arith.mulf %24, %25 : vector<32x256xf32>
    %27 = vector.broadcast %2 : vector<1x256xf32> to vector<32x256xf32>
    %28 = arith.addf %26, %27 : vector<32x256xf32>
    %29 = arith.maximumf %22, %28 : vector<32x256xf32>
    %cst_16 = arith.constant 0.000000e+00 : f32
    %30 = vector.broadcast %cst_16 : f32 to vector<32x256xf32>
    %31 = arith.maximumf %29, %30 : vector<32x256xf32>
    %c0_17 = arith.constant 0 : index
    %c0_18 = arith.constant 0 : index
    %32 = vector.load %arg8[%c0_17, %c0_18] : memref<32x256xf32, #tpu.memory_space<vmem>>, vector<32x256xf32>
    tpu.vector_store %arg8[%c0_17, %c0_18], %31 {strides = array<i32>} : memref<32x256xf32, #tpu.memory_space<vmem>>, vector<32x256xf32>,
    return
  }
  func.func @transform_0(%arg0: i32) -> (i32, i32) {
    %c0_i32 = arith.constant 0 : i32
    %c0_i32_0 = arith.constant 0 : i32
    return %arg0, %c0_i32 : i32, i32
  }
  func.func @transform_1(%arg0: i32) -> (i32, i32) {
    %c0_i32 = arith.constant 0 : i32
    %c0_i32_0 = arith.constant 0 : i32
    return %arg0, %c0_i32 : i32, i32
  }
  func.func @transform_2(%arg0: i32) -> (i32, i32) {
    %c0_i32 = arith.constant 0 : i32
    %c0_i32_0 = arith.constant 0 : i32
    return %arg0, %c0_i32 : i32, i32
  }
  func.func @transform_3(%arg0: i32) -> (i32, i32) {
    %c0_i32 = arith.constant 0 : i32
    %c0_i32_0 = arith.constant 0 : i32
    return %arg0, %c0_i32 : i32, i32
  }
  func.func @transform_4(%arg0: i32) -> (i32, i32) {
    %c0_i32 = arith.constant 0 : i32
    %c0_i32_0 = arith.constant 0 : i32
    %c0_i32_1 = arith.constant 0 : i32
    return %c0_i32, %c0_i32_0 : i32, i32
  }
  func.func @transform_5(%arg0: i32) -> (i32, i32) {
    %c0_i32 = arith.constant 0 : i32
    %c0_i32_0 = arith.constant 0 : i32
    %c0_i32_1 = arith.constant 0 : i32
    return %c0_i32, %c0_i32_0 : i32, i32
  }
  func.func @transform_6(%arg0: i32) -> (i32, i32) {
    %c0_i32 = arith.constant 0 : i32
    %c0_i32_0 = arith.constant 0 : i32
    %c0_i32_1 = arith.constant 0 : i32
    return %c0_i32, %c0_i32_0 : i32, i32
  }
  func.func @transform_7(%arg0: i32) -> (i32, i32) {
    %c0_i32 = arith.constant 0 : i32
    %c0_i32_0 = arith.constant 0 : i32
    return %arg0, %c0_i32 : i32, i32
  }
}

module attributes {stable_mosaic.version = 11 : i64} {
  func.func @_linear_ktiled_kernel(%arg0: i32, %arg1: memref<2x2048xbf16, #tpu.memory_space<vmem>>, %arg2: memref<2048x1024xbf16, #tpu.memory_space<vmem>>, %arg3: memref<1x1024xf32, #tpu.memory_space<vmem>>, %arg4: memref<1x1024xf32, #tpu.memory_space<vmem>>, %arg5: memref<2x1024xf32, #tpu.memory_space<vmem>>) attributes {dimension_semantics = [#tpu.dimension_semantics<arbitrary>], iteration_bounds = array<i64: 2>, scalar_prefetch = 0 : i64, scratch_operands = 0 : i64, tpu.core_type = #tpu.core_type<tc>, window_params = [{transform_indices = @transform_0, window_bounds = array<i64: 2, 2048>}, {transform_indices = @transform_1, window_bounds = array<i64: 2048, 1024>}, {pipeline_mode = #tpu.pipeline_mode<synchronous>, transform_indices = @transform_2, window_bounds = array<i64: 1, 1024>}, {pipeline_mode = #tpu.pipeline_mode<synchronous>, transform_indices = @transform_3, window_bounds = array<i64: 1, 1024>}, {pipeline_mode = #tpu.pipeline_mode<synchronous>, transform_indices = @transform_4, window_bounds = array<i64: 2, 1024>}]} {
    %c0_i32 = arith.constant 0 : i32
    %0 = arith.cmpi eq, %arg0, %c0_i32 : i32
    %1 = arith.extui %0 : i1 to i32
    %c0_i32_0 = arith.constant 0 : i32
    %2 = arith.cmpi ne, %1, %c0_i32_0 : i32
    scf.if %2 {
      %cst_9 = arith.constant 0.000000e+00 : f32
      %12 = vector.broadcast %cst_9 : f32 to vector<2x1024xf32>
      %c0_10 = arith.constant 0 : index
      %c0_11 = arith.constant 0 : index
      %13 = vector.load %arg5[%c0_10, %c0_11] : memref<2x1024xf32, #tpu.memory_space<vmem>>, vector<2x1024xf32>
      tpu.vector_store %arg5[%c0_10, %c0_11], %12 {strides = array<i32>} : memref<2x1024xf32, #tpu.memory_space<vmem>>, vector<2x1024xf32>,
    } else {
    }
    %c0 = arith.constant 0 : index
    %c0_1 = arith.constant 0 : index
    %3 = vector.load %arg5[%c0, %c0_1] : memref<2x1024xf32, #tpu.memory_space<vmem>>, vector<2x1024xf32>
    %c0_2 = arith.constant 0 : index
    %c0_3 = arith.constant 0 : index
    %4 = vector.load %arg1[%c0_2, %c0_3] : memref<2x2048xbf16, #tpu.memory_space<vmem>>, vector<2x2048xbf16>
    %c0_4 = arith.constant 0 : index
    %c0_5 = arith.constant 0 : index
    %5 = vector.load %arg2[%c0_4, %c0_5] : memref<2048x1024xbf16, #tpu.memory_space<vmem>>, vector<2048x1024xbf16>
    %cst = arith.constant dense<0.000000e+00> : vector<2x1024xf32>
    %6 = tpu.matmul %4, %5, %cst {dimension_numbers = #tpu.dot_dimension_numbers<[1], [0], [0], [1], [0, 0, 1, 1], [], []>} : vector<2x2048xbf16>, vector<2048x1024xbf16>, vector<2x1024xf32> -> vector<2x1024xf32>
    %7 = arith.addf %3, %6 : vector<2x1024xf32>
    %c0_6 = arith.constant 0 : index
    %c0_7 = arith.constant 0 : index
    %8 = vector.load %arg5[%c0_6, %c0_7] : memref<2x1024xf32, #tpu.memory_space<vmem>>, vector<2x1024xf32>
    tpu.vector_store %arg5[%c0_6, %c0_7], %7 {strides = array<i32>} : memref<2x1024xf32, #tpu.memory_space<vmem>>, vector<2x1024xf32>,
    %c1_i32 = arith.constant 1 : i32
    %9 = arith.cmpi eq, %arg0, %c1_i32 : i32
    %10 = arith.extui %9 : i1 to i32
    %c0_i32_8 = arith.constant 0 : i32
    %11 = arith.cmpi ne, %10, %c0_i32_8 : i32
    scf.if %11 {
      %c0_9 = arith.constant 0 : index
      %c0_10 = arith.constant 0 : index
      %12 = vector.load %arg5[%c0_9, %c0_10] : memref<2x1024xf32, #tpu.memory_space<vmem>>, vector<2x1024xf32>
      %c0_11 = arith.constant 0 : index
      %c0_12 = arith.constant 0 : index
      %13 = vector.load %arg3[%c0_11, %c0_12] : memref<1x1024xf32, #tpu.memory_space<vmem>>, vector<1x1024xf32>
      %14 = vector.broadcast %13 : vector<1x1024xf32> to vector<2x1024xf32>
      %15 = arith.mulf %12, %14 : vector<2x1024xf32>
      %c0_13 = arith.constant 0 : index
      %c0_14 = arith.constant 0 : index
      %16 = vector.load %arg4[%c0_13, %c0_14] : memref<1x1024xf32, #tpu.memory_space<vmem>>, vector<1x1024xf32>
      %17 = vector.broadcast %16 : vector<1x1024xf32> to vector<2x1024xf32>
      %18 = arith.addf %15, %17 : vector<2x1024xf32>
      %cst_15 = arith.constant 0.000000e+00 : f32
      %19 = vector.broadcast %cst_15 : f32 to vector<2x1024xf32>
      %20 = arith.maximumf %18, %19 : vector<2x1024xf32>
      %c0_16 = arith.constant 0 : index
      %c0_17 = arith.constant 0 : index
      %21 = vector.load %arg5[%c0_16, %c0_17] : memref<2x1024xf32, #tpu.memory_space<vmem>>, vector<2x1024xf32>
      tpu.vector_store %arg5[%c0_16, %c0_17], %20 {strides = array<i32>} : memref<2x1024xf32, #tpu.memory_space<vmem>>, vector<2x1024xf32>,
    } else {
    }
    return
  }
  func.func @transform_0(%arg0: i32) -> (i32, i32) {
    %c0_i32 = arith.constant 0 : i32
    %c0_i32_0 = arith.constant 0 : i32
    return %c0_i32, %arg0 : i32, i32
  }
  func.func @transform_1(%arg0: i32) -> (i32, i32) {
    %c0_i32 = arith.constant 0 : i32
    %c0_i32_0 = arith.constant 0 : i32
    return %arg0, %c0_i32 : i32, i32
  }
  func.func @transform_2(%arg0: i32) -> (i32, i32) {
    %c0_i32 = arith.constant 0 : i32
    %c0_i32_0 = arith.constant 0 : i32
    %c0_i32_1 = arith.constant 0 : i32
    return %c0_i32, %c0_i32_0 : i32, i32
  }
  func.func @transform_3(%arg0: i32) -> (i32, i32) {
    %c0_i32 = arith.constant 0 : i32
    %c0_i32_0 = arith.constant 0 : i32
    %c0_i32_1 = arith.constant 0 : i32
    return %c0_i32, %c0_i32_0 : i32, i32
  }
  func.func @transform_4(%arg0: i32) -> (i32, i32) {
    %c0_i32 = arith.constant 0 : i32
    %c0_i32_0 = arith.constant 0 : i32
    %c0_i32_1 = arith.constant 0 : i32
    return %c0_i32, %c0_i32_0 : i32, i32
  }
}

module attributes {stable_mosaic.version = 11 : i64} {
  func.func @_linear_kernel(%arg0: i32, %arg1: memref<2x1024xbf16, #tpu.memory_space<vmem>>, %arg2: memref<1024x512xbf16, #tpu.memory_space<vmem>>, %arg3: memref<1x512xf32, #tpu.memory_space<vmem>>, %arg4: memref<1x512xf32, #tpu.memory_space<vmem>>, %arg5: memref<2x512xf32, #tpu.memory_space<vmem>>) attributes {dimension_semantics = [#tpu.dimension_semantics<arbitrary>], iteration_bounds = array<i64: 1>, scalar_prefetch = 0 : i64, scratch_operands = 0 : i64, tpu.core_type = #tpu.core_type<tc>, window_params = [{pipeline_mode = #tpu.pipeline_mode<synchronous>, transform_indices = @transform_0, window_bounds = array<i64: 2, 1024>}, {pipeline_mode = #tpu.pipeline_mode<synchronous>, transform_indices = @transform_1, window_bounds = array<i64: 1024, 512>}, {pipeline_mode = #tpu.pipeline_mode<synchronous>, transform_indices = @transform_2, window_bounds = array<i64: 1, 512>}, {pipeline_mode = #tpu.pipeline_mode<synchronous>, transform_indices = @transform_3, window_bounds = array<i64: 1, 512>}, {pipeline_mode = #tpu.pipeline_mode<synchronous>, transform_indices = @transform_4, window_bounds = array<i64: 2, 512>}]} {
    %c0 = arith.constant 0 : index
    %c0_0 = arith.constant 0 : index
    %0 = vector.load %arg1[%c0, %c0_0] : memref<2x1024xbf16, #tpu.memory_space<vmem>>, vector<2x1024xbf16>
    %c0_1 = arith.constant 0 : index
    %c0_2 = arith.constant 0 : index
    %1 = vector.load %arg2[%c0_1, %c0_2] : memref<1024x512xbf16, #tpu.memory_space<vmem>>, vector<1024x512xbf16>
    %cst = arith.constant dense<0.000000e+00> : vector<2x512xf32>
    %2 = tpu.matmul %0, %1, %cst {dimension_numbers = #tpu.dot_dimension_numbers<[1], [0], [0], [1], [0, 0, 1, 1], [], []>} : vector<2x1024xbf16>, vector<1024x512xbf16>, vector<2x512xf32> -> vector<2x512xf32>
    %c0_3 = arith.constant 0 : index
    %c0_4 = arith.constant 0 : index
    %3 = vector.load %arg3[%c0_3, %c0_4] : memref<1x512xf32, #tpu.memory_space<vmem>>, vector<1x512xf32>
    %4 = vector.broadcast %3 : vector<1x512xf32> to vector<2x512xf32>
    %5 = arith.mulf %2, %4 : vector<2x512xf32>
    %c0_5 = arith.constant 0 : index
    %c0_6 = arith.constant 0 : index
    %6 = vector.load %arg4[%c0_5, %c0_6] : memref<1x512xf32, #tpu.memory_space<vmem>>, vector<1x512xf32>
    %7 = vector.broadcast %6 : vector<1x512xf32> to vector<2x512xf32>
    %8 = arith.addf %5, %7 : vector<2x512xf32>
    %cst_7 = arith.constant 0.000000e+00 : f32
    %9 = vector.broadcast %cst_7 : f32 to vector<2x512xf32>
    %10 = arith.maximumf %8, %9 : vector<2x512xf32>
    %c0_8 = arith.constant 0 : index
    %c0_9 = arith.constant 0 : index
    %11 = vector.load %arg5[%c0_8, %c0_9] : memref<2x512xf32, #tpu.memory_space<vmem>>, vector<2x512xf32>
    tpu.vector_store %arg5[%c0_8, %c0_9], %10 {strides = array<i32>} : memref<2x512xf32, #tpu.memory_space<vmem>>, vector<2x512xf32>,
    return
  }
  func.func @transform_0(%arg0: i32) -> (i32, i32) {
    %c0_i32 = arith.constant 0 : i32
    %c0_i32_0 = arith.constant 0 : i32
    %c0_i32_1 = arith.constant 0 : i32
    return %c0_i32, %c0_i32_0 : i32, i32
  }
  func.func @transform_1(%arg0: i32) -> (i32, i32) {
    %c0_i32 = arith.constant 0 : i32
    %c0_i32_0 = arith.constant 0 : i32
    %c0_i32_1 = arith.constant 0 : i32
    return %c0_i32, %c0_i32_0 : i32, i32
  }
  func.func @transform_2(%arg0: i32) -> (i32, i32) {
    %c0_i32 = arith.constant 0 : i32
    %c0_i32_0 = arith.constant 0 : i32
    %c0_i32_1 = arith.constant 0 : i32
    return %c0_i32, %c0_i32_0 : i32, i32
  }
  func.func @transform_3(%arg0: i32) -> (i32, i32) {
    %c0_i32 = arith.constant 0 : i32
    %c0_i32_0 = arith.constant 0 : i32
    %c0_i32_1 = arith.constant 0 : i32
    return %c0_i32, %c0_i32_0 : i32, i32
  }
  func.func @transform_4(%arg0: i32) -> (i32, i32) {
    %c0_i32 = arith.constant 0 : i32
    %c0_i32_0 = arith.constant 0 : i32
    %c0_i32_1 = arith.constant 0 : i32
    return %c0_i32, %c0_i32_0 : i32, i32
  }
}

module attributes {stable_mosaic.version = 11 : i64} {
  func.func @_linear_kernel(%arg0: i32, %arg1: memref<2x512xbf16, #tpu.memory_space<vmem>>, %arg2: memref<512x128xbf16, #tpu.memory_space<vmem>>, %arg3: memref<1x128xf32, #tpu.memory_space<vmem>>, %arg4: memref<1x128xf32, #tpu.memory_space<vmem>>, %arg5: memref<2x128xf32, #tpu.memory_space<vmem>>) attributes {dimension_semantics = [#tpu.dimension_semantics<arbitrary>], iteration_bounds = array<i64: 1>, scalar_prefetch = 0 : i64, scratch_operands = 0 : i64, tpu.core_type = #tpu.core_type<tc>, window_params = [{pipeline_mode = #tpu.pipeline_mode<synchronous>, transform_indices = @transform_0, window_bounds = array<i64: 2, 512>}, {pipeline_mode = #tpu.pipeline_mode<synchronous>, transform_indices = @transform_1, window_bounds = array<i64: 512, 128>}, {pipeline_mode = #tpu.pipeline_mode<synchronous>, transform_indices = @transform_2, window_bounds = array<i64: 1, 128>}, {pipeline_mode = #tpu.pipeline_mode<synchronous>, transform_indices = @transform_3, window_bounds = array<i64: 1, 128>}, {pipeline_mode = #tpu.pipeline_mode<synchronous>, transform_indices = @transform_4, window_bounds = array<i64: 2, 128>}]} {
    %c0 = arith.constant 0 : index
    %c0_0 = arith.constant 0 : index
    %0 = vector.load %arg1[%c0, %c0_0] : memref<2x512xbf16, #tpu.memory_space<vmem>>, vector<2x512xbf16>
    %c0_1 = arith.constant 0 : index
    %c0_2 = arith.constant 0 : index
    %1 = vector.load %arg2[%c0_1, %c0_2] : memref<512x128xbf16, #tpu.memory_space<vmem>>, vector<512x128xbf16>
    %cst = arith.constant dense<0.000000e+00> : vector<2x128xf32>
    %2 = tpu.matmul %0, %1, %cst {dimension_numbers = #tpu.dot_dimension_numbers<[1], [0], [0], [1], [0, 0, 1, 1], [], []>} : vector<2x512xbf16>, vector<512x128xbf16>, vector<2x128xf32> -> vector<2x128xf32>
    %c0_3 = arith.constant 0 : index
    %c0_4 = arith.constant 0 : index
    %3 = vector.load %arg3[%c0_3, %c0_4] : memref<1x128xf32, #tpu.memory_space<vmem>>, vector<1x128xf32>
    %4 = vector.broadcast %3 : vector<1x128xf32> to vector<2x128xf32>
    %5 = arith.mulf %2, %4 : vector<2x128xf32>
    %c0_5 = arith.constant 0 : index
    %c0_6 = arith.constant 0 : index
    %6 = vector.load %arg4[%c0_5, %c0_6] : memref<1x128xf32, #tpu.memory_space<vmem>>, vector<1x128xf32>
    %7 = vector.broadcast %6 : vector<1x128xf32> to vector<2x128xf32>
    %8 = arith.addf %5, %7 : vector<2x128xf32>
    %c0_7 = arith.constant 0 : index
    %c0_8 = arith.constant 0 : index
    %9 = vector.load %arg5[%c0_7, %c0_8] : memref<2x128xf32, #tpu.memory_space<vmem>>, vector<2x128xf32>
    tpu.vector_store %arg5[%c0_7, %c0_8], %8 {strides = array<i32>} : memref<2x128xf32, #tpu.memory_space<vmem>>, vector<2x128xf32>,
    return
  }
  func.func @transform_0(%arg0: i32) -> (i32, i32) {
    %c0_i32 = arith.constant 0 : i32
    %c0_i32_0 = arith.constant 0 : i32
    %c0_i32_1 = arith.constant 0 : i32
    return %c0_i32, %c0_i32_0 : i32, i32
  }
  func.func @transform_1(%arg0: i32) -> (i32, i32) {
    %c0_i32 = arith.constant 0 : i32
    %c0_i32_0 = arith.constant 0 : i32
    %c0_i32_1 = arith.constant 0 : i32
    return %c0_i32, %c0_i32_0 : i32, i32
  }
  func.func @transform_2(%arg0: i32) -> (i32, i32) {
    %c0_i32 = arith.constant 0 : i32
    %c0_i32_0 = arith.constant 0 : i32
    %c0_i32_1 = arith.constant 0 : i32
    return %c0_i32, %c0_i32_0 : i32, i32
  }
  func.func @transform_3(%arg0: i32) -> (i32, i32) {
    %c0_i32 = arith.constant 0 : i32
    %c0_i32_0 = arith.constant 0 : i32
    %c0_i32_1 = arith.constant 0 : i32
    return %c0_i32, %c0_i32_0 : i32, i32
  }
  func.func @transform_4(%arg0: i32) -> (i32, i32) {
    %c0_i32 = arith.constant 0 : i32
    %c0_i32_0 = arith.constant 0 : i32
    %c0_i32_1 = arith.constant 0 : i32
    return %c0_i32, %c0_i32_0 : i32, i32
  }
}

</mosaic_0001>

<bundles_post_ra>
// kernel: cnn_forward.6
= control target key start
LH: loop header
LB: loop body
LE: loop exit
PB: predicated region body
PF: predicated region fallthrough
CT: control target
= control target key end

     0   :  { %12 = vsyncpa [#allocation3], 0  ;;  %s2338_s0 = inlined_call_operand.vmem [shape: bf16[512,27], index: 0, kind: input, shape index: {}]   ;;  %s2339_s1 = inlined_call_operand.vmem [shape: bf16[512,27], index: 1, kind: input, shape index: {}]   ;;  %s2340_s2 = inlined_call_operand.vmem [shape: bf16[512,27], index: 2, kind: input, shape index: {}]   ;;  %s2341_s3 = inlined_call_operand.vmem [shape: bf16[512,27], index: 3, kind: input, shape index: {}]   ;;  %s2342_s4 = inlined_call_operand.hbm [shape: bf16[27,64], index: 4, kind: input, shape index: {}]   ;;  %s2343_s5 = inlined_call_operand.vmem [shape: f32[1,64], index: 5, kind: input, shape index: {}]   ;;  %s2344_s6 = inlined_call_operand.hbm [shape: f32[1,64], index: 6, kind: input, shape index: {}]   ;;  %s2345_s7 = inlined_call_operand.vmem [shape: f32[512,64], index: 7, kind: output, shape index: {}]  }
   0x1   :  { %13 = vsyncpa [#allocation5], 0  ;;  %s1837_s24 = smov 0  }
   0x2 LB: > { %s1445_s25 = sadd.s32 4294967295, %s1790_s24   ;;  %p1447_p0 = scmp.ge.s32.totalorder %s1790_s24, 1  ;;  %s1790_s24 = sphi %s1837_s24, %s19_s24  }
   0x3   : > { %p217_p1 = scmp.lt.s32.totalorder %s1790_s24, 5  ;;  %s1792_s26 = smov [#allocation2]  }
   0x4   : > { %s229_s27 = sshll.u32 %s1792_s26, 4  ;;  %p1851_p3 = scmp.eq.s32.totalorder %s1445_s25, 0  ;;  %s230_s27 = int_to_ptr.vmem [resolvable:$true] %s229_s27 }
   0x5   : > { %p1845_p2 = pnand %p1447_p0, %p217_p1  ;;  %s1793_s30 = smov [#allocation4]  }
   0x6   : > { %s2350_s29 = scalar_select %p1851_p3, 1, 0 }
   0x7   : > { %s2349_s28 = scalar_select %p1845_p2, 1, 0 }
   0x8   : > { %p1662_p4 = pneg %p1845_p2  ;;  %s246_s8 = sshll.u32 %s1793_s30, 4  ;;  %s1863_s8 = int_to_ptr.vmem [resolvable:$true] %s246_s8 }
   0x9   : > { %s1720_s12 = scalar_lea.hbm %s2342_s4, 256 }
   0xa   : > { %p1859_p5 = pnand %p1851_p3, %p1662_p4  ;;  %p1721_p6 = scmp.ne.s32.totalorder %s2342_s4, %s1720_s12 }
   0xb   : > { %p1727_p10 = scmp.lt.u32.totalorder %s1720_s12, %s2342_s4 }
   0xc   : > { %p1722_p7 = pneg %p1859_p5 }
   0xe   : > { %p1723_p8 = pnand %p1722_p7, %p1721_p6 }
  0x10   : > { %p1724_p9 = pneg %p1723_p8 }
  0x12   : > { %p1729_p11 = pnand %p1727_p10, %p1724_p9 }
  0x14   : > { %1732 = shalt.err (!%p1729_p11)
}
  0x15   : > { %s1733_s17 = scalar_lea.vmem %s230_s27, 256  ;;  %p1741_p1 = scmp.lt.s32.totalorder %s230_s27, %s230_s27 }
  0x16   : > { %p1734_p12 = scmp.ne.s32.totalorder %s230_s27, %s1733_s17  ;;  %p1742_p4 = scmp.lt.s32.totalorder %s1733_s17, %s1733_s17 }
  0x18   : > { %p1736_p13 = pnand %p1734_p12, %p1722_p7  ;;  %p1743_p3 = por %p1742_p4, %p1741_p1 }
  0x1a   : > { %p1737_p0 = pneg %p1736_p13 }
  0x1c   : > { %p1744_p2 = pnand %p1743_p3, %p1737_p0 }
  0x1e   : > { %1747 = shalt.err (!%p1744_p2)
}
  0x1f   : > { %s1794_s18 = smov 64   ;;  %s1795_s19 = smov 4  }
  0x20   : > { %1665 = dma.hbm_to_vmem [thread:$0]  (!%p1859_p5), %s2342_s4, 256, %s230_s27, [#allocation3], %s1794_s18, %s1794_s18, %s1795_s19  }
  0x21   : > { %s1748_s26 = scalar_lea.hbm %s2344_s6, 16 }
  0x22   : > { %p1749_p6 = scmp.ne.s32.totalorder %s2344_s6, %s1748_s26  ;;  %p1755_p8 = scmp.lt.u32.totalorder %s1748_s26, %s2344_s6 }
  0x24   : > { %p1751_p2 = pnand %p1749_p6, %p1722_p7 }
  0x26   : > { %p1752_p3 = pneg %p1751_p2 }
  0x28   : > { %p1757_p9 = pnand %p1755_p8, %p1752_p3 }
  0x2a   : > { %1760 = shalt.err (!%p1757_p9)
}
  0x2b   : > { %s1761_s27 = scalar_lea.vmem %s1863_s8, 16  ;;  %s1768_s13 = scalar_lea.vmem %s1863_s8, 32 }
  0x2c   : > { %p1762_p10 = scmp.ne.s32.totalorder %s1863_s8, %s1761_s27  ;;  %p1769_p13 = scmp.lt.s32.totalorder %s1863_s8, %s1863_s8 }
  0x2d   : > { %p1770_p0 = scmp.lt.s32.totalorder %s1768_s13, %s1761_s27 }
  0x2e   : > { %p1764_p11 = pnand %p1762_p10, %p1722_p7 }
  0x2f   : > { %p1771_p1 = por %p1770_p0, %p1769_p13 }
  0x30   : > { %p1765_p12 = pneg %p1764_p11 }
  0x32   : > { %p1772_p4 = pnand %p1771_p1, %p1765_p12 }
  0x34   : > { %1775 = shalt.err (!%p1772_p4)
}
  0x35   : > { %1668 = dma.hbm_to_vmem [thread:$0]  (!%p1859_p5), %s2344_s6, 16, %s1863_s8, [#allocation5]  }
  0x36   : > { %p2352_p6 = scmp.ne.s32.totalorder %s2349_s28, 0 }
  0x37   : > { %p2353_p7 = scmp.ne.s32.totalorder (!%p2352_p6), %s2350_s29, 0 }
  0x38   : > { %295 = sbr.rel (%p2352_p6) target bundleno = 360 (0x168), region = 48 }
  0x3f   : > { %1781 = dma.done.wait (%p2353_p7), [#allocation3], 256  }
  0x40   : > { %1783 = vsyncadd (%p2353_p7), [#allocation3], 4294967040 }
  0x41   : > { %1785 = dma.done.wait (%p2353_p7), [#allocation5], 16  }
  0x42   : > { %1787 = vsyncadd (%p2353_p7), [#allocation5], 4294967280  ;;  %s1454_s9 = sshll.u32 %s1445_s25, 4  ;;  %vm475_vm0 = vcmask 1044480   ;;  %vm476_vm1 = vcmask 1045504   ;;  %v1796_v0 = vmov 65535  }
  0x43   : > { %p347_p5 = scmp.lt.s32.totalorder %s1454_s9, 63  ;;  %v477_v1 = vsel %vm475_vm0, 4294967295, %v1796_v0  ;;  %vm450_vm2 = vcmask 220160   ;;  %v1686_v2 = vld [vmem:[#allocation2] sm:$0xff]   ;;  %v1687_v4 = vld [vmem:[#allocation2 + $0x8] sm:$0x3f]  }
  0x44   : > { %v478_v3 = vsel %vm476_vm1, %v477_v1, 0  ;;  %1574 = vmatprep.subr.bf16.mxu0 %v1686_v2  ;;  %1594 = vmatprep.subr.bf16.mxu1 %v1686_v2  ;;  %v2021_v38 = vld [vmem:[%s2343_s5] ss:$0 sm:$0xff]  ;;  %v2023_v39 = vld [vmem:[#allocation4] ss:$0 sm:$0xff]  ;;  %vm1314_vm3 = vcmask 523264  }
  0x45   : > { %s2357_s9 = smov (!%p347_p5, %s1454_s9), 63  ;;  %1575 = vmatpush3.bf16.msra.mxu0 %v1686_v2  ;;  %1595 = vmatpush3.bf16.msra.mxu1 %v1686_v2  ;;  %v480_v6 = vand.u32 %v1687_v4, %v478_v3 }
  0x46   : > { %s1928_s28 = sshll.u32 %s2357_s9, 2  ;;  %s1463_s11 = sshll.u32 %s2357_s9, 3 }
  0x47   : > { %s1934_s29 = scalar_lea.vmem %s2338_s0, %s1928_s28  ;;  %s1940_s18 = scalar_lea.vmem %s2339_s1, %s1928_s28  ;;  %1576 = vmatprep.subr.bf16.mxu0 %v480_v6  ;;  %1596 = vmatprep.subr.bf16.mxu1 %v480_v6 }
  0x48   : > { %v1688_v5 = vld [vmem:[%s1934_s29] sm:$0xff]   ;;  %v1690_v8 = vld [vmem:[%s1934_s29 + $0x8] sm:$0xff]   ;;  %v1692_v10 = vld [vmem:[%s1934_s29 + $0x10] sm:$0xff]   ;;  %s1962_s21 = scalar_lea.vmem %s2340_s2, %s1928_s28  ;;  %s1970_s26 = scalar_lea.vmem %s2341_s3, %s1928_s28 }
  0x49   : > { %v1689_v7 = vld [vmem:[%s1940_s18] sm:$0xff]   ;;  %1578 = vmatprep.mubr.msk.bf16.mxu0 %vm450_vm2, %v1688_v5  ;;  %v1691_v9 = vld [vmem:[%s1940_s18 + $0x8] sm:$0xff]   ;;  %1577 = vmatpush3.bf16.msra.mxu0 %v480_v6  ;;  %v1693_v11 = vld [vmem:[%s1940_s18 + $0x10] sm:$0xff]   ;;  %s2213_s13 = scalar_lea.vmem %s2345_s7, %s1463_s11 }
  0x4a   : > { %1598 = vmatprep.mubr.msk.bf16.mxu1 %vm450_vm2, %v1689_v7  ;;  %1597 = vmatpush3.bf16.msra.mxu1 %v480_v6  ;;  %v1694_v12 = vld [vmem:[%s1934_s29 + $0x18] sm:$0xff]   ;;  %v1696_v14 = vld [vmem:[%s1934_s29 + $0x20] sm:$0xff]   ;;  %v1698_v16 = vld [vmem:[%s1934_s29 + $0x28] sm:$0xff]  }
  0x4b   : > { %1614 = vmatprep.subr.bf16.mxu0 %v1686_v2  ;;  %1634 = vmatprep.subr.bf16.mxu1 %v1686_v2  ;;  %v1695_v13 = vld [vmem:[%s1940_s18 + $0x18] sm:$0xff]   ;;  %v1697_v15 = vld [vmem:[%s1940_s18 + $0x20] sm:$0xff]   ;;  %v1699_v17 = vld [vmem:[%s1940_s18 + $0x28] sm:$0xff]  }
  0x4c   : > { %1579 = vmatmul.mubr.msk.bf16.vlgmr.msra.gmra.mrb[0].mxu0 %vm450_vm2, %v1690_v8  ;;  %v1700_v18 = vld [vmem:[%s1934_s29 + $0x30] sm:$0xff]   ;;  %v1702_v20 = vld [vmem:[%s1934_s29 + $0x38] sm:$0xff]   ;;  %v1704_v22 = vld [vmem:[%s1962_s21] sm:$0xff]  }
  0x4d   : > { %1599 = vmatmul.mubr.msk.bf16.vlgmr.msra.gmra.mrb[0].mxu1 %vm450_vm2, %v1691_v9  ;;  %1615 = vmatpush3.bf16.msra.mxu0 %v1686_v2  ;;  %v1701_v19 = vld [vmem:[%s1940_s18 + $0x30] sm:$0xff]   ;;  %v1703_v21 = vld [vmem:[%s1940_s18 + $0x38] sm:$0xff]   ;;  %v1705_v23 = vld [vmem:[%s1970_s26] sm:$0xff]  }
  0x4e   : > { %1635 = vmatpush3.bf16.msra.mxu1 %v1686_v2  ;;  %1582 = vmatprep.mubr.msk.bf16.mxu0 %vm450_vm2, %v1692_v10  ;;  %v1706_v24 = vld [vmem:[%s1962_s21 + $0x8] sm:$0xff]   ;;  %v1708_v26 = vld [vmem:[%s1962_s21 + $0x10] sm:$0xff]   ;;  %v1710_v28 = vld [vmem:[%s1962_s21 + $0x18] sm:$0xff]  }
  0x4f   : > { %1602 = vmatprep.mubr.msk.bf16.mxu1 %vm450_vm2, %v1693_v11  ;;  %1616 = vmatprep.subr.bf16.mxu0 %v480_v6  ;;  %v1707_v25 = vld [vmem:[%s1970_s26 + $0x8] sm:$0xff]   ;;  %v1709_v27 = vld [vmem:[%s1970_s26 + $0x10] sm:$0xff]   ;;  %v1711_v29 = vld [vmem:[%s1970_s26 + $0x18] sm:$0xff]  }
  0x50   : > { %1636 = vmatprep.subr.bf16.mxu1 %v480_v6  ;;  %v1712_v30 = vld [vmem:[%s1962_s21 + $0x20] sm:$0xff]   ;;  %v1714_v32 = vld [vmem:[%s1962_s21 + $0x28] sm:$0xff]   ;;  %v1716_v34 = vld [vmem:[%s1962_s21 + $0x30] sm:$0xff]  }
  0x51   : > { %1617 = vmatpush3.bf16.msra.mxu0 %v480_v6  ;;  %v1713_v31 = vld [vmem:[%s1970_s26 + $0x20] sm:$0xff]   ;;  %v1715_v33 = vld [vmem:[%s1970_s26 + $0x28] sm:$0xff]   ;;  %v1717_v35 = vld [vmem:[%s1970_s26 + $0x30] sm:$0xff]  }
  0x52   : > { %1637 = vmatpush3.bf16.msra.mxu1 %v480_v6  ;;  %v1718_v36 = vld [vmem:[%s1962_s21 + $0x38] sm:$0xff]  }
  0x53   : > { %v1719_v37 = vld [vmem:[%s1970_s26 + $0x38] sm:$0xff]  }
  0x54   : > { %1583 = vmatmul.mubr.msk.bf16.gmra.mrb[4].mxu0 %vm450_vm2, %v1694_v12 }
  0x55   : > { %1603 = vmatmul.mubr.msk.bf16.gmra.mrb[4].mxu1 %vm450_vm2, %v1695_v13  ;;  %1586 = vmatprep.mubr.msk.bf16.mxu0 %vm450_vm2, %v1696_v14 }
  0x56   : > { %1606 = vmatprep.mubr.msk.bf16.mxu1 %vm450_vm2, %v1697_v15 }
  0x5c   : > { %1587 = vmatmul.mubr.msk.bf16.gmra.mrb[8].mxu0 %vm450_vm2, %v1698_v16 }
  0x5d   : > { %1607 = vmatmul.mubr.msk.bf16.gmra.mrb[8].mxu1 %vm450_vm2, %v1699_v17  ;;  %1590 = vmatprep.mubr.msk.bf16.mxu0 %vm450_vm2, %v1700_v18 }
  0x5e   : > { %1610 = vmatprep.mubr.msk.bf16.mxu1 %vm450_vm2, %v1701_v19 }
  0x64   : > { %1591 = vmatmul.mubr.msk.bf16.gmra.mrb[12].mxu0 %vm450_vm2, %v1702_v20 }
  0x65   : > { %1611 = vmatmul.mubr.msk.bf16.gmra.mrb[12].mxu1 %vm450_vm2, %v1703_v21  ;;  %1618 = vmatprep.mubr.msk.bf16.mxu0 %vm450_vm2, %v1704_v22 }
  0x66   : > { %1638 = vmatprep.mubr.msk.bf16.mxu1 %vm450_vm2, %v1705_v23 }
  0x6c   : > { %1619 = vmatmul.mubr.msk.bf16.vlgmr.msra.gmra.mrb[16].mxu0 %vm450_vm2, %v1706_v24 }
  0x6d   : > { %1639 = vmatmul.mubr.msk.bf16.vlgmr.msra.gmra.mrb[16].mxu1 %vm450_vm2, %v1707_v25  ;;  %1622 = vmatprep.mubr.msk.bf16.mxu0 %vm450_vm2, %v1708_v26 }
  0x6e   : > { %1642 = vmatprep.mubr.msk.bf16.mxu1 %vm450_vm2, %v1709_v27 }
  0x74   : > { %1623 = vmatmul.mubr.msk.bf16.gmra.mrb[20].mxu0 %vm450_vm2, %v1710_v28 }
  0x75   : > { %1643 = vmatmul.mubr.msk.bf16.gmra.mrb[20].mxu1 %vm450_vm2, %v1711_v29  ;;  %1626 = vmatprep.mubr.msk.bf16.mxu0 %vm450_vm2, %v1712_v30 }
  0x76   : > { %1646 = vmatprep.mubr.msk.bf16.mxu1 %vm450_vm2, %v1713_v31 }
  0x7c   : > { %1627 = vmatmul.mubr.msk.bf16.gmra.mrb[24].mxu0 %vm450_vm2, %v1714_v32 }
  0x7d   : > { %1647 = vmatmul.mubr.msk.bf16.gmra.mrb[24].mxu1 %vm450_vm2, %v1715_v33  ;;  %1630 = vmatprep.mubr.msk.bf16.mxu0 %vm450_vm2, %v1716_v34 }
  0x7e   : > { %1650 = vmatprep.mubr.msk.bf16.mxu1 %vm450_vm2, %v1717_v35 }
  0x84   : > { %1631 = vmatmul.mubr.msk.bf16.gmra.mrb[28].mxu0 %vm450_vm2, %v1718_v36 }
  0x85   : > { %1651 = vmatmul.mubr.msk.bf16.gmra.mrb[28].mxu1 %vm450_vm2, %v1719_v37 }
 0x11f   : > { %v1580_v40 = vpop.f32.mrb[0].mxu0 }
 0x120   : > { %v1600_v41 = vpop.f32.mrb[0].mxu1  ;;  %v587_v42 = vmul.f32 %v1580_v40, %v2021_v38  ;;  %v516_v44 = vpop.f32.mrb[1].mxu0 }
 0x121   : > { %v802_v43 = vmul.f32 %v1600_v41, %v2021_v38  ;;  %v737_v45 = vpop.f32.mrb[1].mxu1  ;;  %v585_v46 = vmul.f32 %v2021_v38, %v516_v44  ;;  %v1581_v48 = vpop.f32.mrb[2].mxu0 }
 0x122   : > { %v800_v47 = vmul.f32 %v2021_v38, %v737_v45  ;;  %v1601_v49 = vpop.f32.mrb[2].mxu1  ;;  %v2030_v50 = vadd.f32 %v2023_v39, %v587_v42  ;;  %v588_v52 = vmul.f32 %v1581_v48, %v2021_v38  ;;  %v519_v54 = vpop.f32.mrb[3].mxu0 }
 0x123   : > { %v2033_v51 = vadd.f32 %v2023_v39, %v802_v43  ;;  %v803_v53 = vmul.f32 %v1601_v49, %v2021_v38  ;;  %v740_v55 = vpop.f32.mrb[3].mxu1  ;;  %v2038_v56 = vadd.f32 %v2023_v39, %v585_v46  ;;  %v586_v58 = vmul.f32 %v2021_v38, %v519_v54 }
 0x124   : > { %v2041_v57 = vadd.f32 %v2023_v39, %v800_v47  ;;  %v801_v59 = vmul.f32 %v2021_v38, %v740_v55  ;;  %v2048_v61 = vadd.f32 %v2023_v39, %v588_v52 }
 0x125   : > { %v834_v60 = vmax.f32 %v2030_v50, %v2033_v51  ;;  %v2051_v62 = vadd.f32 %v2023_v39, %v803_v53  ;;  %v2056_v0 = vadd.f32 %v2023_v39, %v586_v58 }
 0x126   : > { %v832_v63 = vmax.f32 %v2038_v56, %v2041_v57  ;;  %v2059_v1 = vadd.f32 %v2023_v39, %v801_v59 }
 0x127   : > { %v835_v2 = vmax.f32 %v2048_v61, %v2051_v62  ;;  %v1584_v4 = vpop.f32.mrb[4].mxu0 }
 0x128   : > { %v833_v3 = vmax.f32 %v2056_v0, %v2059_v1  ;;  %v1604_v5 = vpop.f32.mrb[4].mxu1  ;;  %v591_v6 = vmul.f32 %v1584_v4, %v2021_v38  ;;  %v532_v8 = vpop.f32.mrb[5].mxu0 }
 0x129   : > { %v806_v7 = vmul.f32 %v1604_v5, %v2021_v38  ;;  %v753_v9 = vpop.f32.mrb[5].mxu1  ;;  %v589_v10 = vmul.f32 %v2021_v38, %v532_v8  ;;  %v1585_v12 = vpop.f32.mrb[6].mxu0 }
 0x12a   : > { %v804_v11 = vmul.f32 %v2021_v38, %v753_v9  ;;  %v1605_v13 = vpop.f32.mrb[6].mxu1  ;;  %v2070_v14 = vadd.f32 %v2023_v39, %v591_v6  ;;  %v592_v16 = vmul.f32 %v1585_v12, %v2021_v38  ;;  %v535_v18 = vpop.f32.mrb[7].mxu0 }
 0x12b   : > { %v2073_v15 = vadd.f32 %v2023_v39, %v806_v7  ;;  %v807_v17 = vmul.f32 %v1605_v13, %v2021_v38  ;;  %v756_v19 = vpop.f32.mrb[7].mxu1  ;;  %v2078_v20 = vadd.f32 %v2023_v39, %v589_v10  ;;  %v590_v22 = vmul.f32 %v2021_v38, %v535_v18 }
 0x12c   : > { %v2081_v21 = vadd.f32 %v2023_v39, %v804_v11  ;;  %v805_v23 = vmul.f32 %v2021_v38, %v756_v19  ;;  %v2088_v25 = vadd.f32 %v2023_v39, %v592_v16 }
 0x12d   : > { %v838_v24 = vmax.f32 %v2070_v14, %v2073_v15  ;;  %v2091_v26 = vadd.f32 %v2023_v39, %v807_v17  ;;  %v2096_v28 = vadd.f32 %v2023_v39, %v590_v22 }
 0x12e   : > { %v836_v27 = vmax.f32 %v2078_v20, %v2081_v21  ;;  %v2099_v29 = vadd.f32 %v2023_v39, %v805_v23 }
 0x12f   : > { %v839_v30 = vmax.f32 %v2088_v25, %v2091_v26  ;;  %v1588_v32 = vpop.f32.mrb[8].mxu0 }
 0x130   : > { %v837_v31 = vmax.f32 %v2096_v28, %v2099_v29  ;;  %v1608_v33 = vpop.f32.mrb[8].mxu1  ;;  %v595_v34 = vmul.f32 %v1588_v32, %v2021_v38  ;;  %v548_v36 = vpop.f32.mrb[9].mxu0 }
 0x131   : > { %v810_v35 = vmul.f32 %v1608_v33, %v2021_v38  ;;  %v769_v37 = vpop.f32.mrb[9].mxu1  ;;  %v593_v40 = vmul.f32 %v2021_v38, %v548_v36  ;;  %v1589_v42 = vpop.f32.mrb[10].mxu0 }
 0x132   : > { %v808_v41 = vmul.f32 %v2021_v38, %v769_v37  ;;  %v1609_v43 = vpop.f32.mrb[10].mxu1  ;;  %v2110_v44 = vadd.f32 %v2023_v39, %v595_v34  ;;  %v596_v46 = vmul.f32 %v1589_v42, %v2021_v38  ;;  %v551_v48 = vpop.f32.mrb[11].mxu0 }
 0x133   : > { %v2113_v45 = vadd.f32 %v2023_v39, %v810_v35  ;;  %v811_v47 = vmul.f32 %v1609_v43, %v2021_v38  ;;  %v772_v49 = vpop.f32.mrb[11].mxu1  ;;  %v2118_v52 = vadd.f32 %v2023_v39, %v593_v40  ;;  %v594_v54 = vmul.f32 %v2021_v38, %v551_v48 }
 0x134   : > { %v2121_v53 = vadd.f32 %v2023_v39, %v808_v41  ;;  %v809_v55 = vmul.f32 %v2021_v38, %v772_v49  ;;  %v2128_v59 = vadd.f32 %v2023_v39, %v596_v46 }
 0x135   : > { %v842_v58 = vmax.f32 %v2110_v44, %v2113_v45  ;;  %v2131_v4 = vadd.f32 %v2023_v39, %v811_v47  ;;  %v2136_v6 = vadd.f32 %v2023_v39, %v594_v54 }
 0x136   : > { %v840_v5 = vmax.f32 %v2118_v52, %v2121_v53  ;;  %v2139_v7 = vadd.f32 %v2023_v39, %v809_v55 }
 0x137   : > { %v843_v8 = vmax.f32 %v2128_v59, %v2131_v4  ;;  %v1592_v10 = vpop.f32.mrb[12].mxu0 }
 0x138   : > { %v841_v9 = vmax.f32 %v2136_v6, %v2139_v7  ;;  %v1612_v11 = vpop.f32.mrb[12].mxu1  ;;  %v599_v12 = vmul.f32 %v1592_v10, %v2021_v38  ;;  %v564_v16 = vpop.f32.mrb[13].mxu0 }
 0x139   : > { %v814_v13 = vmul.f32 %v1612_v11, %v2021_v38  ;;  %v785_v17 = vpop.f32.mrb[13].mxu1  ;;  %v597_v18 = vmul.f32 %v2021_v38, %v564_v16  ;;  %v1593_v22 = vpop.f32.mrb[14].mxu0 }
 0x13a   : > { %v812_v19 = vmul.f32 %v2021_v38, %v785_v17  ;;  %v1613_v23 = vpop.f32.mrb[14].mxu1  ;;  %v2150_v32 = vadd.f32 %v2023_v39, %v599_v12  ;;  %v600_v34 = vmul.f32 %v1593_v22, %v2021_v38  ;;  %v567_v36 = vpop.f32.mrb[15].mxu0 }
 0x13b   : > { %v2153_v33 = vadd.f32 %v2023_v39, %v814_v13  ;;  %v815_v35 = vmul.f32 %v1613_v23, %v2021_v38  ;;  %v788_v37 = vpop.f32.mrb[15].mxu1  ;;  %v2158_v40 = vadd.f32 %v2023_v39, %v597_v18  ;;  %v598_v42 = vmul.f32 %v2021_v38, %v567_v36 }
 0x13c   : > { %v2161_v41 = vadd.f32 %v2023_v39, %v812_v19  ;;  %v813_v43 = vmul.f32 %v2021_v38, %v788_v37  ;;  %v2168_v47 = vadd.f32 %v2023_v39, %v600_v34 }
 0x13d   : > { %v846_v46 = vmax.f32 %v2150_v32, %v2153_v33  ;;  %v2171_v48 = vadd.f32 %v2023_v39, %v815_v35  ;;  %v2176_v54 = vadd.f32 %v2023_v39, %v598_v42 }
 0x13e   : > { %v844_v49 = vmax.f32 %v2158_v40, %v2161_v41  ;;  %v2179_v55 = vadd.f32 %v2023_v39, %v813_v43 }
 0x13f   : > { %v1620_v12 = vpop.f32.mrb[16].mxu0  ;;  %v2354_v32 = vmax.f32 %v2168_v47, %v2171_v48 }
 0x140   : > { %v1640_v13 = vpop.f32.mrb[16].mxu1  ;;  %v1027_v16 = vmul.f32 %v1620_v12, %v2021_v38  ;;  %v962_v18 = vpop.f32.mrb[17].mxu0  ;;  %v2355_v41 = vmax.f32 %v2176_v54, %v2179_v55 }
 0x141   : > { %v1252_v17 = vmul.f32 %v1640_v13, %v2021_v38  ;;  %v1187_v19 = vpop.f32.mrb[17].mxu1  ;;  %v1025_v22 = vmul.f32 %v2021_v38, %v962_v18  ;;  %v1621_v34 = vpop.f32.mrb[18].mxu0 }
 0x142   : > { %v1250_v23 = vmul.f32 %v2021_v38, %v1187_v19  ;;  %v1641_v35 = vpop.f32.mrb[18].mxu1  ;;  %v1043_v36 = vadd.f32 %v2023_v39, %v1027_v16  ;;  %v1028_v42 = vmul.f32 %v1621_v34, %v2021_v38  ;;  %v965_v12 = vpop.f32.mrb[19].mxu0 }
 0x143   : > { %v1268_v37 = vadd.f32 %v2023_v39, %v1252_v17  ;;  %v1253_v43 = vmul.f32 %v1641_v35, %v2021_v38  ;;  %v1190_v11 = vpop.f32.mrb[19].mxu1  ;;  %v1041_v13 = vadd.f32 %v2023_v39, %v1025_v22  ;;  %v1026_v18 = vmul.f32 %v2021_v38, %v965_v12 }
 0x144   : > { %v1266_v10 = vadd.f32 %v2023_v39, %v1250_v23  ;;  %v1251_v19 = vmul.f32 %v2021_v38, %v1190_v11  ;;  %v1059_v16 = vmax.f32 %v834_v60, %v1043_v36  ;;  %v1044_v17 = vadd.f32 %v2023_v39, %v1028_v42 }
 0x145   : > { %v1057_v34 = vmax.f32 %v832_v63, %v1041_v13  ;;  %v1042_v35 = vadd.f32 %v2023_v39, %v1026_v18  ;;  %v1269_v11 = vadd.f32 %v2023_v39, %v1253_v43 }
 0x146   : > { %v1284_v22 = vmax.f32 %v1059_v16, %v1268_v37  ;;  %v1060_v23 = vmax.f32 %v835_v2, %v1044_v17  ;;  %v1267_v56 = vadd.f32 %v2023_v39, %v1251_v19 }
 0x147   : > { %v1282_v50 = vmax.f32 %v1057_v34, %v1266_v10  ;;  %v1058_v51 = vmax.f32 %v833_v3, %v1042_v35  ;;  %v1624_v57 = vpop.f32.mrb[20].mxu0 }
 0x148   : > { %v1644_v60 = vpop.f32.mrb[20].mxu1  ;;  %v1300_v61 = vmax.f32 %v1284_v22, 0.0  ;;  %v1285_v62 = vmax.f32 %v1060_v23, %v1269_v11  ;;  %v1031_v63 = vmul.f32 %v1624_v57, %v2021_v38  ;;  %v978_v36 = vpop.f32.mrb[21].mxu0 }
 0x149   : > { %v1256_v2 = vmul.f32 %v1644_v60, %v2021_v38  ;;  %v1203_v37 = vpop.f32.mrb[21].mxu1  ;;  %v1298_v42 = vmax.f32 %v1282_v50, 0.0  ;;  %v1283_v10 = vmax.f32 %v1058_v51, %v1267_v56  ;;  %v1029_v43 = vmul.f32 %v2021_v38, %v978_v36  ;;  %v1625_v1 = vpop.f32.mrb[22].mxu0 }
 0x14a   : > { %v1254_v0 = vmul.f32 %v2021_v38, %v1203_v37  ;;  %v1645_v3 = vpop.f32.mrb[22].mxu1  ;;  %1317 = vst.msk [vmem:[%s2213_s13 + $0x10] sm:$0xff] %vm1314_vm3, %v1300_v61  ;;  %v1301_v12 = vmax.f32 %v1285_v62, 0.0  ;;  %v1047_v13 = vadd.f32 %v2023_v39, %v1031_v63  ;;  %v1032_v19 = vmul.f32 %v1625_v1, %v2021_v38  ;;  %v981_v16 = vpop.f32.mrb[23].mxu0 }
 0x14b   : > { %v1272_v18 = vadd.f32 %v2023_v39, %v1256_v2  ;;  %v1206_v17 = vpop.f32.mrb[23].mxu1  ;;  %1315 = vst.msk [vmem:[%s2213_s13] sm:$0xff] %vm1314_vm3, %v1298_v42  ;;  %v1299_v34 = vmax.f32 %v1283_v10, 0.0  ;;  %v1045_v35 = vadd.f32 %v2023_v39, %v1029_v43  ;;  %v1257_v23 = vmul.f32 %v1645_v3, %v2021_v38 }
 0x14c   : > { %v1270_v22 = vadd.f32 %v2023_v39, %v1254_v0  ;;  %1318 = vst.msk [vmem:[%s2213_s13 + $0x18] sm:$0xff] %vm1314_vm3, %v1301_v12  ;;  %v1063_v11 = vmax.f32 %v838_v24, %v1047_v13  ;;  %v1048_v50 = vadd.f32 %v2023_v39, %v1032_v19  ;;  %v1030_v51 = vmul.f32 %v2021_v38, %v981_v16 }
 0x14d   : > { %v1255_v56 = vmul.f32 %v2021_v38, %v1206_v17  ;;  %1316 = vst.msk [vmem:[%s2213_s13 + $0x8] sm:$0xff] %vm1314_vm3, %v1299_v34  ;;  %v1061_v57 = vmax.f32 %v836_v27, %v1045_v35  ;;  %v1273_v14 = vadd.f32 %v2023_v39, %v1257_v23 }
 0x14e   : > { %v1288_v60 = vmax.f32 %v1063_v11, %v1272_v18  ;;  %v1064_v61 = vmax.f32 %v839_v30, %v1048_v50  ;;  %v1046_v15 = vadd.f32 %v2023_v39, %v1030_v51 }
 0x14f   : > { %v1286_v24 = vmax.f32 %v1061_v57, %v1270_v22  ;;  %v1271_v62 = vadd.f32 %v2023_v39, %v1255_v56  ;;  %v1628_v63 = vpop.f32.mrb[24].mxu0 }
 0x150   : > { %v1648_v2 = vpop.f32.mrb[24].mxu1  ;;  %v1304_v36 = vmax.f32 %v1288_v60, 0.0  ;;  %v1289_v37 = vmax.f32 %v1064_v61, %v1273_v14  ;;  %v1062_v20 = vmax.f32 %v837_v31, %v1046_v15  ;;  %v1035_v21 = vmul.f32 %v1628_v63, %v2021_v38  ;;  %v994_v25 = vpop.f32.mrb[25].mxu0 }
 0x151   : > { %v1219_v26 = vpop.f32.mrb[25].mxu1  ;;  %v1302_v27 = vmax.f32 %v1286_v24, 0.0  ;;  %v1260_v30 = vmul.f32 %v1648_v2, %v2021_v38  ;;  %v1033_v42 = vmul.f32 %v2021_v38, %v994_v25  ;;  %v1629_v43 = vpop.f32.mrb[26].mxu0 }
 0x152   : > { %v1258_v10 = vmul.f32 %v2021_v38, %v1219_v26  ;;  %v1649_v0 = vpop.f32.mrb[26].mxu1  ;;  %1321 = vst.msk [vmem:[%s2213_s13 + $0x30] sm:$0xff] %vm1314_vm3, %v1304_v36  ;;  %v1305_v1 = vmax.f32 %v1289_v37, 0.0  ;;  %v1287_v28 = vmax.f32 %v1062_v20, %v1271_v62  ;;  %v1051_v29 = vadd.f32 %v2023_v39, %v1035_v21  ;;  %v997_v3 = vpop.f32.mrb[27].mxu0 }
 0x153   : > { %v1036_v31 = vmul.f32 %v1629_v43, %v2021_v38  ;;  %v1222_v12 = vpop.f32.mrb[27].mxu1  ;;  %1319 = vst.msk [vmem:[%s2213_s13 + $0x20] sm:$0xff] %vm1314_vm3, %v1302_v27  ;;  %v1276_v13 = vadd.f32 %v2023_v39, %v1260_v30  ;;  %v1049_v18 = vadd.f32 %v2023_v39, %v1033_v42  ;;  %v1261_v16 = vmul.f32 %v1649_v0, %v2021_v38 }
 0x154   : > { %v1274_v19 = vadd.f32 %v2023_v39, %v1258_v10  ;;  %1322 = vst.msk [vmem:[%s2213_s13 + $0x38] sm:$0xff] %vm1314_vm3, %v1305_v1  ;;  %v1303_v17 = vmax.f32 %v1287_v28, 0.0  ;;  %v1067_v34 = vmax.f32 %v842_v58, %v1051_v29  ;;  %v1034_v22 = vmul.f32 %v2021_v38, %v997_v3 }
 0x155   : > { %v1052_v35 = vadd.f32 %v2023_v39, %v1036_v31  ;;  %v1065_v23 = vmax.f32 %v840_v5, %v1049_v18  ;;  %v1259_v11 = vmul.f32 %v2021_v38, %v1222_v12  ;;  %v1277_v44 = vadd.f32 %v2023_v39, %v1261_v16 }
 0x156   : > { %1320 = vst.msk [vmem:[%s2213_s13 + $0x28] sm:$0xff] %vm1314_vm3, %v1303_v17  ;;  %v1292_v50 = vmax.f32 %v1067_v34, %v1276_v13  ;;  %v1050_v45 = vadd.f32 %v2023_v39, %v1034_v22 }
 0x157   : > { %v1068_v51 = vmax.f32 %v843_v8, %v1052_v35  ;;  %v1290_v58 = vmax.f32 %v1065_v23, %v1274_v19  ;;  %v1275_v56 = vadd.f32 %v2023_v39, %v1259_v11  ;;  %v1632_v57 = vpop.f32.mrb[28].mxu0 }
 0x158   : > { %v1652_v52 = vpop.f32.mrb[28].mxu1  ;;  %v1308_v53 = vmax.f32 %v1292_v50, 0.0  ;;  %v1066_v60 = vmax.f32 %v841_v9, %v1050_v45  ;;  %v1039_v61 = vmul.f32 %v1632_v57, %v2021_v38  ;;  %v1010_v59 = vpop.f32.mrb[29].mxu0 }
 0x159   : > { %v1293_v5 = vmax.f32 %v1068_v51, %v1277_v44  ;;  %v1235_v4 = vpop.f32.mrb[29].mxu1  ;;  %v1306_v8 = vmax.f32 %v1290_v58, 0.0  ;;  %v1264_v14 = vmul.f32 %v1652_v52, %v2021_v38  ;;  %v1037_v15 = vmul.f32 %v2021_v38, %v1010_v59  ;;  %v1633_v62 = vpop.f32.mrb[30].mxu0 }
 0x15a   : > { %v1262_v24 = vmul.f32 %v2021_v38, %v1235_v4  ;;  %v1653_v63 = vpop.f32.mrb[30].mxu1  ;;  %1325 = vst.msk [vmem:[%s2213_s13 + $0x50] sm:$0xff] %vm1314_vm3, %v1308_v53  ;;  %v1291_v6 = vmax.f32 %v1066_v60, %v1275_v56  ;;  %v1055_v7 = vadd.f32 %v2023_v39, %v1039_v61  ;;  %v1040_v9 = vmul.f32 %v1633_v62, %v2021_v38  ;;  %v1013_v36 = vpop.f32.mrb[31].mxu0 }
 0x15b   : > { %v1309_v2 = vmax.f32 %v1293_v5, 0.0  ;;  %v1238_v37 = vpop.f32.mrb[31].mxu1  ;;  %1323 = vst.msk [vmem:[%s2213_s13 + $0x40] sm:$0xff] %vm1314_vm3, %v1306_v8  ;;  %v1280_v20 = vadd.f32 %v2023_v39, %v1264_v14  ;;  %v1053_v21 = vadd.f32 %v2023_v39, %v1037_v15  ;;  %v1265_v26 = vmul.f32 %v1653_v63, %v2021_v38 }
 0x15c   : > { %v1278_v25 = vadd.f32 %v2023_v39, %v1262_v24  ;;  %v1307_v27 = vmax.f32 %v1291_v6, 0.0  ;;  %v1071_v30 = vmax.f32 %v846_v46, %v1055_v7  ;;  %v1056_v42 = vadd.f32 %v2023_v39, %v1040_v9 }
 0x15d   : > { %1326 = vst.msk [vmem:[%s2213_s13 + $0x58] sm:$0xff] %vm1314_vm3, %v1309_v2  ;;  %v1038_v10 = vmul.f32 %v2021_v38, %v1013_v36  ;;  %v1069_v43 = vmax.f32 %v844_v49, %v1053_v21  ;;  %v1263_v0 = vmul.f32 %v2021_v38, %v1238_v37  ;;  %v1281_v46 = vadd.f32 %v2023_v39, %v1265_v26 }
 0x15e   : > { %1324 = vst.msk [vmem:[%s2213_s13 + $0x48] sm:$0xff] %vm1314_vm3, %v1307_v27  ;;  %v1296_v1 = vmax.f32 %v1071_v30, %v1280_v20  ;;  %v1072_v33 = vmax.f32 %v2354_v32, %v1056_v42 }
 0x15f   : > { %v1054_v28 = vadd.f32 %v2023_v39, %v1038_v10  ;;  %v1294_v29 = vmax.f32 %v1069_v43, %v1278_v25  ;;  %v1279_v49 = vadd.f32 %v2023_v39, %v1263_v0 }
 0x160   : > { %v1312_v31 = vmax.f32 %v1296_v1, 0.0  ;;  %v1297_v40 = vmax.f32 %v1072_v33, %v1281_v46 }
 0x161   : > { %v1070_v38 = vmax.f32 %v2355_v41, %v1054_v28  ;;  %v1310_v3 = vmax.f32 %v1294_v29, 0.0 }
 0x162   : > { %1329 = vst.msk [vmem:[%s2213_s13 + $0x70] sm:$0xff] %vm1314_vm3, %v1312_v31  ;;  %v1313_v12 = vmax.f32 %v1297_v40, 0.0 }
 0x163   : > { %v1295_v47 = vmax.f32 %v1070_v38, %v1279_v49  ;;  %1327 = vst.msk [vmem:[%s2213_s13 + $0x60] sm:$0xff] %vm1314_vm3, %v1310_v3 }
 0x164   : > { %1330 = vst.msk [vmem:[%s2213_s13 + $0x78] sm:$0xff] %vm1314_vm3, %v1313_v12 }
 0x165   : > { %v1311_v48 = vmax.f32 %v1295_v47, 0.0 }
 0x167   : > { %1328 = vst.msk [vmem:[%s2213_s13 + $0x68] sm:$0xff] %vm1314_vm3, %v1311_v48 }
 0x168 PF: > { %s19_s24 = sadd.s32 1, %s1790_s24  }
 0x169   : > { %p16_p2 = scmp.ge.s32.totalorder %s19_s24, 6  }
 0x16b   :  { %18 = sbr.rel (!%p16_p2) target bundleno = 2 (0x2), region = 96 }
 0x172   :  { %1353 = vsyncpa [#allocation3], 1 }
 0x173   :  { %1355 = vsyncpa [#allocation3 + $0x1], 1 }
 0x174   :  { %1356 = vsyncpa [#allocation5], 1 }

// kernel: cnn_forward.7
= control target key start
LH: loop header
LB: loop body
LE: loop exit
PB: predicated region body
PF: predicated region fallthrough
CT: control target
= control target key end

     0   :  { %12 = vsyncpa [#allocation3], 0  ;;  %s5471_s0 = inlined_call_operand.vmem [shape: bf16[128,576], index: 0, kind: input, shape index: {}]   ;;  %s5472_s1 = inlined_call_operand.vmem [shape: bf16[128,576], index: 1, kind: input, shape index: {}]   ;;  %s5473_s2 = inlined_call_operand.vmem [shape: bf16[128,576], index: 2, kind: input, shape index: {}]   ;;  %s5474_s3 = inlined_call_operand.vmem [shape: bf16[128,576], index: 3, kind: input, shape index: {}]   ;;  %s5475_s4 = inlined_call_operand.hbm [shape: bf16[576,128], index: 4, kind: input, shape index: {}]   ;;  %s5476_s5 = inlined_call_operand.vmem [shape: f32[1,128], index: 5, kind: input, shape index: {}]   ;;  %s5477_s6 = inlined_call_operand.hbm [shape: f32[1,128], index: 6, kind: input, shape index: {}]   ;;  %s5478_s7 = inlined_call_operand.vmem [shape: f32[128,128], index: 7, kind: output, shape index: {}]  }
   0x1   :  { %13 = vsyncpa [#allocation5], 0  ;;  %s4058_s24 = smov [#allocation2]   ;;  %s4010_s28 = scalar_lea.hbm %s5475_s4, 4608 }
   0x2   :  { %s27_s25 = sshll.u32 %s4058_s24, 4  ;;  %p4011_p0 = scmp.ne.s32.totalorder %s5475_s4, %s4010_s28  ;;  %s28_s25 = int_to_ptr.vmem [resolvable:$true] %s27_s25 }
   0x3   :  { %p4014_p1 = scmp.lt.u32.totalorder %s4010_s28, %s5475_s4 }
   0x5   :  { %p4016_p2 = pnand %p4014_p1, %p4011_p0 }
   0x7   :  { %4019 = shalt.err (!%p4016_p2)
}
   0x8   :  { %s4020_s10 = scalar_lea.vmem %s28_s25, 4608  ;;  %p4025_p4 = scmp.lt.s32.totalorder %s28_s25, %s28_s25 }
   0x9   :  { %p4021_p3 = scmp.ne.s32.totalorder %s28_s25, %s4020_s10  ;;  %p4026_p5 = scmp.lt.s32.totalorder %s4020_s10, %s4020_s10 }
   0xb   :  { %p4027_p6 = por %p4026_p5, %p4025_p4 }
   0xd   :  { %p4028_p7 = pnand %p4027_p6, %p4021_p3 }
   0xf   :  { %4031 = shalt.err (!%p4028_p7)
}
  0x10   :  { %s4059_s11 = smov 64   ;;  %s4060_s12 = smov 4  }
  0x11   :  { %33 = dma.hbm_to_vmem [thread:$0]  %s5475_s4, 4608, %s28_s25, [#allocation3], %s4059_s11, %s4059_s11, %s4060_s12  }
  0x12   :  { %s4061_s15 = smov [#allocation4]   ;;  %s4032_s19 = scalar_lea.hbm %s5477_s6, 16 }
  0x13   :  { %s42_s16 = sshll.u32 %s4061_s15, 4  ;;  %p4033_p8 = scmp.ne.s32.totalorder %s5477_s6, %s4032_s19  ;;  %s43_s16 = int_to_ptr.vmem [resolvable:$true] %s42_s16 }
  0x14   :  { %p4036_p9 = scmp.lt.u32.totalorder %s4032_s19, %s5477_s6 }
  0x16   :  { %p4038_p10 = pnand %p4036_p9, %p4033_p8 }
  0x18   :  { %4041 = shalt.err (!%p4038_p10)
}
  0x19   :  { %s4042_s24 = scalar_lea.vmem %s43_s16, 16  ;;  %s4046_s4 = scalar_lea.vmem %s43_s16, 32 }
  0x1a   :  { %p4043_p11 = scmp.ne.s32.totalorder %s43_s16, %s4042_s24  ;;  %p4047_p12 = scmp.lt.s32.totalorder %s43_s16, %s43_s16 }
  0x1b   :  { %p4048_p13 = scmp.lt.s32.totalorder %s4046_s4, %s4042_s24 }
  0x1d   :  { %p4049_p0 = por %p4048_p13, %p4047_p12 }
  0x1f   :  { %p4050_p1 = pnand %p4049_p0, %p4043_p11 }
  0x21   :  { %4053 = shalt.err (!%p4050_p1)
}
  0x22   :  { %45 = dma.hbm_to_vmem [thread:$0]  %s5477_s6, 16, %s43_s16, [#allocation5]  }
  0x23   :  { %4054 = dma.done.wait [#allocation3], 4608  }
  0x24   :  { %4055 = vsyncadd [#allocation3], 4294962688 }
  0x25   :  { %4056 = dma.done.wait [#allocation5], 16  }
  0x26   :  { %4057 = vsyncadd [#allocation5], 4294967280  ;;  %v4126_v0 = vld [vmem:[#allocation2 + $0x40] sm:$0xff]   ;;  %v4137_v4 = vld [vmem:[#allocation2 + $0x48] sm:$0xff]   ;;  %vm591_vm0 = vcmask 523264  }
  0x27   :  { %v4128_v1 = vld [vmem:[#allocation2 + $0xc0] sm:$0xff]   ;;  %3052 = vmatprep.subr.bf16.mxu0 %v4126_v0  ;;  %v4140_v5 = vld [vmem:[#allocation2 + $0xc8] sm:$0xff]   ;;  %v4149_v8 = vld [vmem:[#allocation2 + $0x50] sm:$0xff]  }
  0x28   :  { %v4131_v2 = vld [vmem:[#allocation2] sm:$0xff]   ;;  %3116 = vmatprep.subr.bf16.mxu1 %v4128_v1  ;;  %v4143_v6 = vld [vmem:[#allocation2 + $0x8] sm:$0xff]   ;;  %v4152_v9 = vld [vmem:[#allocation2 + $0xd0] sm:$0xff]  }
  0x29   :  { %v4134_v3 = vld [vmem:[#allocation2 + $0x80] sm:$0xff]   ;;  %3053 = vmatpush3.bf16.msra.mxu0 %v4131_v2  ;;  %v4146_v7 = vld [vmem:[#allocation2 + $0x88] sm:$0xff]   ;;  %v4155_v10 = vld [vmem:[#allocation2 + $0x10] sm:$0xff]  }
  0x2a   :  { %3117 = vmatpush3.bf16.msra.mxu1 %v4134_v3  ;;  %3054 = vmatprep.subr.bf16.mxu0 %v4137_v4  ;;  %v4158_v11 = vld [vmem:[#allocation2 + $0x90] sm:$0xff]   ;;  %v4161_v12 = vld [vmem:[#allocation2 + $0x58] sm:$0xff]   ;;  %v4173_v16 = vld [vmem:[#allocation2 + $0x60] sm:$0xff]  }
  0x2b   :  { %3118 = vmatprep.subr.bf16.mxu1 %v4140_v5  ;;  %v4164_v13 = vld [vmem:[#allocation2 + $0xd8] sm:$0xff]   ;;  %v4176_v17 = vld [vmem:[#allocation2 + $0xe0] sm:$0xff]   ;;  %v4185_v20 = vld [vmem:[#allocation2 + $0x68] sm:$0xff]  }
  0x2c   :  { %v4167_v14 = vld [vmem:[#allocation2 + $0x18] sm:$0xff]   ;;  %v4179_v18 = vld [vmem:[#allocation2 + $0x20] sm:$0xff]   ;;  %v4188_v21 = vld [vmem:[#allocation2 + $0xe8] sm:$0xff]  }
  0x2d   :  { %3055 = vmatpush3.bf16.msra.mxu0 %v4143_v6  ;;  %v4170_v15 = vld [vmem:[#allocation2 + $0x98] sm:$0xff]   ;;  %v4182_v19 = vld [vmem:[#allocation2 + $0xa0] sm:$0xff]   ;;  %v4191_v22 = vld [vmem:[#allocation2 + $0x28] sm:$0xff]  }
  0x2e   :  { %3119 = vmatpush3.bf16.msra.mxu1 %v4146_v7  ;;  %3056 = vmatprep.subr.bf16.mxu0 %v4149_v8  ;;  %v4194_v23 = vld [vmem:[#allocation2 + $0xa8] sm:$0xff]   ;;  %v4197_v24 = vld [vmem:[#allocation2 + $0x70] sm:$0xff]   ;;  %v4209_v28 = vld [vmem:[#allocation2 + $0x78] sm:$0xff]  }
  0x2f   :  { %3120 = vmatprep.subr.bf16.mxu1 %v4152_v9  ;;  %v4200_v25 = vld [vmem:[#allocation2 + $0xf0] sm:$0xff]   ;;  %v4212_v29 = vld [vmem:[#allocation2 + $0xf8] sm:$0xff]   ;;  %v3749_v35 = vld [vmem:[%s5471_s0 + $0xc] ss:$20 sps:$4 sm:$0xff]  }
  0x30   :  { %v4203_v26 = vld [vmem:[#allocation2 + $0x30] sm:$0xff]   ;;  %v4215_v30 = vld [vmem:[#allocation2 + $0x38] sm:$0xff]   ;;  %v4235_v36 = vld [vmem:[#allocation2 + $0x100] sm:$0xff]   ;;  %745 = vmatprep.mubr.bf16.mxu1 %v3749_v35 }
  0x31   :  { %3057 = vmatpush3.bf16.msra.mxu0 %v4155_v10  ;;  %v4206_v27 = vld [vmem:[#allocation2 + $0xb0] sm:$0xff]   ;;  %v4218_v31 = vld [vmem:[#allocation2 + $0xb8] sm:$0xff]   ;;  %v3751_v37 = vld [vmem:[%s5471_s0 + $0x2c] ss:$20 sps:$4 sm:$0xff]  }
  0x32   :  { %3121 = vmatpush3.bf16.msra.mxu1 %v4158_v11  ;;  %3058 = vmatprep.subr.bf16.mxu0 %v4161_v12  ;;  %v3744_v32 = vld [vmem:[%s5471_s0] ss:$20 sps:$4 sm:$0xff]   ;;  %v3746_v33 = vld [vmem:[%s5471_s0 + $0x4] ss:$20 sps:$4 sm:$0xff]   ;;  %v3747_v34 = vld [vmem:[%s5471_s0 + $0x8] ss:$20 sps:$4 sm:$0xff]  }
  0x33   :  { %3122 = vmatprep.subr.bf16.mxu1 %v4164_v13  ;;  %648 = vmatprep.mubr.bf16.mxu0 %v3746_v33  ;;  %v3753_v38 = vld [vmem:[%s5471_s0 + $0x34] ss:$20 sps:$4 sm:$0xff]   ;;  %v3756_v40 = vld [vmem:[%s5471_s0 + $0x30] ss:$20 sps:$4 sm:$0xff]   ;;  %v3762_v45 = vld [vmem:[%s5471_s0 + $0x58] ss:$20 sps:$4 sm:$0xff]  }
  0x34   :  { %v3755_v39 = vld [vmem:[%s5471_s0 + $0x28] ss:$20 sps:$4 sm:$0xff]   ;;  %v3761_v44 = vld [vmem:[%s5471_s0 + $0x50] ss:$20 sps:$4 sm:$0xff]   ;;  %v3768_v50 = vld [vmem:[%s5471_s0 + $0x78] ss:$20 sps:$4 sm:$0xff]  }
  0x35   :  { %3059 = vmatpush3.bf16.msra.mxu0 %v4167_v14  ;;  %v3757_v41 = vld [vmem:[%s5471_s0 + $0x54] ss:$20 sps:$4 sm:$0xff]   ;;  %v3759_v43 = vld [vmem:[%s5471_s0 + $0x5c] ss:$20 sps:$4 sm:$0xff]   ;;  %v3766_v48 = vld [vmem:[%s5471_s0 + $0x84] ss:$20 sps:$4 sm:$0xff]  }
  0x36   :  { %3123 = vmatpush3.bf16.msra.mxu1 %v4170_v15  ;;  %3060 = vmatprep.subr.bf16.mxu0 %v4173_v16  ;;  %v4256_v42 = vld [vmem:[#allocation2 + $0x108] sm:$0xff]   ;;  %v4273_v46 = vld [vmem:[#allocation2 + $0x110] sm:$0xff]   ;;  %v4285_v49 = vld [vmem:[#allocation2 + $0x118] sm:$0xff]  }
  0x37   :  { %3124 = vmatprep.subr.bf16.mxu1 %v4176_v17  ;;  %v3764_v47 = vld [vmem:[%s5471_s0 + $0x7c] ss:$20 sps:$4 sm:$0xff]   ;;  %v3769_v51 = vld [vmem:[%s5471_s0 + $0x80] ss:$20 sps:$4 sm:$0xff]   ;;  %v3770_v52 = vld [vmem:[%s5471_s0 + $0xa4] ss:$20 sps:$4 sm:$0xff]  }
  0x38   :  { %v3772_v53 = vld [vmem:[%s5471_s0 + $0xac] ss:$20 sps:$4 sm:$0xff]   ;;  %v3775_v55 = vld [vmem:[%s5471_s0 + $0xa8] ss:$20 sps:$4 sm:$0xff]   ;;  %v3782_v59 = vld [vmem:[%s5471_s0 + $0xd0] ss:$20 sps:$4 sm:$0xff]  }
  0x39   :  { %3061 = vmatpush3.bf16.msra.mxu0 %v4179_v18  ;;  %v3774_v54 = vld [vmem:[%s5471_s0 + $0xa0] ss:$20 sps:$4 sm:$0xff]   ;;  %v3781_v58 = vld [vmem:[%s5471_s0 + $0xc8] ss:$20 sps:$4 sm:$0xff]   ;;  %v3787_v62 = vld [vmem:[%s5471_s0 + $0xf0] ss:$20 sps:$4 sm:$0xff]  }
  0x3a   :  { %3125 = vmatpush3.bf16.msra.mxu1 %v4182_v19  ;;  %3062 = vmatprep.subr.bf16.mxu0 %v4185_v20  ;;  %v3777_v56 = vld [vmem:[%s5471_s0 + $0xcc] ss:$20 sps:$4 sm:$0xff]   ;;  %v3779_v57 = vld [vmem:[%s5471_s0 + $0xd4] ss:$20 sps:$4 sm:$0xff]   ;;  %v3785_v61 = vld [vmem:[%s5471_s0 + $0xfc] ss:$20 sps:$4 sm:$0xff]  }
  0x3b   :  { %3126 = vmatprep.subr.bf16.mxu1 %v4188_v21  ;;  %v3783_v60 = vld [vmem:[%s5471_s0 + $0xf4] ss:$20 sps:$4 sm:$0xff]   ;;  %v3788_v63 = vld [vmem:[%s5471_s0 + $0xf8] ss:$20 sps:$4 sm:$0xff]  }
  0x3c   :  { %v3792_v33 = vld [vmem:[%s5471_s0 + $0x124] ss:$20 sps:$4 sm:$0xff]   ;;  %v3795_v35 = vld [vmem:[%s5471_s0 + $0x120] ss:$20 sps:$4 sm:$0xff]  }
  0x3d   :  { %3063 = vmatpush3.bf16.msra.mxu0 %v4191_v22 }
  0x3e   :  { %3127 = vmatpush3.bf16.msra.mxu1 %v4194_v23  ;;  %3064 = vmatprep.subr.bf16.mxu0 %v4197_v24 }
  0x3f   :  { %3128 = vmatprep.subr.bf16.mxu1 %v4200_v25 }
  0x41   :  { %3065 = vmatpush3.bf16.msra.mxu0 %v4203_v26 }
  0x42   :  { %3129 = vmatpush3.bf16.msra.mxu1 %v4206_v27  ;;  %3066 = vmatprep.subr.bf16.mxu0 %v4209_v28 }
  0x43   :  { %3130 = vmatprep.subr.bf16.mxu1 %v4212_v29 }
  0x45   :  { %3067 = vmatpush3.bf16.msra.mxu0 %v4215_v30 }
  0x46   :  { %3131 = vmatpush3.bf16.msra.mxu1 %v4218_v31  ;;  %3612 = vmatprep.subr.bf16.mxu0 %v4235_v36 }
  0x47   :  { %3192 = vmatprep.subr.bf16.mxu1 %v4126_v0 }
  0x48   :  { %649 = vmatmul.mubr.bf16.vlgmr.msra.gmra.mrb[0].mxu0 %v3744_v32  ;;  %v3790_v32 = vld [vmem:[%s5471_s0 + $0x11c] ss:$20 sps:$4 sm:$0xff]  }
  0x49   :  { %746 = vmatmul.mubr.bf16.vlgmr.msra.gmra.mrb[0].mxu1 %v3747_v34  ;;  %3613 = vmatpush3.bf16.msra.mxu0 %v4235_v36  ;;  %v3794_v34 = vld [vmem:[%s5471_s0 + $0x118] ss:$20 sps:$4 sm:$0xff]  }
  0x4a   :  { %3193 = vmatpush3.bf16.msra.mxu1 %v4131_v2  ;;  %656 = vmatprep.mubr.bf16.mxu0 %v3751_v37  ;;  %v3796_v37 = vld [vmem:[%s5471_s0 + $0x10] ss:$20 sps:$4 sm:$0xff]  }
  0x4b   :  { %753 = vmatprep.mubr.bf16.mxu1 %v3753_v38  ;;  %3194 = vmatprep.subr.bf16.mxu1 %v4137_v4  ;;  %v3799_v38 = vld [vmem:[%s5472_s1 + $0x4] ss:$20 sps:$4 sm:$0xff]  }
  0x4c   :  { %3614 = vmatprep.subr.bf16.mxu0 %v4256_v42 }
  0x4d   :  { %3615 = vmatpush3.bf16.msra.mxu0 %v4256_v42 }
  0x4e   :  { %3195 = vmatpush3.bf16.msra.mxu1 %v4143_v6  ;;  %3616 = vmatprep.subr.bf16.mxu0 %v4273_v46 }
  0x4f   :  { %3196 = vmatprep.subr.bf16.mxu1 %v4149_v8 }
  0x50   :  { %657 = vmatmul.mubr.bf16.gmra.mrb[4].mxu0 %v3755_v39  ;;  %v3800_v39 = vld [vmem:[%s5471_s0 + $0x38] ss:$20 sps:$4 sm:$0xff]  }
  0x51   :  { %754 = vmatmul.mubr.bf16.gmra.mrb[4].mxu1 %v3756_v40  ;;  %664 = vmatprep.mubr.bf16.mxu0 %v3757_v41  ;;  %v3797_v40 = vld [vmem:[%s5472_s1] ss:$20 sps:$4 sm:$0xff]  }
  0x52   :  { %761 = vmatprep.mubr.bf16.mxu1 %v3759_v43  ;;  %3197 = vmatpush3.bf16.msra.mxu1 %v4155_v10  ;;  %v3801_v41 = vld [vmem:[%s5471_s0 + $0x60] ss:$20 sps:$4 sm:$0xff]  }
  0x53   :  { %3198 = vmatprep.subr.bf16.mxu1 %v4161_v12  ;;  %3617 = vmatpush3.bf16.msra.mxu0 %v4273_v46  ;;  %v3802_v43 = vld [vmem:[%s5472_s1 + $0x2c] ss:$20 sps:$4 sm:$0xff]  }
  0x54   :  { %3618 = vmatprep.subr.bf16.mxu0 %v4285_v49 }
  0x56   :  { %3199 = vmatpush3.bf16.msra.mxu1 %v4167_v14 }
  0x57   :  { %3200 = vmatprep.subr.bf16.mxu1 %v4173_v16  ;;  %3619 = vmatpush3.bf16.msra.mxu0 %v4285_v49 }
  0x58   :  { %665 = vmatmul.mubr.bf16.gmra.mrb[8].mxu0 %v3761_v44  ;;  %3256 = vmatprep.subr.bf16.mxu0 %v4128_v1  ;;  %v3804_v44 = vld [vmem:[%s5471_s0 + $0x88] ss:$20 sps:$4 sm:$0xff]  }
  0x59   :  { %762 = vmatmul.mubr.bf16.gmra.mrb[8].mxu1 %v3762_v45  ;;  %672 = vmatprep.mubr.bf16.mxu0 %v3764_v47  ;;  %v3805_v45 = vld [vmem:[%s5472_s1 + $0x28] ss:$20 sps:$4 sm:$0xff]   ;;  %v3810_v47 = vld [vmem:[%s5472_s1 + $0x50] ss:$20 sps:$4 sm:$0xff]  }
  0x5a   :  { %769 = vmatprep.mubr.bf16.mxu1 %v3766_v48  ;;  %3201 = vmatpush3.bf16.msra.mxu1 %v4179_v18  ;;  %v3811_v48 = vld [vmem:[%s5471_s0 + $0x100] ss:$20 sps:$4 sm:$0xff]  }
  0x5b   :  { %3202 = vmatprep.subr.bf16.mxu1 %v4185_v20 }
  0x5e   :  { %3203 = vmatpush3.bf16.msra.mxu1 %v4191_v22 }
  0x5f   :  { %3204 = vmatprep.subr.bf16.mxu1 %v4197_v24 }
  0x60   :  { %673 = vmatmul.mubr.bf16.gmra.mrb[12].mxu0 %v3768_v50  ;;  %v3812_v50 = vld [vmem:[%s5472_s1 + $0x7c] ss:$20 sps:$4 sm:$0xff]  }
  0x61   :  { %770 = vmatmul.mubr.bf16.gmra.mrb[12].mxu1 %v3769_v51  ;;  %680 = vmatprep.mubr.bf16.mxu0 %v3770_v52  ;;  %v3814_v51 = vld [vmem:[%s5471_s0 + $0x128] ss:$20 sps:$4 sm:$0xff]   ;;  %v3815_v52 = vld [vmem:[%s5472_s1 + $0x78] ss:$20 sps:$4 sm:$0xff]  }
  0x62   :  { %777 = vmatprep.mubr.bf16.mxu1 %v3772_v53  ;;  %3205 = vmatpush3.bf16.msra.mxu1 %v4203_v26  ;;  %v3820_v53 = vld [vmem:[%s5472_s1 + $0xc] ss:$20 sps:$4 sm:$0xff]  }
  0x63   :  { %3206 = vmatprep.subr.bf16.mxu1 %v4209_v28 }
  0x66   :  { %3207 = vmatpush3.bf16.msra.mxu1 %v4215_v30 }
  0x67   :  { %3636 = vmatprep.subr.bf16.mxu1 %v4235_v36 }
  0x68   :  { %681 = vmatmul.mubr.bf16.gmra.mrb[16].mxu0 %v3774_v54  ;;  %v3818_v54 = vld [vmem:[%s5472_s1 + $0x8] ss:$20 sps:$4 sm:$0xff]  }
  0x69   :  { %778 = vmatmul.mubr.bf16.gmra.mrb[16].mxu1 %v3775_v55  ;;  %688 = vmatprep.mubr.bf16.mxu0 %v3777_v56  ;;  %v3821_v55 = vld [vmem:[%s5472_s1 + $0xa0] ss:$20 sps:$4 sm:$0xff]  }
  0x6a   :  { %785 = vmatprep.mubr.bf16.mxu1 %v3779_v57  ;;  %v3822_v56 = vld [vmem:[%s5472_s1 + $0xcc] ss:$20 sps:$4 sm:$0xff]   ;;  %v3824_v57 = vld [vmem:[%s5472_s1 + $0x34] ss:$20 sps:$4 sm:$0xff]  }
  0x70   :  { %689 = vmatmul.mubr.bf16.gmra.mrb[20].mxu0 %v3781_v58  ;;  %v3827_v58 = vld [vmem:[%s5472_s1 + $0x30] ss:$20 sps:$4 sm:$0xff]  }
  0x71   :  { %786 = vmatmul.mubr.bf16.gmra.mrb[20].mxu1 %v3782_v59  ;;  %696 = vmatprep.mubr.bf16.mxu0 %v3783_v60  ;;  %v3830_v59 = vld [vmem:[%s5472_s1 + $0x5c] ss:$20 sps:$4 sm:$0xff]  }
  0x72   :  { %793 = vmatprep.mubr.bf16.mxu1 %v3785_v61  ;;  %v3834_v60 = vld [vmem:[%s5472_s1 + $0x11c] ss:$20 sps:$4 sm:$0xff]  }
  0x73   :  { %v3849_v61 = vld [vmem:[%s5472_s1 + $0x88] ss:$20 sps:$4 sm:$0xff]  }
  0x78   :  { %697 = vmatmul.mubr.bf16.gmra.mrb[24].mxu0 %v3787_v62  ;;  %v3850_v62 = vld [vmem:[%s5472_s1 + $0xfc] ss:$20 sps:$4 sm:$0xff]  }
  0x79   :  { %794 = vmatmul.mubr.bf16.gmra.mrb[24].mxu1 %v3788_v63  ;;  %704 = vmatprep.mubr.bf16.mxu0 %v3790_v32  ;;  %v4532_v63 = vld [vmem:[#allocation2 + $0x88] sm:$0xff]   ;;  %v3852_v32 = vld [vmem:[%s5472_s1 + $0xb0] ss:$20 sps:$4 sm:$0xff]  }
  0x7a   :  { %801 = vmatprep.mubr.bf16.mxu1 %v3792_v33  ;;  %v3853_v33 = vld [vmem:[%s5472_s1 + $0xf8] ss:$20 sps:$4 sm:$0xff]  }
  0x80   :  { %705 = vmatmul.mubr.bf16.gmra.mrb[28].mxu0 %v3794_v34  ;;  %v3854_v34 = vld [vmem:[%s5472_s1 + $0xd8] ss:$20 sps:$4 sm:$0xff]  }
  0x81   :  { %802 = vmatmul.mubr.bf16.gmra.mrb[28].mxu1 %v3795_v35  ;;  %3620 = vmatprep.mubr.msk.bf16.mxu0 %vm591_vm0, %v3796_v37  ;;  %v3975_v35 = vld [vmem:[#allocation2 + $0x40] sm:$0xff]   ;;  %v3977_v37 = vld [vmem:[#allocation2 + $0x48] sm:$0xff]  }
  0x82   :  { %1255 = vmatprep.mubr.bf16.mxu1 %v3799_v38  ;;  %v3871_v38 = vld [vmem:[%s5473_s2 + $0x30] ss:$20 sps:$4 sm:$0xff]  }
  0x88   :  { %3621 = vmatmul.mubr.msk.bf16.vlgmr.msra.gmra.mrb[32].mxu0 %vm591_vm0, %v3800_v39  ;;  %v3872_v39 = vld [vmem:[%s5473_s2 + $0x54] ss:$20 sps:$4 sm:$0xff]  }
  0x89   :  { %1256 = vmatmul.mubr.bf16.vlgmr.msra.gmra.mrb[32].mxu1 %v3797_v40  ;;  %3257 = vmatpush3.bf16.msra.mxu0 %v4134_v3  ;;  %v3806_v3 = vld [vmem:[%s5471_s0 + $0xb0] ss:$20 sps:$4 sm:$0xff]   ;;  %v3978_v40 = vld [vmem:[#allocation2 + $0x8] sm:$0xff]  }
  0x8a   :  { %3258 = vmatprep.subr.bf16.mxu0 %v4140_v5  ;;  %3637 = vmatpush3.bf16.msra.mxu1 %v4235_v36  ;;  %v3807_v5 = vld [vmem:[%s5472_s1 + $0x54] ss:$20 sps:$4 sm:$0xff]  }
  0x8b   :  { %3624 = vmatprep.mubr.msk.bf16.mxu0 %vm591_vm0, %v3801_v41  ;;  %1263 = vmatprep.mubr.bf16.mxu1 %v3802_v43  ;;  %v3874_v41 = vld [vmem:[%s5473_s2 + $0x5c] ss:$20 sps:$4 sm:$0xff]  }
  0x8c   :  { %3638 = vmatprep.subr.bf16.mxu1 %v4256_v42  ;;  %v3979_v43 = vld [vmem:[#allocation2 + $0x50] sm:$0xff]  }
  0x8d   :  { %3259 = vmatpush3.bf16.msra.mxu0 %v4146_v7  ;;  %v3809_v7 = vld [vmem:[%s5471_s0 + $0xd8] ss:$20 sps:$4 sm:$0xff]  }
  0x8e   :  { %3260 = vmatprep.subr.bf16.mxu0 %v4152_v9  ;;  %3639 = vmatpush3.bf16.msra.mxu1 %v4256_v42 }
  0x8f   :  { %3640 = vmatprep.subr.bf16.mxu1 %v4273_v46 }
  0x90   :  { %3625 = vmatmul.mubr.msk.bf16.gmra.mrb[36].mxu0 %vm591_vm0, %v3804_v44  ;;  %v3980_v44 = vld [vmem:[#allocation2 + $0x10] sm:$0xff]  }
  0x91   :  { %1264 = vmatmul.mubr.bf16.gmra.mrb[36].mxu1 %v3805_v45  ;;  %3261 = vmatpush3.bf16.msra.mxu0 %v4158_v11  ;;  %v3981_v45 = vld [vmem:[#allocation2 + $0x58] sm:$0xff]  }
  0x92   :  { %3262 = vmatprep.subr.bf16.mxu0 %v4164_v13  ;;  %3628 = vmatprep.mubr.msk.bf16.mxu0 %vm591_vm0, %v3806_v3  ;;  %v3877_v3 = vld [vmem:[%s5473_s2 + $0x58] ss:$20 sps:$4 sm:$0xff]  }
  0x93   :  { %1271 = vmatprep.mubr.bf16.mxu1 %v3807_v5  ;;  %3641 = vmatpush3.bf16.msra.mxu1 %v4273_v46  ;;  %v3878_v5 = vld [vmem:[%s5473_s2 + $0x7c] ss:$20 sps:$4 sm:$0xff]  }
  0x94   :  { %3642 = vmatprep.subr.bf16.mxu1 %v4285_v49 }
  0x95   :  { %3263 = vmatpush3.bf16.msra.mxu0 %v4170_v15 }
  0x96   :  { %3264 = vmatprep.subr.bf16.mxu0 %v4176_v17 }
  0x97   :  { %3643 = vmatpush3.bf16.msra.mxu1 %v4285_v49 }
  0x98   :  { %3629 = vmatmul.mubr.msk.bf16.gmra.mrb[40].mxu0 %vm591_vm0, %v3809_v7  ;;  %3396 = vmatprep.subr.bf16.mxu1 %v4128_v1  ;;  %v3816_v1 = vld [vmem:[%s5472_s1 + $0xa4] ss:$20 sps:$4 sm:$0xff]  }
  0x99   :  { %1272 = vmatmul.mubr.bf16.gmra.mrb[40].mxu1 %v3810_v47  ;;  %3265 = vmatpush3.bf16.msra.mxu0 %v4182_v19  ;;  %v3880_v7 = vld [vmem:[%s5473_s2 + $0x84] ss:$20 sps:$4 sm:$0xff]  }
  0x9a   :  { %3266 = vmatprep.subr.bf16.mxu0 %v4188_v21  ;;  %3632 = vmatprep.mubr.msk.bf16.mxu0 %vm591_vm0, %v3811_v48  ;;  %v3982_v47 = vld [vmem:[#allocation2 + $0x18] sm:$0xff]   ;;  %v3984_v48 = vld [vmem:[#allocation2 + $0xc0] sm:$0xff]  }
  0x9b   :  { %1279 = vmatprep.mubr.bf16.mxu1 %v3812_v50  ;;  %v3985_v50 = vld [vmem:[#allocation2 + $0x20] sm:$0xff]  }
  0x9d   :  { %3267 = vmatpush3.bf16.msra.mxu0 %v4194_v23 }
  0x9e   :  { %3268 = vmatprep.subr.bf16.mxu0 %v4200_v25 }
  0xa0   :  { %3633 = vmatmul.mubr.msk.bf16.gmra.mrb[44].mxu0 %vm591_vm0, %v3814_v51  ;;  %v3986_v51 = vld [vmem:[#allocation2 + $0x68] sm:$0xff]  }
  0xa1   :  { %1280 = vmatmul.mubr.bf16.gmra.mrb[44].mxu1 %v3815_v52  ;;  %3269 = vmatpush3.bf16.msra.mxu0 %v4206_v27  ;;  %v3882_v52 = vld [vmem:[%s5473_s2 + $0x78] ss:$20 sps:$4 sm:$0xff]  }
  0xa2   :  { %3270 = vmatprep.subr.bf16.mxu0 %v4212_v29  ;;  %1287 = vmatprep.mubr.bf16.mxu1 %v3816_v1  ;;  %v3883_v1 = vld [vmem:[%s5473_s2 + $0x80] ss:$20 sps:$4 sm:$0xff]  }
  0xa3   :  { %1352 = vmatprep.mubr.bf16.mxu0 %v3820_v53  ;;  %v3886_v53 = vld [vmem:[%s5473_s2 + $0xac] ss:$20 sps:$4 sm:$0xff]  }
  0xa5   :  { %3271 = vmatpush3.bf16.msra.mxu0 %v4218_v31 }
  0xa6   :  { %3332 = vmatprep.subr.bf16.mxu0 %v4126_v0  ;;  %v3826_v0 = vld [vmem:[%s5472_s1 + $0xc8] ss:$20 sps:$4 sm:$0xff]  }
  0xa8   :  { %1353 = vmatmul.mubr.bf16.vlgmr.msra.gmra.mrb[48].mxu0 %v3818_v54  ;;  %v3987_v54 = vld [vmem:[#allocation2 + $0x28] sm:$0xff]  }
  0xa9   :  { %1288 = vmatmul.mubr.bf16.gmra.mrb[48].mxu1 %v3821_v55  ;;  %3333 = vmatpush3.bf16.msra.mxu0 %v4131_v2  ;;  %v3828_v2 = vld [vmem:[%s5472_s1 + $0xf4] ss:$20 sps:$4 sm:$0xff]  }
  0xaa   :  { %1295 = vmatprep.mubr.bf16.mxu1 %v3822_v56  ;;  %1360 = vmatprep.mubr.bf16.mxu0 %v3824_v57  ;;  %v3988_v55 = vld [vmem:[#allocation2 + $0x70] sm:$0xff]   ;;  %v3990_v57 = vld [vmem:[#allocation2 + $0x78] sm:$0xff]  }
  0xab   :  { %3334 = vmatprep.subr.bf16.mxu0 %v4137_v4  ;;  %v3833_v4 = vld [vmem:[%s5472_s1 + $0x58] ss:$20 sps:$4 sm:$0xff]   ;;  %v3989_v56 = vld [vmem:[#allocation2 + $0x30] sm:$0xff]  }
  0xad   :  { %3335 = vmatpush3.bf16.msra.mxu0 %v4143_v6  ;;  %v3832_v6 = vld [vmem:[%s5472_s1 + $0xf0] ss:$20 sps:$4 sm:$0xff]  }
  0xae   :  { %3336 = vmatprep.subr.bf16.mxu0 %v4149_v8  ;;  %v3836_v8 = vld [vmem:[%s5472_s1 + $0x84] ss:$20 sps:$4 sm:$0xff]  }
  0xb0   :  { %1361 = vmatmul.mubr.bf16.gmra.mrb[52].mxu0 %v3827_v58  ;;  %v3888_v58 = vld [vmem:[%s5473_s2 + $0xa0] ss:$20 sps:$4 sm:$0xff]  }
  0xb1   :  { %1296 = vmatmul.mubr.bf16.gmra.mrb[52].mxu1 %v3826_v0  ;;  %1368 = vmatprep.mubr.bf16.mxu0 %v3830_v59  ;;  %v3889_v0 = vld [vmem:[%s5473_s2 + $0xa8] ss:$20 sps:$4 sm:$0xff]   ;;  %v3890_v59 = vld [vmem:[%s5473_s2 + $0xcc] ss:$20 sps:$4 sm:$0xff]  }
  0xb2   :  { %1303 = vmatprep.mubr.bf16.mxu1 %v3828_v2  ;;  %3337 = vmatpush3.bf16.msra.mxu0 %v4155_v10  ;;  %v3839_v10 = vld [vmem:[%s5472_s1 + $0x80] ss:$20 sps:$4 sm:$0xff]  }
  0xb3   :  { %3338 = vmatprep.subr.bf16.mxu0 %v4161_v12  ;;  %v3838_v12 = vld [vmem:[%s5472_s1 + $0x118] ss:$20 sps:$4 sm:$0xff]   ;;  %v3892_v2 = vld [vmem:[%s5473_s2 + $0xd4] ss:$20 sps:$4 sm:$0xff]  }
  0xb6   :  { %3339 = vmatpush3.bf16.msra.mxu0 %v4167_v14  ;;  %v3840_v14 = vld [vmem:[%s5472_s1 + $0xac] ss:$20 sps:$4 sm:$0xff]  }
  0xb7   :  { %3340 = vmatprep.subr.bf16.mxu0 %v4173_v16  ;;  %v3842_v16 = vld [vmem:[%s5472_s1 + $0x10] ss:$20 sps:$4 sm:$0xff]  }
  0xb8   :  { %1369 = vmatmul.mubr.bf16.gmra.mrb[56].mxu0 %v3833_v4  ;;  %v3991_v4 = vld [vmem:[#allocation2 + $0x38] sm:$0xff]  }
  0xb9   :  { %1304 = vmatmul.mubr.bf16.gmra.mrb[56].mxu1 %v3832_v6  ;;  %1376 = vmatprep.mubr.bf16.mxu0 %v3836_v8  ;;  %v3894_v6 = vld [vmem:[%s5473_s2 + $0xc8] ss:$20 sps:$4 sm:$0xff]   ;;  %v3895_v8 = vld [vmem:[%s5473_s2 + $0xd0] ss:$20 sps:$4 sm:$0xff]  }
  0xba   :  { %1311 = vmatprep.mubr.bf16.mxu1 %v3834_v60  ;;  %3341 = vmatpush3.bf16.msra.mxu0 %v4179_v18  ;;  %v3843_v18 = vld [vmem:[%s5472_s1 + $0xa8] ss:$20 sps:$4 sm:$0xff]  }
  0xbb   :  { %3342 = vmatprep.subr.bf16.mxu0 %v4185_v20  ;;  %v3844_v20 = vld [vmem:[%s5472_s1 + $0x38] ss:$20 sps:$4 sm:$0xff]   ;;  %v3896_v60 = vld [vmem:[%s5473_s2 + $0xf4] ss:$20 sps:$4 sm:$0xff]  }
  0xbe   :  { %3343 = vmatpush3.bf16.msra.mxu0 %v4191_v22  ;;  %v3845_v22 = vld [vmem:[%s5472_s1 + $0xd4] ss:$20 sps:$4 sm:$0xff]  }
  0xbf   :  { %3344 = vmatprep.subr.bf16.mxu0 %v4197_v24  ;;  %v3847_v24 = vld [vmem:[%s5472_s1 + $0x60] ss:$20 sps:$4 sm:$0xff]  }
  0xc0   :  { %1377 = vmatmul.mubr.bf16.gmra.mrb[60].mxu0 %v3839_v10  ;;  %v3900_v10 = vld [vmem:[%s5473_s2 + $0xf0] ss:$20 sps:$4 sm:$0xff]  }
  0xc1   :  { %1312 = vmatmul.mubr.bf16.gmra.mrb[60].mxu1 %v3838_v12  ;;  %1384 = vmatprep.mubr.bf16.mxu0 %v3840_v14  ;;  %v3901_v12 = vld [vmem:[%s5473_s2 + $0xf8] ss:$20 sps:$4 sm:$0xff]   ;;  %v3902_v14 = vld [vmem:[%s5473_s2 + $0x11c] ss:$20 sps:$4 sm:$0xff]  }
  0xc2   :  { %3644 = vmatprep.mubr.msk.bf16.mxu1 %vm591_vm0, %v3842_v16  ;;  %3345 = vmatpush3.bf16.msra.mxu0 %v4203_v26  ;;  %v4516_v26 = vld [vmem:[#allocation2 + $0x80] sm:$0xff]  }
  0xc3   :  { %3346 = vmatprep.subr.bf16.mxu0 %v4209_v28  ;;  %v4520_v28 = vld [vmem:[#allocation2 + $0xc8] sm:$0xff]   ;;  %v3904_v16 = vld [vmem:[%s5473_s2 + $0x124] ss:$20 sps:$4 sm:$0xff]  }
  0xc6   :  { %3347 = vmatpush3.bf16.msra.mxu0 %v4215_v30  ;;  %v3848_v30 = vld [vmem:[%s5472_s1 + $0xd0] ss:$20 sps:$4 sm:$0xff]  }
  0xc7   :  { %3660 = vmatprep.subr.bf16.mxu0 %v4235_v36 }
  0xc8   :  { %1385 = vmatmul.mubr.bf16.gmra.mrb[64].mxu0 %v3843_v18 }
  0xc9   :  { %3645 = vmatmul.mubr.msk.bf16.vlgmr.msra.gmra.mrb[64].mxu1 %vm591_vm0, %v3844_v20  ;;  %1392 = vmatprep.mubr.bf16.mxu0 %v3845_v22 }
  0xca   :  { %3397 = vmatpush3.bf16.msra.mxu1 %v4516_v26  ;;  %3648 = vmatprep.mubr.msk.bf16.mxu1 %vm591_vm0, %v3847_v24  ;;  %v3906_v24 = vld [vmem:[%s5473_s2 + $0x118] ss:$20 sps:$4 sm:$0xff]  }
  0xcb   :  { %3398 = vmatprep.subr.bf16.mxu1 %v4520_v28 }
  0xce   :  { %3399 = vmatpush3.bf16.msra.mxu1 %v4532_v63 }
  0xcf   :  { %3400 = vmatprep.subr.bf16.mxu1 %v4152_v9  ;;  %v3855_v9 = vld [vmem:[%s5472_s1 + $0x124] ss:$20 sps:$4 sm:$0xff]  }
  0xd0   :  { %1393 = vmatmul.mubr.bf16.gmra.mrb[68].mxu0 %v3848_v30 }
  0xd1   :  { %3649 = vmatmul.mubr.msk.bf16.gmra.mrb[68].mxu1 %vm591_vm0, %v3849_v61  ;;  %1400 = vmatprep.mubr.bf16.mxu0 %v3850_v62 }
  0xd2   :  { %3401 = vmatpush3.bf16.msra.mxu1 %v4158_v11  ;;  %3652 = vmatprep.mubr.msk.bf16.mxu1 %vm591_vm0, %v3852_v32  ;;  %v3857_v11 = vld [vmem:[%s5472_s1 + $0x100] ss:$20 sps:$4 sm:$0xff]  }
  0xd3   :  { %3402 = vmatprep.subr.bf16.mxu1 %v4164_v13  ;;  %v3858_v13 = vld [vmem:[%s5472_s1 + $0x120] ss:$20 sps:$4 sm:$0xff]  }
  0xd4   :  { %v3907_v32 = vld [vmem:[%s5473_s2 + $0x120] ss:$20 sps:$4 sm:$0xff]  }
  0xd6   :  { %3403 = vmatpush3.bf16.msra.mxu1 %v4170_v15  ;;  %v3859_v15 = vld [vmem:[%s5472_s1 + $0x128] ss:$20 sps:$4 sm:$0xff]  }
  0xd7   :  { %3404 = vmatprep.subr.bf16.mxu1 %v4176_v17  ;;  %v3862_v17 = vld [vmem:[%s5473_s2 + $0x4] ss:$20 sps:$4 sm:$0xff]  }
  0xd8   :  { %1401 = vmatmul.mubr.bf16.gmra.mrb[72].mxu0 %v3853_v33  ;;  %v3908_v33 = vld [vmem:[%s5473_s2 + $0x10] ss:$20 sps:$4 sm:$0xff]  }
  0xd9   :  { %3653 = vmatmul.mubr.msk.bf16.gmra.mrb[72].mxu1 %vm591_vm0, %v3854_v34  ;;  %1408 = vmatprep.mubr.bf16.mxu0 %v3855_v9 }
  0xda   :  { %3405 = vmatpush3.bf16.msra.mxu1 %v4182_v19  ;;  %3656 = vmatprep.mubr.msk.bf16.mxu1 %vm591_vm0, %v3857_v11  ;;  %v3865_v19 = vld [vmem:[%s5473_s2 + $0xc] ss:$20 sps:$4 sm:$0xff]  }
  0xdb   :  { %3406 = vmatprep.subr.bf16.mxu1 %v4188_v21  ;;  %v3860_v21 = vld [vmem:[%s5473_s2] ss:$20 sps:$4 sm:$0xff]  }
  0xde   :  { %3407 = vmatpush3.bf16.msra.mxu1 %v4194_v23  ;;  %v3863_v23 = vld [vmem:[%s5473_s2 + $0x8] ss:$20 sps:$4 sm:$0xff]  }
  0xdf   :  { %3408 = vmatprep.subr.bf16.mxu1 %v4200_v25  ;;  %v3866_v25 = vld [vmem:[%s5473_s2 + $0x2c] ss:$20 sps:$4 sm:$0xff]  }
  0xe0   :  { %1409 = vmatmul.mubr.bf16.gmra.mrb[76].mxu0 %v3858_v13  ;;  %v3911_v13 = vld [vmem:[%s5474_s3 + $0x4] ss:$20 sps:$4 sm:$0xff]  }
  0xe1   :  { %3657 = vmatmul.mubr.msk.bf16.gmra.mrb[76].mxu1 %vm591_vm0, %v3859_v15  ;;  %1866 = vmatprep.mubr.bf16.mxu0 %v3862_v17 }
  0xe2   :  { %3409 = vmatpush3.bf16.msra.mxu1 %v4206_v27  ;;  %1963 = vmatprep.mubr.bf16.mxu1 %v3865_v19  ;;  %v3868_v27 = vld [vmem:[%s5473_s2 + $0x34] ss:$20 sps:$4 sm:$0xff]  }
  0xe3   :  { %3410 = vmatprep.subr.bf16.mxu1 %v4212_v29  ;;  %v3976_v29 = vld [vmem:[#allocation2] sm:$0xff]  }
  0xe6   :  { %3411 = vmatpush3.bf16.msra.mxu1 %v4218_v31  ;;  %v3870_v31 = vld [vmem:[%s5473_s2 + $0x28] ss:$20 sps:$4 sm:$0xff]  }
  0xe7   :  { %3472 = vmatprep.subr.bf16.mxu1 %v3975_v35 }
  0xe8   :  { %1867 = vmatmul.mubr.bf16.vlgmr.msra.gmra.mrb[80].mxu0 %v3860_v21 }
  0xe9   :  { %1964 = vmatmul.mubr.bf16.vlgmr.msra.gmra.mrb[80].mxu1 %v3863_v23  ;;  %3661 = vmatpush3.bf16.msra.mxu0 %v4235_v36 }
  0xea   :  { %3473 = vmatpush3.bf16.msra.mxu1 %v3976_v29  ;;  %1874 = vmatprep.mubr.bf16.mxu0 %v3866_v25  ;;  %v3912_v29 = vld [vmem:[%s5473_s2 + $0x38] ss:$20 sps:$4 sm:$0xff]  }
  0xeb   :  { %1971 = vmatprep.mubr.bf16.mxu1 %v3868_v27  ;;  %3474 = vmatprep.subr.bf16.mxu1 %v3977_v37 }
  0xec   :  { %3662 = vmatprep.subr.bf16.mxu0 %v4256_v42 }
  0xed   :  { %3663 = vmatpush3.bf16.msra.mxu0 %v4256_v42  ;;  %v3876_v42 = vld [vmem:[%s5473_s2 + $0x50] ss:$20 sps:$4 sm:$0xff]  }
  0xee   :  { %3475 = vmatpush3.bf16.msra.mxu1 %v3978_v40  ;;  %3664 = vmatprep.subr.bf16.mxu0 %v4273_v46 }
  0xef   :  { %3476 = vmatprep.subr.bf16.mxu1 %v3979_v43 }
  0xf0   :  { %1875 = vmatmul.mubr.bf16.gmra.mrb[84].mxu0 %v3870_v31 }
  0xf1   :  { %1972 = vmatmul.mubr.bf16.gmra.mrb[84].mxu1 %v3871_v38  ;;  %1882 = vmatprep.mubr.bf16.mxu0 %v3872_v39  ;;  %v3909_v39 = vld [vmem:[%s5474_s3] ss:$20 sps:$4 sm:$0xff]  }
  0xf2   :  { %1979 = vmatprep.mubr.bf16.mxu1 %v3874_v41  ;;  %3477 = vmatpush3.bf16.msra.mxu1 %v3980_v44 }
  0xf3   :  { %3478 = vmatprep.subr.bf16.mxu1 %v3981_v45  ;;  %3665 = vmatpush3.bf16.msra.mxu0 %v4273_v46  ;;  %v3983_v46 = vld [vmem:[#allocation2 + $0x60] sm:$0xff]  }
  0xf4   :  { %3666 = vmatprep.subr.bf16.mxu0 %v4285_v49 }
  0xf6   :  { %3479 = vmatpush3.bf16.msra.mxu1 %v3982_v47  ;;  %v3992_v47 = vld [vmem:[#allocation2 + $0x100] sm:$0xff]  }
  0xf7   :  { %3480 = vmatprep.subr.bf16.mxu1 %v3983_v46  ;;  %3667 = vmatpush3.bf16.msra.mxu0 %v4285_v49  ;;  %v3884_v49 = vld [vmem:[%s5473_s2 + $0xa4] ss:$20 sps:$4 sm:$0xff]  }
  0xf8   :  { %1883 = vmatmul.mubr.bf16.gmra.mrb[88].mxu0 %v3876_v42  ;;  %3536 = vmatprep.subr.bf16.mxu0 %v3984_v48  ;;  %v3913_v42 = vld [vmem:[%s5473_s2 + $0x60] ss:$20 sps:$4 sm:$0xff]  }
  0xf9   :  { %1980 = vmatmul.mubr.bf16.gmra.mrb[88].mxu1 %v3877_v3  ;;  %1890 = vmatprep.mubr.bf16.mxu0 %v3878_v5  ;;  %v3914_v3 = vld [vmem:[%s5474_s3 + $0x2c] ss:$20 sps:$4 sm:$0xff]  }
  0xfa   :  { %1987 = vmatprep.mubr.bf16.mxu1 %v3880_v7  ;;  %3481 = vmatpush3.bf16.msra.mxu1 %v3985_v50 }
  0xfb   :  { %3482 = vmatprep.subr.bf16.mxu1 %v3986_v51 }
  0xfe   :  { %3483 = vmatpush3.bf16.msra.mxu1 %v3987_v54 }
  0xff   :  { %3484 = vmatprep.subr.bf16.mxu1 %v3988_v55 }
 0x100   :  { %1891 = vmatmul.mubr.bf16.gmra.mrb[92].mxu0 %v3882_v52  ;;  %v3916_v52 = vld [vmem:[%s5473_s2 + $0x88] ss:$20 sps:$4 sm:$0xff]  }
 0x101   :  { %1988 = vmatmul.mubr.bf16.gmra.mrb[92].mxu1 %v3883_v1  ;;  %1898 = vmatprep.mubr.bf16.mxu0 %v3884_v49  ;;  %v3993_v1 = vld [vmem:[#allocation2 + $0x108] sm:$0xff]  }
 0x102   :  { %1995 = vmatprep.mubr.bf16.mxu1 %v3886_v53  ;;  %3485 = vmatpush3.bf16.msra.mxu1 %v3989_v56 }
 0x103   :  { %3486 = vmatprep.subr.bf16.mxu1 %v3990_v57  ;;  %v3994_v57 = vld [vmem:[#allocation2 + $0xd0] sm:$0xff]  }
 0x106   :  { %3487 = vmatpush3.bf16.msra.mxu1 %v3991_v4 }
 0x107   :  { %3684 = vmatprep.subr.bf16.mxu1 %v4235_v36  ;;  %v3898_v36 = vld [vmem:[%s5473_s2 + $0xfc] ss:$20 sps:$4 sm:$0xff]  }
 0x108   :  { %1899 = vmatmul.mubr.bf16.gmra.mrb[96].mxu0 %v3888_v58  ;;  %v3918_v58 = vld [vmem:[%s5473_s2 + $0xb0] ss:$20 sps:$4 sm:$0xff]  }
 0x109   :  { %1996 = vmatmul.mubr.bf16.gmra.mrb[96].mxu1 %v3889_v0  ;;  %1906 = vmatprep.mubr.bf16.mxu0 %v3890_v59 }
 0x10a   :  { %2003 = vmatprep.mubr.bf16.mxu1 %v3892_v2  ;;  %v3995_v2 = vld [vmem:[#allocation2 + $0x110] sm:$0xff]  }
 0x110   :  { %1907 = vmatmul.mubr.bf16.gmra.mrb[100].mxu0 %v3894_v6 }
 0x111   :  { %2004 = vmatmul.mubr.bf16.gmra.mrb[100].mxu1 %v3895_v8  ;;  %1914 = vmatprep.mubr.bf16.mxu0 %v3896_v60  ;;  %v3996_v8 = vld [vmem:[#allocation2 + $0x90] sm:$0xff]   ;;  %v3997_v60 = vld [vmem:[#allocation2 + $0xd8] sm:$0xff]  }
 0x112   :  { %2011 = vmatprep.mubr.bf16.mxu1 %v3898_v36 }
 0x118   :  { %1915 = vmatmul.mubr.bf16.gmra.mrb[104].mxu0 %v3900_v10 }
 0x119   :  { %2012 = vmatmul.mubr.bf16.gmra.mrb[104].mxu1 %v3901_v12  ;;  %1922 = vmatprep.mubr.bf16.mxu0 %v3902_v14 }
 0x11a   :  { %2019 = vmatprep.mubr.bf16.mxu1 %v3904_v16  ;;  %v3921_v16 = vld [vmem:[%s5473_s2 + $0xd8] ss:$20 sps:$4 sm:$0xff]  }
 0x11b   :  { %v3068_v18 = vpop.f32.mrb[0].mxu0 }
 0x11c   :  { %v3132_v20 = vpop.f32.mrb[0].mxu1  ;;  %v3069_v22 = vpop.f32.mrb[1].mxu0 }
 0x11d   :  { %v3070_v30 = vadd.f32 %v3069_v22, %v3068_v18  ;;  %v3133_v61 = vpop.f32.mrb[1].mxu1  ;;  %v3071_v62 = vpop.f32.mrb[2].mxu0  ;;  %v3998_v18 = vld [vmem:[#allocation2 + $0x118] sm:$0xff]  }
 0x11e   :  { %v3134_v34 = vadd.f32 %v3133_v61, %v3132_v20  ;;  %v3135_v9 = vpop.f32.mrb[2].mxu1  ;;  %v3072_v11 = vpop.f32.mrb[3].mxu0  ;;  %v3922_v61 = vld [vmem:[%s5474_s3 + $0x50] ss:$20 sps:$4 sm:$0xff]  }
 0x11f   :  { %v3073_v15 = vadd.f32 %v3072_v11, %v3071_v62  ;;  %v3136_v17 = vpop.f32.mrb[3].mxu1 }
 0x120   :  { %v3137_v19 = vadd.f32 %v3136_v17, %v3135_v9  ;;  %1923 = vmatmul.mubr.bf16.gmra.mrb[108].mxu0 %v3906_v24  ;;  %v4683_v21 = vadd.f32 %v3134_v34, %v3070_v30  ;;  %v3999_v30 = vld [vmem:[#allocation2 + $0x98] sm:$0xff]   ;;  %v4000_v34 = vld [vmem:[#allocation2 + $0xe0] sm:$0xff]  }
 0x121   :  { %2020 = vmatmul.mubr.bf16.gmra.mrb[108].mxu1 %v3907_v32  ;;  %3668 = vmatprep.mubr.msk.bf16.mxu0 %vm591_vm0, %v3908_v33  ;;  %v3923_v9 = vld [vmem:[%s5473_s2 + $0x100] ss:$20 sps:$4 sm:$0xff]  }
 0x122   :  { %2477 = vmatprep.mubr.bf16.mxu1 %v3911_v13  ;;  %v4686_v23 = vadd.f32 %v3137_v19, %v3073_v15  ;;  %v3924_v15 = vld [vmem:[%s5474_s3 + $0x7c] ss:$20 sps:$4 sm:$0xff]  }
 0x123   :  { %v3074_v25 = vpop.f32.mrb[4].mxu0 }
 0x124   :  { %v3138_v35 = vpop.f32.mrb[4].mxu1  ;;  %v3075_v27 = vpop.f32.mrb[5].mxu0 }
 0x125   :  { %v3076_v37 = vadd.f32 %v3075_v27, %v3074_v25  ;;  %v3139_v31 = vpop.f32.mrb[5].mxu1  ;;  %v3077_v38 = vpop.f32.mrb[6].mxu0  ;;  %v4001_v25 = vld [vmem:[#allocation2 + $0xa0] sm:$0xff]  }
 0x126   :  { %v3140_v40 = vadd.f32 %v3139_v31, %v3138_v35  ;;  %v3141_v41 = vpop.f32.mrb[6].mxu1  ;;  %v3078_v43 = vpop.f32.mrb[7].mxu0  ;;  %v4002_v35 = vld [vmem:[#allocation2 + $0xe8] sm:$0xff]  }
 0x127   :  { %v3079_v44 = vadd.f32 %v3078_v43, %v3077_v38  ;;  %v3142_v45 = vpop.f32.mrb[7].mxu1  ;;  %v3926_v38 = vld [vmem:[%s5473_s2 + $0x128] ss:$20 sps:$4 sm:$0xff]  }
 0x128   :  { %v3143_v5 = vadd.f32 %v3142_v45, %v3141_v41  ;;  %3669 = vmatmul.mubr.msk.bf16.vlgmr.msra.gmra.mrb[112].mxu0 %vm591_vm0, %v3912_v29  ;;  %v4701_v7 = vadd.f32 %v3140_v40, %v3076_v37  ;;  %v4003_v43 = vld [vmem:[#allocation2 + $0xa8] sm:$0xff]  }
 0x129   :  { %2478 = vmatmul.mubr.bf16.vlgmr.msra.gmra.mrb[112].mxu1 %v3909_v39  ;;  %3537 = vmatpush3.bf16.msra.mxu0 %v4516_v26 }
 0x12a   :  { %3538 = vmatprep.subr.bf16.mxu0 %v4520_v28  ;;  %3685 = vmatpush3.bf16.msra.mxu1 %v3992_v47  ;;  %v4705_v46 = vadd.f32 %v3143_v5, %v3079_v44  ;;  %v3917_v28 = vld [vmem:[%s5474_s3 + $0x28] ss:$20 sps:$4 sm:$0xff]   ;;  %v3927_v44 = vld [vmem:[%s5474_s3 + $0x78] ss:$20 sps:$4 sm:$0xff]   ;;  %v4004_v5 = vld [vmem:[#allocation2 + $0xf0] sm:$0xff]  }
 0x12b   :  { %v3080_v48 = vpop.f32.mrb[8].mxu0  ;;  %3672 = vmatprep.mubr.msk.bf16.mxu0 %vm591_vm0, %v3913_v42  ;;  %2485 = vmatprep.mubr.bf16.mxu1 %v3914_v3  ;;  %v3928_v47 = vld [vmem:[%s5474_s3 + $0xa4] ss:$20 sps:$4 sm:$0xff]  }
 0x12c   :  { %v3144_v50 = vpop.f32.mrb[8].mxu1  ;;  %v3081_v51 = vpop.f32.mrb[9].mxu0  ;;  %3686 = vmatprep.subr.bf16.mxu1 %v3993_v1 }
 0x12d   :  { %v3082_v49 = vadd.f32 %v3081_v51, %v3080_v48  ;;  %v3145_v26 = vpop.f32.mrb[9].mxu1  ;;  %v3083_v53 = vpop.f32.mrb[10].mxu0  ;;  %3539 = vmatpush3.bf16.msra.mxu0 %v4532_v63  ;;  %v3919_v63 = vld [vmem:[%s5474_s3 + $0x54] ss:$20 sps:$4 sm:$0xff]   ;;  %v3932_v51 = vld [vmem:[%s5474_s3 + $0xc] ss:$20 sps:$4 sm:$0xff]  }
 0x12e   :  { %v3146_v54 = vadd.f32 %v3145_v26, %v3144_v50  ;;  %v3147_v55 = vpop.f32.mrb[10].mxu1  ;;  %v3084_v56 = vpop.f32.mrb[11].mxu0  ;;  %3540 = vmatprep.subr.bf16.mxu0 %v3994_v57  ;;  %3687 = vmatpush3.bf16.msra.mxu1 %v3993_v1  ;;  %v4006_v26 = vld [vmem:[#allocation2 + $0xf8] sm:$0xff]  }
 0x12f   :  { %v3085_v0 = vadd.f32 %v3084_v56, %v3083_v53  ;;  %v3148_v59 = vpop.f32.mrb[11].mxu1  ;;  %3688 = vmatprep.subr.bf16.mxu1 %v3995_v2  ;;  %v3930_v56 = vld [vmem:[%s5474_s3 + $0x8] ss:$20 sps:$4 sm:$0xff]  }
 0x130   :  { %v3149_v4 = vadd.f32 %v3148_v59, %v3147_v55  ;;  %3673 = vmatmul.mubr.msk.bf16.gmra.mrb[116].mxu0 %vm591_vm0, %v3916_v52  ;;  %v4722_v6 = vadd.f32 %v3146_v54, %v3082_v49  ;;  %v4005_v49 = vld [vmem:[#allocation2 + $0xb0] sm:$0xff]   ;;  %v4007_v59 = vld [vmem:[#allocation2 + $0xb8] sm:$0xff]  }
 0x131   :  { %2486 = vmatmul.mubr.bf16.gmra.mrb[116].mxu1 %v3917_v28  ;;  %3541 = vmatpush3.bf16.msra.mxu0 %v3996_v8 }
 0x132   :  { %3542 = vmatprep.subr.bf16.mxu0 %v3997_v60  ;;  %3676 = vmatprep.mubr.msk.bf16.mxu0 %vm591_vm0, %v3918_v58  ;;  %v4725_v36 = vadd.f32 %v3149_v4, %v3085_v0 }
 0x133   :  { %v3086_v10 = vpop.f32.mrb[12].mxu0  ;;  %2493 = vmatprep.mubr.bf16.mxu1 %v3919_v63  ;;  %3689 = vmatpush3.bf16.msra.mxu1 %v3995_v2  ;;  %v3933_v63 = vld [vmem:[%s5474_s3 + $0xa0] ss:$20 sps:$4 sm:$0xff]  }
 0x134   :  { %v3150_v12 = vpop.f32.mrb[12].mxu1  ;;  %v3087_v14 = vpop.f32.mrb[13].mxu0  ;;  %3690 = vmatprep.subr.bf16.mxu1 %v3998_v18  ;;  %v3936_v2 = vld [vmem:[%s5474_s3 + $0x34] ss:$20 sps:$4 sm:$0xff]  }
 0x135   :  { %v3088_v20 = vadd.f32 %v3087_v14, %v3086_v10  ;;  %v3151_v22 = vpop.f32.mrb[13].mxu1  ;;  %v3089_v24 = vpop.f32.mrb[14].mxu0  ;;  %3543 = vmatpush3.bf16.msra.mxu0 %v3999_v30  ;;  %v3934_v10 = vld [vmem:[%s5474_s3 + $0xcc] ss:$20 sps:$4 sm:$0xff]  }
 0x136   :  { %v3152_v62 = vadd.f32 %v3151_v22, %v3150_v12  ;;  %v3153_v32 = vpop.f32.mrb[14].mxu1  ;;  %v3090_v33 = vpop.f32.mrb[15].mxu0  ;;  %3544 = vmatprep.subr.bf16.mxu0 %v4000_v34  ;;  %v3938_v34 = vld [vmem:[%s5474_s3 + $0xc8] ss:$20 sps:$4 sm:$0xff]  }
 0x137   :  { %v3091_v11 = vadd.f32 %v3090_v33, %v3089_v24  ;;  %v3154_v13 = vpop.f32.mrb[15].mxu1  ;;  %3691 = vmatpush3.bf16.msra.mxu1 %v3998_v18 }
 0x138   :  { %v3155_v17 = vadd.f32 %v3154_v13, %v3153_v32  ;;  %3677 = vmatmul.mubr.msk.bf16.gmra.mrb[120].mxu0 %vm591_vm0, %v3921_v16  ;;  %v4740_v19 = vadd.f32 %v3152_v62, %v3088_v20 }
 0x139   :  { %2494 = vmatmul.mubr.bf16.gmra.mrb[120].mxu1 %v3922_v61  ;;  %3545 = vmatpush3.bf16.msra.mxu0 %v4001_v25  ;;  %v3939_v61 = vld [vmem:[%s5474_s3 + $0x30] ss:$20 sps:$4 sm:$0xff]  }
 0x13a   :  { %3546 = vmatprep.subr.bf16.mxu0 %v4002_v35  ;;  %3680 = vmatprep.mubr.msk.bf16.mxu0 %vm591_vm0, %v3923_v9  ;;  %v4743_v27 = vadd.f32 %v3155_v17, %v3091_v11  ;;  %v3942_v9 = vld [vmem:[%s5474_s3 + $0x5c] ss:$20 sps:$4 sm:$0xff]   ;;  %v3940_v17 = vld [vmem:[%s5474_s3 + $0xf4] ss:$20 sps:$4 sm:$0xff]  }
 0x13b   :  { %v3092_v29 = vpop.f32.mrb[16].mxu0  ;;  %2501 = vmatprep.mubr.bf16.mxu1 %v3924_v15 }
 0x13c   :  { %v3156_v37 = vpop.f32.mrb[16].mxu1  ;;  %v3093_v31 = vpop.f32.mrb[17].mxu0 }
 0x13d   :  { %v3094_v39 = vadd.f32 %v3093_v31, %v3092_v29  ;;  %v3157_v40 = vpop.f32.mrb[17].mxu1  ;;  %v3095_v41 = vpop.f32.mrb[18].mxu0  ;;  %3547 = vmatpush3.bf16.msra.mxu0 %v4003_v43 }
 0x13e   :  { %v3158_v45 = vadd.f32 %v3157_v40, %v3156_v37  ;;  %v3159_v42 = vpop.f32.mrb[18].mxu1  ;;  %v3096_v3 = vpop.f32.mrb[19].mxu0  ;;  %3548 = vmatprep.subr.bf16.mxu0 %v4004_v5 }
 0x13f   :  { %v3097_v48 = vadd.f32 %v3096_v3, %v3095_v41  ;;  %v3160_v50 = vpop.f32.mrb[19].mxu1  ;;  %v3945_v41 = vld [vmem:[%s5474_s3 + $0x58] ss:$20 sps:$4 sm:$0xff]  }
 0x140   :  { %v3161_v52 = vadd.f32 %v3160_v50, %v3159_v42  ;;  %3681 = vmatmul.mubr.msk.bf16.gmra.mrb[124].mxu0 %vm591_vm0, %v3926_v38  ;;  %v4758_v1 = vadd.f32 %v3158_v45, %v3094_v39  ;;  %v3944_v42 = vld [vmem:[%s5474_s3 + $0xf0] ss:$20 sps:$4 sm:$0xff]  }
 0x141   :  { %2502 = vmatmul.mubr.bf16.gmra.mrb[124].mxu1 %v3927_v44  ;;  %3549 = vmatpush3.bf16.msra.mxu0 %v4005_v49  ;;  %v3948_v3 = vld [vmem:[%s5474_s3 + $0x84] ss:$20 sps:$4 sm:$0xff]   ;;  %v3946_v50 = vld [vmem:[%s5474_s3 + $0x11c] ss:$20 sps:$4 sm:$0xff]  }
 0x142   :  { %3550 = vmatprep.subr.bf16.mxu0 %v4006_v26  ;;  %2509 = vmatprep.mubr.bf16.mxu1 %v3928_v47  ;;  %v4760_v53 = vadd.f32 %v3161_v52, %v3097_v48 }
 0x143   :  { %v3098_v28 = vpop.f32.mrb[20].mxu0  ;;  %2574 = vmatprep.mubr.bf16.mxu0 %v3932_v51 }
 0x144   :  { %v3162_v54 = vpop.f32.mrb[20].mxu1  ;;  %v3099_v55 = vpop.f32.mrb[21].mxu0 }
 0x145   :  { %v3100_v57 = vadd.f32 %v3099_v55, %v3098_v28  ;;  %v3163_v58 = vpop.f32.mrb[21].mxu1  ;;  %v3101_v0 = vpop.f32.mrb[22].mxu0  ;;  %3551 = vmatpush3.bf16.msra.mxu0 %v4007_v59 }
 0x146   :  { %v3164_v4 = vadd.f32 %v3163_v58, %v3162_v54  ;;  %v3165_v8 = vpop.f32.mrb[22].mxu1  ;;  %v3102_v60 = vpop.f32.mrb[23].mxu0  ;;  %v3951_v58 = vld [vmem:[%s5474_s3 + $0x80] ss:$20 sps:$4 sm:$0xff]  }
 0x147   :  { %v3103_v12 = vadd.f32 %v3102_v60, %v3101_v0  ;;  %v3166_v14 = vpop.f32.mrb[23].mxu1 }
 0x148   :  { %v3167_v16 = vadd.f32 %v3166_v14, %v3165_v8  ;;  %2575 = vmatmul.mubr.bf16.vlgmr.msra.gmra.mrb[128].mxu0 %v3930_v56  ;;  %v4774_v18 = vadd.f32 %v3164_v4, %v3100_v57 }
 0x149   :  { %2510 = vmatmul.mubr.bf16.gmra.mrb[128].mxu1 %v3933_v63  ;;  %2582 = vmatprep.mubr.bf16.mxu0 %v3936_v2  ;;  %v3950_v2 = vld [vmem:[%s5474_s3 + $0x118] ss:$20 sps:$4 sm:$0xff]  }
 0x14a   :  { %2517 = vmatprep.mubr.bf16.mxu1 %v3934_v10  ;;  %v4776_v20 = vadd.f32 %v3167_v16, %v3103_v12 }
 0x14b   :  { %v3104_v22 = vpop.f32.mrb[24].mxu0 }
 0x14c   :  { %v3168_v24 = vpop.f32.mrb[24].mxu1  ;;  %v3105_v30 = vpop.f32.mrb[25].mxu0 }
 0x14d   :  { %v3106_v62 = vadd.f32 %v3105_v30, %v3104_v22  ;;  %v3169_v32 = vpop.f32.mrb[25].mxu1  ;;  %v3107_v33 = vpop.f32.mrb[26].mxu0 }
 0x14e   :  { %v3170_v11 = vadd.f32 %v3169_v32, %v3168_v24  ;;  %v3171_v13 = vpop.f32.mrb[26].mxu1  ;;  %v3108_v15 = vpop.f32.mrb[27].mxu0 }
 0x14f   :  { %v3109_v25 = vadd.f32 %v3108_v15, %v3107_v33  ;;  %v3172_v35 = vpop.f32.mrb[27].mxu1  ;;  %v3956_v33 = vld [vmem:[%s5474_s3 + $0x38] ss:$20 sps:$4 sm:$0xff]  }
 0x150   :  { %v3173_v29 = vadd.f32 %v3172_v35, %v3171_v13  ;;  %2583 = vmatmul.mubr.bf16.gmra.mrb[132].mxu0 %v3939_v61  ;;  %v4790_v37 = vadd.f32 %v3170_v11, %v3106_v62  ;;  %v3955_v61 = vld [vmem:[%s5474_s3 + $0xa8] ss:$20 sps:$4 sm:$0xff]  }
 0x151   :  { %2518 = vmatmul.mubr.bf16.gmra.mrb[132].mxu1 %v3938_v34  ;;  %2590 = vmatprep.mubr.bf16.mxu0 %v3942_v9 }
 0x152   :  { %2525 = vmatprep.mubr.bf16.mxu1 %v3940_v17  ;;  %v4792_v31 = vadd.f32 %v3173_v29, %v3109_v25 }
 0x153   :  { %v3110_v38 = vpop.f32.mrb[28].mxu0 }
 0x154   :  { %v3174_v39 = vpop.f32.mrb[28].mxu1  ;;  %v3111_v40 = vpop.f32.mrb[29].mxu0 }
 0x155   :  { %v3112_v43 = vadd.f32 %v3111_v40, %v3110_v38  ;;  %v3175_v44 = vpop.f32.mrb[29].mxu1  ;;  %v3113_v45 = vpop.f32.mrb[30].mxu0 }
 0x156   :  { %v3176_v5 = vadd.f32 %v3175_v44, %v3174_v39  ;;  %v3177_v47 = vpop.f32.mrb[30].mxu1  ;;  %v3114_v48 = vpop.f32.mrb[31].mxu0 }
 0x157   :  { %v3115_v51 = vadd.f32 %v3114_v48, %v3113_v45  ;;  %v3178_v52 = vpop.f32.mrb[31].mxu1 }
 0x158   :  { %v3179_v49 = vadd.f32 %v3178_v52, %v3177_v47  ;;  %2591 = vmatmul.mubr.bf16.gmra.mrb[136].mxu0 %v3945_v41  ;;  %v4806_v26 = vadd.f32 %v3176_v5, %v3112_v43  ;;  %v3961_v43 = vld [vmem:[%s5474_s3 + $0x88] ss:$20 sps:$4 sm:$0xff]  }
 0x159   :  { %2526 = vmatmul.mubr.bf16.gmra.mrb[136].mxu1 %v3944_v42  ;;  %2598 = vmatprep.mubr.bf16.mxu0 %v3948_v3 }
 0x15a   :  { %2533 = vmatprep.mubr.bf16.mxu1 %v3946_v50  ;;  %v4808_v28 = vadd.f32 %v3179_v49, %v3115_v51 }
 0x15b   :  { %v3622_v54 = vpop.f32.mrb[32].mxu0 }
 0x15c   :  { %v4811_v55 = vadd.f32 %v3622_v54, %v4701_v7  ;;  %v844_v56 = vpop.f32.mrb[33].mxu0  ;;  %v3208_v57 = vpop.f32.mrb[32].mxu1  ;;  %v3952_v7 = vld [vmem:[%s5474_s3 + $0xac] ss:$20 sps:$4 sm:$0xff]  }
 0x15d   :  { %v4817_v0 = vadd.f32 %v844_v56, %v4683_v21  ;;  %v3623_v59 = vpop.f32.mrb[34].mxu0  ;;  %v3209_v63 = vpop.f32.mrb[33].mxu1  ;;  %v3954_v21 = vld [vmem:[%s5474_s3 + $0x10] ss:$20 sps:$4 sm:$0xff]  }
 0x15e   :  { %v4826_v4 = vadd.f32 %v3623_v59, %v4705_v46  ;;  %v847_v8 = vpop.f32.mrb[35].mxu0  ;;  %v4828_v60 = vadd.f32 %v3209_v63, %v3208_v57  ;;  %v3211_v10 = vpop.f32.mrb[34].mxu1  ;;  %v3966_v57 = vld [vmem:[%s5474_s3 + $0xd8] ss:$20 sps:$4 sm:$0xff]  }
 0x15f   :  { %v4834_v12 = vadd.f32 %v847_v8, %v4686_v23  ;;  %v3212_v14 = vpop.f32.mrb[35].mxu1 }
 0x160   :  { %v4836_v16 = vadd.f32 %v3212_v14, %v3211_v10  ;;  %2599 = vmatmul.mubr.bf16.gmra.mrb[140].mxu0 %v3951_v58 }
 0x161   :  { %2534 = vmatmul.mubr.bf16.gmra.mrb[140].mxu1 %v3950_v2  ;;  %2606 = vmatprep.mubr.bf16.mxu0 %v3952_v7 }
 0x162   :  { %3692 = vmatprep.mubr.msk.bf16.mxu1 %vm591_vm0, %v3954_v21 }
 0x163   :  { %v3626_v46 = vpop.f32.mrb[36].mxu0 }
 0x164   :  { %v4840_v22 = vadd.f32 %v3626_v46, %v4740_v19  ;;  %v860_v24 = vpop.f32.mrb[37].mxu0  ;;  %v3214_v30 = vpop.f32.mrb[36].mxu1  ;;  %v3957_v19 = vld [vmem:[%s5474_s3 + $0xd4] ss:$20 sps:$4 sm:$0xff]  }
 0x165   :  { %v4846_v23 = vadd.f32 %v860_v24, %v4722_v6  ;;  %v3627_v62 = vpop.f32.mrb[38].mxu0  ;;  %v3215_v32 = vpop.f32.mrb[37].mxu1  ;;  %v3959_v6 = vld [vmem:[%s5474_s3 + $0x60] ss:$20 sps:$4 sm:$0xff]  }
 0x166   :  { %v4855_v34 = vadd.f32 %v3627_v62, %v4743_v27  ;;  %v863_v9 = vpop.f32.mrb[39].mxu0  ;;  %v4857_v11 = vadd.f32 %v3215_v32, %v3214_v30  ;;  %v3217_v13 = vpop.f32.mrb[38].mxu1  ;;  %v3970_v46 = vld [vmem:[%s5474_s3 + $0x120] ss:$20 sps:$4 sm:$0xff]  }
 0x167   :  { %v4863_v15 = vadd.f32 %v863_v9, %v4725_v36  ;;  %v3218_v17 = vpop.f32.mrb[39].mxu1  ;;  %v3960_v36 = vld [vmem:[%s5474_s3 + $0xd0] ss:$20 sps:$4 sm:$0xff]  }
 0x168   :  { %v4865_v25 = vadd.f32 %v3218_v17, %v3217_v13  ;;  %2607 = vmatmul.mubr.bf16.gmra.mrb[144].mxu0 %v3955_v61  ;;  %v3971_v61 = vld [vmem:[%s5474_s3 + $0x128] ss:$20 sps:$4 sm:$0xff]  }
 0x169   :  { %3693 = vmatmul.mubr.msk.bf16.vlgmr.msra.gmra.mrb[144].mxu1 %vm591_vm0, %v3956_v33  ;;  %2614 = vmatprep.mubr.bf16.mxu0 %v3957_v19 }
 0x16a   :  { %3696 = vmatprep.mubr.msk.bf16.mxu1 %vm591_vm0, %v3959_v6 }
 0x16b   :  { %v3630_v27 = vpop.f32.mrb[40].mxu0 }
 0x16c   :  { %v4870_v35 = vadd.f32 %v3630_v27, %v4774_v18  ;;  %v876_v29 = vpop.f32.mrb[41].mxu0  ;;  %v3220_v38 = vpop.f32.mrb[40].mxu1  ;;  %v3962_v18 = vld [vmem:[%s5474_s3 + $0xfc] ss:$20 sps:$4 sm:$0xff]  }
 0x16d   :  { %v4876_v39 = vadd.f32 %v876_v29, %v4758_v1  ;;  %v3631_v40 = vpop.f32.mrb[42].mxu0  ;;  %v3221_v41 = vpop.f32.mrb[41].mxu1  ;;  %v3964_v1 = vld [vmem:[%s5474_s3 + $0xb0] ss:$20 sps:$4 sm:$0xff]  }
 0x16e   :  { %v4885_v44 = vadd.f32 %v3631_v40, %v4776_v20  ;;  %v879_v45 = vpop.f32.mrb[43].mxu0  ;;  %v4887_v42 = vadd.f32 %v3221_v41, %v3220_v38  ;;  %v3223_v3 = vpop.f32.mrb[42].mxu1 }
 0x16f   :  { %v4893_v5 = vadd.f32 %v879_v45, %v4760_v53  ;;  %v3224_v47 = vpop.f32.mrb[43].mxu1  ;;  %v3965_v53 = vld [vmem:[%s5474_s3 + $0xf8] ss:$20 sps:$4 sm:$0xff]  }
 0x170   :  { %v4895_v48 = vadd.f32 %v3224_v47, %v3223_v3  ;;  %2615 = vmatmul.mubr.bf16.gmra.mrb[148].mxu0 %v3960_v36 }
 0x171   :  { %3697 = vmatmul.mubr.msk.bf16.gmra.mrb[148].mxu1 %vm591_vm0, %v3961_v43  ;;  %2622 = vmatprep.mubr.bf16.mxu0 %v3962_v18 }
 0x172   :  { %3700 = vmatprep.mubr.msk.bf16.mxu1 %vm591_vm0, %v3964_v1 }
 0x173   :  { %v3634_v20 = vpop.f32.mrb[44].mxu0 }
 0x174   :  { %v4900_v50 = vadd.f32 %v3634_v20, %v4806_v26  ;;  %v892_v51 = vpop.f32.mrb[45].mxu0  ;;  %v3226_v52 = vpop.f32.mrb[44].mxu1  ;;  %v3967_v26 = vld [vmem:[%s5474_s3 + $0x124] ss:$20 sps:$4 sm:$0xff]  }
 0x175   :  { %v4906_v49 = vadd.f32 %v892_v51, %v4790_v37  ;;  %v3635_v54 = vpop.f32.mrb[46].mxu0  ;;  %v3227_v56 = vpop.f32.mrb[45].mxu1  ;;  %v3969_v37 = vld [vmem:[%s5474_s3 + $0x100] ss:$20 sps:$4 sm:$0xff]  }
 0x176   :  { %v4915_v58 = vadd.f32 %v3635_v54, %v4808_v28  ;;  %v895_v59 = vpop.f32.mrb[47].mxu0  ;;  %v4917_v63 = vadd.f32 %v3227_v56, %v3226_v52  ;;  %v3229_v2 = vpop.f32.mrb[46].mxu1 }
 0x177   :  { %v4923_v7 = vadd.f32 %v895_v59, %v4792_v31  ;;  %v3230_v8 = vpop.f32.mrb[47].mxu1 }
 0x178   :  { %v4925_v10 = vadd.f32 %v3230_v8, %v3229_v2  ;;  %2623 = vmatmul.mubr.bf16.gmra.mrb[152].mxu0 %v3965_v53 }
 0x179   :  { %3701 = vmatmul.mubr.msk.bf16.gmra.mrb[152].mxu1 %vm591_vm0, %v3966_v57  ;;  %2630 = vmatprep.mubr.bf16.mxu0 %v3967_v26 }
 0x17a   :  { %3704 = vmatprep.mubr.msk.bf16.mxu1 %vm591_vm0, %v3969_v37 }
 0x17b   :  { %v3272_v28 = vpop.f32.mrb[48].mxu0 }
 0x17c   :  { %v3273_v21 = vpop.f32.mrb[49].mxu0  ;;  %v3232_v14 = vpop.f32.mrb[48].mxu1 }
 0x17d   :  { %v3274_v24 = vadd.f32 %v3273_v21, %v3272_v28  ;;  %v3275_v30 = vpop.f32.mrb[50].mxu0  ;;  %v3233_v31 = vpop.f32.mrb[49].mxu1 }
 0x17e   :  { %v4935_v62 = vadd.f32 %v3233_v31, %v3232_v14  ;;  %v3276_v32 = vpop.f32.mrb[51].mxu0  ;;  %v3235_v33 = vpop.f32.mrb[50].mxu1 }
 0x17f   :  { %v3277_v19 = vadd.f32 %v3276_v32, %v3275_v30  ;;  %v3236_v9 = vpop.f32.mrb[51].mxu1  ;;  %v1355_v13 = vadd.f32 %v3274_v24, %v4828_v60 }
 0x180   :  { %v4938_v6 = vadd.f32 %v3236_v9, %v3235_v33  ;;  %2631 = vmatmul.mubr.bf16.gmra.mrb[156].mxu0 %v3970_v46 }
 0x181   :  { %3705 = vmatmul.mubr.msk.bf16.gmra.mrb[156].mxu1 %vm591_vm0, %v3971_v61  ;;  %v4942_v17 = vadd.f32 %v3277_v19, %v4836_v16 }
 0x183   :  { %v3278_v27 = vpop.f32.mrb[52].mxu0 }
 0x184   :  { %v3279_v29 = vpop.f32.mrb[53].mxu0  ;;  %v3238_v38 = vpop.f32.mrb[52].mxu1 }
 0x185   :  { %v3280_v36 = vadd.f32 %v3279_v29, %v3278_v27  ;;  %v3281_v40 = vpop.f32.mrb[54].mxu0  ;;  %v3239_v41 = vpop.f32.mrb[53].mxu1 }
 0x186   :  { %v4944_v43 = vadd.f32 %v3239_v41, %v3238_v38  ;;  %v3282_v18 = vpop.f32.mrb[55].mxu0  ;;  %v3241_v45 = vpop.f32.mrb[54].mxu1 }
 0x187   :  { %v3283_v3 = vadd.f32 %v3282_v18, %v3281_v40  ;;  %v3242_v60 = vpop.f32.mrb[55].mxu1  ;;  %v1363_v1 = vadd.f32 %v3280_v36, %v4857_v11 }
 0x188   :  { %v4947_v47 = vadd.f32 %v3242_v60, %v3241_v45 }
 0x189   :  { %v1366_v20 = vadd.f32 %v3283_v3, %v4865_v25 }
 0x18b   :  { %v3284_v16 = vpop.f32.mrb[56].mxu0 }
 0x18c   :  { %v3285_v51 = vpop.f32.mrb[57].mxu0  ;;  %v3244_v52 = vpop.f32.mrb[56].mxu1 }
 0x18d   :  { %v3286_v53 = vadd.f32 %v3285_v51, %v3284_v16  ;;  %v3287_v54 = vpop.f32.mrb[58].mxu0  ;;  %v3245_v56 = vpop.f32.mrb[57].mxu1 }
 0x18e   :  { %v4950_v57 = vadd.f32 %v3245_v56, %v3244_v52  ;;  %v3288_v26 = vpop.f32.mrb[59].mxu0  ;;  %v3247_v59 = vpop.f32.mrb[58].mxu1 }
 0x18f   :  { %v3289_v2 = vadd.f32 %v3288_v26, %v3287_v54  ;;  %v3248_v37 = vpop.f32.mrb[59].mxu1  ;;  %v4953_v8 = vadd.f32 %v3286_v53, %v4887_v42 }
 0x190   :  { %v4955_v11 = vadd.f32 %v3248_v37, %v3247_v59 }
 0x191   :  { %v4958_v28 = vadd.f32 %v3289_v2, %v4895_v48  ;;  %v4969_v48 = vld [vmem:[%s5476_s5] ss:$0 sm:$0xff] }
 0x192   :  { %v915_v40 = vmul.f32 %v4969_v48, %v4811_v55  ;;  %v916_v60 = vmul.f32 %v4969_v48, %v4826_v4  ;;  %v914_v26 = vmul.f32 %v4969_v48, %v4834_v12 }
 0x193   :  { %v3290_v25 = vpop.f32.mrb[60].mxu0 }
 0x194   :  { %v3291_v21 = vpop.f32.mrb[61].mxu0  ;;  %v3250_v14 = vpop.f32.mrb[60].mxu1 }
 0x195   :  { %v3292_v46 = vadd.f32 %v3291_v21, %v3290_v25  ;;  %v3293_v24 = vpop.f32.mrb[62].mxu0  ;;  %v3251_v30 = vpop.f32.mrb[61].mxu1 }
 0x196   :  { %v4960_v31 = vadd.f32 %v3251_v30, %v3250_v14  ;;  %v3294_v61 = vpop.f32.mrb[63].mxu0  ;;  %v3253_v32 = vpop.f32.mrb[62].mxu1 }
 0x197   :  { %v3295_v33 = vadd.f32 %v3294_v61, %v3293_v24  ;;  %v3254_v19 = vpop.f32.mrb[63].mxu1  ;;  %v1379_v42 = vadd.f32 %v3292_v46, %v4917_v63  ;;  %v4973_v63 = vld [vmem:[#allocation4] ss:$0 sm:$0xff] }
 0x198   :  { %v4963_v9 = vadd.f32 %v3254_v19, %v3253_v32  ;;  %v4988_v4 = vadd.f32 %v4973_v63, %v915_v40  ;;  %v919_v32 = vmul.f32 %v4969_v48, %v4840_v22  ;;  %v917_v40 = vmul.f32 %v4969_v48, %v4846_v23 }
 0x199   :  { %v1382_v27 = vadd.f32 %v3295_v33, %v4925_v10  ;;  %v913_v10 = vmul.f32 %v4969_v48, %v4817_v0  ;;  %v918_v23 = vmul.f32 %v4969_v48, %v4863_v15 }
 0x19b   :  { %v3296_v29 = vpop.f32.mrb[64].mxu0 }
 0x19c   :  { %v3646_v38 = vpop.f32.mrb[64].mxu1  ;;  %v3297_v36 = vpop.f32.mrb[65].mxu0 }
 0x19d   :  { %v1460_v41 = vadd.f32 %v3646_v38, %v1363_v1  ;;  %v3298_v18 = vadd.f32 %v3297_v36, %v3296_v29  ;;  %v1451_v45 = vpop.f32.mrb[65].mxu1  ;;  %v3299_v3 = vpop.f32.mrb[66].mxu0 }
 0x19e   :  { %v1452_v16 = vadd.f32 %v1451_v45, %v1355_v13  ;;  %v3647_v51 = vpop.f32.mrb[66].mxu1  ;;  %v3300_v52 = vpop.f32.mrb[67].mxu0 }
 0x19f   :  { %v1516_v53 = vmul.f32 %v4969_v48, %v1460_v41  ;;  %v1463_v54 = vadd.f32 %v3647_v51, %v1366_v20  ;;  %v3301_v56 = vadd.f32 %v3300_v52, %v3299_v3  ;;  %v1454_v55 = vpop.f32.mrb[67].mxu1  ;;  %v4981_v1 = vadd.f32 %v3298_v18, %v4935_v62 }
 0x1a0   :  { %v1514_v59 = vmul.f32 %v4969_v48, %v1452_v16  ;;  %v1455_v0 = vadd.f32 %v1454_v55, %v4942_v17  ;;  %v4998_v62 = vadd.f32 %v4973_v63, %v913_v10  ;;  %v5005_v17 = vadd.f32 %v4973_v63, %v916_v60 }
 0x1a1   :  { %v4991_v13 = vadd.f32 %v4973_v63, %v1516_v53  ;;  %v1517_v20 = vmul.f32 %v4969_v48, %v1463_v54  ;;  %v4995_v2 = vadd.f32 %v3301_v56, %v4938_v6  ;;  %v5013_v6 = vadd.f32 %v4973_v63, %v914_v26 }
 0x1a2   :  { %v5001_v12 = vadd.f32 %v4973_v63, %v1514_v59  ;;  %v1515_v37 = vmul.f32 %v4969_v48, %v1455_v0  ;;  %v920_v41 = vmul.f32 %v4969_v48, %v4855_v34  ;;  %v5038_v53 = vadd.f32 %v4973_v63, %v919_v32 }
 0x1a3   :  { %v5010_v21 = vadd.f32 %v4973_v63, %v1517_v20  ;;  %v3302_v14 = vpop.f32.mrb[68].mxu0  ;;  %v5046_v56 = vadd.f32 %v4973_v63, %v917_v40  ;;  %v924_v40 = vmul.f32 %v4969_v48, %v4885_v44 }
 0x1a4   :  { %v5018_v24 = vadd.f32 %v4973_v63, %v1515_v37  ;;  %v3650_v30 = vpop.f32.mrb[68].mxu1  ;;  %v3303_v61 = vpop.f32.mrb[69].mxu0 }
 0x1a5   :  { %v1476_v19 = vadd.f32 %v3650_v30, %v1379_v42  ;;  %v3304_v29 = vadd.f32 %v3303_v61, %v3302_v14  ;;  %v1467_v38 = vpop.f32.mrb[69].mxu1  ;;  %v3305_v36 = vpop.f32.mrb[70].mxu0  ;;  %v923_v30 = vmul.f32 %v4969_v48, %v4870_v35 }
 0x1a6   :  { %v1468_v45 = vadd.f32 %v1467_v38, %v4953_v8  ;;  %v3651_v3 = vpop.f32.mrb[70].mxu1  ;;  %v3306_v22 = vpop.f32.mrb[71].mxu0 }
 0x1a7   :  { %v1520_v10 = vmul.f32 %v4969_v48, %v1476_v19  ;;  %v1479_v60 = vadd.f32 %v3651_v3, %v1382_v27  ;;  %v3307_v42 = vadd.f32 %v3306_v22, %v3305_v36  ;;  %v1470_v16 = vpop.f32.mrb[71].mxu1  ;;  %v1395_v51 = vadd.f32 %v3304_v29, %v4944_v43 }
 0x1a8   :  { %v1518_v52 = vmul.f32 %v4969_v48, %v1468_v45  ;;  %v1471_v34 = vadd.f32 %v1470_v16, %v4958_v28  ;;  %v5053_v28 = vadd.f32 %v4973_v63, %v920_v41  ;;  %v921_v36 = vmul.f32 %v4969_v48, %v4876_v39 }
 0x1a9   :  { %v5041_v8 = vadd.f32 %v4973_v63, %v1520_v10  ;;  %v1521_v54 = vmul.f32 %v4969_v48, %v1479_v60  ;;  %v1398_v27 = vadd.f32 %v3307_v42, %v4947_v47  ;;  %v5061_v47 = vadd.f32 %v4973_v63, %v918_v23 }
 0x1aa   :  { %v5049_v43 = vadd.f32 %v4973_v63, %v1518_v52  ;;  %v1519_v15 = vmul.f32 %v4969_v48, %v1471_v34  ;;  %v922_v39 = vmul.f32 %v4969_v48, %v4893_v5  ;;  %v5086_v23 = vadd.f32 %v4973_v63, %v923_v30 }
 0x1ab   :  { %v5058_v26 = vadd.f32 %v4973_v63, %v1521_v54  ;;  %v3308_v59 = vpop.f32.mrb[72].mxu0  ;;  %v5094_v54 = vadd.f32 %v4973_v63, %v921_v36 }
 0x1ac   :  { %v5066_v20 = vadd.f32 %v4973_v63, %v1519_v15  ;;  %v3654_v37 = vpop.f32.mrb[72].mxu1  ;;  %v3309_v14 = vpop.f32.mrb[73].mxu0 }
 0x1ad   :  { %v1492_v32 = vadd.f32 %v3654_v37, %v1395_v51  ;;  %v3310_v19 = vadd.f32 %v3309_v14, %v3308_v59  ;;  %v1483_v29 = vpop.f32.mrb[73].mxu1  ;;  %v3311_v38 = vpop.f32.mrb[74].mxu0 }
 0x1ae   :  { %v1484_v45 = vadd.f32 %v1483_v29, %v4981_v1  ;;  %v3655_v3 = vpop.f32.mrb[74].mxu1  ;;  %v3312_v35 = vpop.f32.mrb[75].mxu0 }
 0x1af   :  { %v1524_v22 = vmul.f32 %v4969_v48, %v1492_v32  ;;  %v1495_v10 = vadd.f32 %v3655_v3, %v1398_v27  ;;  %v3313_v60 = vadd.f32 %v3312_v35, %v3311_v38  ;;  %v1486_v42 = vpop.f32.mrb[75].mxu1  ;;  %v1403_v16 = vadd.f32 %v3310_v19, %v4950_v57 }
 0x1b0   :  { %v1522_v51 = vmul.f32 %v4969_v48, %v1484_v45  ;;  %v1487_v44 = vadd.f32 %v1486_v42, %v4995_v2  ;;  %v5101_v2 = vadd.f32 %v4973_v63, %v924_v40  ;;  %v925_v40 = vmul.f32 %v4969_v48, %v4906_v49 }
 0x1b1   :  { %v5089_v1 = vadd.f32 %v4973_v63, %v1524_v22  ;;  %v1525_v52 = vmul.f32 %v4969_v48, %v1495_v10  ;;  %v1406_v34 = vadd.f32 %v3313_v60, %v4955_v11  ;;  %v5109_v11 = vadd.f32 %v4973_v63, %v922_v39 }
 0x1b2   :  { %v5097_v57 = vadd.f32 %v4973_v63, %v1522_v51  ;;  %v1523_v5 = vmul.f32 %v4969_v48, %v1487_v44  ;;  %v926_v39 = vmul.f32 %v4969_v48, %v4923_v7  ;;  %v928_v7 = vmul.f32 %v4969_v48, %v4915_v58 }
 0x1b3   :  { %v5106_v15 = vadd.f32 %v4973_v63, %v1525_v52  ;;  %v3314_v59 = vpop.f32.mrb[76].mxu0  ;;  %v927_v52 = vmul.f32 %v4969_v48, %v4900_v50 }
 0x1b4   :  { %v5114_v14 = vadd.f32 %v4973_v63, %v1523_v5  ;;  %v3658_v30 = vpop.f32.mrb[76].mxu1  ;;  %v3315_v32 = vpop.f32.mrb[77].mxu0  ;;  %v5140_v50 = vadd.f32 %v4973_v63, %v926_v39 }
 0x1b5   :  { %v3316_v29 = vadd.f32 %v3315_v32, %v3314_v59  ;;  %v1499_v38 = vpop.f32.mrb[77].mxu1  ;;  %v3317_v36 = vpop.f32.mrb[78].mxu0 }
 0x1b6   :  { %v1500_v3 = vadd.f32 %v1499_v38, %v1403_v16  ;;  %v3659_v35 = vpop.f32.mrb[78].mxu1  ;;  %v3318_v22 = vpop.f32.mrb[79].mxu0  ;;  %v5130_v16 = vadd.f32 %v4973_v63, %v925_v40  ;;  %5485 = vst [vmem:[#allocation9_spill] sm:$0xff] %v5140_v50  ;;  %v5148_v40 = vadd.f32 %v4973_v63, %v927_v52 }
 0x1b7   :  { %v1411_v10 = vadd.f32 %v3316_v29, %v4960_v31  ;;  %v3319_v60 = vadd.f32 %v3318_v22, %v3317_v36  ;;  %v1502_v42 = vpop.f32.mrb[79].mxu1 }
 0x1b8   :  { %v1526_v51 = vmul.f32 %v4969_v48, %v1500_v3  ;;  %v1503_v44 = vadd.f32 %v1502_v42, %v1406_v34 }
 0x1b9   :  { %v1508_v49 = vadd.f32 %v3658_v30, %v1411_v10  ;;  %v1414_v5 = vadd.f32 %v3319_v60, %v4963_v9 }
 0x1ba   :  { %v5133_v59 = vadd.f32 %v4973_v63, %v1526_v51  ;;  %v1527_v31 = vmul.f32 %v4969_v48, %v1503_v44  ;;  %v5157_v44 = vadd.f32 %v4973_v63, %v928_v7 }
 0x1bb   :  { %v1528_v32 = vmul.f32 %v4969_v48, %v1508_v49  ;;  %v1511_v34 = vadd.f32 %v3659_v35, %v1414_v5  ;;  %v3348_v29 = vpop.f32.mrb[80].mxu0 }
 0x1bc   :  { %5484 = vst [vmem:[#allocation8_spill] sm:$0xff] %v5133_v59  ;;  %v5145_v30 = vadd.f32 %v4973_v63, %v1527_v31  ;;  %v3412_v38 = vpop.f32.mrb[80].mxu1  ;;  %v3349_v36 = vpop.f32.mrb[81].mxu0  ;;  %5487 = vst [vmem:[#allocation11_spill] sm:$0xff] %v5157_v44 }
 0x1bd   :  { %v5151_v58 = vadd.f32 %v4973_v63, %v1528_v32  ;;  %v1529_v3 = vmul.f32 %v4969_v48, %v1511_v34  ;;  %v3350_v35 = vadd.f32 %v3349_v36, %v3348_v29  ;;  %v3413_v22 = vpop.f32.mrb[81].mxu1  ;;  %v3351_v10 = vpop.f32.mrb[82].mxu0 }
 0x1be   :  { %5486 = vst [vmem:[#allocation10_spill] sm:$0xff] %v5145_v30  ;;  %v3414_v42 = vadd.f32 %v3413_v22, %v3412_v38  ;;  %v3415_v39 = vpop.f32.mrb[82].mxu1  ;;  %v3352_v51 = vpop.f32.mrb[83].mxu0 }
 0x1bf   :  { %v5160_v52 = vadd.f32 %v4973_v63, %v1529_v3  ;;  %v3353_v49 = vadd.f32 %v3352_v51, %v3351_v10  ;;  %v3416_v5 = vpop.f32.mrb[83].mxu1 }
 0x1c0   :  { %v3417_v32 = vadd.f32 %v3416_v5, %v3415_v39  ;;  %v5164_v34 = vadd.f32 %v3414_v42, %v3350_v35 }
 0x1c1   :  { %5488 = vst [vmem:[#allocation12_spill] sm:$0xff] %v5160_v52 }
 0x1c2   :  { %v5168_v38 = vadd.f32 %v3417_v32, %v3353_v49 }
 0x1c3   :  { %v3354_v36 = vpop.f32.mrb[84].mxu0 }
 0x1c4   :  { %v3418_v22 = vpop.f32.mrb[84].mxu1  ;;  %v3355_v7 = vpop.f32.mrb[85].mxu0 }
 0x1c5   :  { %v3356_v60 = vadd.f32 %v3355_v7, %v3354_v36  ;;  %v3419_v9 = vpop.f32.mrb[85].mxu1  ;;  %v3357_v3 = vpop.f32.mrb[86].mxu0 }
 0x1c6   :  { %v3420_v45 = vadd.f32 %v3419_v9, %v3418_v22  ;;  %v3421_v10 = vpop.f32.mrb[86].mxu1  ;;  %v3358_v51 = vpop.f32.mrb[87].mxu0 }
 0x1c7   :  { %v3359_v19 = vadd.f32 %v3358_v51, %v3357_v3  ;;  %v3422_v37 = vpop.f32.mrb[87].mxu1 }
 0x1c8   :  { %v3423_v31 = vadd.f32 %v3422_v37, %v3421_v10  ;;  %v5170_v39 = vadd.f32 %v3420_v45, %v3356_v60 }
 0x1ca   :  { %v5172_v35 = vadd.f32 %v3423_v31, %v3359_v19 }
 0x1cb   :  { %v3360_v42 = vpop.f32.mrb[88].mxu0 }
 0x1cc   :  { %v3424_v5 = vpop.f32.mrb[88].mxu1  ;;  %v3361_v49 = vpop.f32.mrb[89].mxu0 }
 0x1cd   :  { %v3362_v32 = vadd.f32 %v3361_v49, %v3360_v42  ;;  %v3425_v29 = vpop.f32.mrb[89].mxu1  ;;  %v3363_v27 = vpop.f32.mrb[90].mxu0 }
 0x1ce   :  { %v3426_v41 = vadd.f32 %v3425_v29, %v3424_v5  ;;  %v3427_v36 = vpop.f32.mrb[90].mxu1  ;;  %v3364_v7 = vpop.f32.mrb[91].mxu0 }
 0x1cf   :  { %v3365_v61 = vadd.f32 %v3364_v7, %v3363_v27  ;;  %v3428_v9 = vpop.f32.mrb[91].mxu1 }
 0x1d0   :  { %v3429_v22 = vadd.f32 %v3428_v9, %v3427_v36  ;;  %v5174_v0 = vadd.f32 %v3426_v41, %v3362_v32 }
 0x1d2   :  { %v5176_v3 = vadd.f32 %v3429_v22, %v3365_v61 }
 0x1d3   :  { %v3366_v37 = vpop.f32.mrb[92].mxu0 }
 0x1d4   :  { %v3430_v45 = vpop.f32.mrb[92].mxu1  ;;  %v3367_v19 = vpop.f32.mrb[93].mxu0 }
 0x1d5   :  { %v3368_v60 = vadd.f32 %v3367_v19, %v3366_v37  ;;  %v3431_v31 = vpop.f32.mrb[93].mxu1  ;;  %v3369_v10 = vpop.f32.mrb[94].mxu0 }
 0x1d6   :  { %v3432_v51 = vadd.f32 %v3431_v31, %v3430_v45  ;;  %v3433_v42 = vpop.f32.mrb[94].mxu1  ;;  %v3370_v49 = vpop.f32.mrb[95].mxu0 }
 0x1d7   :  { %v3371_v55 = vadd.f32 %v3370_v49, %v3369_v10  ;;  %v3434_v29 = vpop.f32.mrb[95].mxu1 }
 0x1d8   :  { %v3435_v5 = vadd.f32 %v3434_v29, %v3433_v42  ;;  %v5178_v18 = vadd.f32 %v3432_v51, %v3368_v60 }
 0x1da   :  { %v5180_v27 = vadd.f32 %v3435_v5, %v3371_v55 }
 0x1db   :  { %v3372_v41 = vpop.f32.mrb[96].mxu0 }
 0x1dc   :  { %v3436_v32 = vpop.f32.mrb[96].mxu1  ;;  %v3373_v61 = vpop.f32.mrb[97].mxu0 }
 0x1dd   :  { %v3374_v36 = vadd.f32 %v3373_v61, %v3372_v41  ;;  %v3437_v7 = vpop.f32.mrb[97].mxu1  ;;  %v3375_v9 = vpop.f32.mrb[98].mxu0 }
 0x1de   :  { %v3438_v22 = vadd.f32 %v3437_v7, %v3436_v32  ;;  %v3439_v37 = vpop.f32.mrb[98].mxu1  ;;  %v3376_v19 = vpop.f32.mrb[99].mxu0 }
 0x1df   :  { %v3377_v33 = vadd.f32 %v3376_v19, %v3375_v9  ;;  %v3440_v45 = vpop.f32.mrb[99].mxu1 }
 0x1e0   :  { %v3441_v31 = vadd.f32 %v3440_v45, %v3439_v37  ;;  %v5182_v46 = vadd.f32 %v3438_v22, %v3374_v36 }
 0x1e2   :  { %v5184_v10 = vadd.f32 %v3441_v31, %v3377_v33 }
 0x1e3   :  { %v3378_v60 = vpop.f32.mrb[100].mxu0 }
 0x1e4   :  { %v3442_v51 = vpop.f32.mrb[100].mxu1  ;;  %v3379_v55 = vpop.f32.mrb[101].mxu0 }
 0x1e5   :  { %v3380_v42 = vadd.f32 %v3379_v55, %v3378_v60  ;;  %v3443_v49 = vpop.f32.mrb[101].mxu1  ;;  %v3381_v29 = vpop.f32.mrb[102].mxu0 }
 0x1e6   :  { %v3444_v5 = vadd.f32 %v3443_v49, %v3442_v51  ;;  %v3445_v41 = vpop.f32.mrb[102].mxu1  ;;  %v3382_v61 = vpop.f32.mrb[103].mxu0 }
 0x1e7   :  { %v3383_v25 = vadd.f32 %v3382_v61, %v3381_v29  ;;  %v3446_v32 = vpop.f32.mrb[103].mxu1 }
 0x1e8   :  { %v3447_v7 = vadd.f32 %v3446_v32, %v3445_v41  ;;  %v5186_v30 = vadd.f32 %v3444_v5, %v3380_v42 }
 0x1ea   :  { %v5188_v9 = vadd.f32 %v3447_v7, %v3383_v25 }
 0x1eb   :  { %v3384_v36 = vpop.f32.mrb[104].mxu0 }
 0x1ec   :  { %v3448_v22 = vpop.f32.mrb[104].mxu1  ;;  %v3385_v33 = vpop.f32.mrb[105].mxu0 }
 0x1ed   :  { %v3386_v37 = vadd.f32 %v3385_v33, %v3384_v36  ;;  %v3449_v19 = vpop.f32.mrb[105].mxu1  ;;  %v3387_v45 = vpop.f32.mrb[106].mxu0 }
 0x1ee   :  { %v3450_v31 = vadd.f32 %v3449_v19, %v3448_v22  ;;  %v3451_v60 = vpop.f32.mrb[106].mxu1  ;;  %v3388_v55 = vpop.f32.mrb[107].mxu0 }
 0x1ef   :  { %v3389_v50 = vadd.f32 %v3388_v55, %v3387_v45  ;;  %v3452_v51 = vpop.f32.mrb[107].mxu1 }
 0x1f0   :  { %v3453_v49 = vadd.f32 %v3452_v51, %v3451_v60  ;;  %v5190_v52 = vadd.f32 %v3450_v31, %v3386_v37 }
 0x1f2   :  { %v5192_v29 = vadd.f32 %v3453_v49, %v3389_v50 }
 0x1f3   :  { %v3390_v42 = vpop.f32.mrb[108].mxu0 }
 0x1f4   :  { %v3454_v5 = vpop.f32.mrb[108].mxu1  ;;  %v3391_v25 = vpop.f32.mrb[109].mxu0 }
 0x1f5   :  { %v3392_v41 = vadd.f32 %v3391_v25, %v3390_v42  ;;  %v3455_v61 = vpop.f32.mrb[109].mxu1  ;;  %v3393_v32 = vpop.f32.mrb[110].mxu0 }
 0x1f6   :  { %v3456_v7 = vadd.f32 %v3455_v61, %v3454_v5  ;;  %v3457_v36 = vpop.f32.mrb[110].mxu1  ;;  %v3394_v33 = vpop.f32.mrb[111].mxu0 }
 0x1f7   :  { %v3395_v44 = vadd.f32 %v3394_v33, %v3393_v32  ;;  %v3458_v22 = vpop.f32.mrb[111].mxu1 }
 0x1f8   :  { %v3459_v19 = vadd.f32 %v3458_v22, %v3457_v36  ;;  %v5194_v59 = vadd.f32 %v3456_v7, %v3392_v41 }
 0x1fa   :  { %v5196_v45 = vadd.f32 %v3459_v19, %v3395_v44 }
 0x1fb   :  { %v3670_v37 = vpop.f32.mrb[112].mxu0 }
 0x1fc   :  { %v2071_v50 = vadd.f32 %v3670_v37, %v5170_v39  ;;  %v2062_v31 = vpop.f32.mrb[113].mxu0  ;;  %v3488_v60 = vpop.f32.mrb[112].mxu1 }
 0x1fd   :  { %v2063_v55 = vadd.f32 %v2062_v31, %v5164_v34  ;;  %v3671_v51 = vpop.f32.mrb[114].mxu0  ;;  %v3489_v49 = vpop.f32.mrb[113].mxu1 }
 0x1fe   :  { %v2127_v42 = vmul.f32 %v4969_v48, %v2071_v50  ;;  %v2074_v5 = vadd.f32 %v3671_v51, %v5172_v35  ;;  %v2065_v25 = vpop.f32.mrb[115].mxu0  ;;  %v5202_v61 = vadd.f32 %v3489_v49, %v3488_v60  ;;  %v3491_v41 = vpop.f32.mrb[114].mxu1  ;;  %v5489_v35 = vmax.f32 %v4988_v4, %v4991_v13 }
 0x1ff   :  { %v2125_v44 = vmul.f32 %v4969_v48, %v2063_v55  ;;  %v2066_v32 = vadd.f32 %v2065_v25, %v5168_v38  ;;  %v3492_v7 = vpop.f32.mrb[115].mxu1  ;;  %v5490_v38 = vmax.f32 %v4998_v62, %v5001_v12  ;;  %v5491_v55 = vmax.f32 %v5005_v17, %v5010_v21 }
 0x200   :  { %v2143_v39 = vadd.f32 %v4973_v63, %v2127_v42  ;;  %v2128_v36 = vmul.f32 %v4969_v48, %v2074_v5  ;;  %v5208_v34 = vadd.f32 %v3492_v7, %v3491_v41  ;;  %v5492_v42 = vmax.f32 %v5013_v6, %v5018_v24 }
 0x201   :  { %v2141_v33 = vadd.f32 %v4973_v63, %v2125_v44  ;;  %v2126_v22 = vmul.f32 %v4969_v48, %v2066_v32 }
 0x202   :  { %v5215_v19 = vmax.f32 %v5489_v35, %v2143_v39  ;;  %v2144_v37 = vadd.f32 %v4973_v63, %v2128_v36 }
 0x203   :  { %v5221_v50 = vmax.f32 %v5490_v38, %v2141_v33  ;;  %v2142_v31 = vadd.f32 %v4973_v63, %v2126_v22  ;;  %v3674_v60 = vpop.f32.mrb[116].mxu0 }
 0x204   :  { %v5227_v51 = vmax.f32 %v5491_v55, %v2144_v37  ;;  %v2087_v49 = vadd.f32 %v3674_v60, %v5178_v18  ;;  %v2078_v4 = vpop.f32.mrb[117].mxu0  ;;  %v3494_v13 = vpop.f32.mrb[116].mxu1  ;;  %v5495_v60 = vmax.f32 %v5053_v28, %v5058_v26 }
 0x205   :  { %v5233_v5 = vmax.f32 %v5492_v42, %v2142_v31  ;;  %v2079_v62 = vadd.f32 %v2078_v4, %v5174_v0  ;;  %v3675_v12 = vpop.f32.mrb[118].mxu0  ;;  %v3495_v25 = vpop.f32.mrb[117].mxu1  ;;  %v5496_v4 = vmax.f32 %v5061_v47, %v5066_v20 }
 0x206   :  { %v2131_v41 = vmul.f32 %v4969_v48, %v2087_v49  ;;  %v2090_v44 = vadd.f32 %v3675_v12, %v5180_v27  ;;  %v2081_v17 = vpop.f32.mrb[119].mxu0  ;;  %v5238_v21 = vadd.f32 %v3495_v25, %v3494_v13  ;;  %v3497_v32 = vpop.f32.mrb[118].mxu1  ;;  %v5493_v27 = vmax.f32 %v5038_v53, %v5041_v8 }
 0x207   :  { %v2129_v18 = vmul.f32 %v4969_v48, %v2079_v62  ;;  %v2082_v7 = vadd.f32 %v2081_v17, %v5176_v3  ;;  %v3498_v39 = vpop.f32.mrb[119].mxu1  ;;  %v5494_v3 = vmax.f32 %v5046_v56, %v5049_v43 }
 0x208   :  { %v2147_v6 = vadd.f32 %v4973_v63, %v2131_v41  ;;  %v2132_v24 = vmul.f32 %v4969_v48, %v2090_v44  ;;  %v5244_v0 = vadd.f32 %v3498_v39, %v3497_v32 }
 0x209   :  { %v2145_v36 = vadd.f32 %v4973_v63, %v2129_v18  ;;  %v2130_v33 = vmul.f32 %v4969_v48, %v2082_v7 }
 0x20a   :  { %v5251_v22 = vmax.f32 %v5493_v27, %v2147_v6  ;;  %v2148_v35 = vadd.f32 %v4973_v63, %v2132_v24 }
 0x20b   :  { %v5257_v37 = vmax.f32 %v5494_v3, %v2145_v36  ;;  %v2146_v38 = vadd.f32 %v4973_v63, %v2130_v33  ;;  %v3678_v31 = vpop.f32.mrb[120].mxu0  ;;  %v5499_v36 = vmax.f32 %v5101_v2, %v5106_v15 }
 0x20c   :  { %v5263_v55 = vmax.f32 %v5495_v60, %v2148_v35  ;;  %v2103_v49 = vadd.f32 %v3678_v31, %v5186_v30  ;;  %v2094_v53 = vpop.f32.mrb[121].mxu0  ;;  %v3500_v8 = vpop.f32.mrb[120].mxu1  ;;  %v5500_v35 = vmax.f32 %v5109_v11, %v5114_v14 }
 0x20d   :  { %v5269_v13 = vmax.f32 %v5496_v4, %v2146_v38  ;;  %v2095_v56 = vadd.f32 %v2094_v53, %v5182_v46  ;;  %v3679_v43 = vpop.f32.mrb[122].mxu0  ;;  %v3501_v42 = vpop.f32.mrb[121].mxu1 }
 0x20e   :  { %v2135_v62 = vmul.f32 %v4969_v48, %v2103_v49  ;;  %v2106_v12 = vadd.f32 %v3679_v43, %v5188_v9  ;;  %v2097_v28 = vpop.f32.mrb[123].mxu0  ;;  %v5274_v26 = vadd.f32 %v3501_v42, %v3500_v8  ;;  %v3503_v25 = vpop.f32.mrb[122].mxu1  ;;  %v5497_v9 = vmax.f32 %v5086_v23, %v5089_v1 }
 0x20f   :  { %v2133_v30 = vmul.f32 %v4969_v48, %v2095_v56  ;;  %v2098_v41 = vadd.f32 %v2097_v28, %v5184_v10  ;;  %v3504_v44 = vpop.f32.mrb[123].mxu1  ;;  %v5498_v10 = vmax.f32 %v5094_v54, %v5097_v57 }
 0x210   :  { %v2151_v47 = vadd.f32 %v4973_v63, %v2135_v62  ;;  %v2136_v20 = vmul.f32 %v4969_v48, %v2106_v12  ;;  %v5280_v46 = vadd.f32 %v3504_v44, %v3503_v25 }
 0x211   :  { %v2149_v17 = vadd.f32 %v4973_v63, %v2133_v30  ;;  %v2134_v32 = vmul.f32 %v4969_v48, %v2098_v41  ;;  %v5504_v30 = vld [vmem:[#allocation11_spill] sm:$0xff]  ;;  %v5505_v41 = vld [vmem:[#allocation12_spill] sm:$0xff] }
 0x212   :  { %v5287_v18 = vmax.f32 %v5497_v9, %v2151_v47  ;;  %v2152_v7 = vadd.f32 %v4973_v63, %v2136_v20  ;;  %v5506_v44 = vmax.f32 %v5504_v30, %v5505_v41 }
 0x213   :  { %v5293_v39 = vmax.f32 %v5498_v10, %v2149_v17  ;;  %v2150_v6 = vadd.f32 %v4973_v63, %v2134_v32  ;;  %v3682_v24 = vpop.f32.mrb[124].mxu0 }
 0x214   :  { %v5299_v33 = vmax.f32 %v5499_v36, %v2152_v7  ;;  %v2119_v27 = vadd.f32 %v3682_v24, %v5194_v59  ;;  %v2110_v23 = vpop.f32.mrb[125].mxu0  ;;  %v3506_v1 = vpop.f32.mrb[124].mxu1 }
 0x215   :  { %v5305_v3 = vmax.f32 %v5500_v35, %v2150_v6  ;;  %v2111_v54 = vadd.f32 %v2110_v23, %v5190_v52  ;;  %v3683_v57 = vpop.f32.mrb[126].mxu0  ;;  %v3507_v38 = vpop.f32.mrb[125].mxu1 }
 0x216   :  { %v2139_v31 = vmul.f32 %v4969_v48, %v2119_v27  ;;  %v2122_v60 = vadd.f32 %v3683_v57, %v5196_v45  ;;  %v2113_v2 = vpop.f32.mrb[127].mxu0  ;;  %v5310_v15 = vadd.f32 %v3507_v38, %v3506_v1  ;;  %v3509_v49 = vpop.f32.mrb[126].mxu1  ;;  %v5501_v45 = vmax.f32 %v5148_v40, %v5151_v58  ;;  %v5507_v40 = vld [vmem:[#allocation9_spill] sm:$0xff]  ;;  %v5508_v58 = vld [vmem:[#allocation10_spill] sm:$0xff] }
 0x217   :  { %v2137_v59 = vmul.f32 %v4969_v48, %v2111_v54  ;;  %v2114_v53 = vadd.f32 %v2113_v2, %v5192_v29  ;;  %v3510_v8 = vpop.f32.mrb[127].mxu1  ;;  %v5502_v29 = vld [vmem:[#allocation8_spill] sm:$0xff]  ;;  %v5509_v32 = vmax.f32 %v5507_v40, %v5508_v58 }
 0x218   :  { %v2155_v11 = vadd.f32 %v4973_v63, %v2139_v31  ;;  %v2140_v14 = vmul.f32 %v4969_v48, %v2122_v60  ;;  %v5316_v52 = vadd.f32 %v3510_v8, %v3509_v49  ;;  %v5503_v62 = vmax.f32 %v5130_v16, %v5502_v29 }
 0x219   :  { %v2153_v4 = vadd.f32 %v4973_v63, %v2137_v59  ;;  %v2138_v56 = vmul.f32 %v4969_v48, %v2114_v53 }
 0x21a   :  { %v5323_v43 = vmax.f32 %v5501_v45, %v2155_v11  ;;  %v2156_v42 = vadd.f32 %v4973_v63, %v2140_v14 }
 0x21b   :  { %v5329_v12 = vmax.f32 %v5503_v62, %v2153_v4  ;;  %v2154_v28 = vadd.f32 %v4973_v63, %v2138_v56  ;;  %v3552_v25 = vpop.f32.mrb[128].mxu0 }
 0x21c   :  { %v5335_v47 = vmax.f32 %v5506_v44, %v2156_v42  ;;  %v3553_v20 = vpop.f32.mrb[129].mxu0  ;;  %v3512_v17 = vpop.f32.mrb[128].mxu1 }
 0x21d   :  { %v5340_v9 = vmax.f32 %v5509_v32, %v2154_v28  ;;  %v3554_v7 = vadd.f32 %v3553_v20, %v3552_v25  ;;  %v3555_v10 = vpop.f32.mrb[130].mxu0  ;;  %v3513_v16 = vpop.f32.mrb[129].mxu1 }
 0x21e   :  { %v5342_v6 = vadd.f32 %v3513_v16, %v3512_v17  ;;  %v3556_v24 = vpop.f32.mrb[131].mxu0  ;;  %v3515_v36 = vpop.f32.mrb[130].mxu1 }
 0x21f   :  { %v3557_v27 = vadd.f32 %v3556_v24, %v3555_v10  ;;  %v3516_v23 = vpop.f32.mrb[131].mxu1  ;;  %v2577_v1 = vadd.f32 %v3554_v7, %v5202_v61 }
 0x220   :  { %v5345_v35 = vadd.f32 %v3516_v23, %v3515_v36 }
 0x221   :  { %v2580_v54 = vadd.f32 %v3557_v27, %v5208_v34 }
 0x223   :  { %v3558_v57 = vpop.f32.mrb[132].mxu0 }
 0x224   :  { %v3559_v38 = vpop.f32.mrb[133].mxu0  ;;  %v3518_v31 = vpop.f32.mrb[132].mxu1 }
 0x225   :  { %v3560_v60 = vadd.f32 %v3559_v38, %v3558_v57  ;;  %v3561_v2 = vpop.f32.mrb[134].mxu0  ;;  %v3519_v49 = vpop.f32.mrb[133].mxu1 }
 0x226   :  { %v5348_v59 = vadd.f32 %v3519_v49, %v3518_v31  ;;  %v3562_v53 = vpop.f32.mrb[135].mxu0  ;;  %v3521_v8 = vpop.f32.mrb[134].mxu1 }
 0x227   :  { %v3563_v11 = vadd.f32 %v3562_v53, %v3561_v2  ;;  %v3522_v14 = vpop.f32.mrb[135].mxu1  ;;  %v2585_v4 = vadd.f32 %v3560_v60, %v5238_v21 }
 0x228   :  { %v5351_v56 = vadd.f32 %v3522_v14, %v3521_v8 }
 0x229   :  { %v2588_v61 = vadd.f32 %v3563_v11, %v5244_v0 }
 0x22b   :  { %v3564_v45 = vpop.f32.mrb[136].mxu0 }
 0x22c   :  { %v3565_v34 = vpop.f32.mrb[137].mxu0  ;;  %v3524_v42 = vpop.f32.mrb[136].mxu1 }
 0x22d   :  { %v3566_v29 = vadd.f32 %v3565_v34, %v3564_v45  ;;  %v3567_v62 = vpop.f32.mrb[138].mxu0  ;;  %v3525_v28 = vpop.f32.mrb[137].mxu1 }
 0x22e   :  { %v5354_v25 = vadd.f32 %v3525_v28, %v3524_v42  ;;  %v3568_v30 = vpop.f32.mrb[139].mxu0  ;;  %v3527_v41 = vpop.f32.mrb[138].mxu1 }
 0x22f   :  { %v3569_v44 = vadd.f32 %v3568_v30, %v3567_v62  ;;  %v3528_v20 = vpop.f32.mrb[139].mxu1  ;;  %v2593_v17 = vadd.f32 %v3566_v29, %v5274_v26 }
 0x230   :  { %v5357_v40 = vadd.f32 %v3528_v20, %v3527_v41 }
 0x231   :  { %v5360_v21 = vadd.f32 %v3569_v44, %v5280_v46 }
 0x233   :  { %v3570_v0 = vpop.f32.mrb[140].mxu0 }
 0x234   :  { %v3571_v58 = vpop.f32.mrb[141].mxu0  ;;  %v3530_v32 = vpop.f32.mrb[140].mxu1 }
 0x235   :  { %v3572_v7 = vadd.f32 %v3571_v58, %v3570_v0  ;;  %v3573_v10 = vpop.f32.mrb[142].mxu0  ;;  %v3531_v16 = vpop.f32.mrb[141].mxu1 }
 0x236   :  { %v5362_v24 = vadd.f32 %v3531_v16, %v3530_v32  ;;  %v3574_v36 = vpop.f32.mrb[143].mxu0  ;;  %v3533_v27 = vpop.f32.mrb[142].mxu1 }
 0x237   :  { %v3575_v23 = vadd.f32 %v3574_v36, %v3573_v10  ;;  %v3534_v57 = vpop.f32.mrb[143].mxu1  ;;  %v2601_v38 = vadd.f32 %v3572_v7, %v5310_v15 }
 0x238   :  { %v5365_v26 = vadd.f32 %v3534_v57, %v3533_v27 }
 0x239   :  { %v2604_v31 = vadd.f32 %v3575_v23, %v5316_v52 }
 0x23b   :  { %v3576_v46 = vpop.f32.mrb[144].mxu0 }
 0x23c   :  { %v3694_v60 = vpop.f32.mrb[144].mxu1  ;;  %v3577_v2 = vpop.f32.mrb[145].mxu0 }
 0x23d   :  { %v2682_v49 = vadd.f32 %v3694_v60, %v2585_v4  ;;  %v3578_v53 = vadd.f32 %v3577_v2, %v3576_v46  ;;  %v2673_v8 = vpop.f32.mrb[145].mxu1  ;;  %v3579_v11 = vpop.f32.mrb[146].mxu0 }
 0x23e   :  { %v2674_v14 = vadd.f32 %v2673_v8, %v2577_v1  ;;  %v3695_v45 = vpop.f32.mrb[146].mxu1  ;;  %v3580_v34 = vpop.f32.mrb[147].mxu0 }
 0x23f   :  { %v2738_v42 = vmul.f32 %v4969_v48, %v2682_v49  ;;  %v2685_v29 = vadd.f32 %v3695_v45, %v2588_v61  ;;  %v3581_v62 = vadd.f32 %v3580_v34, %v3579_v11  ;;  %v2676_v28 = vpop.f32.mrb[147].mxu1  ;;  %v2609_v15 = vadd.f32 %v3578_v53, %v5342_v6 }
 0x240   :  { %v2736_v30 = vmul.f32 %v4969_v48, %v2674_v14  ;;  %v2677_v52 = vadd.f32 %v2676_v28, %v2580_v54 }
 0x241   :  { %v2754_v41 = vadd.f32 %v4973_v63, %v2738_v42  ;;  %v2739_v4 = vmul.f32 %v4969_v48, %v2685_v29  ;;  %v5374_v44 = vadd.f32 %v3581_v62, %v5345_v35 }
 0x242   :  { %v2752_v1 = vadd.f32 %v4973_v63, %v2736_v30  ;;  %v2737_v20 = vmul.f32 %v4969_v48, %v2677_v52 }
 0x243   :  { %v2770_v61 = vmax.f32 %v5215_v19, %v2754_v41  ;;  %v2755_v0 = vadd.f32 %v4973_v63, %v2739_v4  ;;  %v3582_v58 = vpop.f32.mrb[148].mxu0 }
 0x244   :  { %v2768_v6 = vmax.f32 %v5221_v50, %v2752_v1  ;;  %v2753_v54 = vadd.f32 %v4973_v63, %v2737_v20  ;;  %v3698_v32 = vpop.f32.mrb[148].mxu1  ;;  %v3583_v7 = vpop.f32.mrb[149].mxu0 }
 0x245   :  { %v2786_v10 = vmax.f32 %v2770_v61, 0.0  ;;  %v2771_v16 = vmax.f32 %v5227_v51, %v2755_v0  ;;  %v2698_v35 = vadd.f32 %v3698_v32, %v2601_v38  ;;  %v3584_v36 = vadd.f32 %v3583_v7, %v3582_v58  ;;  %v2689_v27 = vpop.f32.mrb[149].mxu1  ;;  %v3585_v23 = vpop.f32.mrb[150].mxu0 }
 0x246   :  { %v2784_v57 = vmax.f32 %v2768_v6, 0.0  ;;  %v2769_v46 = vmax.f32 %v5233_v5, %v2753_v54  ;;  %v2690_v19 = vadd.f32 %v2689_v27, %v2593_v17  ;;  %v3699_v60 = vpop.f32.mrb[150].mxu1  ;;  %v3586_v2 = vpop.f32.mrb[151].mxu0 }
 0x247   :  { %2802 = vst [vmem:[%s5478_s7 + $0x10] sm:$0xff] %v2786_v10  ;;  %v2787_v50 = vmax.f32 %v2771_v16, 0.0  ;;  %v2742_v49 = vmul.f32 %v4969_v48, %v2698_v35  ;;  %v2701_v53 = vadd.f32 %v3699_v60, %v2604_v31  ;;  %v3587_v8 = vadd.f32 %v3586_v2, %v3585_v23  ;;  %v2692_v51 = vpop.f32.mrb[151].mxu1 }
 0x248   :  { %2800 = vst [vmem:[%s5478_s7] sm:$0xff] %v2784_v57  ;;  %v2785_v38 = vmax.f32 %v2769_v46, 0.0  ;;  %v2740_v5 = vmul.f32 %v4969_v48, %v2690_v19  ;;  %v2693_v17 = vadd.f32 %v2692_v51, %v5360_v21  ;;  %v2617_v11 = vadd.f32 %v3584_v36, %v5348_v59 }
 0x249   :  { %2803 = vst [vmem:[%s5478_s7 + $0x18] sm:$0xff] %v2787_v50  ;;  %v2758_v14 = vadd.f32 %v4973_v63, %v2742_v49  ;;  %v2743_v31 = vmul.f32 %v4969_v48, %v2701_v53  ;;  %v2620_v45 = vadd.f32 %v3587_v8, %v5351_v56 }
 0x24a   :  { %2801 = vst [vmem:[%s5478_s7 + $0x8] sm:$0xff] %v2785_v38  ;;  %v2756_v34 = vadd.f32 %v4973_v63, %v2740_v5  ;;  %v2741_v21 = vmul.f32 %v4969_v48, %v2693_v17 }
 0x24b   :  { %v2774_v59 = vmax.f32 %v5251_v22, %v2758_v14  ;;  %v2759_v42 = vadd.f32 %v4973_v63, %v2743_v31  ;;  %v3588_v29 = vpop.f32.mrb[152].mxu0 }
 0x24c   :  { %v2772_v62 = vmax.f32 %v5257_v37, %v2756_v34  ;;  %v2757_v28 = vadd.f32 %v4973_v63, %v2741_v21  ;;  %v3702_v30 = vpop.f32.mrb[152].mxu1  ;;  %v3589_v52 = vpop.f32.mrb[153].mxu0 }
 0x24d   :  { %v2790_v56 = vmax.f32 %v2774_v59, 0.0  ;;  %v2775_v41 = vmax.f32 %v5263_v55, %v2759_v42  ;;  %v2714_v4 = vadd.f32 %v3702_v30, %v2617_v11  ;;  %v3590_v1 = vadd.f32 %v3589_v52, %v3588_v29  ;;  %v2705_v20 = vpop.f32.mrb[153].mxu1  ;;  %v3591_v61 = vpop.f32.mrb[154].mxu0  ;;  %v4009_v59 = vld [vmem:[#allocation4] ss:$0 sm:$0xff] }
 0x24e   :  { %v2788_v0 = vmax.f32 %v2772_v62, 0.0  ;;  %v2773_v58 = vmax.f32 %v5269_v13, %v2757_v28  ;;  %v2706_v22 = vadd.f32 %v2705_v20, %v2609_v15  ;;  %v3703_v6 = vpop.f32.mrb[154].mxu1  ;;  %v3592_v54 = vpop.f32.mrb[155].mxu0 }
 0x24f   :  { %2806 = vst [vmem:[%s5478_s7 + $0x30] sm:$0xff] %v2790_v56  ;;  %v2791_v37 = vmax.f32 %v2775_v41, 0.0  ;;  %v2746_v32 = vmul.f32 %v4969_v48, %v2714_v4  ;;  %v2717_v7 = vadd.f32 %v3703_v6, %v2620_v45  ;;  %v3593_v10 = vadd.f32 %v3592_v54, %v3591_v61  ;;  %v2708_v55 = vpop.f32.mrb[155].mxu1 }
 0x250   :  { %2804 = vst [vmem:[%s5478_s7 + $0x20] sm:$0xff] %v2788_v0  ;;  %v2789_v16 = vmax.f32 %v2773_v58, 0.0  ;;  %v2744_v13 = vmul.f32 %v4969_v48, %v2706_v22  ;;  %v2709_v15 = vadd.f32 %v2708_v55, %v5374_v44  ;;  %v2625_v35 = vadd.f32 %v3590_v1, %v5354_v25 }
 0x251   :  { %2807 = vst [vmem:[%s5478_s7 + $0x38] sm:$0xff] %v2791_v37  ;;  %v2762_v36 = vadd.f32 %v4973_v63, %v2746_v32  ;;  %v2747_v27 = vmul.f32 %v4969_v48, %v2717_v7  ;;  %v2628_v23 = vadd.f32 %v3593_v10, %v5357_v40 }
 0x252   :  { %2805 = vst [vmem:[%s5478_s7 + $0x28] sm:$0xff] %v2789_v16  ;;  %v2760_v57 = vadd.f32 %v4973_v63, %v2744_v13  ;;  %v2745_v44 = vmul.f32 %v4969_v48, %v2709_v15 }
 0x253   :  { %v2778_v25 = vmax.f32 %v5287_v18, %v2762_v36  ;;  %v2763_v46 = vadd.f32 %v4973_v63, %v2747_v27  ;;  %v3594_v19 = vpop.f32.mrb[156].mxu0 }
 0x254   :  { %v2776_v60 = vmax.f32 %v5293_v39, %v2760_v57  ;;  %v2761_v2 = vadd.f32 %v4973_v63, %v2745_v44  ;;  %v3706_v50 = vpop.f32.mrb[156].mxu1  ;;  %v3595_v49 = vpop.f32.mrb[157].mxu0 }
 0x255   :  { %v2794_v40 = vmax.f32 %v2778_v25, 0.0  ;;  %v2779_v53 = vmax.f32 %v5299_v33, %v2763_v46  ;;  %v3596_v8 = vadd.f32 %v3595_v49, %v3594_v19  ;;  %v2721_v51 = vpop.f32.mrb[157].mxu1  ;;  %v3597_v38 = vpop.f32.mrb[158].mxu0 }
 0x256   :  { %v2792_v5 = vmax.f32 %v2776_v60, 0.0  ;;  %v2777_v48 = vmax.f32 %v5305_v3, %v2761_v2  ;;  %v2722_v17 = vadd.f32 %v2721_v51, %v2625_v35  ;;  %v3707_v18 = vpop.f32.mrb[158].mxu1  ;;  %v3598_v11 = vpop.f32.mrb[159].mxu0  ;;  %v4008_v3 = vld [vmem:[%s5476_s5] ss:$0 sm:$0xff] }
 0x257   :  { %2810 = vst [vmem:[%s5478_s7 + $0x50] sm:$0xff] %v2794_v40  ;;  %v2795_v39 = vmax.f32 %v2779_v53, 0.0  ;;  %v2633_v63 = vadd.f32 %v3596_v8, %v5362_v24  ;;  %v3599_v14 = vadd.f32 %v3598_v11, %v3597_v38  ;;  %v2724_v31 = vpop.f32.mrb[159].mxu1 }
 0x258   :  { %2808 = vst [vmem:[%s5478_s7 + $0x40] sm:$0xff] %v2792_v5  ;;  %v2793_v33 = vmax.f32 %v2777_v48, 0.0  ;;  %v2748_v45 = vmul.f32 %v4008_v3, %v2722_v17  ;;  %v2725_v34 = vadd.f32 %v2724_v31, %v2628_v23 }
 0x259   :  { %2811 = vst [vmem:[%s5478_s7 + $0x58] sm:$0xff] %v2795_v39  ;;  %v2730_v21 = vadd.f32 %v3706_v50, %v2633_v63  ;;  %v2636_v24 = vadd.f32 %v3599_v14, %v5365_v26 }
 0x25a   :  { %2809 = vst [vmem:[%s5478_s7 + $0x48] sm:$0xff] %v2793_v33  ;;  %v2764_v42 = vadd.f32 %v4009_v59, %v2748_v45  ;;  %v2749_v29 = vmul.f32 %v4008_v3, %v2725_v34 }
 0x25b   :  { %v2750_v62 = vmul.f32 %v4008_v3, %v2730_v21  ;;  %v2733_v28 = vadd.f32 %v3707_v18, %v2636_v24 }
 0x25c   :  { %v2780_v30 = vmax.f32 %v5329_v12, %v2764_v42  ;;  %v2765_v52 = vadd.f32 %v4009_v59, %v2749_v29 }
 0x25d   :  { %v2766_v56 = vadd.f32 %v4009_v59, %v2750_v62  ;;  %v2751_v41 = vmul.f32 %v4008_v3, %v2733_v28 }
 0x25e   :  { %v2796_v4 = vmax.f32 %v2780_v30, 0.0  ;;  %v2781_v1 = vmax.f32 %v5340_v9, %v2765_v52 }
 0x25f   :  { %v2782_v20 = vmax.f32 %v5323_v43, %v2766_v56  ;;  %v2767_v26 = vadd.f32 %v4009_v59, %v2751_v41 }
 0x260   :  { %2812 = vst [vmem:[%s5478_s7 + $0x60] sm:$0xff] %v2796_v4  ;;  %v2797_v61 = vmax.f32 %v2781_v1, 0.0 }
 0x261   :  { %v2798_v0 = vmax.f32 %v2782_v20, 0.0  ;;  %v2783_v58 = vmax.f32 %v5335_v47, %v2767_v26 }
 0x262   :  { %2813 = vst [vmem:[%s5478_s7 + $0x68] sm:$0xff] %v2797_v61 }
 0x263   :  { %2814 = vst [vmem:[%s5478_s7 + $0x70] sm:$0xff] %v2798_v0  ;;  %v2799_v12 = vmax.f32 %v2783_v58, 0.0 }
 0x265   :  { %2815 = vst [vmem:[%s5478_s7 + $0x78] sm:$0xff] %v2799_v12 }
 0x266   :  { %2820 = vsyncpa [#allocation3], 1 }
 0x267   :  { %2821 = vsyncpa [#allocation5], 1 }

// kernel: cnn_forward.8
= control target key start
LH: loop header
LB: loop body
LE: loop exit
PB: predicated region body
PF: predicated region fallthrough
CT: control target
= control target key end

     0   :  { %s4828_s4 = inlined_call_operand.vmem [shape: bf16[1152,256], index: 4, kind: input, shape index: {}]   ;;  %s4829_s0 = inlined_call_operand.vmem [shape: bf16[32,1152], index: 0, kind: input, shape index: {}]   ;;  %s4830_s1 = inlined_call_operand.vmem [shape: bf16[32,1152], index: 1, kind: input, shape index: {}]   ;;  %s4831_s2 = inlined_call_operand.vmem [shape: bf16[32,1152], index: 2, kind: input, shape index: {}]   ;;  %s4832_s3 = inlined_call_operand.vmem [shape: bf16[32,1152], index: 3, kind: input, shape index: {}]   ;;  %s4833_s5 = inlined_call_operand.vmem [shape: f32[1,256], index: 5, kind: input, shape index: {}]   ;;  %s4834_s6 = inlined_call_operand.vmem [shape: f32[1,256], index: 6, kind: input, shape index: {}]   ;;  %s4835_s7 = inlined_call_operand.vmem [shape: f32[32,256], index: 7, kind: output, shape index: {}]  }
   0x1   :  { %v2876_v0 = vld [vmem:[%s4828_s4 + $0x4] ss:$8 sps:$4 sm:$0xff]   ;;  %v2878_v1 = vld [vmem:[%s4828_s4] ss:$8 sps:$4 sm:$0xff]   ;;  %v2879_v2 = vld [vmem:[%s4828_s4 + $0x14] ss:$8 sps:$4 sm:$0xff]  }
   0x2   :  { %1005 = vmatprep.subr.bf16.mxu0 %v2876_v0  ;;  %1420 = vmatprep.subr.bf16.mxu1 %v2876_v0  ;;  %v2881_v3 = vld [vmem:[%s4828_s4 + $0x10] ss:$8 sps:$4 sm:$0xff]   ;;  %v2882_v4 = vld [vmem:[%s4828_s4 + $0x24] ss:$8 sps:$4 sm:$0xff]   ;;  %v2884_v5 = vld [vmem:[%s4828_s4 + $0x20] ss:$8 sps:$4 sm:$0xff]  }
   0x3   :  { %1006 = vmatpush1.bf16.msra.mxu0 %v2878_v1  ;;  %1421 = vmatpush1.bf16.msra.mxu1 %v2878_v1  ;;  %v2885_v6 = vld [vmem:[%s4828_s4 + $0x34] ss:$8 sps:$4 sm:$0xff]   ;;  %v2887_v7 = vld [vmem:[%s4828_s4 + $0x30] ss:$8 sps:$4 sm:$0xff]   ;;  %v2888_v8 = vld [vmem:[%s4828_s4 + $0x44] ss:$8 sps:$4 sm:$0xff]  }
   0x4   :  { %1007 = vmatprep.subr.bf16.mxu0 %v2879_v2  ;;  %1422 = vmatprep.subr.bf16.mxu1 %v2879_v2  ;;  %v2890_v9 = vld [vmem:[%s4828_s4 + $0x40] ss:$8 sps:$4 sm:$0xff]   ;;  %v2891_v10 = vld [vmem:[%s4828_s4 + $0x54] ss:$8 sps:$4 sm:$0xff]   ;;  %v2893_v11 = vld [vmem:[%s4828_s4 + $0x50] ss:$8 sps:$4 sm:$0xff]  }
   0x5   :  { %v2894_v12 = vld [vmem:[%s4828_s4 + $0x64] ss:$8 sps:$4 sm:$0xff]   ;;  %v2896_v14 = vld [vmem:[%s4828_s4 + $0x60] ss:$8 sps:$4 sm:$0xff]   ;;  %v2897_v15 = vld [vmem:[%s4828_s4 + $0x74] ss:$8 sps:$4 sm:$0xff]  }
   0x6   :  { %v2926_v13 = vld [vmem:[%s4829_s0 + $0x4] ss:$36 sps:$4 sm:$0xff]   ;;  %v2899_v17 = vld [vmem:[%s4828_s4 + $0x70] ss:$8 sps:$4 sm:$0xff]   ;;  %v2903_v20 = vld [vmem:[%s4828_s4 + $0x94] ss:$8 sps:$4 sm:$0xff]  }
   0x7   :  { %1008 = vmatpush1.bf16.msra.mxu0 %v2881_v3  ;;  %1423 = vmatpush1.bf16.msra.mxu1 %v2881_v3  ;;  %v2931_v16 = vld [vmem:[%s4830_s1 + $0x4] ss:$36 sps:$4 sm:$0xff]   ;;  %v2905_v21 = vld [vmem:[%s4828_s4 + $0x90] ss:$8 sps:$4 sm:$0xff]   ;;  %v2909_v24 = vld [vmem:[%s4828_s4 + $0xb4] ss:$8 sps:$4 sm:$0xff]  }
   0x8   :  { %1009 = vmatprep.subr.bf16.mxu0 %v2882_v4  ;;  %1424 = vmatprep.subr.bf16.mxu1 %v2882_v4  ;;  %v2900_v18 = vld [vmem:[%s4828_s4 + $0x84] ss:$8 sps:$4 sm:$0xff]   ;;  %v2902_v19 = vld [vmem:[%s4828_s4 + $0x80] ss:$8 sps:$4 sm:$0xff]   ;;  %v2911_v25 = vld [vmem:[%s4828_s4 + $0xb0] ss:$8 sps:$4 sm:$0xff]  }
   0x9   :  { %1037 = vmatprep.mubr.bf16.mxu0 %v2926_v13  ;;  %1452 = vmatprep.mubr.bf16.mxu1 %v2931_v16  ;;  %v2906_v22 = vld [vmem:[%s4828_s4 + $0xa4] ss:$8 sps:$4 sm:$0xff]   ;;  %v2908_v23 = vld [vmem:[%s4828_s4 + $0xa0] ss:$8 sps:$4 sm:$0xff]   ;;  %v2915_v28 = vld [vmem:[%s4828_s4 + $0xd4] ss:$8 sps:$4 sm:$0xff]  }
   0xa   :  { %v2912_v26 = vld [vmem:[%s4828_s4 + $0xc4] ss:$8 sps:$4 sm:$0xff]   ;;  %v2914_v27 = vld [vmem:[%s4828_s4 + $0xc0] ss:$8 sps:$4 sm:$0xff]   ;;  %v2917_v29 = vld [vmem:[%s4828_s4 + $0xd0] ss:$8 sps:$4 sm:$0xff]  }
   0xb   :  { %1010 = vmatpush1.bf16.msra.mxu0 %v2884_v5  ;;  %1425 = vmatpush1.bf16.msra.mxu1 %v2884_v5  ;;  %v2918_v30 = vld [vmem:[%s4828_s4 + $0xe4] ss:$8 sps:$4 sm:$0xff]   ;;  %v2920_v31 = vld [vmem:[%s4828_s4 + $0xe0] ss:$8 sps:$4 sm:$0xff]   ;;  %v2921_v32 = vld [vmem:[%s4828_s4 + $0xf4] ss:$8 sps:$4 sm:$0xff]  }
   0xc   :  { %1011 = vmatprep.subr.bf16.mxu0 %v2885_v6  ;;  %1426 = vmatprep.subr.bf16.mxu1 %v2885_v6  ;;  %v2923_v33 = vld [vmem:[%s4828_s4 + $0xf0] ss:$8 sps:$4 sm:$0xff]   ;;  %v2927_v34 = vld [vmem:[%s4828_s4 + $0x104] ss:$8 sps:$4 sm:$0xff]   ;;  %v2932_v37 = vld [vmem:[%s4828_s4 + $0x100] ss:$8 sps:$4 sm:$0xff]  }
   0xd   :  { %v2924_v35 = vld [vmem:[%s4829_s0] ss:$36 sps:$4 sm:$0xff]   ;;  %v2933_v38 = vld [vmem:[%s4828_s4 + $0x114] ss:$8 sps:$4 sm:$0xff]   ;;  %v2972_v39 = vld [vmem:[%s4829_s0 + $0x4c] ss:$36 sps:$4 sm:$0xff]  }
   0xe   :  { %v2929_v36 = vld [vmem:[%s4830_s1] ss:$36 sps:$4 sm:$0xff]   ;;  %v2976_v40 = vld [vmem:[%s4830_s1 + $0x4c] ss:$36 sps:$4 sm:$0xff]   ;;  %v2939_v46 = vld [vmem:[%s4828_s4 + $0x134] ss:$8 sps:$4 sm:$0xff]  }
   0xf   :  { %1012 = vmatpush1.bf16.msra.mxu0 %v2887_v7  ;;  %1427 = vmatpush1.bf16.msra.mxu1 %v2887_v7  ;;  %v2935_v41 = vld [vmem:[%s4828_s4 + $0x110] ss:$8 sps:$4 sm:$0xff]   ;;  %v2936_v42 = vld [vmem:[%s4828_s4 + $0x124] ss:$8 sps:$4 sm:$0xff]   ;;  %v2938_v45 = vld [vmem:[%s4828_s4 + $0x120] ss:$8 sps:$4 sm:$0xff]  }
  0x10   :  { %1013 = vmatprep.subr.bf16.mxu0 %v2888_v8  ;;  %1428 = vmatprep.subr.bf16.mxu1 %v2888_v8  ;;  %v2978_v43 = vld [vmem:[%s4829_s0 + $0x48] ss:$36 sps:$4 sm:$0xff]   ;;  %v2941_v49 = vld [vmem:[%s4828_s4 + $0x130] ss:$8 sps:$4 sm:$0xff]   ;;  %v2945_v52 = vld [vmem:[%s4828_s4 + $0x154] ss:$8 sps:$4 sm:$0xff]  }
  0x11   :  { %v2980_v44 = vld [vmem:[%s4830_s1 + $0x48] ss:$36 sps:$4 sm:$0xff]   ;;  %v2947_v53 = vld [vmem:[%s4828_s4 + $0x150] ss:$8 sps:$4 sm:$0xff]   ;;  %v2951_v56 = vld [vmem:[%s4828_s4 + $0x174] ss:$8 sps:$4 sm:$0xff]  }
  0x12   :  { %v2986_v47 = vld [vmem:[%s4829_s0 + $0xc] ss:$36 sps:$4 sm:$0xff]   ;;  %v2944_v51 = vld [vmem:[%s4828_s4 + $0x140] ss:$8 sps:$4 sm:$0xff]   ;;  %v2957_v60 = vld [vmem:[%s4828_s4 + $0x194] ss:$8 sps:$4 sm:$0xff]  }
  0x13   :  { %1014 = vmatpush1.bf16.msra.mxu0 %v2890_v9  ;;  %1429 = vmatpush1.bf16.msra.mxu1 %v2890_v9  ;;  %v2991_v48 = vld [vmem:[%s4830_s1 + $0xc] ss:$36 sps:$4 sm:$0xff]   ;;  %v2950_v55 = vld [vmem:[%s4828_s4 + $0x160] ss:$8 sps:$4 sm:$0xff]   ;;  %v3488_v0 = vld [vmem:[%s4828_s4 + $0x1b4] ss:$8 sps:$4 sm:$0xff]  }
  0x14   :  { %1015 = vmatprep.subr.bf16.mxu0 %v2891_v10  ;;  %1430 = vmatprep.subr.bf16.mxu1 %v2891_v10  ;;  %v2942_v50 = vld [vmem:[%s4828_s4 + $0x144] ss:$8 sps:$4 sm:$0xff]   ;;  %v2953_v57 = vld [vmem:[%s4828_s4 + $0x170] ss:$8 sps:$4 sm:$0xff]   ;;  %v2956_v59 = vld [vmem:[%s4828_s4 + $0x180] ss:$8 sps:$4 sm:$0xff]  }
  0x15   :  { %v2948_v54 = vld [vmem:[%s4828_s4 + $0x164] ss:$8 sps:$4 sm:$0xff]   ;;  %v2959_v61 = vld [vmem:[%s4828_s4 + $0x190] ss:$8 sps:$4 sm:$0xff]   ;;  %v3483_v63 = vld [vmem:[%s4828_s4 + $0x1a0] ss:$8 sps:$4 sm:$0xff]  }
  0x16   :  { %v2954_v58 = vld [vmem:[%s4828_s4 + $0x184] ss:$8 sps:$4 sm:$0xff]   ;;  %v3495_v1 = vld [vmem:[%s4828_s4 + $0x1b0] ss:$8 sps:$4 sm:$0xff]   ;;  %v3509_v3 = vld [vmem:[%s4828_s4 + $0x1c0] ss:$8 sps:$4 sm:$0xff]  }
  0x17   :  { %1016 = vmatpush1.bf16.msra.mxu0 %v2893_v11  ;;  %1431 = vmatpush1.bf16.msra.mxu1 %v2893_v11  ;;  %v2960_v62 = vld [vmem:[%s4828_s4 + $0x1a4] ss:$8 sps:$4 sm:$0xff]   ;;  %v3516_v4 = vld [vmem:[%s4828_s4 + $0x1d4] ss:$8 sps:$4 sm:$0xff]   ;;  %v3523_v5 = vld [vmem:[%s4828_s4 + $0x1d0] ss:$8 sps:$4 sm:$0xff]  }
  0x18   :  { %1017 = vmatprep.subr.bf16.mxu0 %v2894_v12  ;;  %1432 = vmatprep.subr.bf16.mxu1 %v2894_v12  ;;  %v3502_v2 = vld [vmem:[%s4828_s4 + $0x1c4] ss:$8 sps:$4 sm:$0xff]   ;;  %v3537_v7 = vld [vmem:[%s4828_s4 + $0x1e0] ss:$8 sps:$4 sm:$0xff]   ;;  %v3544_v8 = vld [vmem:[%s4828_s4 + $0x1f4] ss:$8 sps:$4 sm:$0xff]  }
  0x19   :  { %v3530_v6 = vld [vmem:[%s4828_s4 + $0x1e4] ss:$8 sps:$4 sm:$0xff]   ;;  %v3551_v9 = vld [vmem:[%s4828_s4 + $0x1f0] ss:$8 sps:$4 sm:$0xff]   ;;  %v3571_v13 = vld [vmem:[%s4828_s4 + $0x200] ss:$8 sps:$4 sm:$0xff]  }
  0x1a   :  { %v3558_v10 = vld [vmem:[%s4828_s4 + $0x204] ss:$8 sps:$4 sm:$0xff]   ;;  %v3036_v16 = vld [vmem:[%s4830_s1 + $0x54] ss:$36 sps:$4 sm:$0xff]  }
  0x1b   :  { %1018 = vmatpush1.bf16.msra.mxu0 %v2896_v14  ;;  %1433 = vmatpush1.bf16.msra.mxu1 %v2896_v14  ;;  %v2984_v11 = vld [vmem:[%s4829_s0 + $0x8] ss:$36 sps:$4 sm:$0xff]   ;;  %v3578_v14 = vld [vmem:[%s4828_s4 + $0x214] ss:$8 sps:$4 sm:$0xff]  }
  0x1c   :  { %1019 = vmatprep.subr.bf16.mxu0 %v2897_v15  ;;  %1434 = vmatprep.subr.bf16.mxu1 %v2897_v15  ;;  %v2989_v12 = vld [vmem:[%s4830_s1 + $0x8] ss:$36 sps:$4 sm:$0xff]   ;;  %v3032_v15 = vld [vmem:[%s4829_s0 + $0x54] ss:$36 sps:$4 sm:$0xff]  }
  0x1f   :  { %1020 = vmatpush1.bf16.msra.mxu0 %v2899_v17  ;;  %1435 = vmatpush1.bf16.msra.mxu1 %v2899_v17  ;;  %v3591_v17 = vld [vmem:[%s4828_s4 + $0x210] ss:$8 sps:$4 sm:$0xff]  }
  0x20   :  { %1021 = vmatprep.subr.bf16.mxu0 %v2900_v18  ;;  %1436 = vmatprep.subr.bf16.mxu1 %v2900_v18  ;;  %v3598_v18 = vld [vmem:[%s4828_s4 + $0x224] ss:$8 sps:$4 sm:$0xff]  }
  0x23   :  { %1022 = vmatpush1.bf16.msra.mxu0 %v2902_v19  ;;  %1437 = vmatpush1.bf16.msra.mxu1 %v2902_v19  ;;  %v3038_v19 = vld [vmem:[%s4829_s0 + $0x50] ss:$36 sps:$4 sm:$0xff]  }
  0x24   :  { %1023 = vmatprep.subr.bf16.mxu0 %v2903_v20  ;;  %1438 = vmatprep.subr.bf16.mxu1 %v2903_v20  ;;  %v3040_v20 = vld [vmem:[%s4830_s1 + $0x50] ss:$36 sps:$4 sm:$0xff]  }
  0x27   :  { %1024 = vmatpush1.bf16.msra.mxu0 %v2905_v21  ;;  %1439 = vmatpush1.bf16.msra.mxu1 %v2905_v21  ;;  %v3611_v21 = vld [vmem:[%s4828_s4 + $0x220] ss:$8 sps:$4 sm:$0xff]  }
  0x28   :  { %1025 = vmatprep.subr.bf16.mxu0 %v2906_v22  ;;  %1440 = vmatprep.subr.bf16.mxu1 %v2906_v22  ;;  %v3618_v22 = vld [vmem:[%s4828_s4 + $0x234] ss:$8 sps:$4 sm:$0xff]  }
  0x2b   :  { %1026 = vmatpush1.bf16.msra.mxu0 %v2908_v23  ;;  %1441 = vmatpush1.bf16.msra.mxu1 %v2908_v23  ;;  %v3046_v23 = vld [vmem:[%s4829_s0 + $0x14] ss:$36 sps:$4 sm:$0xff]  }
  0x2c   :  { %1027 = vmatprep.subr.bf16.mxu0 %v2909_v24  ;;  %1442 = vmatprep.subr.bf16.mxu1 %v2909_v24  ;;  %v3051_v24 = vld [vmem:[%s4830_s1 + $0x14] ss:$36 sps:$4 sm:$0xff]  }
  0x2f   :  { %1028 = vmatpush1.bf16.msra.mxu0 %v2911_v25  ;;  %1443 = vmatpush1.bf16.msra.mxu1 %v2911_v25  ;;  %v3631_v25 = vld [vmem:[%s4828_s4 + $0x230] ss:$8 sps:$4 sm:$0xff]  }
  0x30   :  { %1029 = vmatprep.subr.bf16.mxu0 %v2912_v26  ;;  %1444 = vmatprep.subr.bf16.mxu1 %v2912_v26  ;;  %v3638_v26 = vld [vmem:[%s4828_s4 + $0x244] ss:$8 sps:$4 sm:$0xff]  }
  0x33   :  { %1030 = vmatpush1.bf16.msra.mxu0 %v2914_v27  ;;  %1445 = vmatpush1.bf16.msra.mxu1 %v2914_v27  ;;  %v3645_v27 = vld [vmem:[%s4828_s4 + $0x240] ss:$8 sps:$4 sm:$0xff]  }
  0x34   :  { %1031 = vmatprep.subr.bf16.mxu0 %v2915_v28  ;;  %1446 = vmatprep.subr.bf16.mxu1 %v2915_v28  ;;  %v3652_v28 = vld [vmem:[%s4828_s4 + $0x254] ss:$8 sps:$4 sm:$0xff]  }
  0x37   :  { %1032 = vmatpush1.bf16.msra.mxu0 %v2917_v29  ;;  %1447 = vmatpush1.bf16.msra.mxu1 %v2917_v29  ;;  %v3659_v29 = vld [vmem:[%s4828_s4 + $0x250] ss:$8 sps:$4 sm:$0xff]  }
  0x38   :  { %1033 = vmatprep.subr.bf16.mxu0 %v2918_v30  ;;  %1448 = vmatprep.subr.bf16.mxu1 %v2918_v30  ;;  %v3666_v30 = vld [vmem:[%s4828_s4 + $0x264] ss:$8 sps:$4 sm:$0xff]  }
  0x3b   :  { %1034 = vmatpush1.bf16.msra.mxu0 %v2920_v31  ;;  %1449 = vmatpush1.bf16.msra.mxu1 %v2920_v31  ;;  %v3673_v31 = vld [vmem:[%s4828_s4 + $0x260] ss:$8 sps:$4 sm:$0xff]  }
  0x3c   :  { %1035 = vmatprep.subr.bf16.mxu0 %v2921_v32  ;;  %1450 = vmatprep.subr.bf16.mxu1 %v2921_v32  ;;  %v3680_v32 = vld [vmem:[%s4828_s4 + $0x274] ss:$8 sps:$4 sm:$0xff]  }
  0x3f   :  { %1036 = vmatpush1.bf16.msra.mxu0 %v2923_v33  ;;  %1451 = vmatpush1.bf16.msra.mxu1 %v2923_v33  ;;  %v3687_v33 = vld [vmem:[%s4828_s4 + $0x270] ss:$8 sps:$4 sm:$0xff]  }
  0x40   :  { %1058 = vmatprep.subr.bf16.mxu0 %v2927_v34  ;;  %1473 = vmatprep.subr.bf16.mxu1 %v2927_v34  ;;  %v3694_v34 = vld [vmem:[%s4828_s4 + $0x284] ss:$8 sps:$4 sm:$0xff]  }
  0x42   :  { %1038 = vmatmul.mubr.bf16.vlgmr.msra.gmra.mrb[0].mxu0 %v2924_v35  ;;  %1453 = vmatmul.mubr.bf16.vlgmr.msra.gmra.mrb[0].mxu1 %v2929_v36  ;;  %v3701_v35 = vld [vmem:[%s4828_s4 + $0x280] ss:$8 sps:$4 sm:$0xff]   ;;  %v3708_v36 = vld [vmem:[%s4828_s4 + $0x294] ss:$8 sps:$4 sm:$0xff]  }
  0x43   :  { %1059 = vmatpush1.bf16.msra.mxu0 %v2932_v37  ;;  %1474 = vmatpush1.bf16.msra.mxu1 %v2932_v37  ;;  %v3715_v37 = vld [vmem:[%s4828_s4 + $0x290] ss:$8 sps:$4 sm:$0xff]  }
  0x44   :  { %1060 = vmatprep.subr.bf16.mxu0 %v2933_v38  ;;  %1475 = vmatprep.subr.bf16.mxu1 %v2933_v38  ;;  %v3722_v38 = vld [vmem:[%s4828_s4 + $0x2a4] ss:$8 sps:$4 sm:$0xff]  }
  0x45   :  { %1047 = vmatprep.mubr.bf16.mxu0 %v2972_v39  ;;  %1462 = vmatprep.mubr.bf16.mxu1 %v2976_v40  ;;  %v3729_v39 = vld [vmem:[%s4828_s4 + $0x2a0] ss:$8 sps:$4 sm:$0xff]   ;;  %v3736_v40 = vld [vmem:[%s4828_s4 + $0x2b4] ss:$8 sps:$4 sm:$0xff]  }
  0x47   :  { %1061 = vmatpush1.bf16.msra.mxu0 %v2935_v41  ;;  %1476 = vmatpush1.bf16.msra.mxu1 %v2935_v41  ;;  %v3743_v41 = vld [vmem:[%s4828_s4 + $0x2b0] ss:$8 sps:$4 sm:$0xff]  }
  0x48   :  { %1062 = vmatprep.subr.bf16.mxu0 %v2936_v42  ;;  %1477 = vmatprep.subr.bf16.mxu1 %v2936_v42  ;;  %v3750_v42 = vld [vmem:[%s4828_s4 + $0x2c4] ss:$8 sps:$4 sm:$0xff]  }
  0x4a   :  { %1048 = vmatmul.mubr.bf16.gmra.mrb[4].mxu0 %v2978_v43  ;;  %1463 = vmatmul.mubr.bf16.gmra.mrb[4].mxu1 %v2980_v44  ;;  %v3757_v43 = vld [vmem:[%s4828_s4 + $0x2c0] ss:$8 sps:$4 sm:$0xff]   ;;  %v3764_v44 = vld [vmem:[%s4828_s4 + $0x2d4] ss:$8 sps:$4 sm:$0xff]  }
  0x4b   :  { %1063 = vmatpush1.bf16.msra.mxu0 %v2938_v45  ;;  %1478 = vmatpush1.bf16.msra.mxu1 %v2938_v45  ;;  %v3771_v45 = vld [vmem:[%s4828_s4 + $0x2d0] ss:$8 sps:$4 sm:$0xff]  }
  0x4c   :  { %1064 = vmatprep.subr.bf16.mxu0 %v2939_v46  ;;  %1479 = vmatprep.subr.bf16.mxu1 %v2939_v46  ;;  %v3778_v46 = vld [vmem:[%s4828_s4 + $0x2e4] ss:$8 sps:$4 sm:$0xff]  }
  0x4d   :  { %1090 = vmatprep.mubr.bf16.mxu0 %v2986_v47  ;;  %1505 = vmatprep.mubr.bf16.mxu1 %v2991_v48  ;;  %v3785_v47 = vld [vmem:[%s4828_s4 + $0x2e0] ss:$8 sps:$4 sm:$0xff]   ;;  %v3792_v48 = vld [vmem:[%s4828_s4 + $0x2f4] ss:$8 sps:$4 sm:$0xff]  }
  0x4f   :  { %1065 = vmatpush1.bf16.msra.mxu0 %v2941_v49  ;;  %1480 = vmatpush1.bf16.msra.mxu1 %v2941_v49  ;;  %v3799_v49 = vld [vmem:[%s4828_s4 + $0x2f0] ss:$8 sps:$4 sm:$0xff]  }
  0x50   :  { %1066 = vmatprep.subr.bf16.mxu0 %v2942_v50  ;;  %1481 = vmatprep.subr.bf16.mxu1 %v2942_v50  ;;  %v3806_v50 = vld [vmem:[%s4828_s4 + $0x304] ss:$8 sps:$4 sm:$0xff]  }
  0x53   :  { %1067 = vmatpush1.bf16.msra.mxu0 %v2944_v51  ;;  %1482 = vmatpush1.bf16.msra.mxu1 %v2944_v51  ;;  %v3044_v51 = vld [vmem:[%s4829_s0 + $0x10] ss:$36 sps:$4 sm:$0xff]  }
  0x54   :  { %1068 = vmatprep.subr.bf16.mxu0 %v2945_v52  ;;  %1483 = vmatprep.subr.bf16.mxu1 %v2945_v52  ;;  %v3049_v52 = vld [vmem:[%s4830_s1 + $0x10] ss:$36 sps:$4 sm:$0xff]  }
  0x57   :  { %1069 = vmatpush1.bf16.msra.mxu0 %v2947_v53  ;;  %1484 = vmatpush1.bf16.msra.mxu1 %v2947_v53  ;;  %v3819_v53 = vld [vmem:[%s4828_s4 + $0x300] ss:$8 sps:$4 sm:$0xff]  }
  0x58   :  { %1070 = vmatprep.subr.bf16.mxu0 %v2948_v54  ;;  %1485 = vmatprep.subr.bf16.mxu1 %v2948_v54  ;;  %v3826_v54 = vld [vmem:[%s4828_s4 + $0x314] ss:$8 sps:$4 sm:$0xff]  }
  0x5b   :  { %1071 = vmatpush1.bf16.msra.mxu0 %v2950_v55  ;;  %1486 = vmatpush1.bf16.msra.mxu1 %v2950_v55  ;;  %v3092_v55 = vld [vmem:[%s4829_s0 + $0x5c] ss:$36 sps:$4 sm:$0xff]  }
  0x5c   :  { %1072 = vmatprep.subr.bf16.mxu0 %v2951_v56  ;;  %1487 = vmatprep.subr.bf16.mxu1 %v2951_v56  ;;  %v3096_v56 = vld [vmem:[%s4830_s1 + $0x5c] ss:$36 sps:$4 sm:$0xff]  }
  0x5f   :  { %1073 = vmatpush1.bf16.msra.mxu0 %v2953_v57  ;;  %1488 = vmatpush1.bf16.msra.mxu1 %v2953_v57  ;;  %v3839_v57 = vld [vmem:[%s4828_s4 + $0x310] ss:$8 sps:$4 sm:$0xff]  }
  0x60   :  { %1074 = vmatprep.subr.bf16.mxu0 %v2954_v58  ;;  %1489 = vmatprep.subr.bf16.mxu1 %v2954_v58  ;;  %v3846_v58 = vld [vmem:[%s4828_s4 + $0x324] ss:$8 sps:$4 sm:$0xff]  }
  0x63   :  { %1075 = vmatpush1.bf16.msra.mxu0 %v2956_v59  ;;  %1490 = vmatpush1.bf16.msra.mxu1 %v2956_v59  ;;  %v3098_v59 = vld [vmem:[%s4829_s0 + $0x58] ss:$36 sps:$4 sm:$0xff]  }
  0x64   :  { %1076 = vmatprep.subr.bf16.mxu0 %v2957_v60  ;;  %1491 = vmatprep.subr.bf16.mxu1 %v2957_v60  ;;  %v3100_v60 = vld [vmem:[%s4830_s1 + $0x58] ss:$36 sps:$4 sm:$0xff]  }
  0x67   :  { %1077 = vmatpush1.bf16.msra.mxu0 %v2959_v61  ;;  %1492 = vmatpush1.bf16.msra.mxu1 %v2959_v61  ;;  %v3859_v61 = vld [vmem:[%s4828_s4 + $0x320] ss:$8 sps:$4 sm:$0xff]  }
  0x68   :  { %1078 = vmatprep.subr.bf16.mxu0 %v2960_v62  ;;  %1493 = vmatprep.subr.bf16.mxu1 %v2960_v62  ;;  %v3866_v62 = vld [vmem:[%s4828_s4 + $0x334] ss:$8 sps:$4 sm:$0xff]  }
  0x6b   :  { %1079 = vmatpush1.bf16.msra.mxu0 %v3483_v63  ;;  %1494 = vmatpush1.bf16.msra.mxu1 %v3483_v63 }
  0x6c   :  { %1080 = vmatprep.subr.bf16.mxu0 %v3488_v0  ;;  %1495 = vmatprep.subr.bf16.mxu1 %v3488_v0 }
  0x6f   :  { %1081 = vmatpush1.bf16.msra.mxu0 %v3495_v1  ;;  %1496 = vmatpush1.bf16.msra.mxu1 %v3495_v1 }
  0x70   :  { %1082 = vmatprep.subr.bf16.mxu0 %v3502_v2  ;;  %1497 = vmatprep.subr.bf16.mxu1 %v3502_v2 }
  0x73   :  { %1083 = vmatpush1.bf16.msra.mxu0 %v3509_v3  ;;  %1498 = vmatpush1.bf16.msra.mxu1 %v3509_v3 }
  0x74   :  { %1084 = vmatprep.subr.bf16.mxu0 %v3516_v4  ;;  %1499 = vmatprep.subr.bf16.mxu1 %v3516_v4 }
  0x77   :  { %1085 = vmatpush1.bf16.msra.mxu0 %v3523_v5  ;;  %1500 = vmatpush1.bf16.msra.mxu1 %v3523_v5 }
  0x78   :  { %1086 = vmatprep.subr.bf16.mxu0 %v3530_v6  ;;  %1501 = vmatprep.subr.bf16.mxu1 %v3530_v6 }
  0x7b   :  { %1087 = vmatpush1.bf16.msra.mxu0 %v3537_v7  ;;  %1502 = vmatpush1.bf16.msra.mxu1 %v3537_v7 }
  0x7c   :  { %1088 = vmatprep.subr.bf16.mxu0 %v3544_v8  ;;  %1503 = vmatprep.subr.bf16.mxu1 %v3544_v8 }
  0x7f   :  { %1089 = vmatpush1.bf16.msra.mxu0 %v3551_v9  ;;  %1504 = vmatpush1.bf16.msra.mxu1 %v3551_v9 }
  0x80   :  { %1111 = vmatprep.subr.bf16.mxu0 %v3558_v10  ;;  %1526 = vmatprep.subr.bf16.mxu1 %v3558_v10 }
  0x82   :  { %1091 = vmatmul.mubr.bf16.vlgmr.msra.gmra.mrb[0].mxu0 %v2984_v11  ;;  %1506 = vmatmul.mubr.bf16.vlgmr.msra.gmra.mrb[0].mxu1 %v2989_v12  ;;  %v3106_v11 = vld [vmem:[%s4829_s0 + $0x1c] ss:$36 sps:$4 sm:$0xff]  }
  0x83   :  { %1112 = vmatpush1.bf16.msra.mxu0 %v3571_v13  ;;  %1527 = vmatpush1.bf16.msra.mxu1 %v3571_v13  ;;  %v3111_v12 = vld [vmem:[%s4830_s1 + $0x1c] ss:$36 sps:$4 sm:$0xff]  }
  0x84   :  { %1113 = vmatprep.subr.bf16.mxu0 %v3578_v14  ;;  %1528 = vmatprep.subr.bf16.mxu1 %v3578_v14 }
  0x85   :  { %1100 = vmatprep.mubr.bf16.mxu0 %v3032_v15  ;;  %1515 = vmatprep.mubr.bf16.mxu1 %v3036_v16  ;;  %v3879_v15 = vld [vmem:[%s4828_s4 + $0x330] ss:$8 sps:$4 sm:$0xff]   ;;  %v3886_v16 = vld [vmem:[%s4828_s4 + $0x344] ss:$8 sps:$4 sm:$0xff]  }
  0x87   :  { %1114 = vmatpush1.bf16.msra.mxu0 %v3591_v17  ;;  %1529 = vmatpush1.bf16.msra.mxu1 %v3591_v17 }
  0x88   :  { %1115 = vmatprep.subr.bf16.mxu0 %v3598_v18  ;;  %1530 = vmatprep.subr.bf16.mxu1 %v3598_v18 }
  0x8a   :  { %1101 = vmatmul.mubr.bf16.gmra.mrb[4].mxu0 %v3038_v19  ;;  %1516 = vmatmul.mubr.bf16.gmra.mrb[4].mxu1 %v3040_v20  ;;  %v3893_v19 = vld [vmem:[%s4828_s4 + $0x340] ss:$8 sps:$4 sm:$0xff]   ;;  %v3900_v20 = vld [vmem:[%s4828_s4 + $0x354] ss:$8 sps:$4 sm:$0xff]  }
  0x8b   :  { %1116 = vmatpush1.bf16.msra.mxu0 %v3611_v21  ;;  %1531 = vmatpush1.bf16.msra.mxu1 %v3611_v21 }
  0x8c   :  { %1117 = vmatprep.subr.bf16.mxu0 %v3618_v22  ;;  %1532 = vmatprep.subr.bf16.mxu1 %v3618_v22 }
  0x8d   :  { %1143 = vmatprep.mubr.bf16.mxu0 %v3046_v23  ;;  %1558 = vmatprep.mubr.bf16.mxu1 %v3051_v24  ;;  %v3907_v23 = vld [vmem:[%s4828_s4 + $0x350] ss:$8 sps:$4 sm:$0xff]   ;;  %v3914_v24 = vld [vmem:[%s4828_s4 + $0x364] ss:$8 sps:$4 sm:$0xff]  }
  0x8f   :  { %1118 = vmatpush1.bf16.msra.mxu0 %v3631_v25  ;;  %1533 = vmatpush1.bf16.msra.mxu1 %v3631_v25 }
  0x90   :  { %1119 = vmatprep.subr.bf16.mxu0 %v3638_v26  ;;  %1534 = vmatprep.subr.bf16.mxu1 %v3638_v26 }
  0x93   :  { %1120 = vmatpush1.bf16.msra.mxu0 %v3645_v27  ;;  %1535 = vmatpush1.bf16.msra.mxu1 %v3645_v27 }
  0x94   :  { %1121 = vmatprep.subr.bf16.mxu0 %v3652_v28  ;;  %1536 = vmatprep.subr.bf16.mxu1 %v3652_v28 }
  0x97   :  { %1122 = vmatpush1.bf16.msra.mxu0 %v3659_v29  ;;  %1537 = vmatpush1.bf16.msra.mxu1 %v3659_v29 }
  0x98   :  { %1123 = vmatprep.subr.bf16.mxu0 %v3666_v30  ;;  %1538 = vmatprep.subr.bf16.mxu1 %v3666_v30 }
  0x9b   :  { %1124 = vmatpush1.bf16.msra.mxu0 %v3673_v31  ;;  %1539 = vmatpush1.bf16.msra.mxu1 %v3673_v31 }
  0x9c   :  { %1125 = vmatprep.subr.bf16.mxu0 %v3680_v32  ;;  %1540 = vmatprep.subr.bf16.mxu1 %v3680_v32 }
  0x9f   :  { %1126 = vmatpush1.bf16.msra.mxu0 %v3687_v33  ;;  %1541 = vmatpush1.bf16.msra.mxu1 %v3687_v33 }
  0xa0   :  { %1127 = vmatprep.subr.bf16.mxu0 %v3694_v34  ;;  %1542 = vmatprep.subr.bf16.mxu1 %v3694_v34 }
  0xa3   :  { %1128 = vmatpush1.bf16.msra.mxu0 %v3701_v35  ;;  %1543 = vmatpush1.bf16.msra.mxu1 %v3701_v35 }
  0xa4   :  { %1129 = vmatprep.subr.bf16.mxu0 %v3708_v36  ;;  %1544 = vmatprep.subr.bf16.mxu1 %v3708_v36 }
  0xa7   :  { %1130 = vmatpush1.bf16.msra.mxu0 %v3715_v37  ;;  %1545 = vmatpush1.bf16.msra.mxu1 %v3715_v37 }
  0xa8   :  { %1131 = vmatprep.subr.bf16.mxu0 %v3722_v38  ;;  %1546 = vmatprep.subr.bf16.mxu1 %v3722_v38 }
  0xab   :  { %1132 = vmatpush1.bf16.msra.mxu0 %v3729_v39  ;;  %1547 = vmatpush1.bf16.msra.mxu1 %v3729_v39 }
  0xac   :  { %1133 = vmatprep.subr.bf16.mxu0 %v3736_v40  ;;  %1548 = vmatprep.subr.bf16.mxu1 %v3736_v40 }
  0xaf   :  { %1134 = vmatpush1.bf16.msra.mxu0 %v3743_v41  ;;  %1549 = vmatpush1.bf16.msra.mxu1 %v3743_v41 }
  0xb0   :  { %1135 = vmatprep.subr.bf16.mxu0 %v3750_v42  ;;  %1550 = vmatprep.subr.bf16.mxu1 %v3750_v42 }
  0xb3   :  { %1136 = vmatpush1.bf16.msra.mxu0 %v3757_v43  ;;  %1551 = vmatpush1.bf16.msra.mxu1 %v3757_v43 }
  0xb4   :  { %1137 = vmatprep.subr.bf16.mxu0 %v3764_v44  ;;  %1552 = vmatprep.subr.bf16.mxu1 %v3764_v44 }
  0xb7   :  { %1138 = vmatpush1.bf16.msra.mxu0 %v3771_v45  ;;  %1553 = vmatpush1.bf16.msra.mxu1 %v3771_v45 }
  0xb8   :  { %1139 = vmatprep.subr.bf16.mxu0 %v3778_v46  ;;  %1554 = vmatprep.subr.bf16.mxu1 %v3778_v46 }
  0xbb   :  { %1140 = vmatpush1.bf16.msra.mxu0 %v3785_v47  ;;  %1555 = vmatpush1.bf16.msra.mxu1 %v3785_v47 }
  0xbc   :  { %1141 = vmatprep.subr.bf16.mxu0 %v3792_v48  ;;  %1556 = vmatprep.subr.bf16.mxu1 %v3792_v48 }
  0xbf   :  { %1142 = vmatpush1.bf16.msra.mxu0 %v3799_v49  ;;  %1557 = vmatpush1.bf16.msra.mxu1 %v3799_v49 }
  0xc0   :  { %1164 = vmatprep.subr.bf16.mxu0 %v3806_v50  ;;  %1579 = vmatprep.subr.bf16.mxu1 %v3806_v50 }
  0xc2   :  { %1144 = vmatmul.mubr.bf16.vlgmr.msra.gmra.mrb[0].mxu0 %v3044_v51  ;;  %1559 = vmatmul.mubr.bf16.vlgmr.msra.gmra.mrb[0].mxu1 %v3049_v52  ;;  %v3921_v51 = vld [vmem:[%s4828_s4 + $0x360] ss:$8 sps:$4 sm:$0xff]   ;;  %v3928_v52 = vld [vmem:[%s4828_s4 + $0x374] ss:$8 sps:$4 sm:$0xff]  }
  0xc3   :  { %1165 = vmatpush1.bf16.msra.mxu0 %v3819_v53  ;;  %1580 = vmatpush1.bf16.msra.mxu1 %v3819_v53  ;;  %4907 = vst [vmem:[#allocation2_spill] sm:$0xff] %v3921_v51  ;;  %4908 = vst [vmem:[#allocation3_spill] sm:$0xff] %v3928_v52 }
  0xc4   :  { %1166 = vmatprep.subr.bf16.mxu0 %v3826_v54  ;;  %1581 = vmatprep.subr.bf16.mxu1 %v3826_v54 }
  0xc5   :  { %1153 = vmatprep.mubr.bf16.mxu0 %v3092_v55  ;;  %1568 = vmatprep.mubr.bf16.mxu1 %v3096_v56  ;;  %v3935_v55 = vld [vmem:[%s4828_s4 + $0x370] ss:$8 sps:$4 sm:$0xff]   ;;  %v3942_v56 = vld [vmem:[%s4828_s4 + $0x384] ss:$8 sps:$4 sm:$0xff]  }
  0xc6   :  { %4909 = vst [vmem:[#allocation4_spill] sm:$0xff] %v3935_v55  ;;  %4910 = vst [vmem:[#allocation5_spill] sm:$0xff] %v3942_v56 }
  0xc7   :  { %1167 = vmatpush1.bf16.msra.mxu0 %v3839_v57  ;;  %1582 = vmatpush1.bf16.msra.mxu1 %v3839_v57 }
  0xc8   :  { %1168 = vmatprep.subr.bf16.mxu0 %v3846_v58  ;;  %1583 = vmatprep.subr.bf16.mxu1 %v3846_v58 }
  0xca   :  { %1154 = vmatmul.mubr.bf16.gmra.mrb[4].mxu0 %v3098_v59  ;;  %1569 = vmatmul.mubr.bf16.gmra.mrb[4].mxu1 %v3100_v60  ;;  %v3949_v59 = vld [vmem:[%s4828_s4 + $0x380] ss:$8 sps:$4 sm:$0xff]   ;;  %v3956_v60 = vld [vmem:[%s4828_s4 + $0x394] ss:$8 sps:$4 sm:$0xff]  }
  0xcb   :  { %1169 = vmatpush1.bf16.msra.mxu0 %v3859_v61  ;;  %1584 = vmatpush1.bf16.msra.mxu1 %v3859_v61  ;;  %4911 = vst [vmem:[#allocation6_spill] sm:$0xff] %v3949_v59  ;;  %4912 = vst [vmem:[#allocation7_spill] sm:$0xff] %v3956_v60 }
  0xcc   :  { %1170 = vmatprep.subr.bf16.mxu0 %v3866_v62  ;;  %1585 = vmatprep.subr.bf16.mxu1 %v3866_v62 }
  0xcd   :  { %1196 = vmatprep.mubr.bf16.mxu0 %v3106_v11  ;;  %1611 = vmatprep.mubr.bf16.mxu1 %v3111_v12  ;;  %v3961_v11 = vld [vmem:[%s4828_s4 + $0x390] ss:$8 sps:$4 sm:$0xff]   ;;  %v3966_v12 = vld [vmem:[%s4828_s4 + $0x3a4] ss:$8 sps:$4 sm:$0xff]  }
  0xce   :  { %4913 = vst [vmem:[#allocation8_spill] sm:$0xff] %v3961_v11  ;;  %4914 = vst [vmem:[#allocation9_spill] sm:$0xff] %v3966_v12 }
  0xcf   :  { %1171 = vmatpush1.bf16.msra.mxu0 %v3879_v15  ;;  %1586 = vmatpush1.bf16.msra.mxu1 %v3879_v15 }
  0xd0   :  { %1172 = vmatprep.subr.bf16.mxu0 %v3886_v16  ;;  %1587 = vmatprep.subr.bf16.mxu1 %v3886_v16 }
  0xd3   :  { %1173 = vmatpush1.bf16.msra.mxu0 %v3893_v19  ;;  %1588 = vmatpush1.bf16.msra.mxu1 %v3893_v19 }
  0xd4   :  { %1174 = vmatprep.subr.bf16.mxu0 %v3900_v20  ;;  %1589 = vmatprep.subr.bf16.mxu1 %v3900_v20 }
  0xd7   :  { %1175 = vmatpush1.bf16.msra.mxu0 %v3907_v23  ;;  %1590 = vmatpush1.bf16.msra.mxu1 %v3907_v23 }
  0xd8   :  { %1176 = vmatprep.subr.bf16.mxu0 %v3914_v24  ;;  %1591 = vmatprep.subr.bf16.mxu1 %v3914_v24 }
  0xdb   :  { %1177 = vmatpush1.bf16.msra.mxu0 %v3921_v51  ;;  %1592 = vmatpush1.bf16.msra.mxu1 %v3921_v51  ;;  %v4094_v51 = vld [vmem:[%s4828_s4 + $0x424] ss:$8 sps:$4 sm:$0xff]  }
  0xdc   :  { %1178 = vmatprep.subr.bf16.mxu0 %v3928_v52  ;;  %1593 = vmatprep.subr.bf16.mxu1 %v3928_v52  ;;  %v3128_v52 = vld [vmem:[%s4829_s0 + $0x64] ss:$36 sps:$4 sm:$0xff]   ;;  %4929 = vst [vmem:[#allocation24_spill] sm:$0xff] %v4094_v51 }
  0xdf   :  { %1179 = vmatpush1.bf16.msra.mxu0 %v3935_v55  ;;  %1594 = vmatpush1.bf16.msra.mxu1 %v3935_v55  ;;  %v3980_v55 = vld [vmem:[%s4828_s4 + $0x3b4] ss:$8 sps:$4 sm:$0xff]  }
  0xe0   :  { %1180 = vmatprep.subr.bf16.mxu0 %v3942_v56  ;;  %1595 = vmatprep.subr.bf16.mxu1 %v3942_v56  ;;  %v3975_v56 = vld [vmem:[%s4828_s4 + $0x3a0] ss:$8 sps:$4 sm:$0xff]   ;;  %4916 = vst [vmem:[#allocation11_spill] sm:$0xff] %v3980_v55 }
  0xe1   :  { %4915 = vst [vmem:[#allocation10_spill] sm:$0xff] %v3975_v56 }
  0xe3   :  { %1181 = vmatpush1.bf16.msra.mxu0 %v3949_v59  ;;  %1596 = vmatpush1.bf16.msra.mxu1 %v3949_v59  ;;  %v3994_v59 = vld [vmem:[%s4828_s4 + $0x3c4] ss:$8 sps:$4 sm:$0xff]  }
  0xe4   :  { %1182 = vmatprep.subr.bf16.mxu0 %v3956_v60  ;;  %1597 = vmatprep.subr.bf16.mxu1 %v3956_v60  ;;  %v3989_v60 = vld [vmem:[%s4828_s4 + $0x3b0] ss:$8 sps:$4 sm:$0xff]   ;;  %4918 = vst [vmem:[#allocation13_spill] sm:$0xff] %v3994_v59 }
  0xe5   :  { %4917 = vst [vmem:[#allocation12_spill] sm:$0xff] %v3989_v60 }
  0xe7   :  { %1183 = vmatpush1.bf16.msra.mxu0 %v3961_v11  ;;  %1598 = vmatpush1.bf16.msra.mxu1 %v3961_v11  ;;  %v4074_v11 = vld [vmem:[%s4828_s4 + $0x414] ss:$8 sps:$4 sm:$0xff]  }
  0xe8   :  { %1184 = vmatprep.subr.bf16.mxu0 %v3966_v12  ;;  %1599 = vmatprep.subr.bf16.mxu1 %v3966_v12  ;;  %v4005_v12 = vld [vmem:[%s4828_s4 + $0x3c0] ss:$8 sps:$4 sm:$0xff]   ;;  %4927 = vst [vmem:[#allocation22_spill] sm:$0xff] %v4074_v11 }
  0xe9   :  { %4919 = vst [vmem:[#allocation14_spill] sm:$0xff] %v4005_v12 }
  0xeb   :  { %1185 = vmatpush1.bf16.msra.mxu0 %v3975_v56  ;;  %1600 = vmatpush1.bf16.msra.mxu1 %v3975_v56  ;;  %v4012_v56 = vld [vmem:[%s4828_s4 + $0x3d4] ss:$8 sps:$4 sm:$0xff]  }
  0xec   :  { %1186 = vmatprep.subr.bf16.mxu0 %v3980_v55  ;;  %1601 = vmatprep.subr.bf16.mxu1 %v3980_v55  ;;  %4920 = vst [vmem:[#allocation15_spill] sm:$0xff] %v4012_v56  ;;  %v3104_v55 = vld [vmem:[%s4829_s0 + $0x18] ss:$36 sps:$4 sm:$0xff]  }
  0xef   :  { %1187 = vmatpush1.bf16.msra.mxu0 %v3989_v60  ;;  %1602 = vmatpush1.bf16.msra.mxu1 %v3989_v60  ;;  %v4019_v60 = vld [vmem:[%s4828_s4 + $0x3d0] ss:$8 sps:$4 sm:$0xff]  }
  0xf0   :  { %1188 = vmatprep.subr.bf16.mxu0 %v3994_v59  ;;  %1603 = vmatprep.subr.bf16.mxu1 %v3994_v59  ;;  %4921 = vst [vmem:[#allocation16_spill] sm:$0xff] %v4019_v60  ;;  %v4026_v59 = vld [vmem:[%s4828_s4 + $0x3e4] ss:$8 sps:$4 sm:$0xff]  }
  0xf1   :  { %4922 = vst [vmem:[#allocation17_spill] sm:$0xff] %v4026_v59 }
  0xf3   :  { %1189 = vmatpush1.bf16.msra.mxu0 %v4005_v12  ;;  %1604 = vmatpush1.bf16.msra.mxu1 %v4005_v12  ;;  %v4033_v12 = vld [vmem:[%s4828_s4 + $0x3e0] ss:$8 sps:$4 sm:$0xff]  }
  0xf4   :  { %1190 = vmatprep.subr.bf16.mxu0 %v4012_v56  ;;  %1605 = vmatprep.subr.bf16.mxu1 %v4012_v56  ;;  %4923 = vst [vmem:[#allocation18_spill] sm:$0xff] %v4033_v12  ;;  %v4040_v56 = vld [vmem:[%s4828_s4 + $0x3f4] ss:$8 sps:$4 sm:$0xff]  }
  0xf5   :  { %4924 = vst [vmem:[#allocation19_spill] sm:$0xff] %v4040_v56 }
  0xf7   :  { %1191 = vmatpush1.bf16.msra.mxu0 %v4019_v60  ;;  %1606 = vmatpush1.bf16.msra.mxu1 %v4019_v60  ;;  %v4047_v60 = vld [vmem:[%s4828_s4 + $0x3f0] ss:$8 sps:$4 sm:$0xff]  }
  0xf8   :  { %1192 = vmatprep.subr.bf16.mxu0 %v4026_v59  ;;  %1607 = vmatprep.subr.bf16.mxu1 %v4026_v59  ;;  %4925 = vst [vmem:[#allocation20_spill] sm:$0xff] %v4047_v60  ;;  %v4054_v59 = vld [vmem:[%s4828_s4 + $0x404] ss:$8 sps:$4 sm:$0xff]  }
  0xf9   :  { %4926 = vst [vmem:[#allocation21_spill] sm:$0xff] %v4054_v59 }
  0xfb   :  { %1193 = vmatpush1.bf16.msra.mxu0 %v4033_v12  ;;  %1608 = vmatpush1.bf16.msra.mxu1 %v4033_v12  ;;  %v3109_v12 = vld [vmem:[%s4830_s1 + $0x18] ss:$36 sps:$4 sm:$0xff]  }
  0xfc   :  { %1194 = vmatprep.subr.bf16.mxu0 %v4040_v56  ;;  %1609 = vmatprep.subr.bf16.mxu1 %v4040_v56  ;;  %v4067_v56 = vld [vmem:[%s4828_s4 + $0x400] ss:$8 sps:$4 sm:$0xff]  }
  0xff   :  { %1195 = vmatpush1.bf16.msra.mxu0 %v4047_v60  ;;  %1610 = vmatpush1.bf16.msra.mxu1 %v4047_v60  ;;  %v3130_v60 = vld [vmem:[%s4830_s1 + $0x64] ss:$36 sps:$4 sm:$0xff]  }
 0x100   :  { %1217 = vmatprep.subr.bf16.mxu0 %v4054_v59  ;;  %1632 = vmatprep.subr.bf16.mxu1 %v4054_v59  ;;  %v4087_v59 = vld [vmem:[%s4828_s4 + $0x410] ss:$8 sps:$4 sm:$0xff]  }
 0x101   :  { %4928 = vst [vmem:[#allocation23_spill] sm:$0xff] %v4087_v59 }
 0x102   :  { %1197 = vmatmul.mubr.bf16.vlgmr.msra.gmra.mrb[0].mxu0 %v3104_v55  ;;  %1612 = vmatmul.mubr.bf16.vlgmr.msra.gmra.mrb[0].mxu1 %v3109_v12  ;;  %v3132_v55 = vld [vmem:[%s4829_s0 + $0x60] ss:$36 sps:$4 sm:$0xff]  }
 0x103   :  { %1218 = vmatpush1.bf16.msra.mxu0 %v4067_v56  ;;  %1633 = vmatpush1.bf16.msra.mxu1 %v4067_v56  ;;  %v3135_v12 = vld [vmem:[%s4830_s1 + $0x60] ss:$36 sps:$4 sm:$0xff]  }
 0x104   :  { %1219 = vmatprep.subr.bf16.mxu0 %v4074_v11  ;;  %1634 = vmatprep.subr.bf16.mxu1 %v4074_v11  ;;  %v4107_v11 = vld [vmem:[%s4828_s4 + $0x420] ss:$8 sps:$4 sm:$0xff]  }
 0x105   :  { %1206 = vmatprep.mubr.bf16.mxu0 %v3128_v52  ;;  %1621 = vmatprep.mubr.bf16.mxu1 %v3130_v60  ;;  %4930 = vst [vmem:[#allocation25_spill] sm:$0xff] %v4107_v11  ;;  %v4114_v52 = vld [vmem:[%s4828_s4 + $0x434] ss:$8 sps:$4 sm:$0xff]   ;;  %v4121_v60 = vld [vmem:[%s4828_s4 + $0x430] ss:$8 sps:$4 sm:$0xff]  }
 0x106   :  { %4931 = vst [vmem:[#allocation26_spill] sm:$0xff] %v4114_v52  ;;  %4932 = vst [vmem:[#allocation27_spill] sm:$0xff] %v4121_v60 }
 0x107   :  { %1220 = vmatpush1.bf16.msra.mxu0 %v4087_v59  ;;  %1635 = vmatpush1.bf16.msra.mxu1 %v4087_v59  ;;  %v3203_v59 = vld [vmem:[%s4828_s4 + $0x30] ss:$8 sps:$4 sm:$0xff]  }
 0x108   :  { %1221 = vmatprep.subr.bf16.mxu0 %v4094_v51  ;;  %1636 = vmatprep.subr.bf16.mxu1 %v4094_v51  ;;  %v4128_v51 = vld [vmem:[%s4828_s4 + $0x444] ss:$8 sps:$4 sm:$0xff]  }
 0x109   :  { %4933 = vst [vmem:[#allocation28_spill] sm:$0xff] %v4128_v51 }
 0x10a   :  { %1207 = vmatmul.mubr.bf16.gmra.mrb[4].mxu0 %v3132_v55  ;;  %1622 = vmatmul.mubr.bf16.gmra.mrb[4].mxu1 %v3135_v12  ;;  %v4882_v55 = vmov 0   ;;  %v4137_v12 = vld [vmem:[%s4828_s4 + $0x440] ss:$8 sps:$4 sm:$0xff]  }
 0x10b   :  { %1222 = vmatpush1.bf16.msra.mxu0 %v4107_v11  ;;  %1637 = vmatpush1.bf16.msra.mxu1 %v4107_v11  ;;  %4934 = vst [vmem:[#allocation29_spill] sm:$0xff] %v4137_v12  ;;  %v3198_v11 = vld [vmem:[%s4828_s4 + $0x14] ss:$8 sps:$4 sm:$0xff]  }
 0x10c   :  { %1223 = vmatprep.subr.bf16.mxu0 %v4114_v52  ;;  %1638 = vmatprep.subr.bf16.mxu1 %v4114_v52  ;;  %v4144_v52 = vld [vmem:[%s4828_s4 + $0x454] ss:$8 sps:$4 sm:$0xff]  }
 0x10d   :  { %1249 = vmatprep.mubr.bf16.mxu0 %v4882_v55  ;;  %1664 = vmatprep.mubr.bf16.mxu1 %v4882_v55  ;;  %4935 = vst [vmem:[#allocation30_spill] sm:$0xff] %v4144_v52  ;;  %v4151_v55 = vld [vmem:[%s4828_s4 + $0x450] ss:$8 sps:$4 sm:$0xff]  }
 0x10e   :  { %4936 = vst [vmem:[#allocation31_spill] sm:$0xff] %v4151_v55 }
 0x10f   :  { %1224 = vmatpush1.bf16.msra.mxu0 %v4121_v60  ;;  %1639 = vmatpush1.bf16.msra.mxu1 %v4121_v60  ;;  %v3141_v60 = vld [vmem:[%s4830_s1 + $0x20] ss:$36 sps:$4 sm:$0xff]  }
 0x110   :  { %1225 = vmatprep.subr.bf16.mxu0 %v4128_v51  ;;  %1640 = vmatprep.subr.bf16.mxu1 %v4128_v51  ;;  %v4158_v51 = vld [vmem:[%s4828_s4 + $0x464] ss:$8 sps:$4 sm:$0xff]  }
 0x111   :  { %4937 = vst [vmem:[#allocation32_spill] sm:$0xff] %v4158_v51 }
 0x113   :  { %1226 = vmatpush1.bf16.msra.mxu0 %v4137_v12  ;;  %1641 = vmatpush1.bf16.msra.mxu1 %v4137_v12  ;;  %v4165_v12 = vld [vmem:[%s4828_s4 + $0x460] ss:$8 sps:$4 sm:$0xff]  }
 0x114   :  { %1227 = vmatprep.subr.bf16.mxu0 %v4144_v52  ;;  %1642 = vmatprep.subr.bf16.mxu1 %v4144_v52  ;;  %4938 = vst [vmem:[#allocation33_spill] sm:$0xff] %v4165_v12  ;;  %v4172_v52 = vld [vmem:[%s4828_s4 + $0x474] ss:$8 sps:$4 sm:$0xff]  }
 0x115   :  { %4939 = vst [vmem:[#allocation34_spill] sm:$0xff] %v4172_v52 }
 0x117   :  { %1228 = vmatpush1.bf16.msra.mxu0 %v4151_v55  ;;  %1643 = vmatpush1.bf16.msra.mxu1 %v4151_v55  ;;  %v4179_v55 = vld [vmem:[%s4828_s4 + $0x470] ss:$8 sps:$4 sm:$0xff]  }
 0x118   :  { %1229 = vmatprep.subr.bf16.mxu0 %v4158_v51  ;;  %1644 = vmatprep.subr.bf16.mxu1 %v4158_v51  ;;  %4940 = vst [vmem:[#allocation35_spill] sm:$0xff] %v4179_v55  ;;  %v3140_v51 = vld [vmem:[%s4829_s0 + $0x20] ss:$36 sps:$4 sm:$0xff]  }
 0x11b   :  { %1230 = vmatpush1.bf16.msra.mxu0 %v4165_v12  ;;  %1645 = vmatpush1.bf16.msra.mxu1 %v4165_v12  ;;  %v3196_v12 = vld [vmem:[%s4828_s4 + $0x4] ss:$8 sps:$4 sm:$0xff]  }
 0x11c   :  { %1231 = vmatprep.subr.bf16.mxu0 %v4172_v52  ;;  %1646 = vmatprep.subr.bf16.mxu1 %v4172_v52  ;;  %v3197_v52 = vld [vmem:[%s4828_s4] ss:$8 sps:$4 sm:$0xff]  }
 0x11f   :  { %1232 = vmatpush1.bf16.msra.mxu0 %v4179_v55  ;;  %1647 = vmatpush1.bf16.msra.mxu1 %v4179_v55  ;;  %v4941_v55 = vmov 0  }
 0x120   :  { %1821 = vmatprep.subr.bf16.mxu0 %v3196_v12  ;;  %2222 = vmatprep.subr.bf16.mxu1 %v3196_v12  ;;  %v3146_v12 = vld [vmem:[%s4831_s2 + $0x4] ss:$36 sps:$4 sm:$0xff]  }
 0x122   :  { %1250 = vmatmul.mubr.bf16.vlgmr.msra.gmra.mrb[0].mxu0 %v3140_v51  ;;  %1665 = vmatmul.mubr.bf16.vlgmr.msra.gmra.mrb[0].mxu1 %v3141_v60  ;;  %v3142_v51 = vld [vmem:[%s4829_s0 + $0x68] ss:$36 sps:$4 sm:$0xff]  }
 0x123   :  { %1822 = vmatpush1.bf16.msra.mxu0 %v3197_v52  ;;  %2223 = vmatpush1.bf16.msra.mxu1 %v3197_v52  ;;  %v3143_v60 = vld [vmem:[%s4830_s1 + $0x68] ss:$36 sps:$4 sm:$0xff]   ;;  %v3199_v52 = vld [vmem:[%s4828_s4 + $0x10] ss:$8 sps:$4 sm:$0xff]  }
 0x124   :  { %1823 = vmatprep.subr.bf16.mxu0 %v3198_v11  ;;  %2224 = vmatprep.subr.bf16.mxu1 %v3198_v11  ;;  %v3200_v11 = vld [vmem:[%s4828_s4 + $0x24] ss:$8 sps:$4 sm:$0xff]  }
 0x125   :  { %1259 = vmatprep.mubr.bf16.mxu0 %v4941_v55  ;;  %1674 = vmatprep.mubr.bf16.mxu1 %v4941_v55  ;;  %v3149_v55 = vld [vmem:[%s4832_s3 + $0x4] ss:$36 sps:$4 sm:$0xff]  }
 0x127   :  { %1824 = vmatpush1.bf16.msra.mxu0 %v3199_v52  ;;  %2225 = vmatpush1.bf16.msra.mxu1 %v3199_v52  ;;  %v3201_v52 = vld [vmem:[%s4828_s4 + $0x20] ss:$8 sps:$4 sm:$0xff]  }
 0x128   :  { %1825 = vmatprep.subr.bf16.mxu0 %v3200_v11  ;;  %2226 = vmatprep.subr.bf16.mxu1 %v3200_v11  ;;  %v3202_v11 = vld [vmem:[%s4828_s4 + $0x34] ss:$8 sps:$4 sm:$0xff]  }
 0x12a   :  { %1260 = vmatmul.mubr.bf16.gmra.mrb[4].mxu0 %v3142_v51  ;;  %1675 = vmatmul.mubr.bf16.gmra.mrb[4].mxu1 %v3143_v60  ;;  %v3204_v51 = vld [vmem:[%s4828_s4 + $0x44] ss:$8 sps:$4 sm:$0xff]   ;;  %v3205_v60 = vld [vmem:[%s4828_s4 + $0x40] ss:$8 sps:$4 sm:$0xff]  }
 0x12b   :  { %1826 = vmatpush1.bf16.msra.mxu0 %v3201_v52  ;;  %2227 = vmatpush1.bf16.msra.mxu1 %v3201_v52  ;;  %v3209_v52 = vld [vmem:[%s4828_s4 + $0x60] ss:$8 sps:$4 sm:$0xff]  }
 0x12c   :  { %1827 = vmatprep.subr.bf16.mxu0 %v3202_v11  ;;  %2228 = vmatprep.subr.bf16.mxu1 %v3202_v11  ;;  %v3210_v11 = vld [vmem:[%s4828_s4 + $0x74] ss:$8 sps:$4 sm:$0xff]  }
 0x12d   :  { %1853 = vmatprep.mubr.bf16.mxu0 %v3146_v12  ;;  %2254 = vmatprep.mubr.bf16.mxu1 %v3149_v55  ;;  %v3206_v55 = vld [vmem:[%s4828_s4 + $0x54] ss:$8 sps:$4 sm:$0xff]   ;;  %v3208_v12 = vld [vmem:[%s4828_s4 + $0x64] ss:$8 sps:$4 sm:$0xff]  }
 0x12f   :  { %1828 = vmatpush1.bf16.msra.mxu0 %v3203_v59  ;;  %2229 = vmatpush1.bf16.msra.mxu1 %v3203_v59  ;;  %v3207_v59 = vld [vmem:[%s4828_s4 + $0x50] ss:$8 sps:$4 sm:$0xff]  }
 0x130   :  { %1829 = vmatprep.subr.bf16.mxu0 %v3204_v51  ;;  %2230 = vmatprep.subr.bf16.mxu1 %v3204_v51  ;;  %v3211_v51 = vld [vmem:[%s4828_s4 + $0x70] ss:$8 sps:$4 sm:$0xff]  }
 0x133   :  { %1830 = vmatpush1.bf16.msra.mxu0 %v3205_v60  ;;  %2231 = vmatpush1.bf16.msra.mxu1 %v3205_v60  ;;  %v3212_v60 = vld [vmem:[%s4828_s4 + $0x84] ss:$8 sps:$4 sm:$0xff]  }
 0x134   :  { %1831 = vmatprep.subr.bf16.mxu0 %v3206_v55  ;;  %2232 = vmatprep.subr.bf16.mxu1 %v3206_v55  ;;  %v3213_v55 = vld [vmem:[%s4828_s4 + $0x80] ss:$8 sps:$4 sm:$0xff]  }
 0x137   :  { %1832 = vmatpush1.bf16.msra.mxu0 %v3207_v59  ;;  %2233 = vmatpush1.bf16.msra.mxu1 %v3207_v59  ;;  %v3214_v59 = vld [vmem:[%s4828_s4 + $0x94] ss:$8 sps:$4 sm:$0xff]  }
 0x138   :  { %1833 = vmatprep.subr.bf16.mxu0 %v3208_v12  ;;  %2234 = vmatprep.subr.bf16.mxu1 %v3208_v12  ;;  %v3215_v12 = vld [vmem:[%s4828_s4 + $0x90] ss:$8 sps:$4 sm:$0xff]  }
 0x13b   :  { %1834 = vmatpush1.bf16.msra.mxu0 %v3209_v52  ;;  %2235 = vmatpush1.bf16.msra.mxu1 %v3209_v52  ;;  %v3216_v52 = vld [vmem:[%s4828_s4 + $0xa4] ss:$8 sps:$4 sm:$0xff]  }
 0x13c   :  { %1835 = vmatprep.subr.bf16.mxu0 %v3210_v11  ;;  %2236 = vmatprep.subr.bf16.mxu1 %v3210_v11  ;;  %v3217_v11 = vld [vmem:[%s4828_s4 + $0xa0] ss:$8 sps:$4 sm:$0xff]  }
 0x13f   :  { %1836 = vmatpush1.bf16.msra.mxu0 %v3211_v51  ;;  %2237 = vmatpush1.bf16.msra.mxu1 %v3211_v51  ;;  %v3218_v51 = vld [vmem:[%s4828_s4 + $0xb4] ss:$8 sps:$4 sm:$0xff]  }
 0x140   :  { %1837 = vmatprep.subr.bf16.mxu0 %v3212_v60  ;;  %2238 = vmatprep.subr.bf16.mxu1 %v3212_v60  ;;  %v3219_v60 = vld [vmem:[%s4828_s4 + $0xb0] ss:$8 sps:$4 sm:$0xff]  }
 0x143   :  { %1838 = vmatpush1.bf16.msra.mxu0 %v3213_v55  ;;  %2239 = vmatpush1.bf16.msra.mxu1 %v3213_v55  ;;  %v3220_v55 = vld [vmem:[%s4828_s4 + $0xc4] ss:$8 sps:$4 sm:$0xff]  }
 0x144   :  { %1839 = vmatprep.subr.bf16.mxu0 %v3214_v59  ;;  %2240 = vmatprep.subr.bf16.mxu1 %v3214_v59  ;;  %v3221_v59 = vld [vmem:[%s4828_s4 + $0xc0] ss:$8 sps:$4 sm:$0xff]  }
 0x147   :  { %1840 = vmatpush1.bf16.msra.mxu0 %v3215_v12  ;;  %2241 = vmatpush1.bf16.msra.mxu1 %v3215_v12  ;;  %v3222_v12 = vld [vmem:[%s4828_s4 + $0xd4] ss:$8 sps:$4 sm:$0xff]  }
 0x148   :  { %1841 = vmatprep.subr.bf16.mxu0 %v3216_v52  ;;  %2242 = vmatprep.subr.bf16.mxu1 %v3216_v52  ;;  %v3223_v52 = vld [vmem:[%s4828_s4 + $0xd0] ss:$8 sps:$4 sm:$0xff]  }
 0x14b   :  { %1842 = vmatpush1.bf16.msra.mxu0 %v3217_v11  ;;  %2243 = vmatpush1.bf16.msra.mxu1 %v3217_v11  ;;  %v3224_v11 = vld [vmem:[%s4828_s4 + $0xe4] ss:$8 sps:$4 sm:$0xff]  }
 0x14c   :  { %1843 = vmatprep.subr.bf16.mxu0 %v3218_v51  ;;  %2244 = vmatprep.subr.bf16.mxu1 %v3218_v51  ;;  %v3225_v51 = vld [vmem:[%s4828_s4 + $0xe0] ss:$8 sps:$4 sm:$0xff]  }
 0x14f   :  { %1844 = vmatpush1.bf16.msra.mxu0 %v3219_v60  ;;  %2245 = vmatpush1.bf16.msra.mxu1 %v3219_v60  ;;  %v3226_v60 = vld [vmem:[%s4828_s4 + $0xf4] ss:$8 sps:$4 sm:$0xff]  }
 0x150   :  { %1845 = vmatprep.subr.bf16.mxu0 %v3220_v55  ;;  %2246 = vmatprep.subr.bf16.mxu1 %v3220_v55  ;;  %v3144_v55 = vld [vmem:[%s4831_s2] ss:$36 sps:$4 sm:$0xff]  }
 0x153   :  { %1846 = vmatpush1.bf16.msra.mxu0 %v3221_v59  ;;  %2247 = vmatpush1.bf16.msra.mxu1 %v3221_v59  ;;  %v3147_v59 = vld [vmem:[%s4832_s3] ss:$36 sps:$4 sm:$0xff]  }
 0x154   :  { %1847 = vmatprep.subr.bf16.mxu0 %v3222_v12  ;;  %2248 = vmatprep.subr.bf16.mxu1 %v3222_v12  ;;  %v3227_v12 = vld [vmem:[%s4828_s4 + $0xf0] ss:$8 sps:$4 sm:$0xff]  }
 0x157   :  { %1848 = vmatpush1.bf16.msra.mxu0 %v3223_v52  ;;  %2249 = vmatpush1.bf16.msra.mxu1 %v3223_v52  ;;  %v3228_v52 = vld [vmem:[%s4828_s4 + $0x104] ss:$8 sps:$4 sm:$0xff]  }
 0x158   :  { %1849 = vmatprep.subr.bf16.mxu0 %v3224_v11  ;;  %2250 = vmatprep.subr.bf16.mxu1 %v3224_v11  ;;  %v3150_v11 = vld [vmem:[%s4831_s2 + $0x4c] ss:$36 sps:$4 sm:$0xff]  }
 0x15b   :  { %1850 = vmatpush1.bf16.msra.mxu0 %v3225_v51  ;;  %2251 = vmatpush1.bf16.msra.mxu1 %v3225_v51  ;;  %v3152_v51 = vld [vmem:[%s4832_s3 + $0x4c] ss:$36 sps:$4 sm:$0xff]  }
 0x15c   :  { %1851 = vmatprep.subr.bf16.mxu0 %v3226_v60  ;;  %2252 = vmatprep.subr.bf16.mxu1 %v3226_v60  ;;  %v3229_v60 = vld [vmem:[%s4828_s4 + $0x100] ss:$8 sps:$4 sm:$0xff]  }
 0x15f   :  { %1852 = vmatpush1.bf16.msra.mxu0 %v3227_v12  ;;  %2253 = vmatpush1.bf16.msra.mxu1 %v3227_v12  ;;  %v3230_v12 = vld [vmem:[%s4828_s4 + $0x114] ss:$8 sps:$4 sm:$0xff]  }
 0x160   :  { %1874 = vmatprep.subr.bf16.mxu0 %v3228_v52  ;;  %2275 = vmatprep.subr.bf16.mxu1 %v3228_v52  ;;  %v3154_v52 = vld [vmem:[%s4831_s2 + $0x48] ss:$36 sps:$4 sm:$0xff]  }
 0x162   :  { %1854 = vmatmul.mubr.bf16.vlgmr.msra.gmra.mrb[8].mxu0 %v3144_v55  ;;  %2255 = vmatmul.mubr.bf16.vlgmr.msra.gmra.mrb[8].mxu1 %v3147_v59  ;;  %v3155_v55 = vld [vmem:[%s4832_s3 + $0x48] ss:$36 sps:$4 sm:$0xff]   ;;  %v3231_v59 = vld [vmem:[%s4828_s4 + $0x110] ss:$8 sps:$4 sm:$0xff]  }
 0x163   :  { %1875 = vmatpush1.bf16.msra.mxu0 %v3229_v60  ;;  %2276 = vmatpush1.bf16.msra.mxu1 %v3229_v60  ;;  %v3232_v60 = vld [vmem:[%s4828_s4 + $0x124] ss:$8 sps:$4 sm:$0xff]  }
 0x164   :  { %1876 = vmatprep.subr.bf16.mxu0 %v3230_v12  ;;  %2277 = vmatprep.subr.bf16.mxu1 %v3230_v12  ;;  %v3233_v12 = vld [vmem:[%s4828_s4 + $0x120] ss:$8 sps:$4 sm:$0xff]  }
 0x165   :  { %1863 = vmatprep.mubr.bf16.mxu0 %v3150_v11  ;;  %2264 = vmatprep.mubr.bf16.mxu1 %v3152_v51  ;;  %v3158_v11 = vld [vmem:[%s4831_s2 + $0xc] ss:$36 sps:$4 sm:$0xff]  }
 0x166   :  { %v3161_v51 = vld [vmem:[%s4832_s3 + $0xc] ss:$36 sps:$4 sm:$0xff]  }
 0x167   :  { %1877 = vmatpush1.bf16.msra.mxu0 %v3231_v59  ;;  %2278 = vmatpush1.bf16.msra.mxu1 %v3231_v59  ;;  %v3234_v59 = vld [vmem:[%s4828_s4 + $0x134] ss:$8 sps:$4 sm:$0xff]  }
 0x168   :  { %1878 = vmatprep.subr.bf16.mxu0 %v3232_v60  ;;  %2279 = vmatprep.subr.bf16.mxu1 %v3232_v60  ;;  %v3235_v60 = vld [vmem:[%s4828_s4 + $0x130] ss:$8 sps:$4 sm:$0xff]  }
 0x16a   :  { %1864 = vmatmul.mubr.bf16.gmra.mrb[12].mxu0 %v3154_v52  ;;  %2265 = vmatmul.mubr.bf16.gmra.mrb[12].mxu1 %v3155_v55  ;;  %v3236_v52 = vld [vmem:[%s4828_s4 + $0x144] ss:$8 sps:$4 sm:$0xff]   ;;  %v3237_v55 = vld [vmem:[%s4828_s4 + $0x140] ss:$8 sps:$4 sm:$0xff]  }
 0x16b   :  { %1879 = vmatpush1.bf16.msra.mxu0 %v3233_v12  ;;  %2280 = vmatpush1.bf16.msra.mxu1 %v3233_v12  ;;  %v3240_v12 = vld [vmem:[%s4828_s4 + $0x164] ss:$8 sps:$4 sm:$0xff]  }
 0x16c   :  { %1880 = vmatprep.subr.bf16.mxu0 %v3234_v59  ;;  %2281 = vmatprep.subr.bf16.mxu1 %v3234_v59  ;;  %v3241_v59 = vld [vmem:[%s4828_s4 + $0x160] ss:$8 sps:$4 sm:$0xff]  }
 0x16d   :  { %1906 = vmatprep.mubr.bf16.mxu0 %v3158_v11  ;;  %2307 = vmatprep.mubr.bf16.mxu1 %v3161_v51  ;;  %v3238_v11 = vld [vmem:[%s4828_s4 + $0x154] ss:$8 sps:$4 sm:$0xff]   ;;  %v3239_v51 = vld [vmem:[%s4828_s4 + $0x150] ss:$8 sps:$4 sm:$0xff]  }
 0x16f   :  { %1881 = vmatpush1.bf16.msra.mxu0 %v3235_v60  ;;  %2282 = vmatpush1.bf16.msra.mxu1 %v3235_v60  ;;  %v3242_v60 = vld [vmem:[%s4828_s4 + $0x174] ss:$8 sps:$4 sm:$0xff]  }
 0x170   :  { %1882 = vmatprep.subr.bf16.mxu0 %v3236_v52  ;;  %2283 = vmatprep.subr.bf16.mxu1 %v3236_v52  ;;  %v3243_v52 = vld [vmem:[%s4828_s4 + $0x170] ss:$8 sps:$4 sm:$0xff]  }
 0x173   :  { %1883 = vmatpush1.bf16.msra.mxu0 %v3237_v55  ;;  %2284 = vmatpush1.bf16.msra.mxu1 %v3237_v55  ;;  %v3244_v55 = vld [vmem:[%s4828_s4 + $0x184] ss:$8 sps:$4 sm:$0xff]  }
 0x174   :  { %1884 = vmatprep.subr.bf16.mxu0 %v3238_v11  ;;  %2285 = vmatprep.subr.bf16.mxu1 %v3238_v11  ;;  %v3245_v11 = vld [vmem:[%s4828_s4 + $0x180] ss:$8 sps:$4 sm:$0xff]  }
 0x177   :  { %1885 = vmatpush1.bf16.msra.mxu0 %v3239_v51  ;;  %2286 = vmatpush1.bf16.msra.mxu1 %v3239_v51  ;;  %v3246_v51 = vld [vmem:[%s4828_s4 + $0x194] ss:$8 sps:$4 sm:$0xff]  }
 0x178   :  { %1886 = vmatprep.subr.bf16.mxu0 %v3240_v12  ;;  %2287 = vmatprep.subr.bf16.mxu1 %v3240_v12  ;;  %v3247_v12 = vld [vmem:[%s4828_s4 + $0x190] ss:$8 sps:$4 sm:$0xff]  }
 0x17b   :  { %1887 = vmatpush1.bf16.msra.mxu0 %v3241_v59  ;;  %2288 = vmatpush1.bf16.msra.mxu1 %v3241_v59  ;;  %v3248_v59 = vld [vmem:[%s4828_s4 + $0x1a4] ss:$8 sps:$4 sm:$0xff]  }
 0x17c   :  { %1888 = vmatprep.subr.bf16.mxu0 %v3242_v60  ;;  %2289 = vmatprep.subr.bf16.mxu1 %v3242_v60  ;;  %v3249_v60 = vld [vmem:[%s4828_s4 + $0x1a0] ss:$8 sps:$4 sm:$0xff]  }
 0x17f   :  { %1889 = vmatpush1.bf16.msra.mxu0 %v3243_v52  ;;  %2290 = vmatpush1.bf16.msra.mxu1 %v3243_v52 }
 0x180   :  { %1890 = vmatprep.subr.bf16.mxu0 %v3244_v55  ;;  %2291 = vmatprep.subr.bf16.mxu1 %v3244_v55 }
 0x183   :  { %1891 = vmatpush1.bf16.msra.mxu0 %v3245_v11  ;;  %2292 = vmatpush1.bf16.msra.mxu1 %v3245_v11 }
 0x184   :  { %1892 = vmatprep.subr.bf16.mxu0 %v3246_v51  ;;  %2293 = vmatprep.subr.bf16.mxu1 %v3246_v51 }
 0x187   :  { %1893 = vmatpush1.bf16.msra.mxu0 %v3247_v12  ;;  %2294 = vmatpush1.bf16.msra.mxu1 %v3247_v12 }
 0x188   :  { %1894 = vmatprep.subr.bf16.mxu0 %v3248_v59  ;;  %2295 = vmatprep.subr.bf16.mxu1 %v3248_v59 }
 0x18b   :  { %1895 = vmatpush1.bf16.msra.mxu0 %v3483_v63  ;;  %2296 = vmatpush1.bf16.msra.mxu1 %v3249_v60  ;;  %v3156_v63 = vld [vmem:[%s4831_s2 + $0x8] ss:$36 sps:$4 sm:$0xff]  }
 0x18c   :  { %1896 = vmatprep.subr.bf16.mxu0 %v3488_v0  ;;  %2297 = vmatprep.subr.bf16.mxu1 %v3488_v0  ;;  %v3159_v0 = vld [vmem:[%s4832_s3 + $0x8] ss:$36 sps:$4 sm:$0xff]  }
 0x18f   :  { %1897 = vmatpush1.bf16.msra.mxu0 %v3495_v1  ;;  %2298 = vmatpush1.bf16.msra.mxu1 %v3495_v1  ;;  %v3162_v1 = vld [vmem:[%s4831_s2 + $0x54] ss:$36 sps:$4 sm:$0xff]  }
 0x190   :  { %1898 = vmatprep.subr.bf16.mxu0 %v3502_v2  ;;  %2299 = vmatprep.subr.bf16.mxu1 %v3502_v2  ;;  %v3164_v2 = vld [vmem:[%s4832_s3 + $0x54] ss:$36 sps:$4 sm:$0xff]  }
 0x193   :  { %1899 = vmatpush1.bf16.msra.mxu0 %v3509_v3  ;;  %2300 = vmatpush1.bf16.msra.mxu1 %v3509_v3  ;;  %v3166_v3 = vld [vmem:[%s4831_s2 + $0x50] ss:$36 sps:$4 sm:$0xff]  }
 0x194   :  { %1900 = vmatprep.subr.bf16.mxu0 %v3516_v4  ;;  %2301 = vmatprep.subr.bf16.mxu1 %v3516_v4  ;;  %v3167_v4 = vld [vmem:[%s4832_s3 + $0x50] ss:$36 sps:$4 sm:$0xff]  }
 0x197   :  { %1901 = vmatpush1.bf16.msra.mxu0 %v3523_v5  ;;  %2302 = vmatpush1.bf16.msra.mxu1 %v3523_v5  ;;  %v3170_v5 = vld [vmem:[%s4831_s2 + $0x14] ss:$36 sps:$4 sm:$0xff]  }
 0x198   :  { %1902 = vmatprep.subr.bf16.mxu0 %v3530_v6  ;;  %2303 = vmatprep.subr.bf16.mxu1 %v3530_v6  ;;  %v3173_v6 = vld [vmem:[%s4832_s3 + $0x14] ss:$36 sps:$4 sm:$0xff]  }
 0x19b   :  { %1903 = vmatpush1.bf16.msra.mxu0 %v3537_v7  ;;  %2304 = vmatpush1.bf16.msra.mxu1 %v3537_v7  ;;  %v3168_v7 = vld [vmem:[%s4831_s2 + $0x10] ss:$36 sps:$4 sm:$0xff]  }
 0x19c   :  { %1904 = vmatprep.subr.bf16.mxu0 %v3544_v8  ;;  %2305 = vmatprep.subr.bf16.mxu1 %v3544_v8  ;;  %v3171_v8 = vld [vmem:[%s4832_s3 + $0x10] ss:$36 sps:$4 sm:$0xff]  }
 0x19f   :  { %1905 = vmatpush1.bf16.msra.mxu0 %v3551_v9  ;;  %2306 = vmatpush1.bf16.msra.mxu1 %v3551_v9  ;;  %v3174_v9 = vld [vmem:[%s4831_s2 + $0x5c] ss:$36 sps:$4 sm:$0xff]  }
 0x1a0   :  { %1927 = vmatprep.subr.bf16.mxu0 %v3558_v10  ;;  %2328 = vmatprep.subr.bf16.mxu1 %v3558_v10  ;;  %v3176_v10 = vld [vmem:[%s4832_s3 + $0x5c] ss:$36 sps:$4 sm:$0xff]  }
 0x1a2   :  { %1907 = vmatmul.mubr.bf16.vlgmr.msra.gmra.mrb[8].mxu0 %v3156_v63  ;;  %2308 = vmatmul.mubr.bf16.vlgmr.msra.gmra.mrb[8].mxu1 %v3159_v0 }
 0x1a3   :  { %1928 = vmatpush1.bf16.msra.mxu0 %v3571_v13  ;;  %2329 = vmatpush1.bf16.msra.mxu1 %v3571_v13  ;;  %v1271_v13 = vlaneseq }
 0x1a4   :  { %1929 = vmatprep.subr.bf16.mxu0 %v3578_v14  ;;  %2330 = vmatprep.subr.bf16.mxu1 %v3578_v14  ;;  %v3178_v14 = vld [vmem:[%s4831_s2 + $0x58] ss:$36 sps:$4 sm:$0xff]  }
 0x1a5   :  { %1916 = vmatprep.mubr.bf16.mxu0 %v3162_v1  ;;  %2317 = vmatprep.mubr.bf16.mxu1 %v3164_v2  ;;  %v4944_v2 = vld [vmem:[#allocation4_spill] sm:$0xff] }
 0x1a7   :  { %1930 = vmatpush1.bf16.msra.mxu0 %v3591_v17  ;;  %2331 = vmatpush1.bf16.msra.mxu1 %v3591_v17  ;;  %v3179_v17 = vld [vmem:[%s4832_s3 + $0x58] ss:$36 sps:$4 sm:$0xff]  }
 0x1a8   :  { %1931 = vmatprep.subr.bf16.mxu0 %v3598_v18  ;;  %2332 = vmatprep.subr.bf16.mxu1 %v3598_v18  ;;  %v3182_v18 = vld [vmem:[%s4831_s2 + $0x1c] ss:$36 sps:$4 sm:$0xff]  }
 0x1aa   :  { %1917 = vmatmul.mubr.bf16.gmra.mrb[12].mxu0 %v3166_v3  ;;  %2318 = vmatmul.mubr.bf16.gmra.mrb[12].mxu1 %v3167_v4 }
 0x1ab   :  { %1932 = vmatpush1.bf16.msra.mxu0 %v3611_v21  ;;  %2333 = vmatpush1.bf16.msra.mxu1 %v3611_v21  ;;  %v3185_v21 = vld [vmem:[%s4832_s3 + $0x1c] ss:$36 sps:$4 sm:$0xff]  }
 0x1ac   :  { %1933 = vmatprep.subr.bf16.mxu0 %v3618_v22  ;;  %2334 = vmatprep.subr.bf16.mxu1 %v3618_v22  ;;  %v1272_v22 = vshrl.u32 %v1271_v13, 7 }
 0x1ad   :  { %1959 = vmatprep.mubr.bf16.mxu0 %v3170_v5  ;;  %2360 = vmatprep.mubr.bf16.mxu1 %v3173_v6 }
 0x1af   :  { %1934 = vmatpush1.bf16.msra.mxu0 %v3631_v25  ;;  %2335 = vmatpush1.bf16.msra.mxu1 %v3631_v25  ;;  %v1273_v25 = vsub.s32 0, %v1272_v22 }
 0x1b0   :  { %1935 = vmatprep.subr.bf16.mxu0 %v3638_v26  ;;  %2336 = vmatprep.subr.bf16.mxu1 %v3638_v26  ;;  %v171_v26 = vld [vmem:[%s4833_s5] sm:$0x3] }
 0x1b3   :  { %1936 = vmatpush1.bf16.msra.mxu0 %v3645_v27  ;;  %2337 = vmatpush1.bf16.msra.mxu1 %v3645_v27  ;;  %v1277_v27 = vsub.s32 1, %v1272_v22 }
 0x1b4   :  { %1937 = vmatprep.subr.bf16.mxu0 %v3652_v28  ;;  %2338 = vmatprep.subr.bf16.mxu1 %v3652_v28  ;;  %v172_v28 = vld [vmem:[%s4834_s6] sm:$0x3] }
 0x1b7   :  { %1938 = vmatpush1.bf16.msra.mxu0 %v3659_v29  ;;  %2339 = vmatpush1.bf16.msra.mxu1 %v3659_v29  ;;  %v4548_v29 = vrot.slane %v171_v26, %v1273_v25 }
 0x1b8   :  { %1939 = vmatprep.subr.bf16.mxu0 %v3666_v30  ;;  %2340 = vmatprep.subr.bf16.mxu1 %v3666_v30  ;;  %v4552_v30 = vrot.slane %v171_v26, %v1277_v27 }
 0x1bb   :  { %1940 = vmatpush1.bf16.msra.mxu0 %v3673_v31  ;;  %2341 = vmatpush1.bf16.msra.mxu1 %v3673_v31  ;;  %v4554_v31 = vrot.slane %v172_v28, %v1273_v25 }
 0x1bc   :  { %1941 = vmatprep.subr.bf16.mxu0 %v3680_v32  ;;  %2342 = vmatprep.subr.bf16.mxu1 %v3680_v32 }
 0x1bf   :  { %1942 = vmatpush1.bf16.msra.mxu0 %v3687_v33  ;;  %2343 = vmatpush1.bf16.msra.mxu1 %v3687_v33 }
 0x1c0   :  { %1943 = vmatprep.subr.bf16.mxu0 %v3694_v34  ;;  %2344 = vmatprep.subr.bf16.mxu1 %v3694_v34  ;;  %v4558_v34 = vrot.slane %v172_v28, %v1277_v27  ;;  %v4946_v28 = vld [vmem:[#allocation6_spill] sm:$0xff] }
 0x1c3   :  { %1944 = vmatpush1.bf16.msra.mxu0 %v3701_v35  ;;  %2345 = vmatpush1.bf16.msra.mxu1 %v3701_v35 }
 0x1c4   :  { %1945 = vmatprep.subr.bf16.mxu0 %v3708_v36  ;;  %2346 = vmatprep.subr.bf16.mxu1 %v3708_v36 }
 0x1c7   :  { %1946 = vmatpush1.bf16.msra.mxu0 %v3715_v37  ;;  %2347 = vmatpush1.bf16.msra.mxu1 %v3715_v37 }
 0x1c8   :  { %1947 = vmatprep.subr.bf16.mxu0 %v3722_v38  ;;  %2348 = vmatprep.subr.bf16.mxu1 %v3722_v38 }
 0x1cb   :  { %1948 = vmatpush1.bf16.msra.mxu0 %v3729_v39  ;;  %2349 = vmatpush1.bf16.msra.mxu1 %v3729_v39 }
 0x1cc   :  { %1949 = vmatprep.subr.bf16.mxu0 %v3736_v40  ;;  %2350 = vmatprep.subr.bf16.mxu1 %v3736_v40 }
 0x1cf   :  { %1950 = vmatpush1.bf16.msra.mxu0 %v3743_v41  ;;  %2351 = vmatpush1.bf16.msra.mxu1 %v3743_v41 }
 0x1d0   :  { %1951 = vmatprep.subr.bf16.mxu0 %v3750_v42  ;;  %2352 = vmatprep.subr.bf16.mxu1 %v3750_v42 }
 0x1d3   :  { %1952 = vmatpush1.bf16.msra.mxu0 %v3757_v43  ;;  %2353 = vmatpush1.bf16.msra.mxu1 %v3757_v43 }
 0x1d4   :  { %1953 = vmatprep.subr.bf16.mxu0 %v3764_v44  ;;  %2354 = vmatprep.subr.bf16.mxu1 %v3764_v44 }
 0x1d7   :  { %1954 = vmatpush1.bf16.msra.mxu0 %v3771_v45  ;;  %2355 = vmatpush1.bf16.msra.mxu1 %v3771_v45 }
 0x1d8   :  { %1955 = vmatprep.subr.bf16.mxu0 %v3778_v46  ;;  %2356 = vmatprep.subr.bf16.mxu1 %v3778_v46 }
 0x1db   :  { %1956 = vmatpush1.bf16.msra.mxu0 %v3785_v47  ;;  %2357 = vmatpush1.bf16.msra.mxu1 %v3785_v47 }
 0x1dc   :  { %1957 = vmatprep.subr.bf16.mxu0 %v3792_v48  ;;  %2358 = vmatprep.subr.bf16.mxu1 %v3792_v48 }
 0x1df   :  { %1958 = vmatpush1.bf16.msra.mxu0 %v3799_v49  ;;  %2359 = vmatpush1.bf16.msra.mxu1 %v3799_v49 }
 0x1e0   :  { %1980 = vmatprep.subr.bf16.mxu0 %v3806_v50  ;;  %2381 = vmatprep.subr.bf16.mxu1 %v3806_v50 }
 0x1e2   :  { %1960 = vmatmul.mubr.bf16.vlgmr.msra.gmra.mrb[8].mxu0 %v3168_v7  ;;  %2361 = vmatmul.mubr.bf16.vlgmr.msra.gmra.mrb[8].mxu1 %v3171_v8 }
 0x1e3   :  { %1981 = vmatpush1.bf16.msra.mxu0 %v3819_v53  ;;  %2382 = vmatpush1.bf16.msra.mxu1 %v3819_v53 }
 0x1e4   :  { %1982 = vmatprep.subr.bf16.mxu0 %v3826_v54  ;;  %2383 = vmatprep.subr.bf16.mxu1 %v3826_v54 }
 0x1e5   :  { %1969 = vmatprep.mubr.bf16.mxu0 %v3174_v9  ;;  %2370 = vmatprep.mubr.bf16.mxu1 %v3176_v10  ;;  %v4945_v9 = vld [vmem:[#allocation5_spill] sm:$0xff] }
 0x1e7   :  { %1983 = vmatpush1.bf16.msra.mxu0 %v3839_v57  ;;  %2384 = vmatpush1.bf16.msra.mxu1 %v3839_v57 }
 0x1e8   :  { %1984 = vmatprep.subr.bf16.mxu0 %v3846_v58  ;;  %2385 = vmatprep.subr.bf16.mxu1 %v3846_v58 }
 0x1ea   :  { %1970 = vmatmul.mubr.bf16.gmra.mrb[12].mxu0 %v3178_v14  ;;  %2371 = vmatmul.mubr.bf16.gmra.mrb[12].mxu1 %v3179_v17 }
 0x1eb   :  { %1985 = vmatpush1.bf16.msra.mxu0 %v3859_v61  ;;  %2386 = vmatpush1.bf16.msra.mxu1 %v3859_v61 }
 0x1ec   :  { %1986 = vmatprep.subr.bf16.mxu0 %v3866_v62  ;;  %2387 = vmatprep.subr.bf16.mxu1 %v3866_v62 }
 0x1ed   :  { %2012 = vmatprep.mubr.bf16.mxu0 %v3182_v18  ;;  %2413 = vmatprep.mubr.bf16.mxu1 %v3185_v21 }
 0x1ef   :  { %1987 = vmatpush1.bf16.msra.mxu0 %v3879_v15  ;;  %2388 = vmatpush1.bf16.msra.mxu1 %v3879_v15 }
 0x1f0   :  { %1988 = vmatprep.subr.bf16.mxu0 %v3886_v16  ;;  %2389 = vmatprep.subr.bf16.mxu1 %v3886_v16 }
 0x1f3   :  { %1989 = vmatpush1.bf16.msra.mxu0 %v3893_v19  ;;  %2390 = vmatpush1.bf16.msra.mxu1 %v3893_v19  ;;  %v4942_v19 = vld [vmem:[#allocation2_spill] sm:$0xff] }
 0x1f4   :  { %1990 = vmatprep.subr.bf16.mxu0 %v3900_v20  ;;  %2391 = vmatprep.subr.bf16.mxu1 %v3900_v20 }
 0x1f5   :  { %v1251_v32 = vpop.f32.mrb[0].mxu0  ;;  %v1666_v33 = vpop.f32.mrb[0].mxu1 }
 0x1f6   :  { %v1281_v35 = vmul.f32 %v4548_v29, %v1251_v32  ;;  %v1685_v36 = vmul.f32 %v1666_v33, %v4548_v29  ;;  %v1253_v37 = vpop.f32.mrb[1].mxu0  ;;  %v1668_v38 = vpop.f32.mrb[1].mxu1  ;;  %v4947_v33 = vld [vmem:[#allocation7_spill] sm:$0xff] }
 0x1f7   :  { %v1282_v39 = vmul.f32 %v4552_v30, %v1253_v37  ;;  %v1686_v40 = vmul.f32 %v1668_v38, %v4552_v30  ;;  %v1255_v41 = vpop.f32.mrb[2].mxu0  ;;  %v1670_v42 = vpop.f32.mrb[2].mxu1  ;;  %1991 = vmatpush1.bf16.msra.mxu0 %v3907_v23  ;;  %2392 = vmatpush1.bf16.msra.mxu1 %v3907_v23  ;;  %v4943_v23 = vld [vmem:[#allocation3_spill] sm:$0xff]  ;;  %v4949_v37 = vld [vmem:[#allocation9_spill] sm:$0xff]  ;;  %v4950_v38 = vld [vmem:[#allocation10_spill] sm:$0xff] }
 0x1f8   :  { %v4567_v43 = vadd.f32 %v4554_v31, %v1281_v35  ;;  %v4570_v44 = vadd.f32 %v1685_v36, %v4554_v31  ;;  %v1283_v45 = vmul.f32 %v4548_v29, %v1255_v41  ;;  %v1687_v46 = vmul.f32 %v1670_v42, %v4548_v29  ;;  %v1257_v47 = vpop.f32.mrb[3].mxu0  ;;  %v1672_v48 = vpop.f32.mrb[3].mxu1  ;;  %1992 = vmatprep.subr.bf16.mxu0 %v3914_v24  ;;  %v4948_v36 = vld [vmem:[#allocation8_spill] sm:$0xff]  ;;  %v4953_v41 = vld [vmem:[#allocation13_spill] sm:$0xff]  ;;  %v4954_v42 = vld [vmem:[#allocation14_spill] sm:$0xff] }
 0x1f9   :  { %v4576_v49 = vadd.f32 %v4558_v34, %v1282_v39  ;;  %v4579_v50 = vadd.f32 %v1686_v40, %v4558_v34  ;;  %v1284_v53 = vmul.f32 %v4552_v30, %v1257_v47  ;;  %v1688_v54 = vmul.f32 %v1672_v48, %v4552_v30  ;;  %2393 = vmatprep.subr.bf16.mxu1 %v3914_v24  ;;  %v4951_v39 = vld [vmem:[#allocation11_spill] sm:$0xff]  ;;  %v4952_v40 = vld [vmem:[#allocation12_spill] sm:$0xff]  ;;  %v4957_v47 = vld [vmem:[#allocation17_spill] sm:$0xff] }
 0x1fa   :  { %v1701_v57 = vmax.f32 %v4567_v43, %v4570_v44  ;;  %v4587_v58 = vadd.f32 %v4554_v31, %v1283_v45  ;;  %v4590_v61 = vadd.f32 %v1687_v46, %v4554_v31  ;;  %v4955_v45 = vld [vmem:[#allocation15_spill] sm:$0xff]  ;;  %v4956_v46 = vld [vmem:[#allocation16_spill] sm:$0xff]  ;;  %v4958_v48 = vld [vmem:[#allocation18_spill] sm:$0xff] }
 0x1fb   :  { %v1702_v62 = vmax.f32 %v4576_v49, %v4579_v50  ;;  %v4595_v15 = vadd.f32 %v4558_v34, %v1284_v53  ;;  %v4598_v16 = vadd.f32 %v1688_v54, %v4558_v34  ;;  %1993 = vmatpush1.bf16.msra.mxu0 %v4942_v19  ;;  %2394 = vmatpush1.bf16.msra.mxu1 %v4942_v19  ;;  %v4959_v53 = vld [vmem:[#allocation19_spill] sm:$0xff]  ;;  %v3180_v54 = vld [vmem:[%s4831_s2 + $0x18] ss:$36 sps:$4 sm:$0xff]  }
 0x1fc   :  { %v1703_v20 = vmax.f32 %v4587_v58, %v4590_v61  ;;  %1994 = vmatprep.subr.bf16.mxu0 %v4943_v23  ;;  %2395 = vmatprep.subr.bf16.mxu1 %v4943_v23  ;;  %v3183_v19 = vld [vmem:[%s4832_s3 + $0x18] ss:$36 sps:$4 sm:$0xff]   ;;  %v4960_v23 = vld [vmem:[#allocation20_spill] sm:$0xff] }
 0x1fd   :  { %v1704_v24 = vmax.f32 %v4595_v15, %v4598_v16  ;;  %v1261_v52 = vpop.f32.mrb[4].mxu0  ;;  %v1676_v55 = vpop.f32.mrb[4].mxu1 }
 0x1fe   :  { %v1285_v11 = vmul.f32 %v4548_v29, %v1261_v52  ;;  %v1689_v51 = vmul.f32 %v1676_v55, %v4548_v29  ;;  %v1263_v12 = vpop.f32.mrb[5].mxu0  ;;  %v1678_v59 = vpop.f32.mrb[5].mxu1  ;;  %v4961_v52 = vld [vmem:[#allocation21_spill] sm:$0xff]  ;;  %v3186_v55 = vld [vmem:[%s4831_s2 + $0x64] ss:$36 sps:$4 sm:$0xff]  }
 0x1ff   :  { %v1286_v60 = vmul.f32 %v4552_v30, %v1263_v12  ;;  %v1690_v63 = vmul.f32 %v1678_v59, %v4552_v30  ;;  %v1265_v0 = vpop.f32.mrb[6].mxu0  ;;  %v1680_v1 = vpop.f32.mrb[6].mxu1  ;;  %1995 = vmatpush1.bf16.msra.mxu0 %v4944_v2  ;;  %2396 = vmatpush1.bf16.msra.mxu1 %v4944_v2  ;;  %v3190_v12 = vld [vmem:[%s4831_s2 + $0x60] ss:$36 sps:$4 sm:$0xff]   ;;  %v4968_v2 = vld [vmem:[#allocation27_spill] sm:$0xff] }
 0x200   :  { %v4615_v3 = vadd.f32 %v4554_v31, %v1285_v11  ;;  %v4618_v4 = vadd.f32 %v1689_v51, %v4554_v31  ;;  %v1287_v5 = vmul.f32 %v4548_v29, %v1265_v0  ;;  %v1691_v6 = vmul.f32 %v1680_v1, %v4548_v29  ;;  %v1267_v7 = vpop.f32.mrb[7].mxu0  ;;  %v1682_v8 = vpop.f32.mrb[7].mxu1  ;;  %1996 = vmatprep.subr.bf16.mxu0 %v4945_v9  ;;  %v3188_v11 = vld [vmem:[%s4832_s3 + $0x64] ss:$36 sps:$4 sm:$0xff]  }
 0x201   :  { %v4624_v10 = vadd.f32 %v4558_v34, %v1286_v60  ;;  %v4627_v13 = vadd.f32 %v1690_v63, %v4558_v34  ;;  %v1288_v14 = vmul.f32 %v4552_v30, %v1267_v7  ;;  %v1692_v17 = vmul.f32 %v1682_v8, %v4552_v30  ;;  %2397 = vmatprep.subr.bf16.mxu1 %v4945_v9  ;;  %v4962_v51 = vld [vmem:[#allocation22_spill] sm:$0xff]  ;;  %v4963_v60 = vld [vmem:[#allocation23_spill] sm:$0xff]  ;;  %v4964_v63 = vld [vmem:[#allocation24_spill] sm:$0xff] }
 0x202   :  { %v1705_v18 = vmax.f32 %v4615_v3, %v4618_v4  ;;  %v4635_v21 = vadd.f32 %v4554_v31, %v1287_v5  ;;  %v4638_v22 = vadd.f32 %v1691_v6, %v4554_v31  ;;  %v3191_v59 = vld [vmem:[%s4832_s3 + $0x60] ss:$36 sps:$4 sm:$0xff]   ;;  %v4967_v1 = vmov 0   ;;  %v4969_v5 = vld [vmem:[#allocation28_spill] sm:$0xff]  ;;  %v4970_v6 = vld [vmem:[#allocation29_spill] sm:$0xff] }
 0x203   :  { %v1706_v25 = vmax.f32 %v4624_v10, %v4627_v13  ;;  %v4643_v26 = vadd.f32 %v4558_v34, %v1288_v14  ;;  %v4646_v27 = vadd.f32 %v1692_v17, %v4558_v34  ;;  %1997 = vmatpush1.bf16.msra.mxu0 %v4946_v28  ;;  %2398 = vmatpush1.bf16.msra.mxu1 %v4946_v28  ;;  %v4966_v0 = vld [vmem:[#allocation26_spill] sm:$0xff]  ;;  %v4972_v8 = vld [vmem:[#allocation31_spill] sm:$0xff]  ;;  %v4973_v9 = vld [vmem:[#allocation32_spill] sm:$0xff] }
 0x204   :  { %v1707_v32 = vmax.f32 %v4635_v21, %v4638_v22  ;;  %1998 = vmatprep.subr.bf16.mxu0 %v4947_v33  ;;  %2399 = vmatprep.subr.bf16.mxu1 %v4947_v33  ;;  %v4971_v7 = vld [vmem:[#allocation30_spill] sm:$0xff]  ;;  %v4974_v14 = vld [vmem:[#allocation33_spill] sm:$0xff] }
 0x205   :  { %v1708_v35 = vmax.f32 %v4643_v26, %v4646_v27  ;;  %v4975_v17 = vld [vmem:[#allocation34_spill] sm:$0xff] }
 0x206   :  { %v3192_v28 = vld [vmem:[%s4831_s2 + $0x20] ss:$36 sps:$4 sm:$0xff]  }
 0x207   :  { %1999 = vmatpush1.bf16.msra.mxu0 %v4948_v36  ;;  %2400 = vmatpush1.bf16.msra.mxu1 %v4948_v36  ;;  %v3193_v33 = vld [vmem:[%s4832_s3 + $0x20] ss:$36 sps:$4 sm:$0xff]   ;;  %v4976_v36 = vld [vmem:[#allocation35_spill] sm:$0xff] }
 0x208   :  { %2000 = vmatprep.subr.bf16.mxu0 %v4949_v37  ;;  %2401 = vmatprep.subr.bf16.mxu1 %v4949_v37  ;;  %v3194_v37 = vld [vmem:[%s4831_s2 + $0x68] ss:$36 sps:$4 sm:$0xff]  }
 0x20b   :  { %2001 = vmatpush1.bf16.msra.mxu0 %v4950_v38  ;;  %2402 = vmatpush1.bf16.msra.mxu1 %v4950_v38  ;;  %v3195_v38 = vld [vmem:[%s4832_s3 + $0x68] ss:$36 sps:$4 sm:$0xff]  }
 0x20c   :  { %2002 = vmatprep.subr.bf16.mxu0 %v4951_v39  ;;  %2403 = vmatprep.subr.bf16.mxu1 %v4951_v39 }
 0x20f   :  { %2003 = vmatpush1.bf16.msra.mxu0 %v4952_v40  ;;  %2404 = vmatpush1.bf16.msra.mxu1 %v4952_v40 }
 0x210   :  { %2004 = vmatprep.subr.bf16.mxu0 %v4953_v41  ;;  %2405 = vmatprep.subr.bf16.mxu1 %v4953_v41 }
 0x213   :  { %2005 = vmatpush1.bf16.msra.mxu0 %v4954_v42  ;;  %2406 = vmatpush1.bf16.msra.mxu1 %v4954_v42 }
 0x214   :  { %2006 = vmatprep.subr.bf16.mxu0 %v4955_v45  ;;  %2407 = vmatprep.subr.bf16.mxu1 %v4955_v45 }
 0x217   :  { %2007 = vmatpush1.bf16.msra.mxu0 %v4956_v46  ;;  %2408 = vmatpush1.bf16.msra.mxu1 %v4956_v46 }
 0x218   :  { %2008 = vmatprep.subr.bf16.mxu0 %v4957_v47  ;;  %2409 = vmatprep.subr.bf16.mxu1 %v4957_v47 }
 0x21b   :  { %2009 = vmatpush1.bf16.msra.mxu0 %v4958_v48  ;;  %2410 = vmatpush1.bf16.msra.mxu1 %v4958_v48 }
 0x21c   :  { %2010 = vmatprep.subr.bf16.mxu0 %v4959_v53  ;;  %2411 = vmatprep.subr.bf16.mxu1 %v4959_v53 }
 0x21f   :  { %2011 = vmatpush1.bf16.msra.mxu0 %v4960_v23  ;;  %2412 = vmatpush1.bf16.msra.mxu1 %v4960_v23 }
 0x220   :  { %2033 = vmatprep.subr.bf16.mxu0 %v4961_v52  ;;  %2434 = vmatprep.subr.bf16.mxu1 %v4961_v52 }
 0x222   :  { %2013 = vmatmul.mubr.bf16.vlgmr.msra.gmra.mrb[8].mxu0 %v3180_v54  ;;  %2414 = vmatmul.mubr.bf16.vlgmr.msra.gmra.mrb[8].mxu1 %v3183_v19 }
 0x223   :  { %2034 = vmatpush1.bf16.msra.mxu0 %v4067_v56  ;;  %2435 = vmatpush1.bf16.msra.mxu1 %v4067_v56  ;;  %v4965_v56 = vld [vmem:[#allocation25_spill] sm:$0xff] }
 0x224   :  { %2035 = vmatprep.subr.bf16.mxu0 %v4962_v51  ;;  %2436 = vmatprep.subr.bf16.mxu1 %v4962_v51 }
 0x225   :  { %2022 = vmatprep.mubr.bf16.mxu0 %v3186_v55  ;;  %2423 = vmatprep.mubr.bf16.mxu1 %v3188_v11 }
 0x227   :  { %2036 = vmatpush1.bf16.msra.mxu0 %v4963_v60  ;;  %2437 = vmatpush1.bf16.msra.mxu1 %v4963_v60 }
 0x228   :  { %2037 = vmatprep.subr.bf16.mxu0 %v4964_v63  ;;  %2438 = vmatprep.subr.bf16.mxu1 %v4964_v63 }
 0x22a   :  { %2023 = vmatmul.mubr.bf16.gmra.mrb[12].mxu0 %v3190_v12  ;;  %2424 = vmatmul.mubr.bf16.gmra.mrb[12].mxu1 %v3191_v59 }
 0x22b   :  { %2038 = vmatpush1.bf16.msra.mxu0 %v4965_v56  ;;  %2439 = vmatpush1.bf16.msra.mxu1 %v4965_v56 }
 0x22c   :  { %2039 = vmatprep.subr.bf16.mxu0 %v4966_v0  ;;  %2440 = vmatprep.subr.bf16.mxu1 %v4966_v0 }
 0x22d   :  { %2065 = vmatprep.mubr.bf16.mxu0 %v4967_v1  ;;  %2466 = vmatprep.mubr.bf16.mxu1 %v4967_v1 }
 0x22f   :  { %2040 = vmatpush1.bf16.msra.mxu0 %v4968_v2  ;;  %2441 = vmatpush1.bf16.msra.mxu1 %v4968_v2 }
 0x230   :  { %2041 = vmatprep.subr.bf16.mxu0 %v4969_v5  ;;  %2442 = vmatprep.subr.bf16.mxu1 %v4969_v5 }
 0x233   :  { %2042 = vmatpush1.bf16.msra.mxu0 %v4970_v6  ;;  %2443 = vmatpush1.bf16.msra.mxu1 %v4970_v6 }
 0x234   :  { %2043 = vmatprep.subr.bf16.mxu0 %v4971_v7  ;;  %2444 = vmatprep.subr.bf16.mxu1 %v4971_v7 }
 0x237   :  { %2044 = vmatpush1.bf16.msra.mxu0 %v4972_v8  ;;  %2445 = vmatpush1.bf16.msra.mxu1 %v4972_v8 }
 0x238   :  { %2045 = vmatprep.subr.bf16.mxu0 %v4973_v9  ;;  %2446 = vmatprep.subr.bf16.mxu1 %v4973_v9 }
 0x23b   :  { %2046 = vmatpush1.bf16.msra.mxu0 %v4974_v14  ;;  %2447 = vmatpush1.bf16.msra.mxu1 %v4974_v14 }
 0x23c   :  { %2047 = vmatprep.subr.bf16.mxu0 %v4975_v17  ;;  %2448 = vmatprep.subr.bf16.mxu1 %v4975_v17 }
 0x23f   :  { %2048 = vmatpush1.bf16.msra.mxu0 %v4976_v36  ;;  %2449 = vmatpush1.bf16.msra.mxu1 %v4976_v36 }
 0x242   :  { %2066 = vmatmul.mubr.bf16.vlgmr.msra.gmra.mrb[8].mxu0 %v3192_v28  ;;  %2467 = vmatmul.mubr.bf16.vlgmr.msra.gmra.mrb[8].mxu1 %v3193_v33 }
 0x243   :  { %2075 = vmatprep.mubr.bf16.mxu0 %v4967_v1  ;;  %2476 = vmatprep.mubr.bf16.mxu1 %v4967_v1 }
 0x24a   :  { %2076 = vmatmul.mubr.bf16.gmra.mrb[12].mxu0 %v3194_v37  ;;  %2477 = vmatmul.mubr.bf16.gmra.mrb[12].mxu1 %v3195_v38 }
 0x315   :  { %v2067_v39 = vpop.f32.mrb[8].mxu0  ;;  %v2468_v40 = vpop.f32.mrb[8].mxu1 }
 0x316   :  { %v2086_v41 = vmul.f32 %v2067_v39, %v4548_v29  ;;  %v2487_v42 = vmul.f32 %v2468_v40, %v4548_v29  ;;  %v2069_v45 = vpop.f32.mrb[9].mxu0  ;;  %v2470_v46 = vpop.f32.mrb[9].mxu1 }
 0x317   :  { %v2087_v47 = vmul.f32 %v2069_v45, %v4552_v30  ;;  %v2488_v48 = vmul.f32 %v2470_v46, %v4552_v30  ;;  %v2071_v53 = vpop.f32.mrb[10].mxu0  ;;  %v2472_v54 = vpop.f32.mrb[10].mxu1 }
 0x318   :  { %v2094_v19 = vadd.f32 %v2086_v41, %v4554_v31  ;;  %v2088_v23 = vmul.f32 %v2071_v53, %v4548_v29  ;;  %v2489_v52 = vmul.f32 %v2472_v54, %v4548_v29  ;;  %v2073_v55 = vpop.f32.mrb[11].mxu0  ;;  %v2474_v11 = vpop.f32.mrb[11].mxu1  ;;  %v2495_v63 = vadd.f32 %v2487_v42, %v4554_v31 }
 0x319   :  { %v2095_v51 = vadd.f32 %v2087_v47, %v4558_v34  ;;  %v2089_v12 = vmul.f32 %v2073_v55, %v4552_v30  ;;  %v2490_v59 = vmul.f32 %v2474_v11, %v4552_v30  ;;  %v2496_v1 = vadd.f32 %v2488_v48, %v4558_v34 }
 0x31a   :  { %v2102_v60 = vmax.f32 %v1701_v57, %v2094_v19  ;;  %v2096_v56 = vadd.f32 %v2088_v23, %v4554_v31  ;;  %v2497_v43 = vadd.f32 %v2489_v52, %v4554_v31 }
 0x31b   :  { %v2103_v0 = vmax.f32 %v1702_v62, %v2095_v51  ;;  %v2097_v2 = vadd.f32 %v2089_v12, %v4558_v34  ;;  %v2498_v7 = vadd.f32 %v2490_v59, %v4558_v34 }
 0x31c   :  { %v2503_v5 = vmax.f32 %v2102_v60, %v2495_v63  ;;  %v2104_v6 = vmax.f32 %v1703_v20, %v2096_v56 }
 0x31d   :  { %v2504_v44 = vmax.f32 %v2103_v0, %v2496_v1  ;;  %v2105_v57 = vmax.f32 %v1704_v24, %v2097_v2  ;;  %v2077_v49 = vpop.f32.mrb[12].mxu0  ;;  %v2478_v50 = vpop.f32.mrb[12].mxu1 }
 0x31e   :  { %v2511_v62 = vmax.f32 %v2503_v5, 0.0  ;;  %v2505_v8 = vmax.f32 %v2104_v6, %v2497_v43  ;;  %v2090_v9 = vmul.f32 %v2077_v49, %v4548_v29  ;;  %v2491_v14 = vmul.f32 %v2478_v50, %v4548_v29  ;;  %v2079_v17 = vpop.f32.mrb[13].mxu0  ;;  %v2480_v58 = vpop.f32.mrb[13].mxu1 }
 0x31f   :  { %v2512_v61 = vmax.f32 %v2504_v44, 0.0  ;;  %v2506_v20 = vmax.f32 %v2105_v57, %v2498_v7  ;;  %v2091_v28 = vmul.f32 %v2079_v17, %v4552_v30  ;;  %v2492_v33 = vmul.f32 %v2480_v58, %v4552_v30  ;;  %v2081_v15 = vpop.f32.mrb[14].mxu0  ;;  %v2482_v16 = vpop.f32.mrb[14].mxu1 }
 0x320   :  { %2519 = vst [vmem:[%s4835_s7] sm:$0xff] %v2511_v62  ;;  %v2513_v24 = vmax.f32 %v2505_v8, 0.0  ;;  %v2098_v36 = vadd.f32 %v2090_v9, %v4554_v31  ;;  %v2092_v37 = vmul.f32 %v2081_v15, %v4548_v29  ;;  %v2083_v38 = vpop.f32.mrb[15].mxu0  ;;  %v2484_v39 = vpop.f32.mrb[15].mxu1  ;;  %v2499_v41 = vadd.f32 %v2491_v14, %v4554_v31 }
 0x321   :  { %2520 = vst [vmem:[%s4835_s7 + $0x8] sm:$0xff] %v2512_v61  ;;  %v2514_v40 = vmax.f32 %v2506_v20, 0.0  ;;  %v2099_v42 = vadd.f32 %v2091_v28, %v4558_v34  ;;  %v2493_v45 = vmul.f32 %v2482_v16, %v4548_v29  ;;  %v2093_v48 = vmul.f32 %v2083_v38, %v4552_v30 }
 0x322   :  { %2521 = vst [vmem:[%s4835_s7 + $0x10] sm:$0xff] %v2513_v24  ;;  %v2106_v46 = vmax.f32 %v1705_v18, %v2098_v36  ;;  %v2100_v47 = vadd.f32 %v2092_v37, %v4554_v31  ;;  %v2494_v53 = vmul.f32 %v2484_v39, %v4552_v30  ;;  %v2500_v54 = vadd.f32 %v2492_v33, %v4558_v34 }
 0x323   :  { %2522 = vst [vmem:[%s4835_s7 + $0x18] sm:$0xff] %v2514_v40  ;;  %v2107_v29 = vmax.f32 %v1706_v25, %v2099_v42  ;;  %v2501_v4 = vadd.f32 %v2493_v45, %v4554_v31  ;;  %v2101_v18 = vadd.f32 %v2093_v48, %v4558_v34 }
 0x324   :  { %v2507_v19 = vmax.f32 %v2106_v46, %v2499_v41  ;;  %v2108_v3 = vmax.f32 %v1707_v32, %v2100_v47  ;;  %v2502_v10 = vadd.f32 %v2494_v53, %v4558_v34 }
 0x325   :  { %v2508_v30 = vmax.f32 %v2107_v29, %v2500_v54  ;;  %v2109_v55 = vmax.f32 %v1708_v35, %v2101_v18 }
 0x326   :  { %v2515_v23 = vmax.f32 %v2507_v19, 0.0  ;;  %v2509_v52 = vmax.f32 %v2108_v3, %v2501_v4 }
 0x327   :  { %v2516_v13 = vmax.f32 %v2508_v30, 0.0  ;;  %v2510_v22 = vmax.f32 %v2109_v55, %v2502_v10 }
 0x328   :  { %2523 = vst [vmem:[%s4835_s7 + $0x20] sm:$0xff] %v2515_v23  ;;  %v2517_v21 = vmax.f32 %v2509_v52, 0.0 }
 0x329   :  { %2524 = vst [vmem:[%s4835_s7 + $0x28] sm:$0xff] %v2516_v13  ;;  %v2518_v31 = vmax.f32 %v2510_v22, 0.0 }
 0x32a   :  { %2525 = vst [vmem:[%s4835_s7 + $0x30] sm:$0xff] %v2517_v21 }
 0x32b   :  { %2526 = vst [vmem:[%s4835_s7 + $0x38] sm:$0xff] %v2518_v31 }

// kernel: cnn_forward.10
= control target key start
LH: loop header
LB: loop body
LE: loop exit
PB: predicated region body
PF: predicated region fallthrough
CT: control target
= control target key end

     0   :  { %v2690_v36 = vmov 1966171168   ;;  %v279_v38 = vlaneseq  ;;  %s3531_s1 = inlined_call_operand.vmem [shape: bf16[1024,512], index: 1, kind: input, shape index: {}]   ;;  %s3532_s0 = inlined_call_operand.vmem [shape: bf16[2,1024], index: 0, kind: input, shape index: {}]   ;;  %s3533_s2 = inlined_call_operand.vmem [shape: f32[1,512], index: 2, kind: input, shape index: {}]   ;;  %s3534_s3 = inlined_call_operand.vmem [shape: f32[1,512], index: 3, kind: input, shape index: {}]   ;;  %s3535_s4 = inlined_call_operand.vmem [shape: f32[2,512], index: 4, kind: output, shape index: {}]  }
   0x1   :  { %v2305_v0 = vld [vmem:[%s3531_s1 + $0x4] ss:$16 sps:$4 sm:$0xff]   ;;  %v2307_v1 = vld [vmem:[%s3531_s1 + $0xc] ss:$16 sps:$4 sm:$0xff]   ;;  %v2309_v2 = vld [vmem:[%s3531_s1] ss:$16 sps:$4 sm:$0xff]   ;;  %v277_v37 = vunpack.c.l.s4 %v2690_v36 }
   0x2   :  { %1612 = vmatprep.subr.bf16.mxu0 %v2305_v0  ;;  %v2310_v3 = vld [vmem:[%s3531_s1 + $0x8] ss:$16 sps:$4 sm:$0xff]   ;;  %1776 = vmatprep.subr.bf16.mxu1 %v2307_v1  ;;  %v2311_v4 = vld [vmem:[%s3531_s1 + $0x24] ss:$16 sps:$4 sm:$0xff]   ;;  %v2313_v5 = vld [vmem:[%s3531_s1 + $0x2c] ss:$16 sps:$4 sm:$0xff]  }
   0x3   :  { %1613 = vmatpush1.bf16.msra.mxu0 %v2309_v2  ;;  %1777 = vmatpush1.bf16.msra.mxu1 %v2310_v3  ;;  %v2315_v6 = vld [vmem:[%s3531_s1 + $0x20] ss:$16 sps:$4 sm:$0xff]   ;;  %v2316_v7 = vld [vmem:[%s3531_s1 + $0x28] ss:$16 sps:$4 sm:$0xff]   ;;  %v2317_v8 = vld [vmem:[%s3531_s1 + $0x44] ss:$16 sps:$4 sm:$0xff]   ;;  %v278_v42 = vunpack.c.0.s8 %v277_v37 }
   0x4   :  { %1614 = vmatprep.subr.bf16.mxu0 %v2311_v4  ;;  %1778 = vmatprep.subr.bf16.mxu1 %v2313_v5  ;;  %v2319_v9 = vld [vmem:[%s3531_s1 + $0x4c] ss:$16 sps:$4 sm:$0xff]   ;;  %v2321_v10 = vld [vmem:[%s3531_s1 + $0x40] ss:$16 sps:$4 sm:$0xff]   ;;  %v2322_v11 = vld [vmem:[%s3531_s1 + $0x48] ss:$16 sps:$4 sm:$0xff]  }
   0x5   :  { %v2323_v12 = vld [vmem:[%s3531_s1 + $0x64] ss:$16 sps:$4 sm:$0xff]   ;;  %v2325_v13 = vld [vmem:[%s3531_s1 + $0x6c] ss:$16 sps:$4 sm:$0xff]   ;;  %v2327_v14 = vld [vmem:[%s3531_s1 + $0x60] ss:$16 sps:$4 sm:$0xff]  }
   0x6   :  { %v2328_v15 = vld [vmem:[%s3531_s1 + $0x68] ss:$16 sps:$4 sm:$0xff]   ;;  %v2329_v16 = vld [vmem:[%s3531_s1 + $0x84] ss:$16 sps:$4 sm:$0xff]   ;;  %v2331_v17 = vld [vmem:[%s3531_s1 + $0x8c] ss:$16 sps:$4 sm:$0xff]  }
   0x7   :  { %1615 = vmatpush1.bf16.msra.mxu0 %v2315_v6  ;;  %1779 = vmatpush1.bf16.msra.mxu1 %v2316_v7  ;;  %v2333_v18 = vld [vmem:[%s3531_s1 + $0x80] ss:$16 sps:$4 sm:$0xff]   ;;  %v2334_v19 = vld [vmem:[%s3531_s1 + $0x88] ss:$16 sps:$4 sm:$0xff]   ;;  %v2335_v20 = vld [vmem:[%s3531_s1 + $0xa4] ss:$16 sps:$4 sm:$0xff]  }
   0x8   :  { %1616 = vmatprep.subr.bf16.mxu0 %v2317_v8  ;;  %1780 = vmatprep.subr.bf16.mxu1 %v2319_v9  ;;  %v2337_v21 = vld [vmem:[%s3531_s1 + $0xac] ss:$16 sps:$4 sm:$0xff]   ;;  %v2339_v22 = vld [vmem:[%s3531_s1 + $0xa0] ss:$16 sps:$4 sm:$0xff]   ;;  %v2340_v23 = vld [vmem:[%s3531_s1 + $0xa8] ss:$16 sps:$4 sm:$0xff]  }
   0x9   :  { %v2341_v24 = vld [vmem:[%s3531_s1 + $0xc4] ss:$16 sps:$4 sm:$0xff]   ;;  %v2343_v25 = vld [vmem:[%s3531_s1 + $0xcc] ss:$16 sps:$4 sm:$0xff]   ;;  %v2345_v26 = vld [vmem:[%s3531_s1 + $0xc0] ss:$16 sps:$4 sm:$0xff]  }
   0xa   :  { %v2346_v27 = vld [vmem:[%s3531_s1 + $0xc8] ss:$16 sps:$4 sm:$0xff]   ;;  %v2347_v28 = vld [vmem:[%s3531_s1 + $0xe4] ss:$16 sps:$4 sm:$0xff]   ;;  %v2349_v29 = vld [vmem:[%s3531_s1 + $0xec] ss:$16 sps:$4 sm:$0xff]  }
   0xb   :  { %1617 = vmatpush1.bf16.msra.mxu0 %v2321_v10  ;;  %1781 = vmatpush1.bf16.msra.mxu1 %v2322_v11  ;;  %v2351_v30 = vld [vmem:[%s3531_s1 + $0xe0] ss:$16 sps:$4 sm:$0xff]   ;;  %v2352_v31 = vld [vmem:[%s3531_s1 + $0xe8] ss:$16 sps:$4 sm:$0xff]   ;;  %v2353_v32 = vld [vmem:[%s3531_s1 + $0x104] ss:$16 sps:$4 sm:$0xff]  }
   0xc   :  { %1618 = vmatprep.subr.bf16.mxu0 %v2323_v12  ;;  %1782 = vmatprep.subr.bf16.mxu1 %v2325_v13  ;;  %v2355_v33 = vld [vmem:[%s3531_s1 + $0x10c] ss:$16 sps:$4 sm:$0xff]   ;;  %v2357_v34 = vld [vmem:[%s3531_s1 + $0x100] ss:$16 sps:$4 sm:$0xff]   ;;  %v2358_v35 = vld [vmem:[%s3531_s1 + $0x108] ss:$16 sps:$4 sm:$0xff]  }
   0xd   :  { %v2359_v39 = vld [vmem:[%s3531_s1 + $0x124] ss:$16 sps:$4 sm:$0xff]   ;;  %v2361_v40 = vld [vmem:[%s3531_s1 + $0x12c] ss:$16 sps:$4 sm:$0xff]   ;;  %v2363_v41 = vld [vmem:[%s3531_s1 + $0x120] ss:$16 sps:$4 sm:$0xff]  }
   0xe   :  { %v2834_v43 = vshrl.u32 %v279_v38, 7  ;;  %v2364_v44 = vld [vmem:[%s3531_s1 + $0x128] ss:$16 sps:$4 sm:$0xff]   ;;  %v2365_v45 = vld [vmem:[%s3531_s1 + $0x144] ss:$16 sps:$4 sm:$0xff]  }
   0xf   :  { %1619 = vmatpush1.bf16.msra.mxu0 %v2327_v14  ;;  %1783 = vmatpush1.bf16.msra.mxu1 %v2328_v15  ;;  %v2367_v46 = vld [vmem:[%s3531_s1 + $0x14c] ss:$16 sps:$4 sm:$0xff]   ;;  %v2369_v47 = vld [vmem:[%s3531_s1 + $0x140] ss:$16 sps:$4 sm:$0xff]   ;;  %v2370_v48 = vld [vmem:[%s3531_s1 + $0x148] ss:$16 sps:$4 sm:$0xff]  }
  0x10   :  { %1620 = vmatprep.subr.bf16.mxu0 %v2329_v16  ;;  %1784 = vmatprep.subr.bf16.mxu1 %v2331_v17  ;;  %v2852_v49 = vsub.s32 %v278_v42, %v2834_v43  ;;  %v2371_v50 = vld [vmem:[%s3531_s1 + $0x164] ss:$16 sps:$4 sm:$0xff]   ;;  %v2373_v51 = vld [vmem:[%s3531_s1 + $0x16c] ss:$16 sps:$4 sm:$0xff]   ;;  %v2375_v53 = vld [vmem:[%s3531_s1 + $0x160] ss:$16 sps:$4 sm:$0xff]  }
  0x11   :  { %v17_v52 = vld [vmem:[%s3532_s0] sm:$0xff]  ;;  %v2376_v55 = vld [vmem:[%s3531_s1 + $0x168] ss:$16 sps:$4 sm:$0xff]   ;;  %v2379_v57 = vld [vmem:[%s3531_s1 + $0x18c] ss:$16 sps:$4 sm:$0xff]  }
  0x12   :  { %v282_v54 = vrot.slane %v17_v52, %v2852_v49  ;;  %v2377_v56 = vld [vmem:[%s3531_s1 + $0x184] ss:$16 sps:$4 sm:$0xff]   ;;  %v2381_v59 = vld [vmem:[%s3531_s1 + $0x180] ss:$16 sps:$4 sm:$0xff]   ;;  %v2382_v61 = vld [vmem:[%s3531_s1 + $0x188] ss:$16 sps:$4 sm:$0xff]   ;;  %v275_v9 = vcombine.high %v17_v52, %v17_v52 }
  0x13   :  { %1621 = vmatpush1.bf16.msra.mxu0 %v2333_v18  ;;  %1785 = vmatpush1.bf16.msra.mxu1 %v2334_v19  ;;  %v2383_v62 = vld [vmem:[%s3531_s1 + $0x1a4] ss:$16 sps:$4 sm:$0xff]   ;;  %v2385_v63 = vld [vmem:[%s3531_s1 + $0x1ac] ss:$16 sps:$4 sm:$0xff]   ;;  %v2387_v0 = vld [vmem:[%s3531_s1 + $0x1a0] ss:$16 sps:$4 sm:$0xff]  }
  0x14   :  { %1622 = vmatprep.subr.bf16.mxu0 %v2335_v20  ;;  %1786 = vmatprep.subr.bf16.mxu1 %v2337_v21  ;;  %v290_v58 = vcombine.high %v282_v54, %v282_v54  ;;  %v2388_v1 = vld [vmem:[%s3531_s1 + $0x1a8] ss:$16 sps:$4 sm:$0xff]   ;;  %v2389_v2 = vld [vmem:[%s3531_s1 + $0x1c4] ss:$16 sps:$4 sm:$0xff]   ;;  %v2391_v3 = vld [vmem:[%s3531_s1 + $0x1cc] ss:$16 sps:$4 sm:$0xff]   ;;  %v289_v13 = vrot.slane %v275_v9, %v2852_v49  ;;  %v2930_v15 = vrot.slane %v282_v54, %v2852_v49 }
  0x15   :  { %v2393_v4 = vld [vmem:[%s3531_s1 + $0x1c0] ss:$16 sps:$4 sm:$0xff]   ;;  %v2394_v5 = vld [vmem:[%s3531_s1 + $0x1c8] ss:$16 sps:$4 sm:$0xff]   ;;  %v2395_v6 = vld [vmem:[%s3531_s1 + $0x1e4] ss:$16 sps:$4 sm:$0xff]  }
  0x16   :  { %v312_v60 = vrot.slane %v290_v58, %v2852_v49  ;;  %v2397_v7 = vld [vmem:[%s3531_s1 + $0x1ec] ss:$16 sps:$4 sm:$0xff]   ;;  %v2399_v8 = vld [vmem:[%s3531_s1 + $0x1e0] ss:$16 sps:$4 sm:$0xff]   ;;  %v2400_v10 = vld [vmem:[%s3531_s1 + $0x1e8] ss:$16 sps:$4 sm:$0xff]   ;;  %v291_v16 = vcombine.high %v289_v13, %v289_v13  ;;  %v2945_v21 = vrot.slane %v289_v13, %v2852_v49 }
  0x17   :  { %1623 = vmatpush1.bf16.msra.mxu0 %v2339_v22  ;;  %1787 = vmatpush1.bf16.msra.mxu1 %v2340_v23  ;;  %v2403_v11 = vld [vmem:[%s3531_s1 + $0x204] ss:$16 sps:$4 sm:$0xff]   ;;  %v2406_v12 = vld [vmem:[%s3531_s1 + $0x20c] ss:$16 sps:$4 sm:$0xff]   ;;  %v2401_v14 = vld [vmem:[%s3531_s1 + $0x200] ss:$16 sps:$4 sm:$0xff]  }
  0x18   :  { %1624 = vmatprep.subr.bf16.mxu0 %v2341_v24  ;;  %1788 = vmatprep.subr.bf16.mxu1 %v2343_v25  ;;  %v2404_v17 = vld [vmem:[%s3531_s1 + $0x208] ss:$16 sps:$4 sm:$0xff]   ;;  %v2409_v18 = vld [vmem:[%s3531_s1 + $0x224] ss:$16 sps:$4 sm:$0xff]   ;;  %v2412_v19 = vld [vmem:[%s3531_s1 + $0x22c] ss:$16 sps:$4 sm:$0xff]   ;;  %v2942_v20 = vrot.slane %v291_v16, %v2852_v49  ;;  %v322_v22 = vcombine.high %v312_v60, %v312_v60 }
  0x19   :  { %1644 = vmatprep.mubr.bf16.mxu0 %v312_v60  ;;  %1808 = vmatprep.mubr.bf16.mxu1 %v312_v60  ;;  %v2407_v23 = vld [vmem:[%s3531_s1 + $0x220] ss:$16 sps:$4 sm:$0xff]   ;;  %v2410_v24 = vld [vmem:[%s3531_s1 + $0x228] ss:$16 sps:$4 sm:$0xff]   ;;  %v2415_v25 = vld [vmem:[%s3531_s1 + $0x244] ss:$16 sps:$4 sm:$0xff]  }
  0x1a   :  { %v2428_v36 = vld [vmem:[%s3531_s1 + $0x288] ss:$16 sps:$4 sm:$0xff]   ;;  %v2433_v37 = vld [vmem:[%s3531_s1 + $0x2a4] ss:$16 sps:$4 sm:$0xff]   ;;  %v2436_v38 = vld [vmem:[%s3531_s1 + $0x2ac] ss:$16 sps:$4 sm:$0xff]  }
  0x1b   :  { %1625 = vmatpush1.bf16.msra.mxu0 %v2345_v26  ;;  %1789 = vmatpush1.bf16.msra.mxu1 %v2346_v27  ;;  %v2418_v26 = vld [vmem:[%s3531_s1 + $0x24c] ss:$16 sps:$4 sm:$0xff]   ;;  %v2413_v27 = vld [vmem:[%s3531_s1 + $0x240] ss:$16 sps:$4 sm:$0xff]   ;;  %v2446_v49 = vld [vmem:[%s3531_s1 + $0x2e8] ss:$16 sps:$4 sm:$0xff]  }
  0x1c   :  { %1626 = vmatprep.subr.bf16.mxu0 %v2347_v28  ;;  %1790 = vmatprep.subr.bf16.mxu1 %v2349_v29  ;;  %v2416_v28 = vld [vmem:[%s3531_s1 + $0x248] ss:$16 sps:$4 sm:$0xff]   ;;  %v2421_v29 = vld [vmem:[%s3531_s1 + $0x264] ss:$16 sps:$4 sm:$0xff]   ;;  %v2442_v42 = vld [vmem:[%s3531_s1 + $0x2cc] ss:$16 sps:$4 sm:$0xff]  }
  0x1d   :  { %v2449_v52 = vld [vmem:[%s3531_s1 + $0x300] ss:$16 sps:$4 sm:$0xff]   ;;  %v2457_v54 = vld [vmem:[%s3531_s1 + $0x324] ss:$16 sps:$4 sm:$0xff]   ;;  %v2482_v9 = vld [vmem:[%s3531_s1 + $0x3a8] ss:$16 sps:$4 sm:$0xff]  }
  0x1e   :  { %v2463_v58 = vld [vmem:[%s3531_s1 + $0x344] ss:$16 sps:$4 sm:$0xff]   ;;  %v2461_v60 = vld [vmem:[%s3531_s1 + $0x340] ss:$16 sps:$4 sm:$0xff]   ;;  %v2488_v13 = vld [vmem:[%s3531_s1 + $0x3c8] ss:$16 sps:$4 sm:$0xff]  }
  0x1f   :  { %1627 = vmatpush1.bf16.msra.mxu0 %v2351_v30  ;;  %1791 = vmatpush1.bf16.msra.mxu1 %v2352_v31  ;;  %v2424_v30 = vld [vmem:[%s3531_s1 + $0x26c] ss:$16 sps:$4 sm:$0xff]   ;;  %v2419_v31 = vld [vmem:[%s3531_s1 + $0x260] ss:$16 sps:$4 sm:$0xff]  }
  0x20   :  { %1628 = vmatprep.subr.bf16.mxu0 %v2353_v32  ;;  %1792 = vmatprep.subr.bf16.mxu1 %v2355_v33  ;;  %v2422_v32 = vld [vmem:[%s3531_s1 + $0x268] ss:$16 sps:$4 sm:$0xff]   ;;  %v2427_v33 = vld [vmem:[%s3531_s1 + $0x284] ss:$16 sps:$4 sm:$0xff]   ;;  %v2496_v16 = vld [vmem:[%s3531_s1 + $0x3ec] ss:$16 sps:$4 sm:$0xff]  }
  0x23   :  { %1629 = vmatpush1.bf16.msra.mxu0 %v2357_v34  ;;  %1793 = vmatpush1.bf16.msra.mxu1 %v2358_v35  ;;  %v2430_v34 = vld [vmem:[%s3531_s1 + $0x28c] ss:$16 sps:$4 sm:$0xff]   ;;  %v2425_v35 = vld [vmem:[%s3531_s1 + $0x280] ss:$16 sps:$4 sm:$0xff]  }
  0x24   :  { %1630 = vmatprep.subr.bf16.mxu0 %v2359_v39  ;;  %1794 = vmatprep.subr.bf16.mxu1 %v2361_v40  ;;  %v2431_v39 = vld [vmem:[%s3531_s1 + $0x2a0] ss:$16 sps:$4 sm:$0xff]   ;;  %v2434_v40 = vld [vmem:[%s3531_s1 + $0x2a8] ss:$16 sps:$4 sm:$0xff]  }
  0x27   :  { %1631 = vmatpush1.bf16.msra.mxu0 %v2363_v41  ;;  %1795 = vmatpush1.bf16.msra.mxu1 %v2364_v44  ;;  %v2439_v41 = vld [vmem:[%s3531_s1 + $0x2c4] ss:$16 sps:$4 sm:$0xff]   ;;  %v2437_v44 = vld [vmem:[%s3531_s1 + $0x2c0] ss:$16 sps:$4 sm:$0xff]  }
  0x28   :  { %1632 = vmatprep.subr.bf16.mxu0 %v2365_v45  ;;  %1796 = vmatprep.subr.bf16.mxu1 %v2367_v46  ;;  %v2440_v45 = vld [vmem:[%s3531_s1 + $0x2c8] ss:$16 sps:$4 sm:$0xff]   ;;  %v2445_v46 = vld [vmem:[%s3531_s1 + $0x2e4] ss:$16 sps:$4 sm:$0xff]  }
  0x2b   :  { %1633 = vmatpush1.bf16.msra.mxu0 %v2369_v47  ;;  %1797 = vmatpush1.bf16.msra.mxu1 %v2370_v48  ;;  %v2448_v47 = vld [vmem:[%s3531_s1 + $0x2ec] ss:$16 sps:$4 sm:$0xff]   ;;  %v2443_v48 = vld [vmem:[%s3531_s1 + $0x2e0] ss:$16 sps:$4 sm:$0xff]  }
  0x2c   :  { %1634 = vmatprep.subr.bf16.mxu0 %v2371_v50  ;;  %1798 = vmatprep.subr.bf16.mxu1 %v2373_v51  ;;  %v2451_v50 = vld [vmem:[%s3531_s1 + $0x304] ss:$16 sps:$4 sm:$0xff]   ;;  %v2454_v51 = vld [vmem:[%s3531_s1 + $0x30c] ss:$16 sps:$4 sm:$0xff]  }
  0x2f   :  { %1635 = vmatpush1.bf16.msra.mxu0 %v2375_v53  ;;  %1799 = vmatpush1.bf16.msra.mxu1 %v2376_v55  ;;  %v2452_v53 = vld [vmem:[%s3531_s1 + $0x308] ss:$16 sps:$4 sm:$0xff]   ;;  %v2460_v55 = vld [vmem:[%s3531_s1 + $0x32c] ss:$16 sps:$4 sm:$0xff]  }
  0x30   :  { %1636 = vmatprep.subr.bf16.mxu0 %v2377_v56  ;;  %1800 = vmatprep.subr.bf16.mxu1 %v2379_v57  ;;  %v2455_v56 = vld [vmem:[%s3531_s1 + $0x320] ss:$16 sps:$4 sm:$0xff]   ;;  %v2458_v57 = vld [vmem:[%s3531_s1 + $0x328] ss:$16 sps:$4 sm:$0xff]  }
  0x33   :  { %1637 = vmatpush1.bf16.msra.mxu0 %v2381_v59  ;;  %1801 = vmatpush1.bf16.msra.mxu1 %v2382_v61  ;;  %v2466_v59 = vld [vmem:[%s3531_s1 + $0x34c] ss:$16 sps:$4 sm:$0xff]   ;;  %v2464_v61 = vld [vmem:[%s3531_s1 + $0x348] ss:$16 sps:$4 sm:$0xff]  }
  0x34   :  { %1638 = vmatprep.subr.bf16.mxu0 %v2383_v62  ;;  %1802 = vmatprep.subr.bf16.mxu1 %v2385_v63  ;;  %v2469_v62 = vld [vmem:[%s3531_s1 + $0x364] ss:$16 sps:$4 sm:$0xff]   ;;  %v2472_v63 = vld [vmem:[%s3531_s1 + $0x36c] ss:$16 sps:$4 sm:$0xff]  }
  0x37   :  { %1639 = vmatpush1.bf16.msra.mxu0 %v2387_v0  ;;  %1803 = vmatpush1.bf16.msra.mxu1 %v2388_v1  ;;  %v2467_v0 = vld [vmem:[%s3531_s1 + $0x360] ss:$16 sps:$4 sm:$0xff]   ;;  %v2470_v1 = vld [vmem:[%s3531_s1 + $0x368] ss:$16 sps:$4 sm:$0xff]  }
  0x38   :  { %1640 = vmatprep.subr.bf16.mxu0 %v2389_v2  ;;  %1804 = vmatprep.subr.bf16.mxu1 %v2391_v3  ;;  %v2475_v2 = vld [vmem:[%s3531_s1 + $0x384] ss:$16 sps:$4 sm:$0xff]   ;;  %v2478_v3 = vld [vmem:[%s3531_s1 + $0x38c] ss:$16 sps:$4 sm:$0xff]  }
  0x3b   :  { %1641 = vmatpush1.bf16.msra.mxu0 %v2393_v4  ;;  %1805 = vmatpush1.bf16.msra.mxu1 %v2394_v5  ;;  %v2473_v4 = vld [vmem:[%s3531_s1 + $0x380] ss:$16 sps:$4 sm:$0xff]   ;;  %v2476_v5 = vld [vmem:[%s3531_s1 + $0x388] ss:$16 sps:$4 sm:$0xff]  }
  0x3c   :  { %1642 = vmatprep.subr.bf16.mxu0 %v2395_v6  ;;  %1806 = vmatprep.subr.bf16.mxu1 %v2397_v7  ;;  %v2481_v6 = vld [vmem:[%s3531_s1 + $0x3a4] ss:$16 sps:$4 sm:$0xff]   ;;  %v2484_v7 = vld [vmem:[%s3531_s1 + $0x3ac] ss:$16 sps:$4 sm:$0xff]  }
  0x3f   :  { %1643 = vmatpush1.bf16.msra.mxu0 %v2399_v8  ;;  %1807 = vmatpush1.bf16.msra.mxu1 %v2400_v10  ;;  %v2479_v8 = vld [vmem:[%s3531_s1 + $0x3a0] ss:$16 sps:$4 sm:$0xff]   ;;  %v2487_v10 = vld [vmem:[%s3531_s1 + $0x3c4] ss:$16 sps:$4 sm:$0xff]  }
  0x40   :  { %1653 = vmatprep.subr.bf16.mxu0 %v2403_v11  ;;  %1817 = vmatprep.subr.bf16.mxu1 %v2406_v12  ;;  %v2490_v11 = vld [vmem:[%s3531_s1 + $0x3cc] ss:$16 sps:$4 sm:$0xff]   ;;  %v2485_v12 = vld [vmem:[%s3531_s1 + $0x3c0] ss:$16 sps:$4 sm:$0xff]  }
  0x42   :  { %1645 = vmatmul.mubr.bf16.vlgmr.msra.gmra.mrb[0].mxu0 %v2930_v15  ;;  %1809 = vmatmul.mubr.bf16.vlgmr.msra.gmra.mrb[0].mxu1 %v2930_v15 }
  0x43   :  { %1654 = vmatpush1.bf16.msra.mxu0 %v2401_v14  ;;  %1818 = vmatpush1.bf16.msra.mxu1 %v2404_v17  ;;  %v2493_v14 = vld [vmem:[%s3531_s1 + $0x3e4] ss:$16 sps:$4 sm:$0xff]   ;;  %v2491_v17 = vld [vmem:[%s3531_s1 + $0x3e0] ss:$16 sps:$4 sm:$0xff]  }
  0x44   :  { %1655 = vmatprep.subr.bf16.mxu0 %v2409_v18  ;;  %1819 = vmatprep.subr.bf16.mxu1 %v2412_v19  ;;  %v2494_v18 = vld [vmem:[%s3531_s1 + $0x3e8] ss:$16 sps:$4 sm:$0xff]   ;;  %v2499_v19 = vld [vmem:[%s3531_s1 + $0x404] ss:$16 sps:$4 sm:$0xff]  }
  0x45   :  { %1685 = vmatprep.mubr.bf16.mxu0 %v322_v22  ;;  %1849 = vmatprep.mubr.bf16.mxu1 %v322_v22  ;;  %v2502_v22 = vld [vmem:[%s3531_s1 + $0x40c] ss:$16 sps:$4 sm:$0xff]  }
  0x47   :  { %1656 = vmatpush1.bf16.msra.mxu0 %v2407_v23  ;;  %1820 = vmatpush1.bf16.msra.mxu1 %v2410_v24  ;;  %v2497_v23 = vld [vmem:[%s3531_s1 + $0x400] ss:$16 sps:$4 sm:$0xff]   ;;  %v320_v24 = vcombine.high %v2930_v15, %v2930_v15 }
  0x48   :  { %1657 = vmatprep.subr.bf16.mxu0 %v2415_v25  ;;  %1821 = vmatprep.subr.bf16.mxu1 %v2418_v26  ;;  %v2500_v25 = vld [vmem:[%s3531_s1 + $0x408] ss:$16 sps:$4 sm:$0xff]   ;;  %v2505_v26 = vld [vmem:[%s3531_s1 + $0x424] ss:$16 sps:$4 sm:$0xff]   ;;  %v2503_v15 = vld [vmem:[%s3531_s1 + $0x420] ss:$16 sps:$4 sm:$0xff]  }
  0x4b   :  { %1658 = vmatpush1.bf16.msra.mxu0 %v2413_v27  ;;  %1822 = vmatpush1.bf16.msra.mxu1 %v2416_v28  ;;  %v2508_v27 = vld [vmem:[%s3531_s1 + $0x42c] ss:$16 sps:$4 sm:$0xff]   ;;  %v2506_v28 = vld [vmem:[%s3531_s1 + $0x428] ss:$16 sps:$4 sm:$0xff]  }
  0x4c   :  { %1659 = vmatprep.subr.bf16.mxu0 %v2421_v29  ;;  %1823 = vmatprep.subr.bf16.mxu1 %v2424_v30  ;;  %v2511_v29 = vld [vmem:[%s3531_s1 + $0x444] ss:$16 sps:$4 sm:$0xff]   ;;  %v2514_v30 = vld [vmem:[%s3531_s1 + $0x44c] ss:$16 sps:$4 sm:$0xff]  }
  0x4f   :  { %1660 = vmatpush1.bf16.msra.mxu0 %v2419_v31  ;;  %1824 = vmatpush1.bf16.msra.mxu1 %v2422_v32  ;;  %v2509_v31 = vld [vmem:[%s3531_s1 + $0x440] ss:$16 sps:$4 sm:$0xff]   ;;  %v2512_v32 = vld [vmem:[%s3531_s1 + $0x448] ss:$16 sps:$4 sm:$0xff]  }
  0x50   :  { %1661 = vmatprep.subr.bf16.mxu0 %v2427_v33  ;;  %1825 = vmatprep.subr.bf16.mxu1 %v2430_v34  ;;  %v2517_v33 = vld [vmem:[%s3531_s1 + $0x464] ss:$16 sps:$4 sm:$0xff]   ;;  %v2520_v34 = vld [vmem:[%s3531_s1 + $0x46c] ss:$16 sps:$4 sm:$0xff]  }
  0x53   :  { %1662 = vmatpush1.bf16.msra.mxu0 %v2425_v35  ;;  %1826 = vmatpush1.bf16.msra.mxu1 %v2428_v36  ;;  %v2515_v35 = vld [vmem:[%s3531_s1 + $0x460] ss:$16 sps:$4 sm:$0xff]   ;;  %v2518_v36 = vld [vmem:[%s3531_s1 + $0x468] ss:$16 sps:$4 sm:$0xff]  }
  0x54   :  { %1663 = vmatprep.subr.bf16.mxu0 %v2433_v37  ;;  %1827 = vmatprep.subr.bf16.mxu1 %v2436_v38  ;;  %v2523_v37 = vld [vmem:[%s3531_s1 + $0x484] ss:$16 sps:$4 sm:$0xff]   ;;  %v2526_v38 = vld [vmem:[%s3531_s1 + $0x48c] ss:$16 sps:$4 sm:$0xff]  }
  0x57   :  { %1664 = vmatpush1.bf16.msra.mxu0 %v2431_v39  ;;  %1828 = vmatpush1.bf16.msra.mxu1 %v2434_v40  ;;  %v2521_v39 = vld [vmem:[%s3531_s1 + $0x480] ss:$16 sps:$4 sm:$0xff]   ;;  %v2524_v40 = vld [vmem:[%s3531_s1 + $0x488] ss:$16 sps:$4 sm:$0xff]  }
  0x58   :  { %1665 = vmatprep.subr.bf16.mxu0 %v2439_v41  ;;  %1829 = vmatprep.subr.bf16.mxu1 %v2442_v42  ;;  %v2529_v41 = vld [vmem:[%s3531_s1 + $0x4a4] ss:$16 sps:$4 sm:$0xff]   ;;  %v2532_v42 = vld [vmem:[%s3531_s1 + $0x4ac] ss:$16 sps:$4 sm:$0xff]  }
  0x5b   :  { %1666 = vmatpush1.bf16.msra.mxu0 %v2437_v44  ;;  %1830 = vmatpush1.bf16.msra.mxu1 %v2440_v45  ;;  %v2527_v44 = vld [vmem:[%s3531_s1 + $0x4a0] ss:$16 sps:$4 sm:$0xff]   ;;  %v2530_v45 = vld [vmem:[%s3531_s1 + $0x4a8] ss:$16 sps:$4 sm:$0xff]  }
  0x5c   :  { %1667 = vmatprep.subr.bf16.mxu0 %v2445_v46  ;;  %1831 = vmatprep.subr.bf16.mxu1 %v2448_v47  ;;  %v2535_v46 = vld [vmem:[%s3531_s1 + $0x4c4] ss:$16 sps:$4 sm:$0xff]   ;;  %v2538_v47 = vld [vmem:[%s3531_s1 + $0x4cc] ss:$16 sps:$4 sm:$0xff]  }
  0x5f   :  { %1668 = vmatpush1.bf16.msra.mxu0 %v2443_v48  ;;  %1832 = vmatpush1.bf16.msra.mxu1 %v2446_v49  ;;  %v2533_v48 = vld [vmem:[%s3531_s1 + $0x4c0] ss:$16 sps:$4 sm:$0xff]   ;;  %v2536_v49 = vld [vmem:[%s3531_s1 + $0x4c8] ss:$16 sps:$4 sm:$0xff]  }
  0x60   :  { %1669 = vmatprep.subr.bf16.mxu0 %v2451_v50  ;;  %1833 = vmatprep.subr.bf16.mxu1 %v2454_v51  ;;  %v2541_v50 = vld [vmem:[%s3531_s1 + $0x4e4] ss:$16 sps:$4 sm:$0xff]   ;;  %v2544_v51 = vld [vmem:[%s3531_s1 + $0x4ec] ss:$16 sps:$4 sm:$0xff]  }
  0x63   :  { %1670 = vmatpush1.bf16.msra.mxu0 %v2449_v52  ;;  %1834 = vmatpush1.bf16.msra.mxu1 %v2452_v53  ;;  %v2539_v52 = vld [vmem:[%s3531_s1 + $0x4e0] ss:$16 sps:$4 sm:$0xff]   ;;  %v2542_v53 = vld [vmem:[%s3531_s1 + $0x4e8] ss:$16 sps:$4 sm:$0xff]  }
  0x64   :  { %1671 = vmatprep.subr.bf16.mxu0 %v2457_v54  ;;  %1835 = vmatprep.subr.bf16.mxu1 %v2460_v55  ;;  %v2547_v54 = vld [vmem:[%s3531_s1 + $0x504] ss:$16 sps:$4 sm:$0xff]   ;;  %v2550_v55 = vld [vmem:[%s3531_s1 + $0x50c] ss:$16 sps:$4 sm:$0xff]  }
  0x67   :  { %1672 = vmatpush1.bf16.msra.mxu0 %v2455_v56  ;;  %1836 = vmatpush1.bf16.msra.mxu1 %v2458_v57  ;;  %v2545_v56 = vld [vmem:[%s3531_s1 + $0x500] ss:$16 sps:$4 sm:$0xff]   ;;  %v2548_v57 = vld [vmem:[%s3531_s1 + $0x508] ss:$16 sps:$4 sm:$0xff]  }
  0x68   :  { %1673 = vmatprep.subr.bf16.mxu0 %v2463_v58  ;;  %1837 = vmatprep.subr.bf16.mxu1 %v2466_v59  ;;  %v2553_v58 = vld [vmem:[%s3531_s1 + $0x524] ss:$16 sps:$4 sm:$0xff]   ;;  %v2556_v59 = vld [vmem:[%s3531_s1 + $0x52c] ss:$16 sps:$4 sm:$0xff]  }
  0x6b   :  { %1674 = vmatpush1.bf16.msra.mxu0 %v2461_v60  ;;  %1838 = vmatpush1.bf16.msra.mxu1 %v2464_v61  ;;  %v2551_v60 = vld [vmem:[%s3531_s1 + $0x520] ss:$16 sps:$4 sm:$0xff]   ;;  %v2554_v61 = vld [vmem:[%s3531_s1 + $0x528] ss:$16 sps:$4 sm:$0xff]  }
  0x6c   :  { %1675 = vmatprep.subr.bf16.mxu0 %v2469_v62  ;;  %1839 = vmatprep.subr.bf16.mxu1 %v2472_v63  ;;  %v2559_v62 = vld [vmem:[%s3531_s1 + $0x544] ss:$16 sps:$4 sm:$0xff]   ;;  %v2562_v63 = vld [vmem:[%s3531_s1 + $0x54c] ss:$16 sps:$4 sm:$0xff]  }
  0x6f   :  { %1676 = vmatpush1.bf16.msra.mxu0 %v2467_v0  ;;  %1840 = vmatpush1.bf16.msra.mxu1 %v2470_v1  ;;  %v2557_v0 = vld [vmem:[%s3531_s1 + $0x540] ss:$16 sps:$4 sm:$0xff]   ;;  %v2560_v1 = vld [vmem:[%s3531_s1 + $0x548] ss:$16 sps:$4 sm:$0xff]  }
  0x70   :  { %1677 = vmatprep.subr.bf16.mxu0 %v2475_v2  ;;  %1841 = vmatprep.subr.bf16.mxu1 %v2478_v3  ;;  %v2565_v2 = vld [vmem:[%s3531_s1 + $0x564] ss:$16 sps:$4 sm:$0xff]   ;;  %v2568_v3 = vld [vmem:[%s3531_s1 + $0x56c] ss:$16 sps:$4 sm:$0xff]  }
  0x73   :  { %1678 = vmatpush1.bf16.msra.mxu0 %v2473_v4  ;;  %1842 = vmatpush1.bf16.msra.mxu1 %v2476_v5  ;;  %v2563_v4 = vld [vmem:[%s3531_s1 + $0x560] ss:$16 sps:$4 sm:$0xff]   ;;  %v2566_v5 = vld [vmem:[%s3531_s1 + $0x568] ss:$16 sps:$4 sm:$0xff]  }
  0x74   :  { %1679 = vmatprep.subr.bf16.mxu0 %v2481_v6  ;;  %1843 = vmatprep.subr.bf16.mxu1 %v2484_v7  ;;  %v2571_v6 = vld [vmem:[%s3531_s1 + $0x584] ss:$16 sps:$4 sm:$0xff]   ;;  %v2574_v7 = vld [vmem:[%s3531_s1 + $0x58c] ss:$16 sps:$4 sm:$0xff]  }
  0x77   :  { %1680 = vmatpush1.bf16.msra.mxu0 %v2479_v8  ;;  %1844 = vmatpush1.bf16.msra.mxu1 %v2482_v9  ;;  %v2569_v8 = vld [vmem:[%s3531_s1 + $0x580] ss:$16 sps:$4 sm:$0xff]   ;;  %v2572_v9 = vld [vmem:[%s3531_s1 + $0x588] ss:$16 sps:$4 sm:$0xff]  }
  0x78   :  { %1681 = vmatprep.subr.bf16.mxu0 %v2487_v10  ;;  %1845 = vmatprep.subr.bf16.mxu1 %v2490_v11  ;;  %v2577_v10 = vld [vmem:[%s3531_s1 + $0x5a4] ss:$16 sps:$4 sm:$0xff]   ;;  %v2580_v11 = vld [vmem:[%s3531_s1 + $0x5ac] ss:$16 sps:$4 sm:$0xff]  }
  0x7b   :  { %1682 = vmatpush1.bf16.msra.mxu0 %v2485_v12  ;;  %1846 = vmatpush1.bf16.msra.mxu1 %v2488_v13  ;;  %v2575_v12 = vld [vmem:[%s3531_s1 + $0x5a0] ss:$16 sps:$4 sm:$0xff]   ;;  %v2578_v13 = vld [vmem:[%s3531_s1 + $0x5a8] ss:$16 sps:$4 sm:$0xff]  }
  0x7c   :  { %1683 = vmatprep.subr.bf16.mxu0 %v2493_v14  ;;  %1847 = vmatprep.subr.bf16.mxu1 %v2496_v16  ;;  %v2583_v14 = vld [vmem:[%s3531_s1 + $0x5c4] ss:$16 sps:$4 sm:$0xff]   ;;  %v2586_v16 = vld [vmem:[%s3531_s1 + $0x5cc] ss:$16 sps:$4 sm:$0xff]  }
  0x7f   :  { %1684 = vmatpush1.bf16.msra.mxu0 %v2491_v17  ;;  %1848 = vmatpush1.bf16.msra.mxu1 %v2494_v18  ;;  %v2581_v17 = vld [vmem:[%s3531_s1 + $0x5c0] ss:$16 sps:$4 sm:$0xff]   ;;  %v2584_v18 = vld [vmem:[%s3531_s1 + $0x5c8] ss:$16 sps:$4 sm:$0xff]  }
  0x80   :  { %1694 = vmatprep.subr.bf16.mxu0 %v2499_v19  ;;  %1858 = vmatprep.subr.bf16.mxu1 %v2502_v22  ;;  %v2589_v19 = vld [vmem:[%s3531_s1 + $0x5e4] ss:$16 sps:$4 sm:$0xff]   ;;  %v2592_v22 = vld [vmem:[%s3531_s1 + $0x5ec] ss:$16 sps:$4 sm:$0xff]  }
  0x82   :  { %1686 = vmatmul.mubr.bf16.vlgmr.msra.gmra.mrb[0].mxu0 %v320_v24  ;;  %1850 = vmatmul.mubr.bf16.vlgmr.msra.gmra.mrb[0].mxu1 %v320_v24  ;;  %v2590_v24 = vld [vmem:[%s3531_s1 + $0x5e8] ss:$16 sps:$4 sm:$0xff]  }
  0x83   :  { %1695 = vmatpush1.bf16.msra.mxu0 %v2497_v23  ;;  %1859 = vmatpush1.bf16.msra.mxu1 %v2500_v25  ;;  %v2587_v23 = vld [vmem:[%s3531_s1 + $0x5e0] ss:$16 sps:$4 sm:$0xff]   ;;  %v2596_v25 = vld [vmem:[%s3531_s1 + $0x604] ss:$16 sps:$4 sm:$0xff]  }
  0x84   :  { %1696 = vmatprep.subr.bf16.mxu0 %v2505_v26  ;;  %1860 = vmatprep.subr.bf16.mxu1 %v2508_v27  ;;  %v2599_v26 = vld [vmem:[%s3531_s1 + $0x60c] ss:$16 sps:$4 sm:$0xff]   ;;  %v2594_v27 = vld [vmem:[%s3531_s1 + $0x600] ss:$16 sps:$4 sm:$0xff]  }
  0x85   :  { %1726 = vmatprep.mubr.bf16.mxu0 %v2942_v20  ;;  %1890 = vmatprep.mubr.bf16.mxu1 %v2942_v20 }
  0x87   :  { %1697 = vmatpush1.bf16.msra.mxu0 %v2503_v15  ;;  %1861 = vmatpush1.bf16.msra.mxu1 %v2506_v28  ;;  %v2597_v15 = vld [vmem:[%s3531_s1 + $0x608] ss:$16 sps:$4 sm:$0xff]   ;;  %v2602_v28 = vld [vmem:[%s3531_s1 + $0x624] ss:$16 sps:$4 sm:$0xff]  }
  0x88   :  { %1698 = vmatprep.subr.bf16.mxu0 %v2511_v29  ;;  %1862 = vmatprep.subr.bf16.mxu1 %v2514_v30  ;;  %v2605_v29 = vld [vmem:[%s3531_s1 + $0x62c] ss:$16 sps:$4 sm:$0xff]   ;;  %v323_v30 = vcombine.high %v2942_v20, %v2942_v20  ;;  %v2608_v20 = vld [vmem:[%s3531_s1 + $0x644] ss:$16 sps:$4 sm:$0xff]  }
  0x8b   :  { %1699 = vmatpush1.bf16.msra.mxu0 %v2509_v31  ;;  %1863 = vmatpush1.bf16.msra.mxu1 %v2512_v32  ;;  %v2600_v31 = vld [vmem:[%s3531_s1 + $0x620] ss:$16 sps:$4 sm:$0xff]   ;;  %v2603_v32 = vld [vmem:[%s3531_s1 + $0x628] ss:$16 sps:$4 sm:$0xff]  }
  0x8c   :  { %1700 = vmatprep.subr.bf16.mxu0 %v2517_v33  ;;  %1864 = vmatprep.subr.bf16.mxu1 %v2520_v34  ;;  %v2611_v33 = vld [vmem:[%s3531_s1 + $0x64c] ss:$16 sps:$4 sm:$0xff]   ;;  %v2606_v34 = vld [vmem:[%s3531_s1 + $0x640] ss:$16 sps:$4 sm:$0xff]  }
  0x8f   :  { %1701 = vmatpush1.bf16.msra.mxu0 %v2515_v35  ;;  %1865 = vmatpush1.bf16.msra.mxu1 %v2518_v36  ;;  %v2609_v35 = vld [vmem:[%s3531_s1 + $0x648] ss:$16 sps:$4 sm:$0xff]   ;;  %v2614_v36 = vld [vmem:[%s3531_s1 + $0x664] ss:$16 sps:$4 sm:$0xff]  }
  0x90   :  { %1702 = vmatprep.subr.bf16.mxu0 %v2523_v37  ;;  %1866 = vmatprep.subr.bf16.mxu1 %v2526_v38  ;;  %v2617_v37 = vld [vmem:[%s3531_s1 + $0x66c] ss:$16 sps:$4 sm:$0xff]   ;;  %v2612_v38 = vld [vmem:[%s3531_s1 + $0x660] ss:$16 sps:$4 sm:$0xff]  }
  0x93   :  { %1703 = vmatpush1.bf16.msra.mxu0 %v2521_v39  ;;  %1867 = vmatpush1.bf16.msra.mxu1 %v2524_v40  ;;  %v2615_v39 = vld [vmem:[%s3531_s1 + $0x668] ss:$16 sps:$4 sm:$0xff]   ;;  %v2620_v40 = vld [vmem:[%s3531_s1 + $0x684] ss:$16 sps:$4 sm:$0xff]  }
  0x94   :  { %1704 = vmatprep.subr.bf16.mxu0 %v2529_v41  ;;  %1868 = vmatprep.subr.bf16.mxu1 %v2532_v42  ;;  %v2623_v41 = vld [vmem:[%s3531_s1 + $0x68c] ss:$16 sps:$4 sm:$0xff]   ;;  %v2618_v42 = vld [vmem:[%s3531_s1 + $0x680] ss:$16 sps:$4 sm:$0xff]  }
  0x97   :  { %1705 = vmatpush1.bf16.msra.mxu0 %v2527_v44  ;;  %1869 = vmatpush1.bf16.msra.mxu1 %v2530_v45  ;;  %v2621_v44 = vld [vmem:[%s3531_s1 + $0x688] ss:$16 sps:$4 sm:$0xff]   ;;  %v2626_v45 = vld [vmem:[%s3531_s1 + $0x6a4] ss:$16 sps:$4 sm:$0xff]  }
  0x98   :  { %1706 = vmatprep.subr.bf16.mxu0 %v2535_v46  ;;  %1870 = vmatprep.subr.bf16.mxu1 %v2538_v47  ;;  %v2629_v46 = vld [vmem:[%s3531_s1 + $0x6ac] ss:$16 sps:$4 sm:$0xff]   ;;  %v2624_v47 = vld [vmem:[%s3531_s1 + $0x6a0] ss:$16 sps:$4 sm:$0xff]  }
  0x9b   :  { %1707 = vmatpush1.bf16.msra.mxu0 %v2533_v48  ;;  %1871 = vmatpush1.bf16.msra.mxu1 %v2536_v49  ;;  %v2627_v48 = vld [vmem:[%s3531_s1 + $0x6a8] ss:$16 sps:$4 sm:$0xff]   ;;  %v2632_v49 = vld [vmem:[%s3531_s1 + $0x6c4] ss:$16 sps:$4 sm:$0xff]  }
  0x9c   :  { %1708 = vmatprep.subr.bf16.mxu0 %v2541_v50  ;;  %1872 = vmatprep.subr.bf16.mxu1 %v2544_v51  ;;  %v2635_v50 = vld [vmem:[%s3531_s1 + $0x6cc] ss:$16 sps:$4 sm:$0xff]   ;;  %v2630_v51 = vld [vmem:[%s3531_s1 + $0x6c0] ss:$16 sps:$4 sm:$0xff]  }
  0x9f   :  { %1709 = vmatpush1.bf16.msra.mxu0 %v2539_v52  ;;  %1873 = vmatpush1.bf16.msra.mxu1 %v2542_v53  ;;  %v2633_v52 = vld [vmem:[%s3531_s1 + $0x6c8] ss:$16 sps:$4 sm:$0xff]   ;;  %v2638_v53 = vld [vmem:[%s3531_s1 + $0x6e4] ss:$16 sps:$4 sm:$0xff]  }
  0xa0   :  { %1710 = vmatprep.subr.bf16.mxu0 %v2547_v54  ;;  %1874 = vmatprep.subr.bf16.mxu1 %v2550_v55  ;;  %v2641_v54 = vld [vmem:[%s3531_s1 + $0x6ec] ss:$16 sps:$4 sm:$0xff]   ;;  %v2636_v55 = vld [vmem:[%s3531_s1 + $0x6e0] ss:$16 sps:$4 sm:$0xff]  }
  0xa3   :  { %1711 = vmatpush1.bf16.msra.mxu0 %v2545_v56  ;;  %1875 = vmatpush1.bf16.msra.mxu1 %v2548_v57  ;;  %v2639_v56 = vld [vmem:[%s3531_s1 + $0x6e8] ss:$16 sps:$4 sm:$0xff]   ;;  %v2644_v57 = vld [vmem:[%s3531_s1 + $0x704] ss:$16 sps:$4 sm:$0xff]  }
  0xa4   :  { %1712 = vmatprep.subr.bf16.mxu0 %v2553_v58  ;;  %1876 = vmatprep.subr.bf16.mxu1 %v2556_v59  ;;  %v2647_v58 = vld [vmem:[%s3531_s1 + $0x70c] ss:$16 sps:$4 sm:$0xff]   ;;  %v2642_v59 = vld [vmem:[%s3531_s1 + $0x700] ss:$16 sps:$4 sm:$0xff]  }
  0xa7   :  { %1713 = vmatpush1.bf16.msra.mxu0 %v2551_v60  ;;  %1877 = vmatpush1.bf16.msra.mxu1 %v2554_v61  ;;  %v2645_v60 = vld [vmem:[%s3531_s1 + $0x708] ss:$16 sps:$4 sm:$0xff]   ;;  %v2650_v61 = vld [vmem:[%s3531_s1 + $0x724] ss:$16 sps:$4 sm:$0xff]  }
  0xa8   :  { %1714 = vmatprep.subr.bf16.mxu0 %v2559_v62  ;;  %1878 = vmatprep.subr.bf16.mxu1 %v2562_v63  ;;  %v2653_v62 = vld [vmem:[%s3531_s1 + $0x72c] ss:$16 sps:$4 sm:$0xff]   ;;  %v2648_v63 = vld [vmem:[%s3531_s1 + $0x720] ss:$16 sps:$4 sm:$0xff]  }
  0xab   :  { %1715 = vmatpush1.bf16.msra.mxu0 %v2557_v0  ;;  %1879 = vmatpush1.bf16.msra.mxu1 %v2560_v1  ;;  %v2651_v0 = vld [vmem:[%s3531_s1 + $0x728] ss:$16 sps:$4 sm:$0xff]   ;;  %v2656_v1 = vld [vmem:[%s3531_s1 + $0x744] ss:$16 sps:$4 sm:$0xff]  }
  0xac   :  { %1716 = vmatprep.subr.bf16.mxu0 %v2565_v2  ;;  %1880 = vmatprep.subr.bf16.mxu1 %v2568_v3  ;;  %v2659_v2 = vld [vmem:[%s3531_s1 + $0x74c] ss:$16 sps:$4 sm:$0xff]   ;;  %v2654_v3 = vld [vmem:[%s3531_s1 + $0x740] ss:$16 sps:$4 sm:$0xff]  }
  0xaf   :  { %1717 = vmatpush1.bf16.msra.mxu0 %v2563_v4  ;;  %1881 = vmatpush1.bf16.msra.mxu1 %v2566_v5  ;;  %v2657_v4 = vld [vmem:[%s3531_s1 + $0x748] ss:$16 sps:$4 sm:$0xff]   ;;  %v2662_v5 = vld [vmem:[%s3531_s1 + $0x764] ss:$16 sps:$4 sm:$0xff]  }
  0xb0   :  { %1718 = vmatprep.subr.bf16.mxu0 %v2571_v6  ;;  %1882 = vmatprep.subr.bf16.mxu1 %v2574_v7  ;;  %v2665_v6 = vld [vmem:[%s3531_s1 + $0x76c] ss:$16 sps:$4 sm:$0xff]   ;;  %v2660_v7 = vld [vmem:[%s3531_s1 + $0x760] ss:$16 sps:$4 sm:$0xff]  }
  0xb3   :  { %1719 = vmatpush1.bf16.msra.mxu0 %v2569_v8  ;;  %1883 = vmatpush1.bf16.msra.mxu1 %v2572_v9  ;;  %v2663_v8 = vld [vmem:[%s3531_s1 + $0x768] ss:$16 sps:$4 sm:$0xff]   ;;  %v2668_v9 = vld [vmem:[%s3531_s1 + $0x784] ss:$16 sps:$4 sm:$0xff]  }
  0xb4   :  { %1720 = vmatprep.subr.bf16.mxu0 %v2577_v10  ;;  %1884 = vmatprep.subr.bf16.mxu1 %v2580_v11  ;;  %v2671_v10 = vld [vmem:[%s3531_s1 + $0x78c] ss:$16 sps:$4 sm:$0xff]   ;;  %v2666_v11 = vld [vmem:[%s3531_s1 + $0x780] ss:$16 sps:$4 sm:$0xff]  }
  0xb7   :  { %1721 = vmatpush1.bf16.msra.mxu0 %v2575_v12  ;;  %1885 = vmatpush1.bf16.msra.mxu1 %v2578_v13  ;;  %v2669_v12 = vld [vmem:[%s3531_s1 + $0x788] ss:$16 sps:$4 sm:$0xff]   ;;  %v2674_v13 = vld [vmem:[%s3531_s1 + $0x7a4] ss:$16 sps:$4 sm:$0xff]  }
  0xb8   :  { %1722 = vmatprep.subr.bf16.mxu0 %v2583_v14  ;;  %1886 = vmatprep.subr.bf16.mxu1 %v2586_v16  ;;  %v2677_v14 = vld [vmem:[%s3531_s1 + $0x7ac] ss:$16 sps:$4 sm:$0xff]   ;;  %v2672_v16 = vld [vmem:[%s3531_s1 + $0x7a0] ss:$16 sps:$4 sm:$0xff]  }
  0xbb   :  { %1723 = vmatpush1.bf16.msra.mxu0 %v2581_v17  ;;  %1887 = vmatpush1.bf16.msra.mxu1 %v2584_v18  ;;  %v2675_v17 = vld [vmem:[%s3531_s1 + $0x7a8] ss:$16 sps:$4 sm:$0xff]   ;;  %v2680_v18 = vld [vmem:[%s3531_s1 + $0x7c4] ss:$16 sps:$4 sm:$0xff]  }
  0xbc   :  { %1724 = vmatprep.subr.bf16.mxu0 %v2589_v19  ;;  %1888 = vmatprep.subr.bf16.mxu1 %v2592_v22  ;;  %v2683_v19 = vld [vmem:[%s3531_s1 + $0x7cc] ss:$16 sps:$4 sm:$0xff]   ;;  %v2678_v22 = vld [vmem:[%s3531_s1 + $0x7c0] ss:$16 sps:$4 sm:$0xff]  }
  0xbf   :  { %1725 = vmatpush1.bf16.msra.mxu0 %v2587_v23  ;;  %1889 = vmatpush1.bf16.msra.mxu1 %v2590_v24  ;;  %v2681_v23 = vld [vmem:[%s3531_s1 + $0x7c8] ss:$16 sps:$4 sm:$0xff]   ;;  %v2686_v24 = vld [vmem:[%s3531_s1 + $0x7e4] ss:$16 sps:$4 sm:$0xff]  }
  0xc0   :  { %1735 = vmatprep.subr.bf16.mxu0 %v2596_v25  ;;  %1899 = vmatprep.subr.bf16.mxu1 %v2599_v26  ;;  %v2689_v25 = vld [vmem:[%s3531_s1 + $0x7ec] ss:$16 sps:$4 sm:$0xff]   ;;  %v2684_v26 = vld [vmem:[%s3531_s1 + $0x7e0] ss:$16 sps:$4 sm:$0xff]  }
  0xc2   :  { %1727 = vmatmul.mubr.bf16.vlgmr.msra.gmra.mrb[0].mxu0 %v2945_v21  ;;  %1891 = vmatmul.mubr.bf16.vlgmr.msra.gmra.mrb[0].mxu1 %v2945_v21 }
  0xc3   :  { %1736 = vmatpush1.bf16.msra.mxu0 %v2594_v27  ;;  %1900 = vmatpush1.bf16.msra.mxu1 %v2597_v15  ;;  %v2687_v27 = vld [vmem:[%s3531_s1 + $0x7e8] ss:$16 sps:$4 sm:$0xff]   ;;  %v321_v15 = vcombine.high %v2945_v21, %v2945_v21  ;;  %v1966_v21 = vld [vmem:[%s3534_s3] sm:$0xf] }
  0xc4   :  { %1737 = vmatprep.subr.bf16.mxu0 %v2602_v28  ;;  %1901 = vmatprep.subr.bf16.mxu1 %v2605_v29  ;;  %v1944_v28 = vsub.s32 0, %v2834_v43  ;;  %v1952_v29 = vsub.s32 2, %v2834_v43 }
  0xc5   :  { %1767 = vmatprep.mubr.bf16.mxu0 %v323_v30  ;;  %1931 = vmatprep.mubr.bf16.mxu1 %v323_v30  ;;  %v1940_v30 = vld [vmem:[%s3533_s2] sm:$0xf] }
  0xc7   :  { %1738 = vmatpush1.bf16.msra.mxu0 %v2600_v31  ;;  %1902 = vmatpush1.bf16.msra.mxu1 %v2603_v32  ;;  %v1948_v31 = vsub.s32 1, %v2834_v43  ;;  %v1956_v32 = vsub.s32 3, %v2834_v43 }
  0xc8   :  { %1739 = vmatprep.subr.bf16.mxu0 %v2608_v20  ;;  %1903 = vmatprep.subr.bf16.mxu1 %v2611_v33  ;;  %v1945_v20 = vrot.slane %v1940_v30, %v1944_v28  ;;  %v1953_v33 = vrot.slane %v1940_v30, %v1952_v29 }
  0xcb   :  { %1740 = vmatpush1.bf16.msra.mxu0 %v2606_v34  ;;  %1904 = vmatpush1.bf16.msra.mxu1 %v2609_v35  ;;  %v1949_v34 = vrot.slane %v1940_v30, %v1948_v31  ;;  %v2691_v35 = vmov 1983009808  }
  0xcc   :  { %1741 = vmatprep.subr.bf16.mxu0 %v2614_v36  ;;  %1905 = vmatprep.subr.bf16.mxu1 %v2617_v37  ;;  %v2003_v36 = vunpack.c.l.s4 %v2691_v35  ;;  %v1957_v37 = vrot.slane %v1940_v30, %v1956_v32 }
  0xcf   :  { %1742 = vmatpush1.bf16.msra.mxu0 %v2612_v38  ;;  %1906 = vmatpush1.bf16.msra.mxu1 %v2615_v39  ;;  %v1971_v38 = vrot.slane %v1966_v21, %v1944_v28  ;;  %v1979_v39 = vrot.slane %v1966_v21, %v1952_v29 }
  0xd0   :  { %1743 = vmatprep.subr.bf16.mxu0 %v2620_v40  ;;  %1907 = vmatprep.subr.bf16.mxu1 %v2623_v41 }
  0xd3   :  { %1744 = vmatpush1.bf16.msra.mxu0 %v2618_v42  ;;  %1908 = vmatpush1.bf16.msra.mxu1 %v2621_v44  ;;  %v1975_v42 = vrot.slane %v1966_v21, %v1948_v31  ;;  %v1983_v44 = vrot.slane %v1966_v21, %v1956_v32 }
  0xd4   :  { %1745 = vmatprep.subr.bf16.mxu0 %v2626_v45  ;;  %1909 = vmatprep.subr.bf16.mxu1 %v2629_v46 }
  0xd7   :  { %1746 = vmatpush1.bf16.msra.mxu0 %v2624_v47  ;;  %1910 = vmatpush1.bf16.msra.mxu1 %v2627_v48 }
  0xd8   :  { %1747 = vmatprep.subr.bf16.mxu0 %v2632_v49  ;;  %1911 = vmatprep.subr.bf16.mxu1 %v2635_v50  ;;  %v2004_v50 = vunpack.c.0.s8 %v2003_v36 }
  0xdb   :  { %1748 = vmatpush1.bf16.msra.mxu0 %v2630_v51  ;;  %1912 = vmatpush1.bf16.msra.mxu1 %v2633_v52 }
  0xdc   :  { %1749 = vmatprep.subr.bf16.mxu0 %v2638_v53  ;;  %1913 = vmatprep.subr.bf16.mxu1 %v2641_v54 }
  0xdf   :  { %1750 = vmatpush1.bf16.msra.mxu0 %v2636_v55  ;;  %1914 = vmatpush1.bf16.msra.mxu1 %v2639_v56 }
  0xe0   :  { %1751 = vmatprep.subr.bf16.mxu0 %v2644_v57  ;;  %1915 = vmatprep.subr.bf16.mxu1 %v2647_v58 }
  0xe3   :  { %1752 = vmatpush1.bf16.msra.mxu0 %v2642_v59  ;;  %1916 = vmatpush1.bf16.msra.mxu1 %v2645_v60 }
  0xe4   :  { %1753 = vmatprep.subr.bf16.mxu0 %v2650_v61  ;;  %1917 = vmatprep.subr.bf16.mxu1 %v2653_v62 }
  0xe7   :  { %1754 = vmatpush1.bf16.msra.mxu0 %v2648_v63  ;;  %1918 = vmatpush1.bf16.msra.mxu1 %v2651_v0  ;;  %v2007_v63 = vsub.s32 %v2004_v50, %v2834_v43 }
  0xe8   :  { %1755 = vmatprep.subr.bf16.mxu0 %v2656_v1  ;;  %1919 = vmatprep.subr.bf16.mxu1 %v2659_v2 }
  0xeb   :  { %1756 = vmatpush1.bf16.msra.mxu0 %v2654_v3  ;;  %1920 = vmatpush1.bf16.msra.mxu1 %v2657_v4 }
  0xec   :  { %1757 = vmatprep.subr.bf16.mxu0 %v2662_v5  ;;  %1921 = vmatprep.subr.bf16.mxu1 %v2665_v6 }
  0xef   :  { %1758 = vmatpush1.bf16.msra.mxu0 %v2660_v7  ;;  %1922 = vmatpush1.bf16.msra.mxu1 %v2663_v8 }
  0xf0   :  { %1759 = vmatprep.subr.bf16.mxu0 %v2668_v9  ;;  %1923 = vmatprep.subr.bf16.mxu1 %v2671_v10 }
  0xf3   :  { %1760 = vmatpush1.bf16.msra.mxu0 %v2666_v11  ;;  %1924 = vmatpush1.bf16.msra.mxu1 %v2669_v12 }
  0xf4   :  { %1761 = vmatprep.subr.bf16.mxu0 %v2674_v13  ;;  %1925 = vmatprep.subr.bf16.mxu1 %v2677_v14 }
  0xf7   :  { %1762 = vmatpush1.bf16.msra.mxu0 %v2672_v16  ;;  %1926 = vmatpush1.bf16.msra.mxu1 %v2675_v17 }
  0xf8   :  { %1763 = vmatprep.subr.bf16.mxu0 %v2680_v18  ;;  %1927 = vmatprep.subr.bf16.mxu1 %v2683_v19 }
  0xfb   :  { %1764 = vmatpush1.bf16.msra.mxu0 %v2678_v22  ;;  %1928 = vmatpush1.bf16.msra.mxu1 %v2681_v23 }
  0xfc   :  { %1765 = vmatprep.subr.bf16.mxu0 %v2686_v24  ;;  %1929 = vmatprep.subr.bf16.mxu1 %v2689_v25 }
  0xff   :  { %1766 = vmatpush1.bf16.msra.mxu0 %v2684_v26  ;;  %1930 = vmatpush1.bf16.msra.mxu1 %v2687_v27 }
 0x102   :  { %1768 = vmatmul.mubr.bf16.vlgmr.msra.gmra.mrb[0].mxu0 %v321_v15  ;;  %1932 = vmatmul.mubr.bf16.vlgmr.msra.gmra.mrb[0].mxu1 %v321_v15 }
 0x1d5   :  { %v1769_v40 = vpop.f32.mrb[0].mxu0  ;;  %v1933_v41 = vpop.f32.mrb[0].mxu1 }
 0x1d6   :  { %v1962_v45 = vmul.f32 %v1945_v20, %v1769_v40  ;;  %v1964_v46 = vmul.f32 %v1953_v33, %v1933_v41  ;;  %v1771_v47 = vpop.f32.mrb[1].mxu0  ;;  %v1935_v48 = vpop.f32.mrb[1].mxu1 }
 0x1d7   :  { %v1963_v49 = vmul.f32 %v1949_v34, %v1771_v47  ;;  %v1965_v51 = vmul.f32 %v1957_v37, %v1935_v48  ;;  %v1773_v52 = vpop.f32.mrb[2].mxu0  ;;  %v1937_v53 = vpop.f32.mrb[2].mxu1 }
 0x1d8   :  { %v1988_v54 = vadd.f32 %v1971_v38, %v1962_v45  ;;  %v1990_v55 = vadd.f32 %v1979_v39, %v1964_v46  ;;  %v1774_v56 = vpop.f32.mrb[3].mxu0  ;;  %v1938_v57 = vpop.f32.mrb[3].mxu1 }
 0x1d9   :  { %v1989_v58 = vadd.f32 %v1975_v42, %v1963_v49  ;;  %v1991_v59 = vadd.f32 %v1983_v44, %v1965_v51 }
 0x1da   :  { %v1992_v60 = vmax.f32 %v1988_v54, 0.0  ;;  %v1994_v61 = vmax.f32 %v1990_v55, 0.0 }
 0x1db   :  { %v1993_v62 = vmax.f32 %v1989_v58, 0.0  ;;  %v1995_v0 = vmax.f32 %v1991_v59, 0.0 }
 0x1dd   :  { %v2000_v1 = vcombine.low %v1992_v60, %v1993_v62  ;;  %v2001_v2 = vcombine.low %v1994_v61, %v1995_v0 }
 0x1df   :  { %v2008_v3 = vrot.slane %v2000_v1, %v2007_v63  ;;  %v2015_v4 = vrot.slane %v2001_v2, %v2007_v63 }
 0x1e1   :  { %v2016_v5 = vcombine.low %v2008_v3, %v2015_v4 }
 0x1e3   :  { %2018 = vst [vmem:[%s3535_s4] sm:$0xff] %v2016_v5 }

// kernel: cnn_forward.11
= control target key start
LH: loop header
LB: loop body
LE: loop exit
PB: predicated region body
PF: predicated region fallthrough
CT: control target
= control target key end

     0   :  { %v96_v30 = vlaneseq  ;;  %v553_v34 = vmov 1966171168   ;;  %s697_s0 = inlined_call_operand.vmem [shape: bf16[2,512], index: 0, kind: input, shape index: {}]   ;;  %s698_s1 = inlined_call_operand.vmem [shape: bf16[512,128], index: 1, kind: input, shape index: {}]   ;;  %s699_s2 = inlined_call_operand.vmem [shape: f32[1,128], index: 2, kind: input, shape index: {}]   ;;  %s700_s3 = inlined_call_operand.vmem [shape: f32[1,128], index: 3, kind: input, shape index: {}]   ;;  %s701_s4 = inlined_call_operand.hbm [shape: f32[2,128], index: 4, kind: output, shape index: {}]  }
   0x1   :  { %v497_v0 = vld [vmem:[%s698_s1 + $0x40] sm:$0xff]   ;;  %v501_v4 = vld [vmem:[%s698_s1 + $0x48] sm:$0xff]   ;;  %v505_v8 = vld [vmem:[%s698_s1 + $0x50] sm:$0xff]   ;;  %v94_v35 = vunpack.c.l.s4 %v553_v34 }
   0x2   :  { %v498_v1 = vld [vmem:[%s698_s1 + $0xc0] sm:$0xff]   ;;  %451 = vmatprep.subr.bf16.mxu0 %v497_v0  ;;  %v502_v5 = vld [vmem:[%s698_s1 + $0xc8] sm:$0xff]   ;;  %v506_v9 = vld [vmem:[%s698_s1 + $0xd0] sm:$0xff]   ;;  %v97_v36 = vshrl.u32 %v96_v30, 7 }
   0x3   :  { %v499_v2 = vld [vmem:[%s698_s1] sm:$0xff]   ;;  %473 = vmatprep.subr.bf16.mxu1 %v498_v1  ;;  %v503_v6 = vld [vmem:[%s698_s1 + $0x8] sm:$0xff]   ;;  %v507_v10 = vld [vmem:[%s698_s1 + $0x10] sm:$0xff]  }
   0x4   :  { %v500_v3 = vld [vmem:[%s698_s1 + $0x80] sm:$0xff]   ;;  %452 = vmatpush3.bf16.msra.mxu0 %v499_v2  ;;  %v504_v7 = vld [vmem:[%s698_s1 + $0x88] sm:$0xff]   ;;  %v508_v11 = vld [vmem:[%s698_s1 + $0x90] sm:$0xff]  }
   0x5   :  { %474 = vmatpush3.bf16.msra.mxu1 %v500_v3  ;;  %453 = vmatprep.subr.bf16.mxu0 %v501_v4  ;;  %v509_v12 = vld [vmem:[%s698_s1 + $0x58] sm:$0xff]   ;;  %v513_v16 = vld [vmem:[%s698_s1 + $0x60] sm:$0xff]   ;;  %v517_v20 = vld [vmem:[%s698_s1 + $0x68] sm:$0xff]  }
   0x6   :  { %475 = vmatprep.subr.bf16.mxu1 %v502_v5  ;;  %v510_v13 = vld [vmem:[%s698_s1 + $0xd8] sm:$0xff]   ;;  %v514_v17 = vld [vmem:[%s698_s1 + $0xe0] sm:$0xff]   ;;  %v518_v21 = vld [vmem:[%s698_s1 + $0xe8] sm:$0xff]  }
   0x7   :  { %v511_v14 = vld [vmem:[%s698_s1 + $0x18] sm:$0xff]   ;;  %v515_v18 = vld [vmem:[%s698_s1 + $0x20] sm:$0xff]   ;;  %v519_v22 = vld [vmem:[%s698_s1 + $0x28] sm:$0xff]  }
   0x8   :  { %454 = vmatpush3.bf16.msra.mxu0 %v503_v6  ;;  %v512_v15 = vld [vmem:[%s698_s1 + $0x98] sm:$0xff]   ;;  %v516_v19 = vld [vmem:[%s698_s1 + $0xa0] sm:$0xff]   ;;  %v520_v23 = vld [vmem:[%s698_s1 + $0xa8] sm:$0xff]  }
   0x9   :  { %476 = vmatpush3.bf16.msra.mxu1 %v504_v7  ;;  %455 = vmatprep.subr.bf16.mxu0 %v505_v8  ;;  %v521_v24 = vld [vmem:[%s698_s1 + $0x70] sm:$0xff]   ;;  %v525_v28 = vld [vmem:[%s698_s1 + $0x78] sm:$0xff]   ;;  %v416_v33 = vld.sshfl [vmem:[%s697_s0] sm:$0x33 pattern:$0x75316420] }
   0xa   :  { %477 = vmatprep.subr.bf16.mxu1 %v506_v9  ;;  %v522_v25 = vld [vmem:[%s698_s1 + $0xf0] sm:$0xff]   ;;  %v526_v29 = vld [vmem:[%s698_s1 + $0xf8] sm:$0xff]  }
   0xb   :  { %v523_v26 = vld [vmem:[%s698_s1 + $0x30] sm:$0xff]   ;;  %v527_v31 = vld [vmem:[%s698_s1 + $0x38] sm:$0xff]  }
   0xc   :  { %456 = vmatpush3.bf16.msra.mxu0 %v507_v10  ;;  %v524_v27 = vld [vmem:[%s698_s1 + $0xb0] sm:$0xff]   ;;  %v528_v32 = vld [vmem:[%s698_s1 + $0xb8] sm:$0xff]  }
   0xd   :  { %478 = vmatpush3.bf16.msra.mxu1 %v508_v11  ;;  %457 = vmatprep.subr.bf16.mxu0 %v509_v12 }
   0xe   :  { %479 = vmatprep.subr.bf16.mxu1 %v510_v13 }
  0x10   :  { %458 = vmatpush3.bf16.msra.mxu0 %v511_v14 }
  0x11   :  { %480 = vmatpush3.bf16.msra.mxu1 %v512_v15  ;;  %459 = vmatprep.subr.bf16.mxu0 %v513_v16 }
  0x12   :  { %481 = vmatprep.subr.bf16.mxu1 %v514_v17 }
  0x14   :  { %460 = vmatpush3.bf16.msra.mxu0 %v515_v18 }
  0x15   :  { %482 = vmatpush3.bf16.msra.mxu1 %v516_v19  ;;  %461 = vmatprep.subr.bf16.mxu0 %v517_v20 }
  0x16   :  { %483 = vmatprep.subr.bf16.mxu1 %v518_v21 }
  0x18   :  { %462 = vmatpush3.bf16.msra.mxu0 %v519_v22 }
  0x19   :  { %484 = vmatpush3.bf16.msra.mxu1 %v520_v23  ;;  %463 = vmatprep.subr.bf16.mxu0 %v521_v24 }
  0x1a   :  { %485 = vmatprep.subr.bf16.mxu1 %v522_v25 }
  0x1c   :  { %464 = vmatpush3.bf16.msra.mxu0 %v523_v26 }
  0x1d   :  { %486 = vmatpush3.bf16.msra.mxu1 %v524_v27  ;;  %465 = vmatprep.subr.bf16.mxu0 %v525_v28 }
  0x1e   :  { %487 = vmatprep.subr.bf16.mxu1 %v526_v29 }
  0x20   :  { %466 = vmatpush3.bf16.msra.mxu0 %v527_v31 }
  0x21   :  { %488 = vmatpush3.bf16.msra.mxu1 %v528_v32 }
  0x22   :  { %9 = vsyncpa [#allocation3], 0  ;;  %v92_v37 = vcombine.high %v416_v33, %v416_v33  ;;  %v95_v38 = vunpack.c.0.s8 %v94_v35  ;;  %v449_v54 = vld [vmem:[%s699_s2] ss:$0 sm:$0xff]  ;;  %s554_s5 = smov [#allocation2]  }
  0x23   :  { %v450_v56 = vld [vmem:[%s700_s3] ss:$0 sm:$0xff]  ;;  %s408_s6 = sshll.u32 %s554_s5, 4  ;;  %s409_s6 = int_to_ptr.vmem [resolvable:$true] %s408_s6 }
  0x24   :  { %v98_v39 = vsub.s32 %v95_v38, %v97_v36  ;;  %s529_s7 = scalar_lea.vmem %s409_s6, 32  ;;  %p534_p1 = scmp.lt.s32.totalorder %s409_s6, %s409_s6 }
  0x25   :  { %p530_p0 = scmp.ne.s32.totalorder %s409_s6, %s529_s7  ;;  %p535_p2 = scmp.lt.s32.totalorder %s529_s7, %s529_s7 }
  0x26   :  { %v106_v40 = vrot.slane %v92_v37, %v98_v39  ;;  %v99_v41 = vrot.slane %v416_v33, %v98_v39 }
  0x27   :  { %p536_p3 = por %p535_p2, %p534_p1 }
  0x28   :  { %337 = vmatprep.mubr.bf16.mxu0 %v106_v40  ;;  %v108_v42 = vcombine.high %v106_v40, %v106_v40  ;;  %v107_v43 = vcombine.high %v99_v41, %v99_v41 }
  0x29   :  { %338 = vmatmul.mubr.bf16.vlgmr.msra.gmra.mrb[0].mxu0 %v99_v41  ;;  %p537_p4 = pnand %p536_p3, %p530_p0 }
  0x2a   :  { %377 = vmatprep.mubr.bf16.mxu1 %v108_v42 }
  0x2b   :  { %378 = vmatmul.mubr.bf16.vlgmr.msra.gmra.mrb[0].mxu1 %v107_v43 }
  0xfc   :  { %v467_v44 = vpop.f32.mrb[0].mxu0 }
  0xfd   :  { %v468_v45 = vpop.f32.mrb[1].mxu0 }
  0xfe   :  { %v489_v46 = vpop.f32.mrb[0].mxu1  ;;  %v469_v47 = vadd.f32 %v468_v45, %v467_v44  ;;  %v470_v48 = vpop.f32.mrb[2].mxu0 }
  0xff   :  { %v490_v49 = vpop.f32.mrb[1].mxu1  ;;  %v471_v50 = vpop.f32.mrb[3].mxu0 }
 0x100   :  { %v491_v51 = vadd.f32 %v490_v49, %v489_v46  ;;  %v492_v52 = vpop.f32.mrb[2].mxu1 }
 0x101   :  { %v493_v53 = vpop.f32.mrb[3].mxu1 }
 0x102   :  { %v380_v55 = vadd.f32 %v491_v51, %v469_v47 }
 0x104   :  { %v392_v57 = vmul.f32 %v449_v54, %v380_v55 }
 0x106   :  { %v400_v58 = vadd.f32 %v450_v56, %v392_v57 }
 0x108   :  { %401 = vst [vmem:[#allocation2] sm:$0x3] %v400_v58 }
 0x109   :  { %540 = shalt.err (!%p537_p4)
}
 0x10a   :  { %s541_s9 = scalar_lea.hbm %s701_s4, 32 }
 0x10b   :  { %p542_p5 = scmp.ne.s32.totalorder %s701_s4, %s541_s9  ;;  %p545_p6 = scmp.lt.u32.totalorder %s541_s9, %s701_s4 }
 0x10d   :  { %p547_p7 = pnand %p545_p6, %p542_p5 }
 0x10f   :  { %550 = shalt.err (!%p547_p7)
}
 0x110   :  { %411 = dma.vmem_to_hbm [thread:$0]  %s409_s6, 32, %s701_s4, [#allocation3]  }
 0x111   :  { %551 = dma.done.wait [#allocation3], 32  }
 0x112   :  { %552 = vsyncadd [#allocation3], 4294967264 }
 0x113   :  { %415 = vsyncpa [#allocation3], 1 }

// kernel: cnn_forward.9
= control target key start
LH: loop header
LB: loop body
LE: loop exit
PB: predicated region body
PF: predicated region fallthrough
CT: control target
= control target key end

     0   :  { %s9226_s15 = smov 0   ;;  %s10497_s0 = inlined_call_operand.vmem [shape: bf16[2,4096], index: 0, kind: input, shape index: {}]   ;;  %s10498_s1 = inlined_call_operand.vmem [shape: bf16[4096,1024], index: 1, kind: input, shape index: {}]   ;;  %s10499_s2 = inlined_call_operand.vmem [shape: f32[1,1024], index: 2, kind: input, shape index: {}]   ;;  %s10500_s3 = inlined_call_operand.vmem [shape: f32[1,1024], index: 3, kind: input, shape index: {}]   ;;  %s10501_s4 = inlined_call_operand.vmem [shape: f32[2,1024], index: 4, kind: output, shape index: {}]  }
   0x1 LB: > { %s9232_s16 = sadd.s32 4294967295, %s9196_s15   ;;  %p8031_p0 = scmp.ge.s32.totalorder %s9196_s15, 1  ;;  %s9196_s15 = sphi %s9226_s15, %s14_s15  }
   0x2   : > { %p169_p1 = scmp.lt.s32.totalorder %s9196_s15, 3 }
   0x4   : > { %p170_p2 = pnand %p8031_p0, %p169_p1 }
   0x5   : > { %s8032_s17 = sshll.u32 (!%p170_p2), %s9232_s16, 4  ;;  %s8033_s18 = sshll.u32 (!%p170_p2), %s9232_s16, 8 }
   0x6   : > { %173 = sbr.rel (%p170_p2) target bundleno = 1286 (0x506), region = 36  ;;  %p196_p3 = scmp.lt.s32.totalorder (!%p170_p2), %s8032_s17, 31 }
   0x7   : > { %p201_p4 = scmp.lt.s32.totalorder (!%p170_p2), %s8033_s18, 511  ;;  %p8036_p5 = scmp.ne.s32.totalorder (!%p170_p2), %s9232_s16, 0 }
   0xd   : > { %s10503_s17 = smov (!%p196_p3, %s8032_s17), 31  ;;  %s10505_s18 = smov (!%p201_p4, %s8033_s18), 511 }
   0xe   : > { %s9241_s21 = scalar_lea.vmem %s10497_s0, %s10503_s17  ;;  %s9064_s22 = sshll.u32 %s10505_s18, 5  ;;  %v9198_v0 = vmov (!%p8036_p5), 0.0  }
   0xf   : > { %s9246_s25 = scalar_lea.vmem %s10498_s1, %s9064_s22  ;;  %210 = sbr.rel (%p8036_p5) target bundleno = 22 (0x16), region = 40  ;;  %211 = vst [vmem:[%s10501_s4] sm:$0xff] (!%p8036_p5), %v9198_v0  ;;  %212 = vst [vmem:[%s10501_s4 + $0x8] sm:$0xff] (!%p8036_p5), %v9198_v0 }
  0x16 PF: > { %v217_v1 = vld [vmem:[%s9246_s25] sm:$0xff]  ;;  %v218_v3 = vld [vmem:[%s9246_s25 + $0x8] sm:$0xff]  ;;  %v9199_v33 = vmov 1966171168   ;;  %v1247_v35 = vlaneseq  ;;  %p9061_p6 = scmp.ne.s32.totalorder %s9232_s16, 1 }
  0x17   : > { %v221_v2 = vld [vmem:[%s9246_s25 + $0x20] sm:$0xff]  ;;  %v222_v5 = vld [vmem:[%s9246_s25 + $0x28] sm:$0xff]  ;;  %v1245_v34 = vunpack.c.l.s4 %v9199_v33 }
  0x18   : > { %v8038_v4 = vcombine.high %v217_v1, %v221_v2  ;;  %v8037_v6 = vcombine.low %v217_v1, %v221_v2  ;;  %v225_v7 = vld [vmem:[%s9246_s25 + $0x40] sm:$0xff]  ;;  %v8040_v9 = vcombine.high %v218_v3, %v222_v5  ;;  %v8039_v10 = vcombine.low %v218_v3, %v222_v5  ;;  %v226_v12 = vld [vmem:[%s9246_s25 + $0x48] sm:$0xff] }
  0x19   : > { %v229_v8 = vld [vmem:[%s9246_s25 + $0x60] sm:$0xff]  ;;  %v230_v13 = vld [vmem:[%s9246_s25 + $0x68] sm:$0xff]  ;;  %v1246_v44 = vunpack.c.0.s8 %v1245_v34  ;;  %v9277_v45 = vshrl.u32 %v1247_v35, 7 }
  0x1a   : > { %v8046_v11 = vcombine.high %v225_v7, %v229_v8  ;;  %v233_v14 = vld [vmem:[%s9246_s25 + $0x80] sm:$0xff]  ;;  %6477 = vmatprep.subr.bf16.mxu0 %v8038_v4  ;;  %v8048_v15 = vcombine.high %v226_v12, %v230_v13  ;;  %v234_v17 = vld [vmem:[%s9246_s25 + $0x88] sm:$0xff]  ;;  %6805 = vmatprep.subr.bf16.mxu1 %v8040_v9  ;;  %v8045_v19 = vcombine.low %v225_v7, %v229_v8 }
  0x1b   : > { %v237_v16 = vld [vmem:[%s9246_s25 + $0xa0] sm:$0xff]  ;;  %v238_v18 = vld [vmem:[%s9246_s25 + $0xa8] sm:$0xff]  ;;  %6478 = vmatpush1.bf16.msra.mxu0 %v8037_v6  ;;  %6806 = vmatpush1.bf16.msra.mxu1 %v8039_v10  ;;  %v8047_v20 = vcombine.low %v226_v12, %v230_v13  ;;  %v9284_v54 = vsub.s32 %v1246_v44, %v9277_v45 }
  0x1c   : > { %6479 = vmatprep.subr.bf16.mxu0 %v8046_v11  ;;  %v8054_v21 = vcombine.high %v233_v14, %v237_v16  ;;  %6807 = vmatprep.subr.bf16.mxu1 %v8048_v15  ;;  %v8056_v22 = vcombine.high %v234_v17, %v238_v18  ;;  %v241_v23 = vld [vmem:[%s9246_s25 + $0xc0] sm:$0xff]  ;;  %v242_v25 = vld [vmem:[%s9246_s25 + $0xc8] sm:$0xff]  ;;  %v8053_v27 = vcombine.low %v233_v14, %v237_v16 }
  0x1d   : > { %v245_v24 = vld [vmem:[%s9246_s25 + $0xe0] sm:$0xff]  ;;  %v246_v26 = vld [vmem:[%s9246_s25 + $0xe8] sm:$0xff]  ;;  %v8055_v28 = vcombine.low %v234_v17, %v238_v18 }
  0x1e   : > { %v8062_v29 = vcombine.high %v241_v23, %v245_v24  ;;  %v8064_v30 = vcombine.high %v242_v25, %v246_v26  ;;  %v249_v31 = vld [vmem:[%s9246_s25 + $0x100] sm:$0xff]  ;;  %v250_v36 = vld [vmem:[%s9246_s25 + $0x108] sm:$0xff]  ;;  %v8061_v38 = vcombine.low %v241_v23, %v245_v24  ;;  %v8063_v39 = vcombine.low %v242_v25, %v246_v26 }
  0x1f   : > { %6480 = vmatpush1.bf16.msra.mxu0 %v8045_v19  ;;  %6808 = vmatpush1.bf16.msra.mxu1 %v8047_v20  ;;  %v253_v32 = vld [vmem:[%s9246_s25 + $0x120] sm:$0xff]  ;;  %v254_v37 = vld [vmem:[%s9246_s25 + $0x128] sm:$0xff] }
  0x20   : > { %6481 = vmatprep.subr.bf16.mxu0 %v8054_v21  ;;  %6809 = vmatprep.subr.bf16.mxu1 %v8056_v22  ;;  %v8070_v40 = vcombine.high %v249_v31, %v253_v32  ;;  %v8072_v41 = vcombine.high %v250_v36, %v254_v37  ;;  %v257_v42 = vld [vmem:[%s9246_s25 + $0x140] sm:$0xff]  ;;  %v258_v46 = vld [vmem:[%s9246_s25 + $0x148] sm:$0xff]  ;;  %v8069_v48 = vcombine.low %v249_v31, %v253_v32 }
  0x21   : > { %v261_v43 = vld [vmem:[%s9246_s25 + $0x160] sm:$0xff]  ;;  %v262_v47 = vld [vmem:[%s9246_s25 + $0x168] sm:$0xff]  ;;  %v8071_v49 = vcombine.low %v250_v36, %v254_v37 }
  0x22   : > { %v8078_v50 = vcombine.high %v257_v42, %v261_v43  ;;  %v8080_v51 = vcombine.high %v258_v46, %v262_v47  ;;  %v265_v52 = vld [vmem:[%s9246_s25 + $0x180] sm:$0xff]  ;;  %v266_v55 = vld [vmem:[%s9246_s25 + $0x188] sm:$0xff]  ;;  %v8077_v57 = vcombine.low %v257_v42, %v261_v43  ;;  %v8079_v58 = vcombine.low %v258_v46, %v262_v47 }
  0x23   : > { %6482 = vmatpush1.bf16.msra.mxu0 %v8053_v27  ;;  %6810 = vmatpush1.bf16.msra.mxu1 %v8055_v28  ;;  %v269_v53 = vld [vmem:[%s9246_s25 + $0x1a0] sm:$0xff]  ;;  %v270_v56 = vld [vmem:[%s9246_s25 + $0x1a8] sm:$0xff] }
  0x24   : > { %6483 = vmatprep.subr.bf16.mxu0 %v8062_v29  ;;  %6811 = vmatprep.subr.bf16.mxu1 %v8064_v30  ;;  %v8086_v59 = vcombine.high %v265_v52, %v269_v53  ;;  %v9289_v60 = vld [vmem:[%s9241_s21] sm:$0xff]  ;;  %v8088_v61 = vcombine.high %v266_v55, %v270_v56  ;;  %v274_v1 = vld [vmem:[%s9246_s25 + $0x1c8] sm:$0xff]  ;;  %v8085_v3 = vcombine.low %v265_v52, %v269_v53 }
  0x25   : > { %v273_v62 = vld [vmem:[%s9246_s25 + $0x1c0] sm:$0xff]  ;;  %v9295_v0 = vrot.slane %v9289_v60, %v9284_v54  ;;  %v278_v2 = vld [vmem:[%s9246_s25 + $0x1e8] sm:$0xff]  ;;  %v8087_v5 = vcombine.low %v266_v55, %v270_v56 }
  0x26   : > { %v277_v63 = vld [vmem:[%s9246_s25 + $0x1e0] sm:$0xff]  ;;  %v8096_v7 = vcombine.high %v274_v1, %v278_v2  ;;  %v282_v11 = vld [vmem:[%s9246_s25 + $0x208] sm:$0xff]  ;;  %v8095_v14 = vcombine.low %v274_v1, %v278_v2 }
  0x27   : > { %6484 = vmatpush1.bf16.msra.mxu0 %v8061_v38  ;;  %6812 = vmatpush1.bf16.msra.mxu1 %v8063_v39  ;;  %v1258_v4 = vcombine.high %v9295_v0, %v9295_v0  ;;  %v8094_v6 = vcombine.high %v273_v62, %v277_v63  ;;  %v281_v8 = vld [vmem:[%s9246_s25 + $0x200] sm:$0xff]  ;;  %v286_v12 = vld [vmem:[%s9246_s25 + $0x228] sm:$0xff]  ;;  %v8093_v13 = vcombine.low %v273_v62, %v277_v63 }
  0x28   : > { %6485 = vmatprep.subr.bf16.mxu0 %v8070_v40  ;;  %6813 = vmatprep.subr.bf16.mxu1 %v8072_v41  ;;  %v285_v9 = vld [vmem:[%s9246_s25 + $0x220] sm:$0xff]  ;;  %v8104_v16 = vcombine.high %v282_v11, %v286_v12  ;;  %v290_v19 = vld [vmem:[%s9246_s25 + $0x248] sm:$0xff]  ;;  %v8103_v22 = vcombine.low %v282_v11, %v286_v12 }
  0x29   : > { %v9304_v10 = vrot.slane %v1258_v4, %v9284_v54  ;;  %v8102_v15 = vcombine.high %v281_v8, %v285_v9  ;;  %v289_v17 = vld [vmem:[%s9246_s25 + $0x240] sm:$0xff]  ;;  %v294_v20 = vld [vmem:[%s9246_s25 + $0x268] sm:$0xff]  ;;  %v8101_v21 = vcombine.low %v281_v8, %v285_v9 }
  0x2a   : > { %v293_v18 = vld [vmem:[%s9246_s25 + $0x260] sm:$0xff]  ;;  %v8112_v24 = vcombine.high %v290_v19, %v294_v20  ;;  %v298_v27 = vld [vmem:[%s9246_s25 + $0x288] sm:$0xff]  ;;  %v8111_v30 = vcombine.low %v290_v19, %v294_v20 }
  0x2b   : > { %6486 = vmatpush1.bf16.msra.mxu0 %v8069_v48  ;;  %6814 = vmatpush1.bf16.msra.mxu1 %v8071_v49  ;;  %v8110_v23 = vcombine.high %v289_v17, %v293_v18  ;;  %v297_v25 = vld [vmem:[%s9246_s25 + $0x280] sm:$0xff]  ;;  %v302_v28 = vld [vmem:[%s9246_s25 + $0x2a8] sm:$0xff]  ;;  %v8109_v29 = vcombine.low %v289_v17, %v293_v18 }
  0x2c   : > { %6487 = vmatprep.subr.bf16.mxu0 %v8078_v50  ;;  %6815 = vmatprep.subr.bf16.mxu1 %v8080_v51  ;;  %v301_v26 = vld [vmem:[%s9246_s25 + $0x2a0] sm:$0xff]  ;;  %v8120_v32 = vcombine.high %v298_v27, %v302_v28  ;;  %v306_v35 = vld [vmem:[%s9246_s25 + $0x2c8] sm:$0xff]  ;;  %v8119_v38 = vcombine.low %v298_v27, %v302_v28 }
  0x2d   : > { %6509 = vmatprep.mubr.bf16.mxu0 %v9304_v10  ;;  %6837 = vmatprep.mubr.bf16.mxu1 %v9304_v10  ;;  %v8118_v31 = vcombine.high %v297_v25, %v301_v26  ;;  %v305_v33 = vld [vmem:[%s9246_s25 + $0x2c0] sm:$0xff]  ;;  %v310_v36 = vld [vmem:[%s9246_s25 + $0x2e8] sm:$0xff]  ;;  %v8117_v37 = vcombine.low %v297_v25, %v301_v26 }
  0x2e   : > { %v309_v34 = vld [vmem:[%s9246_s25 + $0x2e0] sm:$0xff]  ;;  %v8128_v40 = vcombine.high %v306_v35, %v310_v36  ;;  %v314_v43 = vld [vmem:[%s9246_s25 + $0x308] sm:$0xff]  ;;  %v8127_v47 = vcombine.low %v306_v35, %v310_v36 }
  0x2f   : > { %6488 = vmatpush1.bf16.msra.mxu0 %v8077_v57  ;;  %6816 = vmatpush1.bf16.msra.mxu1 %v8079_v58  ;;  %v8126_v39 = vcombine.high %v305_v33, %v309_v34  ;;  %v313_v41 = vld [vmem:[%s9246_s25 + $0x300] sm:$0xff]  ;;  %v318_v44 = vld [vmem:[%s9246_s25 + $0x328] sm:$0xff]  ;;  %v8125_v46 = vcombine.low %v305_v33, %v309_v34  ;;  %v9354_v33 = vcombine.high %v9304_v10, %v9304_v10 }
  0x30   : > { %6489 = vmatprep.subr.bf16.mxu0 %v8086_v59  ;;  %6817 = vmatprep.subr.bf16.mxu1 %v8088_v61  ;;  %v317_v42 = vld [vmem:[%s9246_s25 + $0x320] sm:$0xff]  ;;  %v8136_v49 = vcombine.high %v314_v43, %v318_v44  ;;  %v322_v52 = vld [vmem:[%s9246_s25 + $0x348] sm:$0xff]  ;;  %v8135_v56 = vcombine.low %v314_v43, %v318_v44 }
  0x31   : > { %v8134_v48 = vcombine.high %v313_v41, %v317_v42  ;;  %v321_v50 = vld [vmem:[%s9246_s25 + $0x340] sm:$0xff]  ;;  %v326_v53 = vld [vmem:[%s9246_s25 + $0x368] sm:$0xff]  ;;  %v8133_v55 = vcombine.low %v313_v41, %v317_v42 }
  0x32   : > { %v325_v51 = vld [vmem:[%s9246_s25 + $0x360] sm:$0xff]  ;;  %v8144_v58 = vcombine.high %v322_v52, %v326_v53  ;;  %v330_v62 = vld [vmem:[%s9246_s25 + $0x388] sm:$0xff]  ;;  %v8143_v2 = vcombine.low %v322_v52, %v326_v53 }
  0x33   : > { %6490 = vmatpush1.bf16.msra.mxu0 %v8085_v3  ;;  %6818 = vmatpush1.bf16.msra.mxu1 %v8087_v5  ;;  %v8142_v57 = vcombine.high %v321_v50, %v325_v51  ;;  %v329_v59 = vld [vmem:[%s9246_s25 + $0x380] sm:$0xff]  ;;  %v334_v63 = vld [vmem:[%s9246_s25 + $0x3a8] sm:$0xff]  ;;  %v8141_v1 = vcombine.low %v321_v50, %v325_v51 }
  0x34   : > { %6491 = vmatprep.subr.bf16.mxu0 %v8094_v6  ;;  %6819 = vmatprep.subr.bf16.mxu1 %v8096_v7  ;;  %v333_v61 = vld [vmem:[%s9246_s25 + $0x3a0] sm:$0xff]  ;;  %v8152_v4 = vcombine.high %v330_v62, %v334_v63  ;;  %v338_v7 = vld [vmem:[%s9246_s25 + $0x3c8] sm:$0xff]  ;;  %v8151_v11 = vcombine.low %v330_v62, %v334_v63 }
  0x35   : > { %v8150_v3 = vcombine.high %v329_v59, %v333_v61  ;;  %v337_v5 = vld [vmem:[%s9246_s25 + $0x3c0] sm:$0xff]  ;;  %v342_v8 = vld [vmem:[%s9246_s25 + $0x3e8] sm:$0xff]  ;;  %v8149_v9 = vcombine.low %v329_v59, %v333_v61 }
  0x36   : > { %v341_v6 = vld [vmem:[%s9246_s25 + $0x3e0] sm:$0xff]  ;;  %v350_v17 = vld [vmem:[%s9246_s25 + $0x428] sm:$0xff]  ;;  %v8159_v19 = vcombine.low %v338_v7, %v342_v8 }
  0x37   : > { %6492 = vmatpush1.bf16.msra.mxu0 %v8093_v13  ;;  %6820 = vmatpush1.bf16.msra.mxu1 %v8095_v14  ;;  %v8158_v12 = vcombine.high %v337_v5, %v341_v6  ;;  %v8160_v13 = vcombine.high %v338_v7, %v342_v8  ;;  %v345_v14 = vld [vmem:[%s9246_s25 + $0x400] sm:$0xff]  ;;  %v8157_v18 = vcombine.low %v337_v5, %v341_v6  ;;  %v354_v25 = vld [vmem:[%s9246_s25 + $0x448] sm:$0xff] }
  0x38   : > { %6493 = vmatprep.subr.bf16.mxu0 %v8102_v15  ;;  %6821 = vmatprep.subr.bf16.mxu1 %v8104_v16  ;;  %v349_v15 = vld [vmem:[%s9246_s25 + $0x420] sm:$0xff]  ;;  %v346_v16 = vld [vmem:[%s9246_s25 + $0x408] sm:$0xff] }
  0x39   : > { %v8166_v20 = vcombine.high %v345_v14, %v349_v15  ;;  %v358_v26 = vld [vmem:[%s9246_s25 + $0x468] sm:$0xff]  ;;  %v8165_v27 = vcombine.low %v345_v14, %v349_v15  ;;  %v8167_v28 = vcombine.low %v346_v16, %v350_v17 }
  0x3a   : > { %v366_v34 = vld [vmem:[%s9246_s25 + $0x4a8] sm:$0xff]  ;;  %v8175_v36 = vcombine.low %v354_v25, %v358_v26 }
  0x3b   : > { %6494 = vmatpush1.bf16.msra.mxu0 %v8101_v21  ;;  %6822 = vmatpush1.bf16.msra.mxu1 %v8103_v22  ;;  %v8168_v21 = vcombine.high %v346_v16, %v350_v17  ;;  %v353_v22 = vld [vmem:[%s9246_s25 + $0x440] sm:$0xff]  ;;  %v370_v41 = vld [vmem:[%s9246_s25 + $0x4c8] sm:$0xff] }
  0x3c   : > { %6495 = vmatprep.subr.bf16.mxu0 %v8110_v23  ;;  %6823 = vmatprep.subr.bf16.mxu1 %v8112_v24  ;;  %v357_v23 = vld [vmem:[%s9246_s25 + $0x460] sm:$0xff]  ;;  %v9346_v24 = vrot.slane %v9295_v0, %v9284_v54  ;;  %v362_v0 = vld [vmem:[%s9246_s25 + $0x488] sm:$0xff] }
  0x3d   : > { %v8173_v35 = vcombine.low %v353_v22, %v357_v23  ;;  %v374_v42 = vld [vmem:[%s9246_s25 + $0x4e8] sm:$0xff]  ;;  %v8183_v44 = vcombine.low %v362_v0, %v366_v34 }
  0x3e   : > { %v378_v50 = vld [vmem:[%s9246_s25 + $0x508] sm:$0xff]  ;;  %v8191_v53 = vcombine.low %v370_v41, %v374_v42 }
  0x3f   : > { %6496 = vmatpush1.bf16.msra.mxu0 %v8109_v29  ;;  %6824 = vmatpush1.bf16.msra.mxu1 %v8111_v30  ;;  %v8174_v29 = vcombine.high %v353_v22, %v357_v23  ;;  %v8176_v30 = vcombine.high %v354_v25, %v358_v26  ;;  %v382_v51 = vld [vmem:[%s9246_s25 + $0x528] sm:$0xff] }
  0x40   : > { %6497 = vmatprep.subr.bf16.mxu0 %v8118_v31  ;;  %6825 = vmatprep.subr.bf16.mxu1 %v8120_v32  ;;  %v361_v31 = vld [vmem:[%s9246_s25 + $0x480] sm:$0xff]  ;;  %v386_v59 = vld [vmem:[%s9246_s25 + $0x548] sm:$0xff]  ;;  %v8199_v63 = vcombine.low %v378_v50, %v382_v51 }
  0x41   : > { %v365_v32 = vld [vmem:[%s9246_s25 + $0x4a0] sm:$0xff]  ;;  %v390_v61 = vld [vmem:[%s9246_s25 + $0x568] sm:$0xff] }
  0x42   : > { %v8181_v43 = vcombine.low %v361_v31, %v365_v32  ;;  %v394_v5 = vld [vmem:[%s9246_s25 + $0x588] sm:$0xff]  ;;  %v8207_v8 = vcombine.low %v386_v59, %v390_v61 }
  0x43   : > { %6498 = vmatpush1.bf16.msra.mxu0 %v8117_v37  ;;  %6826 = vmatpush1.bf16.msra.mxu1 %v8119_v38  ;;  %v8182_v37 = vcombine.high %v361_v31, %v365_v32  ;;  %v8184_v38 = vcombine.high %v362_v0, %v366_v34  ;;  %v398_v6 = vld [vmem:[%s9246_s25 + $0x5a8] sm:$0xff] }
  0x44   : > { %6499 = vmatprep.subr.bf16.mxu0 %v8126_v39  ;;  %6827 = vmatprep.subr.bf16.mxu1 %v8128_v40  ;;  %v369_v39 = vld [vmem:[%s9246_s25 + $0x4c0] sm:$0xff]  ;;  %v402_v14 = vld [vmem:[%s9246_s25 + $0x5c8] sm:$0xff]  ;;  %v8215_v17 = vcombine.low %v394_v5, %v398_v6 }
  0x45   : > { %v373_v40 = vld [vmem:[%s9246_s25 + $0x4e0] sm:$0xff]  ;;  %v406_v15 = vld [vmem:[%s9246_s25 + $0x5e8] sm:$0xff] }
  0x46   : > { %v8189_v52 = vcombine.low %v369_v39, %v373_v40  ;;  %v410_v22 = vld [vmem:[%s9246_s25 + $0x608] sm:$0xff]  ;;  %v8223_v26 = vcombine.low %v402_v14, %v406_v15 }
  0x47   : > { %6500 = vmatpush1.bf16.msra.mxu0 %v8125_v46  ;;  %6828 = vmatpush1.bf16.msra.mxu1 %v8127_v47  ;;  %v8190_v46 = vcombine.high %v369_v39, %v373_v40  ;;  %v8192_v47 = vcombine.high %v370_v41, %v374_v42  ;;  %v414_v23 = vld [vmem:[%s9246_s25 + $0x628] sm:$0xff] }
  0x48   : > { %6501 = vmatprep.subr.bf16.mxu0 %v8134_v48  ;;  %6829 = vmatprep.subr.bf16.mxu1 %v8136_v49  ;;  %v377_v48 = vld [vmem:[%s9246_s25 + $0x500] sm:$0xff]  ;;  %v418_v31 = vld [vmem:[%s9246_s25 + $0x648] sm:$0xff]  ;;  %v8231_v34 = vcombine.low %v410_v22, %v414_v23 }
  0x49   : > { %v381_v49 = vld [vmem:[%s9246_s25 + $0x520] sm:$0xff]  ;;  %v422_v32 = vld [vmem:[%s9246_s25 + $0x668] sm:$0xff] }
  0x4a   : > { %v8197_v62 = vcombine.low %v377_v48, %v381_v49  ;;  %v426_v39 = vld [vmem:[%s9246_s25 + $0x688] sm:$0xff]  ;;  %v8239_v42 = vcombine.low %v418_v31, %v422_v32 }
  0x4b   : > { %6502 = vmatpush1.bf16.msra.mxu0 %v8133_v55  ;;  %6830 = vmatpush1.bf16.msra.mxu1 %v8135_v56  ;;  %v8198_v55 = vcombine.high %v377_v48, %v381_v49  ;;  %v8200_v56 = vcombine.high %v378_v50, %v382_v51  ;;  %v430_v40 = vld [vmem:[%s9246_s25 + $0x6a8] sm:$0xff] }
  0x4c   : > { %6503 = vmatprep.subr.bf16.mxu0 %v8142_v57  ;;  %6831 = vmatprep.subr.bf16.mxu1 %v8144_v58  ;;  %v385_v57 = vld [vmem:[%s9246_s25 + $0x540] sm:$0xff]  ;;  %v434_v48 = vld [vmem:[%s9246_s25 + $0x6c8] sm:$0xff]  ;;  %v8247_v51 = vcombine.low %v426_v39, %v430_v40 }
  0x4d   : > { %v389_v58 = vld [vmem:[%s9246_s25 + $0x560] sm:$0xff]  ;;  %v438_v49 = vld [vmem:[%s9246_s25 + $0x6e8] sm:$0xff] }
  0x4e   : > { %v8205_v7 = vcombine.low %v385_v57, %v389_v58 }
  0x4f   : > { %6504 = vmatpush1.bf16.msra.mxu0 %v8141_v1  ;;  %6832 = vmatpush1.bf16.msra.mxu1 %v8143_v2  ;;  %v8206_v1 = vcombine.high %v385_v57, %v389_v58  ;;  %v8208_v2 = vcombine.high %v386_v59, %v390_v61  ;;  %v442_v57 = vld [vmem:[%s9246_s25 + $0x708] sm:$0xff]  ;;  %v8255_v61 = vcombine.low %v434_v48, %v438_v49 }
  0x50   : > { %6505 = vmatprep.subr.bf16.mxu0 %v8150_v3  ;;  %6833 = vmatprep.subr.bf16.mxu1 %v8152_v4  ;;  %v393_v3 = vld [vmem:[%s9246_s25 + $0x580] sm:$0xff]  ;;  %v446_v58 = vld [vmem:[%s9246_s25 + $0x728] sm:$0xff] }
  0x51   : > { %v397_v4 = vld [vmem:[%s9246_s25 + $0x5a0] sm:$0xff] }
  0x52   : > { %v8213_v16 = vcombine.low %v393_v3, %v397_v4 }
  0x53   : > { %6506 = vmatpush1.bf16.msra.mxu0 %v8149_v9  ;;  %6834 = vmatpush1.bf16.msra.mxu1 %v8151_v11  ;;  %v8214_v9 = vcombine.high %v393_v3, %v397_v4  ;;  %v8216_v11 = vcombine.high %v394_v5, %v398_v6  ;;  %v450_v3 = vld [vmem:[%s9246_s25 + $0x748] sm:$0xff]  ;;  %v8263_v6 = vcombine.low %v442_v57, %v446_v58 }
  0x54   : > { %6507 = vmatprep.subr.bf16.mxu0 %v8158_v12  ;;  %6835 = vmatprep.subr.bf16.mxu1 %v8160_v13  ;;  %v401_v12 = vld [vmem:[%s9246_s25 + $0x5c0] sm:$0xff]  ;;  %v454_v4 = vld [vmem:[%s9246_s25 + $0x768] sm:$0xff] }
  0x55   : > { %v405_v13 = vld [vmem:[%s9246_s25 + $0x5e0] sm:$0xff] }
  0x56   : > { %v8221_v25 = vcombine.low %v401_v12, %v405_v13 }
  0x57   : > { %6508 = vmatpush1.bf16.msra.mxu0 %v8157_v18  ;;  %6836 = vmatpush1.bf16.msra.mxu1 %v8159_v19  ;;  %v8222_v18 = vcombine.high %v401_v12, %v405_v13  ;;  %v8224_v19 = vcombine.high %v402_v14, %v406_v15  ;;  %v458_v12 = vld [vmem:[%s9246_s25 + $0x788] sm:$0xff]  ;;  %v8271_v15 = vcombine.low %v450_v3, %v454_v4 }
  0x58   : > { %6518 = vmatprep.subr.bf16.mxu0 %v8166_v20  ;;  %6846 = vmatprep.subr.bf16.mxu1 %v8168_v21  ;;  %v409_v20 = vld [vmem:[%s9246_s25 + $0x600] sm:$0xff]  ;;  %v462_v13 = vld [vmem:[%s9246_s25 + $0x7a8] sm:$0xff] }
  0x59   : > { %v413_v21 = vld [vmem:[%s9246_s25 + $0x620] sm:$0xff] }
  0x5a   : > { %6510 = vmatmul.mubr.bf16.vlgmr.msra.gmra.mrb[0].mxu0 %v9346_v24  ;;  %6838 = vmatmul.mubr.bf16.vlgmr.msra.gmra.mrb[0].mxu1 %v9346_v24  ;;  %v8229_v0 = vcombine.low %v409_v20, %v413_v21 }
  0x5b   : > { %6519 = vmatpush1.bf16.msra.mxu0 %v8165_v27  ;;  %6847 = vmatpush1.bf16.msra.mxu1 %v8167_v28  ;;  %v8230_v27 = vcombine.high %v409_v20, %v413_v21  ;;  %v8232_v28 = vcombine.high %v410_v22, %v414_v23  ;;  %v1243_v20 = vcombine.high %v9289_v60, %v9289_v60  ;;  %v466_v21 = vld [vmem:[%s9246_s25 + $0x7c8] sm:$0xff] }
  0x5c   : > { %6520 = vmatprep.subr.bf16.mxu0 %v8174_v29  ;;  %6848 = vmatprep.subr.bf16.mxu1 %v8176_v30  ;;  %v417_v29 = vld [vmem:[%s9246_s25 + $0x640] sm:$0xff]  ;;  %v470_v22 = vld [vmem:[%s9246_s25 + $0x7e8] sm:$0xff] }
  0x5d   : > { %6550 = vmatprep.mubr.bf16.mxu0 %v9354_v33  ;;  %6878 = vmatprep.mubr.bf16.mxu1 %v9354_v33  ;;  %v421_v30 = vld [vmem:[%s9246_s25 + $0x660] sm:$0xff]  ;;  %v474_v60 = vld [vmem:[%s9246_s25 + $0x808] sm:$0xff] }
  0x5e   : > { %v8237_v41 = vcombine.low %v417_v29, %v421_v30 }
  0x5f   : > { %6521 = vmatpush1.bf16.msra.mxu0 %v8173_v35  ;;  %6849 = vmatpush1.bf16.msra.mxu1 %v8175_v36  ;;  %v8238_v35 = vcombine.high %v417_v29, %v421_v30  ;;  %v8240_v36 = vcombine.high %v418_v31, %v422_v32  ;;  %v477_v29 = vld [vmem:[%s9246_s25 + $0x820] sm:$0xff]  ;;  %v9419_v30 = vrot.slane %v1243_v20, %v9284_v54  ;;  %v478_v31 = vld [vmem:[%s9246_s25 + $0x828] sm:$0xff] }
  0x60   : > { %6522 = vmatprep.subr.bf16.mxu0 %v8182_v37  ;;  %6850 = vmatprep.subr.bf16.mxu1 %v8184_v38  ;;  %v425_v37 = vld [vmem:[%s9246_s25 + $0x680] sm:$0xff] }
  0x61   : > { %v429_v38 = vld [vmem:[%s9246_s25 + $0x6a0] sm:$0xff] }
  0x62   : > { %v8245_v50 = vcombine.low %v425_v37, %v429_v38  ;;  %v521_v20 = vld [vmem:[%s9246_s25 + $0x980] sm:$0xff] }
  0x63   : > { %6523 = vmatpush1.bf16.msra.mxu0 %v8181_v43  ;;  %6851 = vmatpush1.bf16.msra.mxu1 %v8183_v44  ;;  %v8246_v43 = vcombine.high %v425_v37, %v429_v38  ;;  %v8248_v44 = vcombine.high %v426_v39, %v430_v40  ;;  %v485_v37 = vld [vmem:[%s9246_s25 + $0x860] sm:$0xff]  ;;  %v1259_v38 = vcombine.high %v9419_v30, %v9419_v30  ;;  %v482_v40 = vld [vmem:[%s9246_s25 + $0x848] sm:$0xff] }
  0x64   : > { %6524 = vmatprep.subr.bf16.mxu0 %v8190_v46  ;;  %6852 = vmatprep.subr.bf16.mxu1 %v8192_v47  ;;  %v433_v46 = vld [vmem:[%s9246_s25 + $0x6c0] sm:$0xff]  ;;  %v9429_v39 = vcombine.high %v9346_v24, %v9346_v24 }
  0x65   : > { %v437_v47 = vld [vmem:[%s9246_s25 + $0x6e0] sm:$0xff] }
  0x66   : > { %v8253_v59 = vcombine.low %v433_v46, %v437_v47 }
  0x67   : > { %6525 = vmatpush1.bf16.msra.mxu0 %v8189_v52  ;;  %6853 = vmatpush1.bf16.msra.mxu1 %v8191_v53  ;;  %v8254_v52 = vcombine.high %v433_v46, %v437_v47  ;;  %v8256_v53 = vcombine.high %v434_v48, %v438_v49  ;;  %v489_v47 = vld [vmem:[%s9246_s25 + $0x880] sm:$0xff]  ;;  %v9436_v49 = vrot.slane %v1259_v38, %v9284_v54 }
  0x68   : > { %6526 = vmatprep.subr.bf16.mxu0 %v8198_v55  ;;  %6854 = vmatprep.subr.bf16.mxu1 %v8200_v56  ;;  %v441_v55 = vld [vmem:[%s9246_s25 + $0x700] sm:$0xff] }
  0x69   : > { %v445_v56 = vld [vmem:[%s9246_s25 + $0x720] sm:$0xff] }
  0x6a   : > { %v8261_v5 = vcombine.low %v441_v55, %v445_v56  ;;  %v493_v48 = vld [vmem:[%s9246_s25 + $0x8a0] sm:$0xff] }
  0x6b   : > { %6527 = vmatpush1.bf16.msra.mxu0 %v8197_v62  ;;  %6855 = vmatpush1.bf16.msra.mxu1 %v8199_v63  ;;  %v8262_v62 = vcombine.high %v441_v55, %v445_v56  ;;  %v8264_v63 = vcombine.high %v442_v57, %v446_v58  ;;  %v8310_v55 = vcombine.high %v489_v47, %v493_v48  ;;  %v497_v57 = vld [vmem:[%s9246_s25 + $0x8c0] sm:$0xff] }
  0x6c   : > { %6528 = vmatprep.subr.bf16.mxu0 %v8206_v1  ;;  %6856 = vmatprep.subr.bf16.mxu1 %v8208_v2  ;;  %v449_v1 = vld [vmem:[%s9246_s25 + $0x740] sm:$0xff] }
  0x6d   : > { %v453_v2 = vld [vmem:[%s9246_s25 + $0x760] sm:$0xff] }
  0x6e   : > { %v8269_v14 = vcombine.low %v449_v1, %v453_v2  ;;  %v501_v58 = vld [vmem:[%s9246_s25 + $0x8e0] sm:$0xff] }
  0x6f   : > { %6529 = vmatpush1.bf16.msra.mxu0 %v8205_v7  ;;  %6857 = vmatpush1.bf16.msra.mxu1 %v8207_v8  ;;  %v8270_v7 = vcombine.high %v449_v1, %v453_v2  ;;  %v8272_v8 = vcombine.high %v450_v3, %v454_v4  ;;  %v8318_v1 = vcombine.high %v497_v57, %v501_v58  ;;  %v505_v3 = vld [vmem:[%s9246_s25 + $0x900] sm:$0xff] }
  0x70   : > { %6530 = vmatprep.subr.bf16.mxu0 %v8214_v9  ;;  %6858 = vmatprep.subr.bf16.mxu1 %v8216_v11  ;;  %v457_v9 = vld [vmem:[%s9246_s25 + $0x780] sm:$0xff] }
  0x71   : > { %v461_v11 = vld [vmem:[%s9246_s25 + $0x7a0] sm:$0xff] }
  0x72   : > { %v8277_v23 = vcombine.low %v457_v9, %v461_v11  ;;  %v509_v4 = vld [vmem:[%s9246_s25 + $0x920] sm:$0xff] }
  0x73   : > { %6531 = vmatpush1.bf16.msra.mxu0 %v8213_v16  ;;  %6859 = vmatpush1.bf16.msra.mxu1 %v8215_v17  ;;  %v8278_v16 = vcombine.high %v457_v9, %v461_v11  ;;  %v8280_v17 = vcombine.high %v458_v12, %v462_v13  ;;  %v8326_v9 = vcombine.high %v505_v3, %v509_v4  ;;  %v541_v38 = vld [vmem:[%s9246_s25 + $0xa20] sm:$0xff] }
  0x74   : > { %6532 = vmatprep.subr.bf16.mxu0 %v8222_v18  ;;  %6860 = vmatprep.subr.bf16.mxu1 %v8224_v19  ;;  %v465_v18 = vld [vmem:[%s9246_s25 + $0x7c0] sm:$0xff] }
  0x75   : > { %v469_v19 = vld [vmem:[%s9246_s25 + $0x7e0] sm:$0xff] }
  0x76   : > { %v8285_v32 = vcombine.low %v465_v18, %v469_v19 }
  0x77   : > { %6533 = vmatpush1.bf16.msra.mxu0 %v8221_v25  ;;  %6861 = vmatpush1.bf16.msra.mxu1 %v8223_v26  ;;  %v8279_v25 = vcombine.low %v458_v12, %v462_v13  ;;  %v8286_v26 = vcombine.high %v465_v18, %v469_v19  ;;  %v513_v12 = vld [vmem:[%s9246_s25 + $0x940] sm:$0xff] }
  0x78   : > { %6534 = vmatprep.subr.bf16.mxu0 %v8230_v27  ;;  %6862 = vmatprep.subr.bf16.mxu1 %v8232_v28  ;;  %v8288_v27 = vcombine.high %v466_v21, %v470_v22  ;;  %v473_v28 = vld [vmem:[%s9246_s25 + $0x800] sm:$0xff] }
  0x79   : > { %v517_v13 = vld [vmem:[%s9246_s25 + $0x960] sm:$0xff] }
  0x7a   : > { %v8334_v18 = vcombine.high %v513_v12, %v517_v13 }
  0x7b   : > { %6535 = vmatpush1.bf16.msra.mxu0 %v8229_v0  ;;  %6863 = vmatpush1.bf16.msra.mxu1 %v8231_v34  ;;  %v8287_v0 = vcombine.low %v466_v21, %v470_v22  ;;  %v8294_v34 = vcombine.high %v473_v28, %v477_v29  ;;  %v525_v21 = vld [vmem:[%s9246_s25 + $0x9a0] sm:$0xff]  ;;  %v522_v22 = vld [vmem:[%s9246_s25 + $0x988] sm:$0xff] }
  0x7c   : > { %6536 = vmatprep.subr.bf16.mxu0 %v8238_v35  ;;  %6864 = vmatprep.subr.bf16.mxu1 %v8240_v36  ;;  %v8296_v35 = vcombine.high %v474_v60, %v478_v31  ;;  %v481_v36 = vld [vmem:[%s9246_s25 + $0x840] sm:$0xff] }
  0x7f   : > { %6537 = vmatpush1.bf16.msra.mxu0 %v8237_v41  ;;  %6865 = vmatpush1.bf16.msra.mxu1 %v8239_v42  ;;  %v486_v41 = vld [vmem:[%s9246_s25 + $0x868] sm:$0xff]  ;;  %v8293_v42 = vcombine.low %v473_v28, %v477_v29  ;;  %v529_v29 = vld [vmem:[%s9246_s25 + $0x9c0] sm:$0xff] }
  0x80   : > { %6538 = vmatprep.subr.bf16.mxu0 %v8246_v43  ;;  %6866 = vmatprep.subr.bf16.mxu1 %v8248_v44  ;;  %v8295_v43 = vcombine.low %v474_v60, %v478_v31  ;;  %v8302_v44 = vcombine.high %v481_v36, %v485_v37  ;;  %v8304_v46 = vcombine.high %v482_v40, %v486_v41  ;;  %v533_v60 = vld [vmem:[%s9246_s25 + $0x9e0] sm:$0xff]  ;;  %v530_v31 = vld [vmem:[%s9246_s25 + $0x9c8] sm:$0xff] }
  0x83   : > { %6539 = vmatpush1.bf16.msra.mxu0 %v8245_v50  ;;  %6867 = vmatpush1.bf16.msra.mxu1 %v8247_v51  ;;  %v490_v50 = vld [vmem:[%s9246_s25 + $0x888] sm:$0xff] }
  0x84   : > { %6540 = vmatprep.subr.bf16.mxu0 %v8254_v52  ;;  %6868 = vmatprep.subr.bf16.mxu1 %v8256_v53  ;;  %v494_v51 = vld [vmem:[%s9246_s25 + $0x8a8] sm:$0xff]  ;;  %v8301_v52 = vcombine.low %v481_v36, %v485_v37  ;;  %v8303_v53 = vcombine.low %v482_v40, %v486_v41  ;;  %v537_v37 = vld [vmem:[%s9246_s25 + $0xa00] sm:$0xff] }
  0x85   : > { %v8312_v56 = vcombine.high %v490_v50, %v494_v51  ;;  %v538_v40 = vld [vmem:[%s9246_s25 + $0xa08] sm:$0xff] }
  0x86   : > { %v542_v41 = vld [vmem:[%s9246_s25 + $0xa28] sm:$0xff] }
  0x87   : > { %6541 = vmatpush1.bf16.msra.mxu0 %v8253_v59  ;;  %6869 = vmatpush1.bf16.msra.mxu1 %v8255_v61  ;;  %v498_v59 = vld [vmem:[%s9246_s25 + $0x8c8] sm:$0xff] }
  0x88   : > { %6542 = vmatprep.subr.bf16.mxu0 %v8262_v62  ;;  %6870 = vmatprep.subr.bf16.mxu1 %v8264_v63  ;;  %v502_v61 = vld [vmem:[%s9246_s25 + $0x8e8] sm:$0xff]  ;;  %v8309_v62 = vcombine.low %v489_v47, %v493_v48  ;;  %v8311_v63 = vcombine.low %v490_v50, %v494_v51  ;;  %v545_v47 = vld [vmem:[%s9246_s25 + $0xa40] sm:$0xff] }
  0x89   : > { %v8320_v2 = vcombine.high %v498_v59, %v502_v61  ;;  %v549_v48 = vld [vmem:[%s9246_s25 + $0xa60] sm:$0xff]  ;;  %v546_v50 = vld [vmem:[%s9246_s25 + $0xa48] sm:$0xff] }
  0x8a   : > { %v550_v51 = vld [vmem:[%s9246_s25 + $0xa68] sm:$0xff] }
  0x8b   : > { %6543 = vmatpush1.bf16.msra.mxu0 %v8261_v5  ;;  %6871 = vmatpush1.bf16.msra.mxu1 %v8263_v6  ;;  %v506_v5 = vld [vmem:[%s9246_s25 + $0x908] sm:$0xff] }
  0x8c   : > { %6544 = vmatprep.subr.bf16.mxu0 %v8270_v7  ;;  %6872 = vmatprep.subr.bf16.mxu1 %v8272_v8  ;;  %v510_v6 = vld [vmem:[%s9246_s25 + $0x928] sm:$0xff]  ;;  %v8317_v7 = vcombine.low %v497_v57, %v501_v58  ;;  %v8319_v8 = vcombine.low %v498_v59, %v502_v61  ;;  %v553_v57 = vld [vmem:[%s9246_s25 + $0xa80] sm:$0xff] }
  0x8d   : > { %v8328_v11 = vcombine.high %v506_v5, %v510_v6  ;;  %v557_v58 = vld [vmem:[%s9246_s25 + $0xaa0] sm:$0xff]  ;;  %v554_v59 = vld [vmem:[%s9246_s25 + $0xa88] sm:$0xff] }
  0x8e   : > { %v558_v61 = vld [vmem:[%s9246_s25 + $0xaa8] sm:$0xff] }
  0x8f   : > { %6545 = vmatpush1.bf16.msra.mxu0 %v8269_v14  ;;  %6873 = vmatpush1.bf16.msra.mxu1 %v8271_v15  ;;  %v514_v14 = vld [vmem:[%s9246_s25 + $0x948] sm:$0xff] }
  0x90   : > { %6546 = vmatprep.subr.bf16.mxu0 %v8278_v16  ;;  %6874 = vmatprep.subr.bf16.mxu1 %v8280_v17  ;;  %v518_v15 = vld [vmem:[%s9246_s25 + $0x968] sm:$0xff]  ;;  %v8325_v16 = vcombine.low %v505_v3, %v509_v4  ;;  %v8327_v17 = vcombine.low %v506_v5, %v510_v6  ;;  %v561_v3 = vld [vmem:[%s9246_s25 + $0xac0] sm:$0xff] }
  0x91   : > { %v8336_v19 = vcombine.high %v514_v14, %v518_v15  ;;  %v565_v4 = vld [vmem:[%s9246_s25 + $0xae0] sm:$0xff]  ;;  %v562_v5 = vld [vmem:[%s9246_s25 + $0xac8] sm:$0xff] }
  0x92   : > { %v566_v6 = vld [vmem:[%s9246_s25 + $0xae8] sm:$0xff] }
  0x93   : > { %6547 = vmatpush1.bf16.msra.mxu0 %v8277_v23  ;;  %6875 = vmatpush1.bf16.msra.mxu1 %v8279_v25  ;;  %v526_v23 = vld [vmem:[%s9246_s25 + $0x9a8] sm:$0xff]  ;;  %v8333_v25 = vcombine.low %v513_v12, %v517_v13  ;;  %v569_v12 = vld [vmem:[%s9246_s25 + $0xb00] sm:$0xff] }
  0x94   : > { %6548 = vmatprep.subr.bf16.mxu0 %v8286_v26  ;;  %6876 = vmatprep.subr.bf16.mxu1 %v8288_v27  ;;  %v8335_v26 = vcombine.low %v514_v14, %v518_v15  ;;  %v8342_v27 = vcombine.high %v521_v20, %v525_v21  ;;  %v8344_v28 = vcombine.high %v522_v22, %v526_v23  ;;  %v573_v13 = vld [vmem:[%s9246_s25 + $0xb20] sm:$0xff]  ;;  %v570_v14 = vld [vmem:[%s9246_s25 + $0xb08] sm:$0xff] }
  0x95   : > { %v574_v15 = vld [vmem:[%s9246_s25 + $0xb28] sm:$0xff] }
  0x97   : > { %6549 = vmatpush1.bf16.msra.mxu0 %v8285_v32  ;;  %6877 = vmatpush1.bf16.msra.mxu1 %v8287_v0  ;;  %v534_v32 = vld [vmem:[%s9246_s25 + $0x9e8] sm:$0xff]  ;;  %v8341_v0 = vcombine.low %v521_v20, %v525_v21  ;;  %v577_v20 = vld [vmem:[%s9246_s25 + $0xb40] sm:$0xff] }
  0x98   : > { %6559 = vmatprep.subr.bf16.mxu0 %v8294_v34  ;;  %6887 = vmatprep.subr.bf16.mxu1 %v8296_v35  ;;  %v8343_v34 = vcombine.low %v522_v22, %v526_v23  ;;  %v8350_v35 = vcombine.high %v529_v29, %v533_v60  ;;  %v8352_v36 = vcombine.high %v530_v31, %v534_v32  ;;  %v581_v21 = vld [vmem:[%s9246_s25 + $0xb60] sm:$0xff]  ;;  %v578_v22 = vld [vmem:[%s9246_s25 + $0xb48] sm:$0xff] }
  0x99   : > { %v582_v23 = vld [vmem:[%s9246_s25 + $0xb68] sm:$0xff] }
  0x9a   : > { %6551 = vmatmul.mubr.bf16.vlgmr.msra.gmra.mrb[0].mxu0 %v9429_v39  ;;  %6879 = vmatmul.mubr.bf16.vlgmr.msra.gmra.mrb[0].mxu1 %v9429_v39 }
  0x9b   : > { %6560 = vmatpush1.bf16.msra.mxu0 %v8293_v42  ;;  %6888 = vmatpush1.bf16.msra.mxu1 %v8295_v43  ;;  %v8349_v42 = vcombine.low %v529_v29, %v533_v60  ;;  %v8351_v43 = vcombine.low %v530_v31, %v534_v32  ;;  %v585_v29 = vld [vmem:[%s9246_s25 + $0xb80] sm:$0xff]  ;;  %v586_v31 = vld [vmem:[%s9246_s25 + $0xb88] sm:$0xff] }
  0x9c   : > { %6561 = vmatprep.subr.bf16.mxu0 %v8302_v44  ;;  %6889 = vmatprep.subr.bf16.mxu1 %v8304_v46  ;;  %v8358_v44 = vcombine.high %v537_v37, %v541_v38  ;;  %v8360_v46 = vcombine.high %v538_v40, %v542_v41  ;;  %v589_v60 = vld [vmem:[%s9246_s25 + $0xba0] sm:$0xff]  ;;  %v590_v32 = vld [vmem:[%s9246_s25 + $0xba8] sm:$0xff] }
  0x9d   : > { %6591 = vmatprep.mubr.bf16.mxu0 %v9436_v49  ;;  %6919 = vmatprep.mubr.bf16.mxu1 %v9436_v49 }
  0x9f   : > { %6562 = vmatpush1.bf16.msra.mxu0 %v8301_v52  ;;  %6890 = vmatpush1.bf16.msra.mxu1 %v8303_v53  ;;  %v8357_v52 = vcombine.low %v537_v37, %v541_v38  ;;  %v8359_v53 = vcombine.low %v538_v40, %v542_v41  ;;  %v593_v37 = vld [vmem:[%s9246_s25 + $0xbc0] sm:$0xff]  ;;  %v594_v40 = vld [vmem:[%s9246_s25 + $0xbc8] sm:$0xff] }
  0xa0   : > { %6563 = vmatprep.subr.bf16.mxu0 %v8310_v55  ;;  %6891 = vmatprep.subr.bf16.mxu1 %v8312_v56  ;;  %v8366_v55 = vcombine.high %v545_v47, %v549_v48  ;;  %v8368_v56 = vcombine.high %v546_v50, %v550_v51  ;;  %v597_v38 = vld [vmem:[%s9246_s25 + $0xbe0] sm:$0xff]  ;;  %v598_v41 = vld [vmem:[%s9246_s25 + $0xbe8] sm:$0xff] }
  0xa3   : > { %6564 = vmatpush1.bf16.msra.mxu0 %v8309_v62  ;;  %6892 = vmatpush1.bf16.msra.mxu1 %v8311_v63  ;;  %v8365_v62 = vcombine.low %v545_v47, %v549_v48  ;;  %v8367_v63 = vcombine.low %v546_v50, %v550_v51  ;;  %v601_v47 = vld [vmem:[%s9246_s25 + $0xc00] sm:$0xff]  ;;  %v602_v50 = vld [vmem:[%s9246_s25 + $0xc08] sm:$0xff] }
  0xa4   : > { %6565 = vmatprep.subr.bf16.mxu0 %v8318_v1  ;;  %6893 = vmatprep.subr.bf16.mxu1 %v8320_v2  ;;  %v8374_v1 = vcombine.high %v553_v57, %v557_v58  ;;  %v8376_v2 = vcombine.high %v554_v59, %v558_v61  ;;  %v605_v48 = vld [vmem:[%s9246_s25 + $0xc20] sm:$0xff]  ;;  %v606_v51 = vld [vmem:[%s9246_s25 + $0xc28] sm:$0xff] }
  0xa7   : > { %6566 = vmatpush1.bf16.msra.mxu0 %v8317_v7  ;;  %6894 = vmatpush1.bf16.msra.mxu1 %v8319_v8  ;;  %v8373_v7 = vcombine.low %v553_v57, %v557_v58  ;;  %v8375_v8 = vcombine.low %v554_v59, %v558_v61  ;;  %v609_v57 = vld [vmem:[%s9246_s25 + $0xc40] sm:$0xff]  ;;  %v9504_v59 = vrot.slane %v9419_v30, %v9284_v54  ;;  %v610_v61 = vld [vmem:[%s9246_s25 + $0xc48] sm:$0xff] }
  0xa8   : > { %6567 = vmatprep.subr.bf16.mxu0 %v8326_v9  ;;  %6895 = vmatprep.subr.bf16.mxu1 %v8328_v11  ;;  %v8382_v9 = vcombine.high %v561_v3, %v565_v4  ;;  %v8384_v11 = vcombine.high %v562_v5, %v566_v6  ;;  %v613_v58 = vld [vmem:[%s9246_s25 + $0xc60] sm:$0xff]  ;;  %v618_v30 = vld [vmem:[%s9246_s25 + $0xc88] sm:$0xff] }
  0xab   : > { %6568 = vmatpush1.bf16.msra.mxu0 %v8325_v16  ;;  %6896 = vmatpush1.bf16.msra.mxu1 %v8327_v17  ;;  %v8381_v16 = vcombine.low %v561_v3, %v565_v4  ;;  %v8383_v17 = vcombine.low %v562_v5, %v566_v6  ;;  %v617_v4 = vld [vmem:[%s9246_s25 + $0xc80] sm:$0xff]  ;;  %v9512_v6 = vcombine.high %v9436_v49, %v9436_v49 }
  0xac   : > { %6569 = vmatprep.subr.bf16.mxu0 %v8334_v18  ;;  %6897 = vmatprep.subr.bf16.mxu1 %v8336_v19  ;;  %v8390_v18 = vcombine.high %v569_v12, %v573_v13  ;;  %v8392_v19 = vcombine.high %v570_v14, %v574_v15  ;;  %v621_v5 = vld [vmem:[%s9246_s25 + $0xca0] sm:$0xff] }
  0xaf   : > { %6570 = vmatpush1.bf16.msra.mxu0 %v8333_v25  ;;  %6898 = vmatpush1.bf16.msra.mxu1 %v8335_v26  ;;  %v8389_v25 = vcombine.low %v569_v12, %v573_v13  ;;  %v8391_v26 = vcombine.low %v570_v14, %v574_v15  ;;  %v625_v13 = vld [vmem:[%s9246_s25 + $0xcc0] sm:$0xff]  ;;  %v626_v15 = vld [vmem:[%s9246_s25 + $0xcc8] sm:$0xff] }
  0xb0   : > { %6571 = vmatprep.subr.bf16.mxu0 %v8342_v27  ;;  %6899 = vmatprep.subr.bf16.mxu1 %v8344_v28  ;;  %v8398_v27 = vcombine.high %v577_v20, %v581_v21  ;;  %v8400_v28 = vcombine.high %v578_v22, %v582_v23  ;;  %v629_v14 = vld [vmem:[%s9246_s25 + $0xce0] sm:$0xff] }
  0xb3   : > { %6572 = vmatpush1.bf16.msra.mxu0 %v8341_v0  ;;  %6900 = vmatpush1.bf16.msra.mxu1 %v8343_v34  ;;  %v8397_v0 = vcombine.low %v577_v20, %v581_v21  ;;  %v8399_v34 = vcombine.low %v578_v22, %v582_v23  ;;  %v633_v21 = vld [vmem:[%s9246_s25 + $0xd00] sm:$0xff]  ;;  %v634_v23 = vld [vmem:[%s9246_s25 + $0xd08] sm:$0xff] }
  0xb4   : > { %6573 = vmatprep.subr.bf16.mxu0 %v8350_v35  ;;  %6901 = vmatprep.subr.bf16.mxu1 %v8352_v36  ;;  %v8406_v35 = vcombine.high %v585_v29, %v589_v60  ;;  %v8408_v36 = vcombine.high %v586_v31, %v590_v32  ;;  %v637_v22 = vld [vmem:[%s9246_s25 + $0xd20] sm:$0xff] }
  0xb7   : > { %6574 = vmatpush1.bf16.msra.mxu0 %v8349_v42  ;;  %6902 = vmatpush1.bf16.msra.mxu1 %v8351_v43  ;;  %v8405_v42 = vcombine.low %v585_v29, %v589_v60  ;;  %v8407_v43 = vcombine.low %v586_v31, %v590_v32  ;;  %v641_v60 = vld [vmem:[%s9246_s25 + $0xd40] sm:$0xff]  ;;  %v642_v32 = vld [vmem:[%s9246_s25 + $0xd48] sm:$0xff] }
  0xb8   : > { %6575 = vmatprep.subr.bf16.mxu0 %v8358_v44  ;;  %6903 = vmatprep.subr.bf16.mxu1 %v8360_v46  ;;  %v8414_v44 = vcombine.high %v593_v37, %v597_v38  ;;  %v8416_v46 = vcombine.high %v594_v40, %v598_v41  ;;  %v645_v31 = vld [vmem:[%s9246_s25 + $0xd60] sm:$0xff] }
  0xbb   : > { %6576 = vmatpush1.bf16.msra.mxu0 %v8357_v52  ;;  %6904 = vmatpush1.bf16.msra.mxu1 %v8359_v53  ;;  %v8413_v52 = vcombine.low %v593_v37, %v597_v38  ;;  %v8415_v53 = vcombine.low %v594_v40, %v598_v41  ;;  %v649_v38 = vld [vmem:[%s9246_s25 + $0xd80] sm:$0xff]  ;;  %v650_v41 = vld [vmem:[%s9246_s25 + $0xd88] sm:$0xff] }
  0xbc   : > { %6577 = vmatprep.subr.bf16.mxu0 %v8366_v55  ;;  %6905 = vmatprep.subr.bf16.mxu1 %v8368_v56  ;;  %v8422_v55 = vcombine.high %v601_v47, %v605_v48  ;;  %v8424_v56 = vcombine.high %v602_v50, %v606_v51  ;;  %v653_v40 = vld [vmem:[%s9246_s25 + $0xda0] sm:$0xff] }
  0xbf   : > { %6578 = vmatpush1.bf16.msra.mxu0 %v8365_v62  ;;  %6906 = vmatpush1.bf16.msra.mxu1 %v8367_v63  ;;  %v614_v62 = vld [vmem:[%s9246_s25 + $0xc68] sm:$0xff]  ;;  %v8421_v63 = vcombine.low %v601_v47, %v605_v48  ;;  %v657_v48 = vld [vmem:[%s9246_s25 + $0xdc0] sm:$0xff] }
  0xc0   : > { %6579 = vmatprep.subr.bf16.mxu0 %v8374_v1  ;;  %6907 = vmatprep.subr.bf16.mxu1 %v8376_v2  ;;  %v8423_v1 = vcombine.low %v602_v50, %v606_v51  ;;  %v8430_v2 = vcombine.high %v609_v57, %v613_v58  ;;  %v8432_v3 = vcombine.high %v610_v61, %v614_v62  ;;  %v661_v50 = vld [vmem:[%s9246_s25 + $0xde0] sm:$0xff]  ;;  %v658_v51 = vld [vmem:[%s9246_s25 + $0xdc8] sm:$0xff] }
  0xc3   : > { %6580 = vmatpush1.bf16.msra.mxu0 %v8373_v7  ;;  %6908 = vmatpush1.bf16.msra.mxu1 %v8375_v8  ;;  %v622_v7 = vld [vmem:[%s9246_s25 + $0xca8] sm:$0xff]  ;;  %v8429_v8 = vcombine.low %v609_v57, %v613_v58  ;;  %v665_v58 = vld [vmem:[%s9246_s25 + $0xe00] sm:$0xff] }
  0xc4   : > { %6581 = vmatprep.subr.bf16.mxu0 %v8382_v9  ;;  %6909 = vmatprep.subr.bf16.mxu1 %v8384_v11  ;;  %v8431_v9 = vcombine.low %v610_v61, %v614_v62  ;;  %v8438_v11 = vcombine.high %v617_v4, %v621_v5  ;;  %v8440_v12 = vcombine.high %v618_v30, %v622_v7  ;;  %v669_v61 = vld [vmem:[%s9246_s25 + $0xe20] sm:$0xff]  ;;  %v666_v62 = vld [vmem:[%s9246_s25 + $0xe08] sm:$0xff] }
  0xc7   : > { %6582 = vmatpush1.bf16.msra.mxu0 %v8381_v16  ;;  %6910 = vmatpush1.bf16.msra.mxu1 %v8383_v17  ;;  %v630_v16 = vld [vmem:[%s9246_s25 + $0xce8] sm:$0xff]  ;;  %v8437_v17 = vcombine.low %v617_v4, %v621_v5  ;;  %v673_v5 = vld [vmem:[%s9246_s25 + $0xe40] sm:$0xff] }
  0xc8   : > { %6583 = vmatprep.subr.bf16.mxu0 %v8390_v18  ;;  %6911 = vmatprep.subr.bf16.mxu1 %v8392_v19  ;;  %v8439_v18 = vcombine.low %v618_v30, %v622_v7  ;;  %v8446_v19 = vcombine.high %v625_v13, %v629_v14  ;;  %v8448_v20 = vcombine.high %v626_v15, %v630_v16  ;;  %v677_v30 = vld [vmem:[%s9246_s25 + $0xe60] sm:$0xff]  ;;  %v674_v7 = vld [vmem:[%s9246_s25 + $0xe48] sm:$0xff] }
  0xcb   : > { %6584 = vmatpush1.bf16.msra.mxu0 %v8389_v25  ;;  %6912 = vmatpush1.bf16.msra.mxu1 %v8391_v26  ;;  %v638_v25 = vld [vmem:[%s9246_s25 + $0xd28] sm:$0xff]  ;;  %v8445_v26 = vcombine.low %v625_v13, %v629_v14  ;;  %v681_v14 = vld [vmem:[%s9246_s25 + $0xe80] sm:$0xff] }
  0xcc   : > { %6585 = vmatprep.subr.bf16.mxu0 %v8398_v27  ;;  %6913 = vmatprep.subr.bf16.mxu1 %v8400_v28  ;;  %v8447_v27 = vcombine.low %v626_v15, %v630_v16  ;;  %v8454_v28 = vcombine.high %v633_v21, %v637_v22  ;;  %v8456_v29 = vcombine.high %v634_v23, %v638_v25  ;;  %v685_v15 = vld [vmem:[%s9246_s25 + $0xea0] sm:$0xff]  ;;  %v682_v16 = vld [vmem:[%s9246_s25 + $0xe88] sm:$0xff] }
  0xcf   : > { %6586 = vmatpush1.bf16.msra.mxu0 %v8397_v0  ;;  %6914 = vmatpush1.bf16.msra.mxu1 %v8399_v34  ;;  %v646_v0 = vld [vmem:[%s9246_s25 + $0xd68] sm:$0xff]  ;;  %v8453_v34 = vcombine.low %v633_v21, %v637_v22  ;;  %v689_v22 = vld [vmem:[%s9246_s25 + $0xec0] sm:$0xff] }
  0xd0   : > { %6587 = vmatprep.subr.bf16.mxu0 %v8406_v35  ;;  %6915 = vmatprep.subr.bf16.mxu1 %v8408_v36  ;;  %v8455_v35 = vcombine.low %v634_v23, %v638_v25  ;;  %v8462_v36 = vcombine.high %v641_v60, %v645_v31  ;;  %v8464_v37 = vcombine.high %v642_v32, %v646_v0  ;;  %v693_v23 = vld [vmem:[%s9246_s25 + $0xee0] sm:$0xff]  ;;  %v690_v25 = vld [vmem:[%s9246_s25 + $0xec8] sm:$0xff] }
  0xd3   : > { %6588 = vmatpush1.bf16.msra.mxu0 %v8405_v42  ;;  %6916 = vmatpush1.bf16.msra.mxu1 %v8407_v43  ;;  %v654_v42 = vld [vmem:[%s9246_s25 + $0xda8] sm:$0xff]  ;;  %v8461_v43 = vcombine.low %v641_v60, %v645_v31  ;;  %v697_v31 = vld [vmem:[%s9246_s25 + $0xf00] sm:$0xff] }
  0xd4   : > { %6589 = vmatprep.subr.bf16.mxu0 %v8414_v44  ;;  %6917 = vmatprep.subr.bf16.mxu1 %v8416_v46  ;;  %v8463_v44 = vcombine.low %v642_v32, %v646_v0  ;;  %v8470_v46 = vcombine.high %v649_v38, %v653_v40  ;;  %v8472_v47 = vcombine.high %v650_v41, %v654_v42  ;;  %v701_v32 = vld [vmem:[%s9246_s25 + $0xf20] sm:$0xff]  ;;  %v698_v0 = vld [vmem:[%s9246_s25 + $0xf08] sm:$0xff] }
  0xd7   : > { %6590 = vmatpush1.bf16.msra.mxu0 %v8413_v52  ;;  %6918 = vmatpush1.bf16.msra.mxu1 %v8415_v53  ;;  %v662_v52 = vld [vmem:[%s9246_s25 + $0xde8] sm:$0xff]  ;;  %v8469_v53 = vcombine.low %v649_v38, %v653_v40  ;;  %v705_v40 = vld [vmem:[%s9246_s25 + $0xf40] sm:$0xff] }
  0xd8   : > { %6600 = vmatprep.subr.bf16.mxu0 %v8422_v55  ;;  %6928 = vmatprep.subr.bf16.mxu1 %v8424_v56  ;;  %v8471_v55 = vcombine.low %v650_v41, %v654_v42  ;;  %v8478_v56 = vcombine.high %v657_v48, %v661_v50  ;;  %v8480_v57 = vcombine.high %v658_v51, %v662_v52  ;;  %v709_v41 = vld [vmem:[%s9246_s25 + $0xf60] sm:$0xff]  ;;  %v706_v42 = vld [vmem:[%s9246_s25 + $0xf48] sm:$0xff] }
  0xda   : > { %6592 = vmatmul.mubr.bf16.vlgmr.msra.gmra.mrb[0].mxu0 %v9504_v59  ;;  %6920 = vmatmul.mubr.bf16.vlgmr.msra.gmra.mrb[0].mxu1 %v9504_v59 }
  0xdb   : > { %6601 = vmatpush1.bf16.msra.mxu0 %v8421_v63  ;;  %6929 = vmatpush1.bf16.msra.mxu1 %v8423_v1  ;;  %v670_v63 = vld [vmem:[%s9246_s25 + $0xe28] sm:$0xff]  ;;  %v8477_v1 = vcombine.low %v657_v48, %v661_v50  ;;  %v713_v50 = vld [vmem:[%s9246_s25 + $0xf80] sm:$0xff] }
  0xdc   : > { %6602 = vmatprep.subr.bf16.mxu0 %v8430_v2  ;;  %6930 = vmatprep.subr.bf16.mxu1 %v8432_v3  ;;  %v8479_v2 = vcombine.low %v658_v51, %v662_v52  ;;  %v8486_v3 = vcombine.high %v665_v58, %v669_v61  ;;  %v8488_v4 = vcombine.high %v666_v62, %v670_v63  ;;  %v717_v51 = vld [vmem:[%s9246_s25 + $0xfa0] sm:$0xff]  ;;  %v714_v52 = vld [vmem:[%s9246_s25 + $0xf88] sm:$0xff] }
  0xdd   : > { %6632 = vmatprep.mubr.bf16.mxu0 %v9512_v6  ;;  %6960 = vmatprep.mubr.bf16.mxu1 %v9512_v6 }
  0xdf   : > { %6603 = vmatpush1.bf16.msra.mxu0 %v8429_v8  ;;  %6931 = vmatpush1.bf16.msra.mxu1 %v8431_v9  ;;  %v678_v8 = vld [vmem:[%s9246_s25 + $0xe68] sm:$0xff]  ;;  %v8485_v9 = vcombine.low %v665_v58, %v669_v61  ;;  %v721_v61 = vld [vmem:[%s9246_s25 + $0xfc0] sm:$0xff] }
  0xe0   : > { %6604 = vmatprep.subr.bf16.mxu0 %v8438_v11  ;;  %6932 = vmatprep.subr.bf16.mxu1 %v8440_v12  ;;  %v8487_v11 = vcombine.low %v666_v62, %v670_v63  ;;  %v8494_v12 = vcombine.high %v673_v5, %v677_v30  ;;  %v8496_v13 = vcombine.high %v674_v7, %v678_v8  ;;  %v725_v62 = vld [vmem:[%s9246_s25 + $0xfe0] sm:$0xff]  ;;  %v722_v63 = vld [vmem:[%s9246_s25 + $0xfc8] sm:$0xff] }
  0xe3   : > { %6605 = vmatpush1.bf16.msra.mxu0 %v8437_v17  ;;  %6933 = vmatpush1.bf16.msra.mxu1 %v8439_v18  ;;  %v686_v17 = vld [vmem:[%s9246_s25 + $0xea8] sm:$0xff]  ;;  %v8493_v18 = vcombine.low %v673_v5, %v677_v30  ;;  %v8542_v5 = vcombine.high %v721_v61, %v725_v62 }
  0xe4   : > { %6606 = vmatprep.subr.bf16.mxu0 %v8446_v19  ;;  %6934 = vmatprep.subr.bf16.mxu1 %v8448_v20  ;;  %v8495_v19 = vcombine.low %v674_v7, %v678_v8  ;;  %v8502_v20 = vcombine.high %v681_v14, %v685_v15  ;;  %v8504_v21 = vcombine.high %v682_v16, %v686_v17  ;;  %v729_v7 = vld [vmem:[%s9246_s25 + $0x1000] sm:$0xff] }
  0xe5   : > { %v733_v8 = vld [vmem:[%s9246_s25 + $0x1020] sm:$0xff] }
  0xe7   : > { %6607 = vmatpush1.bf16.msra.mxu0 %v8445_v26  ;;  %6935 = vmatpush1.bf16.msra.mxu1 %v8447_v27  ;;  %v694_v26 = vld [vmem:[%s9246_s25 + $0xee8] sm:$0xff]  ;;  %v8501_v27 = vcombine.low %v681_v14, %v685_v15  ;;  %v8550_v15 = vcombine.high %v729_v7, %v733_v8 }
  0xe8   : > { %6608 = vmatprep.subr.bf16.mxu0 %v8454_v28  ;;  %6936 = vmatprep.subr.bf16.mxu1 %v8456_v29  ;;  %v8503_v28 = vcombine.low %v682_v16, %v686_v17  ;;  %v8510_v29 = vcombine.high %v689_v22, %v693_v23  ;;  %v8512_v60 = vcombine.high %v690_v25, %v694_v26  ;;  %v737_v17 = vld [vmem:[%s9246_s25 + $0x1040] sm:$0xff] }
  0xeb   : > { %6609 = vmatpush1.bf16.msra.mxu0 %v8453_v34  ;;  %6937 = vmatpush1.bf16.msra.mxu1 %v8455_v35  ;;  %v702_v34 = vld [vmem:[%s9246_s25 + $0xf28] sm:$0xff]  ;;  %v8509_v35 = vcombine.low %v689_v22, %v693_v23  ;;  %v8549_v23 = vcombine.low %v729_v7, %v733_v8 }
  0xec   : > { %6610 = vmatprep.subr.bf16.mxu0 %v8462_v36  ;;  %6938 = vmatprep.subr.bf16.mxu1 %v8464_v37  ;;  %v8511_v36 = vcombine.low %v690_v25, %v694_v26  ;;  %v8518_v37 = vcombine.high %v697_v31, %v701_v32  ;;  %v8520_v38 = vcombine.high %v698_v0, %v702_v34  ;;  %v742_v22 = vld [vmem:[%s9246_s25 + $0x1068] sm:$0xff] }
  0xed   : > { %v778_v7 = vld [vmem:[%s9246_s25 + $0x1188] sm:$0xff] }
  0xee   : > { %v782_v8 = vld [vmem:[%s9246_s25 + $0x11a8] sm:$0xff] }
  0xef   : > { %6611 = vmatpush1.bf16.msra.mxu0 %v8461_v43  ;;  %6939 = vmatpush1.bf16.msra.mxu1 %v8463_v44  ;;  %v710_v43 = vld [vmem:[%s9246_s25 + $0xf68] sm:$0xff]  ;;  %v8517_v44 = vcombine.low %v697_v31, %v701_v32 }
  0xf0   : > { %6612 = vmatprep.subr.bf16.mxu0 %v8470_v46  ;;  %6940 = vmatprep.subr.bf16.mxu1 %v8472_v47  ;;  %v8519_v46 = vcombine.low %v698_v0, %v702_v34  ;;  %v8526_v47 = vcombine.high %v705_v40, %v709_v41  ;;  %v8528_v48 = vcombine.high %v706_v42, %v710_v43  ;;  %v746_v31 = vld [vmem:[%s9246_s25 + $0x1088] sm:$0xff] }
  0xf1   : > { %v750_v32 = vld [vmem:[%s9246_s25 + $0x10a8] sm:$0xff] }
  0xf3   : > { %6613 = vmatpush1.bf16.msra.mxu0 %v8469_v53  ;;  %6941 = vmatpush1.bf16.msra.mxu1 %v8471_v55  ;;  %v718_v53 = vld [vmem:[%s9246_s25 + $0xfa8] sm:$0xff]  ;;  %v8525_v55 = vcombine.low %v705_v40, %v709_v41 }
  0xf4   : > { %6614 = vmatprep.subr.bf16.mxu0 %v8478_v56  ;;  %6942 = vmatprep.subr.bf16.mxu1 %v8480_v57  ;;  %v8527_v56 = vcombine.low %v706_v42, %v710_v43  ;;  %v8534_v57 = vcombine.high %v713_v50, %v717_v51  ;;  %v8536_v58 = vcombine.high %v714_v52, %v718_v53  ;;  %v754_v40 = vld [vmem:[%s9246_s25 + $0x10c8] sm:$0xff] }
  0xf5   : > { %v758_v41 = vld [vmem:[%s9246_s25 + $0x10e8] sm:$0xff]  ;;  %v8567_v43 = vcombine.low %v746_v31, %v750_v32 }
  0xf7   : > { %6615 = vmatpush1.bf16.msra.mxu0 %v8477_v1  ;;  %6943 = vmatpush1.bf16.msra.mxu1 %v8479_v2  ;;  %v726_v1 = vld [vmem:[%s9246_s25 + $0xfe8] sm:$0xff] }
  0xf8   : > { %6616 = vmatprep.subr.bf16.mxu0 %v8486_v3  ;;  %6944 = vmatprep.subr.bf16.mxu1 %v8488_v4  ;;  %v9573_v2 = vld [vmem:[%s9241_s21 + $0x8] sm:$0xff]  ;;  %v8533_v3 = vcombine.low %v713_v50, %v717_v51  ;;  %v8535_v4 = vcombine.low %v714_v52, %v718_v53  ;;  %v8544_v30 = vcombine.high %v722_v63, %v726_v1 }
  0xf9   : > { %v8543_v14 = vcombine.low %v722_v63, %v726_v1  ;;  %v762_v50 = vld [vmem:[%s9246_s25 + $0x1108] sm:$0xff]  ;;  %v8575_v53 = vcombine.low %v754_v40, %v758_v41 }
  0xfa   : > { %v766_v51 = vld [vmem:[%s9246_s25 + $0x1128] sm:$0xff] }
  0xfb   : > { %6617 = vmatpush1.bf16.msra.mxu0 %v8485_v9  ;;  %6945 = vmatpush1.bf16.msra.mxu1 %v8487_v11  ;;  %v9579_v9 = vrot.slane %v9573_v2, %v9284_v54  ;;  %v730_v11 = vld [vmem:[%s9246_s25 + $0x1008] sm:$0xff]  ;;  %v8583_v1 = vcombine.low %v762_v50, %v766_v51 }
  0xfc   : > { %6618 = vmatprep.subr.bf16.mxu0 %v8494_v12  ;;  %6946 = vmatprep.subr.bf16.mxu1 %v8496_v13  ;;  %v734_v12 = vld [vmem:[%s9246_s25 + $0x1028] sm:$0xff]  ;;  %v8541_v13 = vcombine.low %v721_v61, %v725_v62 }
  0xfd   : > { %v8552_v16 = vcombine.high %v730_v11, %v734_v12  ;;  %v8551_v25 = vcombine.low %v730_v11, %v734_v12  ;;  %v770_v61 = vld [vmem:[%s9246_s25 + $0x1148] sm:$0xff] }
  0xfe   : > { %v774_v62 = vld [vmem:[%s9246_s25 + $0x1168] sm:$0xff] }
  0xff   : > { %6619 = vmatpush1.bf16.msra.mxu0 %v8493_v18  ;;  %6947 = vmatpush1.bf16.msra.mxu1 %v8495_v19  ;;  %v741_v18 = vld [vmem:[%s9246_s25 + $0x1060] sm:$0xff]  ;;  %v1307_v19 = vcombine.high %v9579_v9, %v9579_v9  ;;  %v8591_v12 = vcombine.low %v770_v61, %v774_v62 }
 0x100   : > { %6620 = vmatprep.subr.bf16.mxu0 %v8502_v20  ;;  %6948 = vmatprep.subr.bf16.mxu1 %v8504_v21  ;;  %v9589_v20 = vcombine.high %v9504_v59, %v9504_v59  ;;  %v738_v21 = vld [vmem:[%s9246_s25 + $0x1048] sm:$0xff]  ;;  %v8558_v26 = vcombine.high %v737_v17, %v741_v18  ;;  %v8557_v0 = vcombine.low %v737_v17, %v741_v18 }
 0x101   : > { %v8559_v34 = vcombine.low %v738_v21, %v742_v22  ;;  %v786_v17 = vld [vmem:[%s9246_s25 + $0x11c8] sm:$0xff] }
 0x102   : > { %v790_v18 = vld [vmem:[%s9246_s25 + $0x11e8] sm:$0xff] }
 0x103   : > { %6621 = vmatpush1.bf16.msra.mxu0 %v8501_v27  ;;  %6949 = vmatpush1.bf16.msra.mxu1 %v8503_v28  ;;  %v8560_v27 = vcombine.high %v738_v21, %v742_v22  ;;  %v745_v28 = vld [vmem:[%s9246_s25 + $0x1080] sm:$0xff]  ;;  %v8599_v21 = vcombine.low %v778_v7, %v782_v8 }
 0x104   : > { %6622 = vmatprep.subr.bf16.mxu0 %v8510_v29  ;;  %6950 = vmatprep.subr.bf16.mxu1 %v8512_v60  ;;  %v749_v29 = vld [vmem:[%s9246_s25 + $0x10a0] sm:$0xff]  ;;  %v9596_v60 = vrot.slane %v1307_v19, %v9284_v54 }
 0x105   : > { %v8565_v42 = vcombine.low %v745_v28, %v749_v29 }
 0x107   : > { %6623 = vmatpush1.bf16.msra.mxu0 %v8509_v35  ;;  %6951 = vmatpush1.bf16.msra.mxu1 %v8511_v36  ;;  %v8566_v35 = vcombine.high %v745_v28, %v749_v29  ;;  %v8568_v36 = vcombine.high %v746_v31, %v750_v32  ;;  %v798_v28 = vld [vmem:[%s9246_s25 + $0x1228] sm:$0xff]  ;;  %v8607_v31 = vcombine.low %v786_v17, %v790_v18 }
 0x108   : > { %6624 = vmatprep.subr.bf16.mxu0 %v8518_v37  ;;  %6952 = vmatprep.subr.bf16.mxu1 %v8520_v38  ;;  %v753_v37 = vld [vmem:[%s9246_s25 + $0x10c0] sm:$0xff] }
 0x109   : > { %v757_v38 = vld [vmem:[%s9246_s25 + $0x10e0] sm:$0xff] }
 0x10a   : > { %v8573_v52 = vcombine.low %v753_v37, %v757_v38 }
 0x10b   : > { %6625 = vmatpush1.bf16.msra.mxu0 %v8517_v44  ;;  %6953 = vmatpush1.bf16.msra.mxu1 %v8519_v46  ;;  %v8574_v44 = vcombine.high %v753_v37, %v757_v38  ;;  %v8576_v46 = vcombine.high %v754_v40, %v758_v41  ;;  %v806_v37 = vld [vmem:[%s9246_s25 + $0x1268] sm:$0xff] }
 0x10c   : > { %6626 = vmatprep.subr.bf16.mxu0 %v8526_v47  ;;  %6954 = vmatprep.subr.bf16.mxu1 %v8528_v48  ;;  %v761_v47 = vld [vmem:[%s9246_s25 + $0x1100] sm:$0xff] }
 0x10d   : > { %v765_v48 = vld [vmem:[%s9246_s25 + $0x1120] sm:$0xff] }
 0x10e   : > { %v8581_v63 = vcombine.low %v761_v47, %v765_v48 }
 0x10f   : > { %6627 = vmatpush1.bf16.msra.mxu0 %v8525_v55  ;;  %6955 = vmatpush1.bf16.msra.mxu1 %v8527_v56  ;;  %v8582_v55 = vcombine.high %v761_v47, %v765_v48  ;;  %v8584_v56 = vcombine.high %v762_v50, %v766_v51  ;;  %v814_v47 = vld [vmem:[%s9246_s25 + $0x12a8] sm:$0xff] }
 0x110   : > { %6628 = vmatprep.subr.bf16.mxu0 %v8534_v57  ;;  %6956 = vmatprep.subr.bf16.mxu1 %v8536_v58  ;;  %v769_v57 = vld [vmem:[%s9246_s25 + $0x1140] sm:$0xff] }
 0x111   : > { %v773_v58 = vld [vmem:[%s9246_s25 + $0x1160] sm:$0xff] }
 0x112   : > { %v8589_v11 = vcombine.low %v769_v57, %v773_v58 }
 0x113   : > { %6629 = vmatpush1.bf16.msra.mxu0 %v8533_v3  ;;  %6957 = vmatpush1.bf16.msra.mxu1 %v8535_v4  ;;  %v8590_v3 = vcombine.high %v769_v57, %v773_v58  ;;  %v8592_v4 = vcombine.high %v770_v61, %v774_v62  ;;  %v822_v57 = vld [vmem:[%s9246_s25 + $0x12e8] sm:$0xff] }
 0x114   : > { %6630 = vmatprep.subr.bf16.mxu0 %v8542_v5  ;;  %6958 = vmatprep.subr.bf16.mxu1 %v8544_v30  ;;  %v777_v5 = vld [vmem:[%s9246_s25 + $0x1180] sm:$0xff] }
 0x115   : > { %v781_v30 = vld [vmem:[%s9246_s25 + $0x11a0] sm:$0xff] }
 0x116   : > { %v8597_v19 = vcombine.low %v777_v5, %v781_v30 }
 0x117   : > { %6631 = vmatpush1.bf16.msra.mxu0 %v8541_v13  ;;  %6959 = vmatpush1.bf16.msra.mxu1 %v8543_v14  ;;  %v8598_v13 = vcombine.high %v777_v5, %v781_v30  ;;  %v8600_v14 = vcombine.high %v778_v7, %v782_v8  ;;  %v830_v5 = vld [vmem:[%s9246_s25 + $0x1328] sm:$0xff] }
 0x118   : > { %6641 = vmatprep.subr.bf16.mxu0 %v8550_v15  ;;  %6969 = vmatprep.subr.bf16.mxu1 %v8552_v16  ;;  %v785_v15 = vld [vmem:[%s9246_s25 + $0x11c0] sm:$0xff] }
 0x119   : > { %v789_v16 = vld [vmem:[%s9246_s25 + $0x11e0] sm:$0xff] }
 0x11a   : > { %6633 = vmatmul.mubr.bf16.vlgmr.msra.gmra.mrb[0].mxu0 %v9589_v20  ;;  %6961 = vmatmul.mubr.bf16.vlgmr.msra.gmra.mrb[0].mxu1 %v9589_v20  ;;  %v8606_v22 = vcombine.high %v785_v15, %v789_v16  ;;  %v8605_v29 = vcombine.low %v785_v15, %v789_v16  ;;  %v838_v15 = vld [vmem:[%s9246_s25 + $0x1368] sm:$0xff] }
 0x11b   : > { %6642 = vmatpush1.bf16.msra.mxu0 %v8549_v23  ;;  %6970 = vmatpush1.bf16.msra.mxu1 %v8551_v25  ;;  %v8608_v23 = vcombine.high %v786_v17, %v790_v18  ;;  %v793_v25 = vld [vmem:[%s9246_s25 + $0x1200] sm:$0xff] }
 0x11c   : > { %6643 = vmatprep.subr.bf16.mxu0 %v8558_v26  ;;  %6971 = vmatprep.subr.bf16.mxu1 %v8560_v27  ;;  %v797_v26 = vld [vmem:[%s9246_s25 + $0x1220] sm:$0xff]  ;;  %v794_v27 = vld [vmem:[%s9246_s25 + $0x1208] sm:$0xff] }
 0x11d   : > { %6673 = vmatprep.mubr.bf16.mxu0 %v9596_v60  ;;  %7001 = vmatprep.mubr.bf16.mxu1 %v9596_v60  ;;  %v8614_v32 = vcombine.high %v793_v25, %v797_v26  ;;  %v8613_v38 = vcombine.low %v793_v25, %v797_v26  ;;  %v8615_v40 = vcombine.low %v794_v27, %v798_v28  ;;  %v846_v25 = vld [vmem:[%s9246_s25 + $0x13a8] sm:$0xff] }
 0x11f   : > { %6644 = vmatpush1.bf16.msra.mxu0 %v8557_v0  ;;  %6972 = vmatpush1.bf16.msra.mxu1 %v8559_v34  ;;  %v8616_v0 = vcombine.high %v794_v27, %v798_v28  ;;  %v801_v34 = vld [vmem:[%s9246_s25 + $0x1240] sm:$0xff] }
 0x120   : > { %6645 = vmatprep.subr.bf16.mxu0 %v8566_v35  ;;  %6973 = vmatprep.subr.bf16.mxu1 %v8568_v36  ;;  %v805_v35 = vld [vmem:[%s9246_s25 + $0x1260] sm:$0xff]  ;;  %v802_v36 = vld [vmem:[%s9246_s25 + $0x1248] sm:$0xff] }
 0x121   : > { %v8622_v41 = vcombine.high %v801_v34, %v805_v35  ;;  %v8621_v48 = vcombine.low %v801_v34, %v805_v35  ;;  %v8623_v50 = vcombine.low %v802_v36, %v806_v37  ;;  %v854_v34 = vld [vmem:[%s9246_s25 + $0x13e8] sm:$0xff] }
 0x123   : > { %6646 = vmatpush1.bf16.msra.mxu0 %v8565_v42  ;;  %6974 = vmatpush1.bf16.msra.mxu1 %v8567_v43  ;;  %v8624_v42 = vcombine.high %v802_v36, %v806_v37  ;;  %v809_v43 = vld [vmem:[%s9246_s25 + $0x1280] sm:$0xff] }
 0x124   : > { %6647 = vmatprep.subr.bf16.mxu0 %v8574_v44  ;;  %6975 = vmatprep.subr.bf16.mxu1 %v8576_v46  ;;  %v813_v44 = vld [vmem:[%s9246_s25 + $0x12a0] sm:$0xff]  ;;  %v810_v46 = vld [vmem:[%s9246_s25 + $0x1288] sm:$0xff] }
 0x125   : > { %v8630_v51 = vcombine.high %v809_v43, %v813_v44  ;;  %v8629_v58 = vcombine.low %v809_v43, %v813_v44  ;;  %v8631_v61 = vcombine.low %v810_v46, %v814_v47  ;;  %v862_v43 = vld [vmem:[%s9246_s25 + $0x1428] sm:$0xff] }
 0x127   : > { %6648 = vmatpush1.bf16.msra.mxu0 %v8573_v52  ;;  %6976 = vmatpush1.bf16.msra.mxu1 %v8575_v53  ;;  %v8632_v52 = vcombine.high %v810_v46, %v814_v47  ;;  %v817_v53 = vld [vmem:[%s9246_s25 + $0x12c0] sm:$0xff] }
 0x128   : > { %6649 = vmatprep.subr.bf16.mxu0 %v8582_v55  ;;  %6977 = vmatprep.subr.bf16.mxu1 %v8584_v56  ;;  %v821_v55 = vld [vmem:[%s9246_s25 + $0x12e0] sm:$0xff]  ;;  %v818_v56 = vld [vmem:[%s9246_s25 + $0x12c8] sm:$0xff] }
 0x129   : > { %v8638_v62 = vcombine.high %v817_v53, %v821_v55  ;;  %v8637_v30 = vcombine.low %v817_v53, %v821_v55  ;;  %v8639_v7 = vcombine.low %v818_v56, %v822_v57  ;;  %v866_v53 = vld [vmem:[%s9246_s25 + $0x1448] sm:$0xff] }
 0x12a   : > { %v870_v55 = vld [vmem:[%s9246_s25 + $0x1468] sm:$0xff] }
 0x12b   : > { %6650 = vmatpush1.bf16.msra.mxu0 %v8581_v63  ;;  %6978 = vmatpush1.bf16.msra.mxu1 %v8583_v1  ;;  %v8640_v63 = vcombine.high %v818_v56, %v822_v57  ;;  %v825_v1 = vld [vmem:[%s9246_s25 + $0x1300] sm:$0xff] }
 0x12c   : > { %6651 = vmatprep.subr.bf16.mxu0 %v8590_v3  ;;  %6979 = vmatprep.subr.bf16.mxu1 %v8592_v4  ;;  %v829_v3 = vld [vmem:[%s9246_s25 + $0x1320] sm:$0xff]  ;;  %v826_v4 = vld [vmem:[%s9246_s25 + $0x1308] sm:$0xff] }
 0x12d   : > { %v8646_v8 = vcombine.high %v825_v1, %v829_v3  ;;  %v8645_v16 = vcombine.low %v825_v1, %v829_v3  ;;  %v8647_v17 = vcombine.low %v826_v4, %v830_v5  ;;  %v9672_v1 = vcombine.high %v9596_v60, %v9596_v60  ;;  %v878_v3 = vld [vmem:[%s9246_s25 + $0x14a8] sm:$0xff] }
 0x12f   : > { %6652 = vmatpush1.bf16.msra.mxu0 %v8589_v11  ;;  %6980 = vmatpush1.bf16.msra.mxu1 %v8591_v12  ;;  %v8648_v11 = vcombine.high %v826_v4, %v830_v5  ;;  %v833_v12 = vld [vmem:[%s9246_s25 + $0x1340] sm:$0xff]  ;;  %v8687_v5 = vcombine.low %v866_v53, %v870_v55 }
 0x130   : > { %6653 = vmatprep.subr.bf16.mxu0 %v8598_v13  ;;  %6981 = vmatprep.subr.bf16.mxu1 %v8600_v14  ;;  %v837_v13 = vld [vmem:[%s9246_s25 + $0x1360] sm:$0xff]  ;;  %v834_v14 = vld [vmem:[%s9246_s25 + $0x1348] sm:$0xff] }
 0x131   : > { %v8654_v18 = vcombine.high %v833_v12, %v837_v13  ;;  %v8653_v26 = vcombine.low %v833_v12, %v837_v13  ;;  %v8655_v27 = vcombine.low %v834_v14, %v838_v15  ;;  %v882_v12 = vld [vmem:[%s9246_s25 + $0x14c8] sm:$0xff] }
 0x132   : > { %v886_v13 = vld [vmem:[%s9246_s25 + $0x14e8] sm:$0xff] }
 0x133   : > { %6654 = vmatpush1.bf16.msra.mxu0 %v8597_v19  ;;  %6982 = vmatpush1.bf16.msra.mxu1 %v8599_v21  ;;  %v8656_v19 = vcombine.high %v834_v14, %v838_v15  ;;  %v841_v21 = vld [vmem:[%s9246_s25 + $0x1380] sm:$0xff] }
 0x134   : > { %6655 = vmatprep.subr.bf16.mxu0 %v8606_v22  ;;  %6983 = vmatprep.subr.bf16.mxu1 %v8608_v23  ;;  %v845_v22 = vld [vmem:[%s9246_s25 + $0x13a0] sm:$0xff]  ;;  %v842_v23 = vld [vmem:[%s9246_s25 + $0x1388] sm:$0xff] }
 0x135   : > { %v8662_v28 = vcombine.high %v841_v21, %v845_v22  ;;  %v8661_v35 = vcombine.low %v841_v21, %v845_v22  ;;  %v8663_v36 = vcombine.low %v842_v23, %v846_v25  ;;  %v890_v21 = vld [vmem:[%s9246_s25 + $0x1508] sm:$0xff] }
 0x136   : > { %v894_v22 = vld [vmem:[%s9246_s25 + $0x1528] sm:$0xff] }
 0x137   : > { %6656 = vmatpush1.bf16.msra.mxu0 %v8605_v29  ;;  %6984 = vmatpush1.bf16.msra.mxu1 %v8607_v31  ;;  %v8664_v29 = vcombine.high %v842_v23, %v846_v25  ;;  %v849_v31 = vld [vmem:[%s9246_s25 + $0x13c0] sm:$0xff]  ;;  %v8703_v25 = vcombine.low %v882_v12, %v886_v13 }
 0x138   : > { %6657 = vmatprep.subr.bf16.mxu0 %v8614_v32  ;;  %6985 = vmatprep.subr.bf16.mxu1 %v8616_v0  ;;  %v853_v32 = vld [vmem:[%s9246_s25 + $0x13e0] sm:$0xff]  ;;  %v850_v0 = vld [vmem:[%s9246_s25 + $0x13c8] sm:$0xff] }
 0x139   : > { %v8670_v37 = vcombine.high %v849_v31, %v853_v32  ;;  %v8669_v44 = vcombine.low %v849_v31, %v853_v32  ;;  %v8671_v46 = vcombine.low %v850_v0, %v854_v34  ;;  %v898_v31 = vld [vmem:[%s9246_s25 + $0x1548] sm:$0xff] }
 0x13a   : > { %v902_v32 = vld [vmem:[%s9246_s25 + $0x1568] sm:$0xff] }
 0x13b   : > { %6658 = vmatpush1.bf16.msra.mxu0 %v8613_v38  ;;  %6986 = vmatpush1.bf16.msra.mxu1 %v8615_v40  ;;  %v8672_v38 = vcombine.high %v850_v0, %v854_v34  ;;  %v857_v40 = vld [vmem:[%s9246_s25 + $0x1400] sm:$0xff]  ;;  %v8711_v34 = vcombine.low %v890_v21, %v894_v22 }
 0x13c   : > { %6659 = vmatprep.subr.bf16.mxu0 %v8622_v41  ;;  %6987 = vmatprep.subr.bf16.mxu1 %v8624_v42  ;;  %v861_v41 = vld [vmem:[%s9246_s25 + $0x1420] sm:$0xff]  ;;  %v858_v42 = vld [vmem:[%s9246_s25 + $0x1408] sm:$0xff] }
 0x13d   : > { %v8678_v47 = vcombine.high %v857_v40, %v861_v41  ;;  %v8677_v56 = vcombine.low %v857_v40, %v861_v41  ;;  %v8679_v57 = vcombine.low %v858_v42, %v862_v43  ;;  %v906_v40 = vld [vmem:[%s9246_s25 + $0x1588] sm:$0xff] }
 0x13e   : > { %v910_v41 = vld [vmem:[%s9246_s25 + $0x15a8] sm:$0xff] }
 0x13f   : > { %6660 = vmatpush1.bf16.msra.mxu0 %v8621_v48  ;;  %6988 = vmatpush1.bf16.msra.mxu1 %v8623_v50  ;;  %v8680_v48 = vcombine.high %v858_v42, %v862_v43  ;;  %v865_v50 = vld [vmem:[%s9246_s25 + $0x1440] sm:$0xff]  ;;  %v8719_v43 = vcombine.low %v898_v31, %v902_v32 }
 0x140   : > { %6661 = vmatprep.subr.bf16.mxu0 %v8630_v51  ;;  %6989 = vmatprep.subr.bf16.mxu1 %v8632_v52  ;;  %v869_v51 = vld [vmem:[%s9246_s25 + $0x1460] sm:$0xff]  ;;  %v9664_v52 = vrot.slane %v9579_v9, %v9284_v54  ;;  %v874_v9 = vld [vmem:[%s9246_s25 + $0x1488] sm:$0xff] }
 0x141   : > { %v8685_v4 = vcombine.low %v865_v50, %v869_v51  ;;  %v8695_v15 = vcombine.low %v874_v9, %v878_v3 }
 0x143   : > { %6662 = vmatpush1.bf16.msra.mxu0 %v8629_v58  ;;  %6990 = vmatpush1.bf16.msra.mxu1 %v8631_v61  ;;  %v8686_v58 = vcombine.high %v865_v50, %v869_v51  ;;  %v8688_v61 = vcombine.high %v866_v53, %v870_v55  ;;  %v914_v50 = vld [vmem:[%s9246_s25 + $0x15c8] sm:$0xff]  ;;  %v8727_v55 = vcombine.low %v906_v40, %v910_v41 }
 0x144   : > { %6663 = vmatprep.subr.bf16.mxu0 %v8638_v62  ;;  %6991 = vmatprep.subr.bf16.mxu1 %v8640_v63  ;;  %v873_v62 = vld [vmem:[%s9246_s25 + $0x1480] sm:$0xff]  ;;  %v918_v51 = vld [vmem:[%s9246_s25 + $0x15e8] sm:$0xff] }
 0x145   : > { %v877_v63 = vld [vmem:[%s9246_s25 + $0x14a0] sm:$0xff] }
 0x146   : > { %v8693_v14 = vcombine.low %v873_v62, %v877_v63 }
 0x147   : > { %6664 = vmatpush1.bf16.msra.mxu0 %v8637_v30  ;;  %6992 = vmatpush1.bf16.msra.mxu1 %v8639_v7  ;;  %v8694_v30 = vcombine.high %v873_v62, %v877_v63  ;;  %v8696_v7 = vcombine.high %v874_v9, %v878_v3  ;;  %v922_v62 = vld [vmem:[%s9246_s25 + $0x1608] sm:$0xff]  ;;  %v8735_v3 = vcombine.low %v914_v50, %v918_v51 }
 0x148   : > { %6665 = vmatprep.subr.bf16.mxu0 %v8646_v8  ;;  %6993 = vmatprep.subr.bf16.mxu1 %v8648_v11  ;;  %v881_v8 = vld [vmem:[%s9246_s25 + $0x14c0] sm:$0xff]  ;;  %v926_v63 = vld [vmem:[%s9246_s25 + $0x1628] sm:$0xff] }
 0x149   : > { %v885_v11 = vld [vmem:[%s9246_s25 + $0x14e0] sm:$0xff] }
 0x14a   : > { %v8701_v23 = vcombine.low %v881_v8, %v885_v11 }
 0x14b   : > { %6666 = vmatpush1.bf16.msra.mxu0 %v8645_v16  ;;  %6994 = vmatpush1.bf16.msra.mxu1 %v8647_v17  ;;  %v8702_v16 = vcombine.high %v881_v8, %v885_v11  ;;  %v8704_v17 = vcombine.high %v882_v12, %v886_v13  ;;  %v930_v8 = vld [vmem:[%s9246_s25 + $0x1648] sm:$0xff]  ;;  %v8743_v13 = vcombine.low %v922_v62, %v926_v63 }
 0x14c   : > { %6667 = vmatprep.subr.bf16.mxu0 %v8654_v18  ;;  %6995 = vmatprep.subr.bf16.mxu1 %v8656_v19  ;;  %v889_v18 = vld [vmem:[%s9246_s25 + $0x1500] sm:$0xff]  ;;  %v934_v11 = vld [vmem:[%s9246_s25 + $0x1668] sm:$0xff] }
 0x14d   : > { %v893_v19 = vld [vmem:[%s9246_s25 + $0x1520] sm:$0xff] }
 0x14e   : > { %v8709_v0 = vcombine.low %v889_v18, %v893_v19 }
 0x14f   : > { %6668 = vmatpush1.bf16.msra.mxu0 %v8653_v26  ;;  %6996 = vmatpush1.bf16.msra.mxu1 %v8655_v27  ;;  %v8710_v26 = vcombine.high %v889_v18, %v893_v19  ;;  %v8712_v27 = vcombine.high %v890_v21, %v894_v22  ;;  %v938_v18 = vld [vmem:[%s9246_s25 + $0x1688] sm:$0xff]  ;;  %v8751_v22 = vcombine.low %v930_v8, %v934_v11 }
 0x150   : > { %6669 = vmatprep.subr.bf16.mxu0 %v8662_v28  ;;  %6997 = vmatprep.subr.bf16.mxu1 %v8664_v29  ;;  %v897_v28 = vld [vmem:[%s9246_s25 + $0x1540] sm:$0xff]  ;;  %v942_v19 = vld [vmem:[%s9246_s25 + $0x16a8] sm:$0xff] }
 0x151   : > { %v901_v29 = vld [vmem:[%s9246_s25 + $0x1560] sm:$0xff] }
 0x152   : > { %v8717_v42 = vcombine.low %v897_v28, %v901_v29 }
 0x153   : > { %6670 = vmatpush1.bf16.msra.mxu0 %v8661_v35  ;;  %6998 = vmatpush1.bf16.msra.mxu1 %v8663_v36  ;;  %v8718_v35 = vcombine.high %v897_v28, %v901_v29  ;;  %v8720_v36 = vcombine.high %v898_v31, %v902_v32  ;;  %v946_v28 = vld [vmem:[%s9246_s25 + $0x16c8] sm:$0xff]  ;;  %v8759_v32 = vcombine.low %v938_v18, %v942_v19 }
 0x154   : > { %6671 = vmatprep.subr.bf16.mxu0 %v8670_v37  ;;  %6999 = vmatprep.subr.bf16.mxu1 %v8672_v38  ;;  %v905_v37 = vld [vmem:[%s9246_s25 + $0x1580] sm:$0xff]  ;;  %v950_v29 = vld [vmem:[%s9246_s25 + $0x16e8] sm:$0xff] }
 0x155   : > { %v909_v38 = vld [vmem:[%s9246_s25 + $0x15a0] sm:$0xff] }
 0x156   : > { %v8725_v53 = vcombine.low %v905_v37, %v909_v38 }
 0x157   : > { %6672 = vmatpush1.bf16.msra.mxu0 %v8669_v44  ;;  %7000 = vmatpush1.bf16.msra.mxu1 %v8671_v46  ;;  %v8726_v44 = vcombine.high %v905_v37, %v909_v38  ;;  %v8728_v46 = vcombine.high %v906_v40, %v910_v41  ;;  %v954_v37 = vld [vmem:[%s9246_s25 + $0x1708] sm:$0xff]  ;;  %v8767_v41 = vcombine.low %v946_v28, %v950_v29 }
 0x158   : > { %6682 = vmatprep.subr.bf16.mxu0 %v8678_v47  ;;  %7010 = vmatprep.subr.bf16.mxu1 %v8680_v48  ;;  %v913_v47 = vld [vmem:[%s9246_s25 + $0x15c0] sm:$0xff]  ;;  %v958_v38 = vld [vmem:[%s9246_s25 + $0x1728] sm:$0xff] }
 0x159   : > { %v917_v48 = vld [vmem:[%s9246_s25 + $0x15e0] sm:$0xff] }
 0x15a   : > { %6674 = vmatmul.mubr.bf16.vlgmr.msra.gmra.mrb[0].mxu0 %v9664_v52  ;;  %7002 = vmatmul.mubr.bf16.vlgmr.msra.gmra.mrb[0].mxu1 %v9664_v52  ;;  %v8733_v9 = vcombine.low %v913_v47, %v917_v48 }
 0x15b   : > { %6683 = vmatpush1.bf16.msra.mxu0 %v8677_v56  ;;  %7011 = vmatpush1.bf16.msra.mxu1 %v8679_v57  ;;  %v8734_v56 = vcombine.high %v913_v47, %v917_v48  ;;  %v8736_v57 = vcombine.high %v914_v50, %v918_v51  ;;  %v962_v47 = vld [vmem:[%s9246_s25 + $0x1748] sm:$0xff]  ;;  %v8775_v51 = vcombine.low %v954_v37, %v958_v38 }
 0x15c   : > { %6684 = vmatprep.subr.bf16.mxu0 %v8686_v58  ;;  %7012 = vmatprep.subr.bf16.mxu1 %v8688_v61  ;;  %v921_v58 = vld [vmem:[%s9246_s25 + $0x1600] sm:$0xff]  ;;  %v966_v48 = vld [vmem:[%s9246_s25 + $0x1768] sm:$0xff] }
 0x15d   : > { %6714 = vmatprep.mubr.bf16.mxu0 %v9672_v1  ;;  %7042 = vmatprep.mubr.bf16.mxu1 %v9672_v1  ;;  %v925_v61 = vld [vmem:[%s9246_s25 + $0x1620] sm:$0xff] }
 0x15e   : > { %v8741_v12 = vcombine.low %v921_v58, %v925_v61 }
 0x15f   : > { %6685 = vmatpush1.bf16.msra.mxu0 %v8685_v4  ;;  %7013 = vmatpush1.bf16.msra.mxu1 %v8687_v5  ;;  %v8742_v4 = vcombine.high %v921_v58, %v925_v61  ;;  %v8744_v5 = vcombine.high %v922_v62, %v926_v63  ;;  %v970_v58 = vld [vmem:[%s9246_s25 + $0x1788] sm:$0xff]  ;;  %v8783_v63 = vcombine.low %v962_v47, %v966_v48 }
 0x160   : > { %6686 = vmatprep.subr.bf16.mxu0 %v8694_v30  ;;  %7014 = vmatprep.subr.bf16.mxu1 %v8696_v7  ;;  %v929_v30 = vld [vmem:[%s9246_s25 + $0x1640] sm:$0xff]  ;;  %v974_v61 = vld [vmem:[%s9246_s25 + $0x17a8] sm:$0xff] }
 0x161   : > { %v933_v7 = vld [vmem:[%s9246_s25 + $0x1660] sm:$0xff] }
 0x162   : > { %v8749_v21 = vcombine.low %v929_v30, %v933_v7 }
 0x163   : > { %6687 = vmatpush1.bf16.msra.mxu0 %v8693_v14  ;;  %7015 = vmatpush1.bf16.msra.mxu1 %v8695_v15  ;;  %v8750_v14 = vcombine.high %v929_v30, %v933_v7  ;;  %v8752_v15 = vcombine.high %v930_v8, %v934_v11  ;;  %v1292_v30 = vcombine.high %v9573_v2, %v9573_v2  ;;  %v978_v7 = vld [vmem:[%s9246_s25 + $0x17c8] sm:$0xff] }
 0x164   : > { %6688 = vmatprep.subr.bf16.mxu0 %v8702_v16  ;;  %7016 = vmatprep.subr.bf16.mxu1 %v8704_v17  ;;  %v937_v16 = vld [vmem:[%s9246_s25 + $0x1680] sm:$0xff]  ;;  %v982_v8 = vld [vmem:[%s9246_s25 + $0x17e8] sm:$0xff] }
 0x165   : > { %v941_v17 = vld [vmem:[%s9246_s25 + $0x16a0] sm:$0xff]  ;;  %v986_v2 = vld [vmem:[%s9246_s25 + $0x1808] sm:$0xff] }
 0x166   : > { %v8757_v31 = vcombine.low %v937_v16, %v941_v17 }
 0x167   : > { %6689 = vmatpush1.bf16.msra.mxu0 %v8701_v23  ;;  %7017 = vmatpush1.bf16.msra.mxu1 %v8703_v25  ;;  %v8758_v23 = vcombine.high %v937_v16, %v941_v17  ;;  %v8760_v25 = vcombine.high %v938_v18, %v942_v19  ;;  %v989_v16 = vld [vmem:[%s9246_s25 + $0x1820] sm:$0xff]  ;;  %v9737_v17 = vrot.slane %v1292_v30, %v9284_v54  ;;  %v990_v18 = vld [vmem:[%s9246_s25 + $0x1828] sm:$0xff] }
 0x168   : > { %6690 = vmatprep.subr.bf16.mxu0 %v8710_v26  ;;  %7018 = vmatprep.subr.bf16.mxu1 %v8712_v27  ;;  %v945_v26 = vld [vmem:[%s9246_s25 + $0x16c0] sm:$0xff] }
 0x169   : > { %v949_v27 = vld [vmem:[%s9246_s25 + $0x16e0] sm:$0xff] }
 0x16a   : > { %v8765_v40 = vcombine.low %v945_v26, %v949_v27  ;;  %v1025_v30 = vld [vmem:[%s9246_s25 + $0x1940] sm:$0xff] }
 0x16b   : > { %6691 = vmatpush1.bf16.msra.mxu0 %v8709_v0  ;;  %7019 = vmatpush1.bf16.msra.mxu1 %v8711_v34  ;;  %v8766_v0 = vcombine.high %v945_v26, %v949_v27  ;;  %v8768_v34 = vcombine.high %v946_v28, %v950_v29  ;;  %v997_v26 = vld [vmem:[%s9246_s25 + $0x1860] sm:$0xff]  ;;  %v1308_v27 = vcombine.high %v9737_v17, %v9737_v17  ;;  %v994_v29 = vld [vmem:[%s9246_s25 + $0x1848] sm:$0xff] }
 0x16c   : > { %6692 = vmatprep.subr.bf16.mxu0 %v8718_v35  ;;  %7020 = vmatprep.subr.bf16.mxu1 %v8720_v36  ;;  %v953_v35 = vld [vmem:[%s9246_s25 + $0x1700] sm:$0xff]  ;;  %v9747_v28 = vcombine.high %v9664_v52, %v9664_v52 }
 0x16d   : > { %v957_v36 = vld [vmem:[%s9246_s25 + $0x1720] sm:$0xff] }
 0x16e   : > { %v8773_v50 = vcombine.low %v953_v35, %v957_v36 }
 0x16f   : > { %6693 = vmatpush1.bf16.msra.mxu0 %v8717_v42  ;;  %7021 = vmatpush1.bf16.msra.mxu1 %v8719_v43  ;;  %v8774_v42 = vcombine.high %v953_v35, %v957_v36  ;;  %v8776_v43 = vcombine.high %v954_v37, %v958_v38  ;;  %v1001_v36 = vld [vmem:[%s9246_s25 + $0x1880] sm:$0xff]  ;;  %v9754_v38 = vrot.slane %v1308_v27, %v9284_v54 }
 0x170   : > { %6694 = vmatprep.subr.bf16.mxu0 %v8726_v44  ;;  %7022 = vmatprep.subr.bf16.mxu1 %v8728_v46  ;;  %v961_v44 = vld [vmem:[%s9246_s25 + $0x1740] sm:$0xff] }
 0x171   : > { %v965_v46 = vld [vmem:[%s9246_s25 + $0x1760] sm:$0xff] }
 0x172   : > { %v8781_v62 = vcombine.low %v961_v44, %v965_v46  ;;  %v1005_v37 = vld [vmem:[%s9246_s25 + $0x18a0] sm:$0xff] }
 0x173   : > { %6695 = vmatpush1.bf16.msra.mxu0 %v8725_v53  ;;  %7023 = vmatpush1.bf16.msra.mxu1 %v8727_v55  ;;  %v8782_v53 = vcombine.high %v961_v44, %v965_v46  ;;  %v8784_v55 = vcombine.high %v962_v47, %v966_v48  ;;  %v8822_v44 = vcombine.high %v1001_v36, %v1005_v37  ;;  %v1009_v47 = vld [vmem:[%s9246_s25 + $0x18c0] sm:$0xff] }
 0x174   : > { %6696 = vmatprep.subr.bf16.mxu0 %v8734_v56  ;;  %7024 = vmatprep.subr.bf16.mxu1 %v8736_v57  ;;  %v969_v56 = vld [vmem:[%s9246_s25 + $0x1780] sm:$0xff] }
 0x175   : > { %v973_v57 = vld [vmem:[%s9246_s25 + $0x17a0] sm:$0xff] }
 0x176   : > { %v8789_v11 = vcombine.low %v969_v56, %v973_v57  ;;  %v1013_v48 = vld [vmem:[%s9246_s25 + $0x18e0] sm:$0xff] }
 0x177   : > { %6697 = vmatpush1.bf16.msra.mxu0 %v8733_v9  ;;  %7025 = vmatpush1.bf16.msra.mxu1 %v8735_v3  ;;  %v8790_v9 = vcombine.high %v969_v56, %v973_v57  ;;  %v8792_v3 = vcombine.high %v970_v58, %v974_v61  ;;  %v8830_v56 = vcombine.high %v1009_v47, %v1013_v48  ;;  %v1045_v27 = vld [vmem:[%s9246_s25 + $0x19e0] sm:$0xff] }
 0x178   : > { %6698 = vmatprep.subr.bf16.mxu0 %v8742_v4  ;;  %7026 = vmatprep.subr.bf16.mxu1 %v8744_v5  ;;  %v977_v4 = vld [vmem:[%s9246_s25 + $0x17c0] sm:$0xff] }
 0x179   : > { %v981_v5 = vld [vmem:[%s9246_s25 + $0x17e0] sm:$0xff] }
 0x17a   : > { %v8797_v19 = vcombine.low %v977_v4, %v981_v5 }
 0x17b   : > { %6699 = vmatpush1.bf16.msra.mxu0 %v8741_v12  ;;  %7027 = vmatpush1.bf16.msra.mxu1 %v8743_v13  ;;  %v8791_v12 = vcombine.low %v970_v58, %v974_v61  ;;  %v8798_v13 = vcombine.high %v977_v4, %v981_v5  ;;  %v1017_v58 = vld [vmem:[%s9246_s25 + $0x1900] sm:$0xff] }
 0x17c   : > { %6700 = vmatprep.subr.bf16.mxu0 %v8750_v14  ;;  %7028 = vmatprep.subr.bf16.mxu1 %v8752_v15  ;;  %v8800_v14 = vcombine.high %v978_v7, %v982_v8  ;;  %v985_v15 = vld [vmem:[%s9246_s25 + $0x1800] sm:$0xff] }
 0x17d   : > { %v1021_v61 = vld [vmem:[%s9246_s25 + $0x1920] sm:$0xff] }
 0x17e   : > { %v8838_v4 = vcombine.high %v1017_v58, %v1021_v61 }
 0x17f   : > { %6701 = vmatpush1.bf16.msra.mxu0 %v8749_v21  ;;  %7029 = vmatpush1.bf16.msra.mxu1 %v8751_v22  ;;  %v8799_v21 = vcombine.low %v978_v7, %v982_v8  ;;  %v8806_v22 = vcombine.high %v985_v15, %v989_v16  ;;  %v1029_v7 = vld [vmem:[%s9246_s25 + $0x1960] sm:$0xff]  ;;  %v1026_v8 = vld [vmem:[%s9246_s25 + $0x1948] sm:$0xff] }
 0x180   : > { %6702 = vmatprep.subr.bf16.mxu0 %v8758_v23  ;;  %7030 = vmatprep.subr.bf16.mxu1 %v8760_v25  ;;  %v8808_v23 = vcombine.high %v986_v2, %v990_v18  ;;  %v993_v25 = vld [vmem:[%s9246_s25 + $0x1840] sm:$0xff] }
 0x183   : > { %6703 = vmatpush1.bf16.msra.mxu0 %v8757_v31  ;;  %7031 = vmatpush1.bf16.msra.mxu1 %v8759_v32  ;;  %v998_v31 = vld [vmem:[%s9246_s25 + $0x1868] sm:$0xff]  ;;  %v8805_v32 = vcombine.low %v985_v15, %v989_v16  ;;  %v1033_v16 = vld [vmem:[%s9246_s25 + $0x1980] sm:$0xff] }
 0x184   : > { %6704 = vmatprep.subr.bf16.mxu0 %v8766_v0  ;;  %7032 = vmatprep.subr.bf16.mxu1 %v8768_v34  ;;  %v8807_v0 = vcombine.low %v986_v2, %v990_v18  ;;  %v8814_v34 = vcombine.high %v993_v25, %v997_v26  ;;  %v8816_v35 = vcombine.high %v994_v29, %v998_v31  ;;  %v1037_v2 = vld [vmem:[%s9246_s25 + $0x19a0] sm:$0xff]  ;;  %v1034_v18 = vld [vmem:[%s9246_s25 + $0x1988] sm:$0xff] }
 0x187   : > { %6705 = vmatpush1.bf16.msra.mxu0 %v8765_v40  ;;  %7033 = vmatpush1.bf16.msra.mxu1 %v8767_v41  ;;  %v1002_v40 = vld [vmem:[%s9246_s25 + $0x1888] sm:$0xff] }
 0x188   : > { %6706 = vmatprep.subr.bf16.mxu0 %v8774_v42  ;;  %7034 = vmatprep.subr.bf16.mxu1 %v8776_v43  ;;  %v1006_v41 = vld [vmem:[%s9246_s25 + $0x18a8] sm:$0xff]  ;;  %v8813_v42 = vcombine.low %v993_v25, %v997_v26  ;;  %v8815_v43 = vcombine.low %v994_v29, %v998_v31  ;;  %v1041_v26 = vld [vmem:[%s9246_s25 + $0x19c0] sm:$0xff] }
 0x189   : > { %v8824_v46 = vcombine.high %v1002_v40, %v1006_v41  ;;  %v1042_v29 = vld [vmem:[%s9246_s25 + $0x19c8] sm:$0xff] }
 0x18a   : > { %v1046_v31 = vld [vmem:[%s9246_s25 + $0x19e8] sm:$0xff] }
 0x18b   : > { %6707 = vmatpush1.bf16.msra.mxu0 %v8773_v50  ;;  %7035 = vmatpush1.bf16.msra.mxu1 %v8775_v51  ;;  %v1010_v50 = vld [vmem:[%s9246_s25 + $0x18c8] sm:$0xff] }
 0x18c   : > { %6708 = vmatprep.subr.bf16.mxu0 %v8782_v53  ;;  %7036 = vmatprep.subr.bf16.mxu1 %v8784_v55  ;;  %v1014_v51 = vld [vmem:[%s9246_s25 + $0x18e8] sm:$0xff]  ;;  %v8821_v53 = vcombine.low %v1001_v36, %v1005_v37  ;;  %v8823_v55 = vcombine.low %v1002_v40, %v1006_v41  ;;  %v1049_v36 = vld [vmem:[%s9246_s25 + $0x1a00] sm:$0xff] }
 0x18d   : > { %v8832_v57 = vcombine.high %v1010_v50, %v1014_v51  ;;  %v1053_v37 = vld [vmem:[%s9246_s25 + $0x1a20] sm:$0xff]  ;;  %v1050_v40 = vld [vmem:[%s9246_s25 + $0x1a08] sm:$0xff] }
 0x18e   : > { %v1054_v41 = vld [vmem:[%s9246_s25 + $0x1a28] sm:$0xff] }
 0x18f   : > { %6709 = vmatpush1.bf16.msra.mxu0 %v8781_v62  ;;  %7037 = vmatpush1.bf16.msra.mxu1 %v8783_v63  ;;  %v1018_v62 = vld [vmem:[%s9246_s25 + $0x1908] sm:$0xff] }
 0x190   : > { %6710 = vmatprep.subr.bf16.mxu0 %v8790_v9  ;;  %7038 = vmatprep.subr.bf16.mxu1 %v8792_v3  ;;  %v1022_v63 = vld [vmem:[%s9246_s25 + $0x1928] sm:$0xff]  ;;  %v8829_v9 = vcombine.low %v1009_v47, %v1013_v48  ;;  %v8831_v3 = vcombine.low %v1010_v50, %v1014_v51  ;;  %v1057_v47 = vld [vmem:[%s9246_s25 + $0x1a40] sm:$0xff] }
 0x191   : > { %v8840_v5 = vcombine.high %v1018_v62, %v1022_v63  ;;  %v1061_v48 = vld [vmem:[%s9246_s25 + $0x1a60] sm:$0xff]  ;;  %v1058_v50 = vld [vmem:[%s9246_s25 + $0x1a48] sm:$0xff] }
 0x192   : > { %v1062_v51 = vld [vmem:[%s9246_s25 + $0x1a68] sm:$0xff] }
 0x193   : > { %6711 = vmatpush1.bf16.msra.mxu0 %v8789_v11  ;;  %7039 = vmatpush1.bf16.msra.mxu1 %v8791_v12  ;;  %v1030_v11 = vld [vmem:[%s9246_s25 + $0x1968] sm:$0xff]  ;;  %v8837_v12 = vcombine.low %v1017_v58, %v1021_v61  ;;  %v1065_v58 = vld [vmem:[%s9246_s25 + $0x1a80] sm:$0xff] }
 0x194   : > { %6712 = vmatprep.subr.bf16.mxu0 %v8798_v13  ;;  %7040 = vmatprep.subr.bf16.mxu1 %v8800_v14  ;;  %v8839_v13 = vcombine.low %v1018_v62, %v1022_v63  ;;  %v8846_v14 = vcombine.high %v1025_v30, %v1029_v7  ;;  %v8848_v15 = vcombine.high %v1026_v8, %v1030_v11  ;;  %v1069_v61 = vld [vmem:[%s9246_s25 + $0x1aa0] sm:$0xff]  ;;  %v1066_v62 = vld [vmem:[%s9246_s25 + $0x1a88] sm:$0xff] }
 0x195   : > { %v1070_v63 = vld [vmem:[%s9246_s25 + $0x1aa8] sm:$0xff] }
 0x197   : > { %6713 = vmatpush1.bf16.msra.mxu0 %v8797_v19  ;;  %7041 = vmatpush1.bf16.msra.mxu1 %v8799_v21  ;;  %v1038_v19 = vld [vmem:[%s9246_s25 + $0x19a8] sm:$0xff]  ;;  %v8845_v21 = vcombine.low %v1025_v30, %v1029_v7  ;;  %v1073_v30 = vld [vmem:[%s9246_s25 + $0x1ac0] sm:$0xff] }
 0x198   : > { %6723 = vmatprep.subr.bf16.mxu0 %v8806_v22  ;;  %7051 = vmatprep.subr.bf16.mxu1 %v8808_v23  ;;  %v8847_v22 = vcombine.low %v1026_v8, %v1030_v11  ;;  %v8854_v23 = vcombine.high %v1033_v16, %v1037_v2  ;;  %v8856_v25 = vcombine.high %v1034_v18, %v1038_v19  ;;  %v1077_v7 = vld [vmem:[%s9246_s25 + $0x1ae0] sm:$0xff]  ;;  %v1074_v8 = vld [vmem:[%s9246_s25 + $0x1ac8] sm:$0xff] }
 0x199   : > { %v1078_v11 = vld [vmem:[%s9246_s25 + $0x1ae8] sm:$0xff] }
 0x19a   : > { %6715 = vmatmul.mubr.bf16.vlgmr.msra.gmra.mrb[0].mxu0 %v9747_v28  ;;  %7043 = vmatmul.mubr.bf16.vlgmr.msra.gmra.mrb[0].mxu1 %v9747_v28 }
 0x19b   : > { %6724 = vmatpush1.bf16.msra.mxu0 %v8805_v32  ;;  %7052 = vmatpush1.bf16.msra.mxu1 %v8807_v0  ;;  %v8853_v32 = vcombine.low %v1033_v16, %v1037_v2  ;;  %v8855_v0 = vcombine.low %v1034_v18, %v1038_v19  ;;  %v1081_v16 = vld [vmem:[%s9246_s25 + $0x1b00] sm:$0xff]  ;;  %v1082_v18 = vld [vmem:[%s9246_s25 + $0x1b08] sm:$0xff] }
 0x19c   : > { %6725 = vmatprep.subr.bf16.mxu0 %v8814_v34  ;;  %7053 = vmatprep.subr.bf16.mxu1 %v8816_v35  ;;  %v8862_v34 = vcombine.high %v1041_v26, %v1045_v27  ;;  %v8864_v35 = vcombine.high %v1042_v29, %v1046_v31  ;;  %v1085_v2 = vld [vmem:[%s9246_s25 + $0x1b20] sm:$0xff]  ;;  %v1086_v19 = vld [vmem:[%s9246_s25 + $0x1b28] sm:$0xff] }
 0x19d   : > { %6755 = vmatprep.mubr.bf16.mxu0 %v9754_v38  ;;  %7083 = vmatprep.mubr.bf16.mxu1 %v9754_v38 }
 0x19f   : > { %6726 = vmatpush1.bf16.msra.mxu0 %v8813_v42  ;;  %7054 = vmatpush1.bf16.msra.mxu1 %v8815_v43  ;;  %v8861_v42 = vcombine.low %v1041_v26, %v1045_v27  ;;  %v8863_v43 = vcombine.low %v1042_v29, %v1046_v31  ;;  %v1089_v26 = vld [vmem:[%s9246_s25 + $0x1b40] sm:$0xff]  ;;  %v1090_v29 = vld [vmem:[%s9246_s25 + $0x1b48] sm:$0xff] }
 0x1a0   : > { %6727 = vmatprep.subr.bf16.mxu0 %v8822_v44  ;;  %7055 = vmatprep.subr.bf16.mxu1 %v8824_v46  ;;  %v8870_v44 = vcombine.high %v1049_v36, %v1053_v37  ;;  %v8872_v46 = vcombine.high %v1050_v40, %v1054_v41  ;;  %v1093_v27 = vld [vmem:[%s9246_s25 + $0x1b60] sm:$0xff]  ;;  %v1094_v31 = vld [vmem:[%s9246_s25 + $0x1b68] sm:$0xff] }
 0x1a3   : > { %6728 = vmatpush1.bf16.msra.mxu0 %v8821_v53  ;;  %7056 = vmatpush1.bf16.msra.mxu1 %v8823_v55  ;;  %v8869_v53 = vcombine.low %v1049_v36, %v1053_v37  ;;  %v8871_v55 = vcombine.low %v1050_v40, %v1054_v41  ;;  %v1097_v36 = vld [vmem:[%s9246_s25 + $0x1b80] sm:$0xff]  ;;  %v1098_v40 = vld [vmem:[%s9246_s25 + $0x1b88] sm:$0xff] }
 0x1a4   : > { %6729 = vmatprep.subr.bf16.mxu0 %v8830_v56  ;;  %7057 = vmatprep.subr.bf16.mxu1 %v8832_v57  ;;  %v8878_v56 = vcombine.high %v1057_v47, %v1061_v48  ;;  %v8880_v57 = vcombine.high %v1058_v50, %v1062_v51  ;;  %v1101_v37 = vld [vmem:[%s9246_s25 + $0x1ba0] sm:$0xff]  ;;  %v1102_v41 = vld [vmem:[%s9246_s25 + $0x1ba8] sm:$0xff] }
 0x1a7   : > { %6730 = vmatpush1.bf16.msra.mxu0 %v8829_v9  ;;  %7058 = vmatpush1.bf16.msra.mxu1 %v8831_v3  ;;  %v8877_v9 = vcombine.low %v1057_v47, %v1061_v48  ;;  %v8879_v3 = vcombine.low %v1058_v50, %v1062_v51  ;;  %v1105_v47 = vld [vmem:[%s9246_s25 + $0x1bc0] sm:$0xff]  ;;  %v1106_v50 = vld [vmem:[%s9246_s25 + $0x1bc8] sm:$0xff] }
 0x1a8   : > { %6731 = vmatprep.subr.bf16.mxu0 %v8838_v4  ;;  %7059 = vmatprep.subr.bf16.mxu1 %v8840_v5  ;;  %v8886_v4 = vcombine.high %v1065_v58, %v1069_v61  ;;  %v8888_v5 = vcombine.high %v1066_v62, %v1070_v63  ;;  %v1109_v48 = vld [vmem:[%s9246_s25 + $0x1be0] sm:$0xff]  ;;  %v1110_v51 = vld [vmem:[%s9246_s25 + $0x1be8] sm:$0xff] }
 0x1ab   : > { %6732 = vmatpush1.bf16.msra.mxu0 %v8837_v12  ;;  %7060 = vmatpush1.bf16.msra.mxu1 %v8839_v13  ;;  %v8885_v12 = vcombine.low %v1065_v58, %v1069_v61  ;;  %v8887_v13 = vcombine.low %v1066_v62, %v1070_v63  ;;  %v1113_v58 = vld [vmem:[%s9246_s25 + $0x1c00] sm:$0xff]  ;;  %v1114_v62 = vld [vmem:[%s9246_s25 + $0x1c08] sm:$0xff] }
 0x1ac   : > { %6733 = vmatprep.subr.bf16.mxu0 %v8846_v14  ;;  %7061 = vmatprep.subr.bf16.mxu1 %v8848_v15  ;;  %v8894_v14 = vcombine.high %v1073_v30, %v1077_v7  ;;  %v8896_v15 = vcombine.high %v1074_v8, %v1078_v11  ;;  %v1117_v61 = vld [vmem:[%s9246_s25 + $0x1c20] sm:$0xff]  ;;  %v1118_v63 = vld [vmem:[%s9246_s25 + $0x1c28] sm:$0xff] }
 0x1af   : > { %6734 = vmatpush1.bf16.msra.mxu0 %v8845_v21  ;;  %7062 = vmatpush1.bf16.msra.mxu1 %v8847_v22  ;;  %v8893_v21 = vcombine.low %v1073_v30, %v1077_v7  ;;  %v8895_v22 = vcombine.low %v1074_v8, %v1078_v11  ;;  %v1121_v30 = vld [vmem:[%s9246_s25 + $0x1c40] sm:$0xff]  ;;  %v9822_v8 = vrot.slane %v9737_v17, %v9284_v54  ;;  %v1122_v11 = vld [vmem:[%s9246_s25 + $0x1c48] sm:$0xff] }
 0x1b0   : > { %6735 = vmatprep.subr.bf16.mxu0 %v8854_v23  ;;  %7063 = vmatprep.subr.bf16.mxu1 %v8856_v25  ;;  %v8902_v23 = vcombine.high %v1081_v16, %v1085_v2  ;;  %v8904_v25 = vcombine.high %v1082_v18, %v1086_v19  ;;  %v1125_v7 = vld [vmem:[%s9246_s25 + $0x1c60] sm:$0xff]  ;;  %v1130_v54 = vld [vmem:[%s9246_s25 + $0x1c88] sm:$0xff] }
 0x1b1   : > { %v1134_v17 = vld [vmem:[%s9246_s25 + $0x1ca8] sm:$0xff] }
 0x1b3   : > { %6736 = vmatpush1.bf16.msra.mxu0 %v8853_v32  ;;  %7064 = vmatpush1.bf16.msra.mxu1 %v8855_v0  ;;  %v8901_v32 = vcombine.low %v1081_v16, %v1085_v2  ;;  %v8903_v0 = vcombine.low %v1082_v18, %v1086_v19  ;;  %v1129_v2 = vld [vmem:[%s9246_s25 + $0x1c80] sm:$0xff]  ;;  %v9830_v19 = vcombine.high %v9754_v38, %v9754_v38 }
 0x1b4   : > { %6737 = vmatprep.subr.bf16.mxu0 %v8862_v34  ;;  %7065 = vmatprep.subr.bf16.mxu1 %v8864_v35  ;;  %v8910_v34 = vcombine.high %v1089_v26, %v1093_v27  ;;  %v8912_v35 = vcombine.high %v1090_v29, %v1094_v31  ;;  %v1133_v18 = vld [vmem:[%s9246_s25 + $0x1ca0] sm:$0xff] }
 0x1b7   : > { %6738 = vmatpush1.bf16.msra.mxu0 %v8861_v42  ;;  %7066 = vmatpush1.bf16.msra.mxu1 %v8863_v43  ;;  %v8909_v42 = vcombine.low %v1089_v26, %v1093_v27  ;;  %v8911_v43 = vcombine.low %v1090_v29, %v1094_v31  ;;  %v1137_v26 = vld [vmem:[%s9246_s25 + $0x1cc0] sm:$0xff]  ;;  %v1138_v29 = vld [vmem:[%s9246_s25 + $0x1cc8] sm:$0xff] }
 0x1b8   : > { %6739 = vmatprep.subr.bf16.mxu0 %v8870_v44  ;;  %7067 = vmatprep.subr.bf16.mxu1 %v8872_v46  ;;  %v8918_v44 = vcombine.high %v1097_v36, %v1101_v37  ;;  %v8920_v46 = vcombine.high %v1098_v40, %v1102_v41  ;;  %v1141_v27 = vld [vmem:[%s9246_s25 + $0x1ce0] sm:$0xff]  ;;  %v1142_v31 = vld [vmem:[%s9246_s25 + $0x1ce8] sm:$0xff] }
 0x1bb   : > { %6740 = vmatpush1.bf16.msra.mxu0 %v8869_v53  ;;  %7068 = vmatpush1.bf16.msra.mxu1 %v8871_v55  ;;  %v8917_v53 = vcombine.low %v1097_v36, %v1101_v37  ;;  %v8919_v55 = vcombine.low %v1098_v40, %v1102_v41  ;;  %v1145_v36 = vld [vmem:[%s9246_s25 + $0x1d00] sm:$0xff]  ;;  %v1146_v40 = vld [vmem:[%s9246_s25 + $0x1d08] sm:$0xff] }
 0x1bc   : > { %6741 = vmatprep.subr.bf16.mxu0 %v8878_v56  ;;  %7069 = vmatprep.subr.bf16.mxu1 %v8880_v57  ;;  %v8926_v56 = vcombine.high %v1105_v47, %v1109_v48  ;;  %v8928_v57 = vcombine.high %v1106_v50, %v1110_v51  ;;  %v1149_v37 = vld [vmem:[%s9246_s25 + $0x1d20] sm:$0xff]  ;;  %v1150_v41 = vld [vmem:[%s9246_s25 + $0x1d28] sm:$0xff] }
 0x1bf   : > { %6742 = vmatpush1.bf16.msra.mxu0 %v8877_v9  ;;  %7070 = vmatpush1.bf16.msra.mxu1 %v8879_v3  ;;  %v8925_v9 = vcombine.low %v1105_v47, %v1109_v48  ;;  %v8927_v3 = vcombine.low %v1106_v50, %v1110_v51  ;;  %v1153_v47 = vld [vmem:[%s9246_s25 + $0x1d40] sm:$0xff]  ;;  %v1154_v50 = vld [vmem:[%s9246_s25 + $0x1d48] sm:$0xff] }
 0x1c0   : > { %6743 = vmatprep.subr.bf16.mxu0 %v8886_v4  ;;  %7071 = vmatprep.subr.bf16.mxu1 %v8888_v5  ;;  %v8934_v4 = vcombine.high %v1113_v58, %v1117_v61  ;;  %v8936_v5 = vcombine.high %v1114_v62, %v1118_v63  ;;  %v1157_v48 = vld [vmem:[%s9246_s25 + $0x1d60] sm:$0xff]  ;;  %v1158_v51 = vld [vmem:[%s9246_s25 + $0x1d68] sm:$0xff] }
 0x1c3   : > { %6744 = vmatpush1.bf16.msra.mxu0 %v8885_v12  ;;  %7072 = vmatpush1.bf16.msra.mxu1 %v8887_v13  ;;  %v1126_v12 = vld [vmem:[%s9246_s25 + $0x1c68] sm:$0xff]  ;;  %v8933_v13 = vcombine.low %v1113_v58, %v1117_v61  ;;  %v1161_v58 = vld [vmem:[%s9246_s25 + $0x1d80] sm:$0xff] }
 0x1c4   : > { %6745 = vmatprep.subr.bf16.mxu0 %v8894_v14  ;;  %7073 = vmatprep.subr.bf16.mxu1 %v8896_v15  ;;  %v8935_v14 = vcombine.low %v1114_v62, %v1118_v63  ;;  %v8942_v15 = vcombine.high %v1121_v30, %v1125_v7  ;;  %v8944_v16 = vcombine.high %v1122_v11, %v1126_v12  ;;  %v1165_v61 = vld [vmem:[%s9246_s25 + $0x1da0] sm:$0xff]  ;;  %v1162_v62 = vld [vmem:[%s9246_s25 + $0x1d88] sm:$0xff] }
 0x1c5   : > { %v1166_v63 = vld [vmem:[%s9246_s25 + $0x1da8] sm:$0xff] }
 0x1c7   : > { %6746 = vmatpush1.bf16.msra.mxu0 %v8893_v21  ;;  %7074 = vmatpush1.bf16.msra.mxu1 %v8895_v22  ;;  %v8941_v21 = vcombine.low %v1121_v30, %v1125_v7  ;;  %v8943_v22 = vcombine.low %v1122_v11, %v1126_v12  ;;  %v1169_v30 = vld [vmem:[%s9246_s25 + $0x1dc0] sm:$0xff]  ;;  %v1170_v11 = vld [vmem:[%s9246_s25 + $0x1dc8] sm:$0xff] }
 0x1c8   : > { %6747 = vmatprep.subr.bf16.mxu0 %v8902_v23  ;;  %7075 = vmatprep.subr.bf16.mxu1 %v8904_v25  ;;  %v8950_v23 = vcombine.high %v1129_v2, %v1133_v18  ;;  %v8952_v25 = vcombine.high %v1130_v54, %v1134_v17  ;;  %v1173_v7 = vld [vmem:[%s9246_s25 + $0x1de0] sm:$0xff]  ;;  %v1174_v12 = vld [vmem:[%s9246_s25 + $0x1de8] sm:$0xff] }
 0x1cb   : > { %6748 = vmatpush1.bf16.msra.mxu0 %v8901_v32  ;;  %7076 = vmatpush1.bf16.msra.mxu1 %v8903_v0  ;;  %v8949_v32 = vcombine.low %v1129_v2, %v1133_v18  ;;  %v8951_v0 = vcombine.low %v1130_v54, %v1134_v17  ;;  %v1177_v2 = vld [vmem:[%s9246_s25 + $0x1e00] sm:$0xff]  ;;  %v1178_v54 = vld [vmem:[%s9246_s25 + $0x1e08] sm:$0xff] }
 0x1cc   : > { %6749 = vmatprep.subr.bf16.mxu0 %v8910_v34  ;;  %7077 = vmatprep.subr.bf16.mxu1 %v8912_v35  ;;  %v8958_v34 = vcombine.high %v1137_v26, %v1141_v27  ;;  %v8960_v35 = vcombine.high %v1138_v29, %v1142_v31  ;;  %v1181_v18 = vld [vmem:[%s9246_s25 + $0x1e20] sm:$0xff]  ;;  %v1182_v17 = vld [vmem:[%s9246_s25 + $0x1e28] sm:$0xff] }
 0x1cf   : > { %6750 = vmatpush1.bf16.msra.mxu0 %v8909_v42  ;;  %7078 = vmatpush1.bf16.msra.mxu1 %v8911_v43  ;;  %v8957_v42 = vcombine.low %v1137_v26, %v1141_v27  ;;  %v8959_v43 = vcombine.low %v1138_v29, %v1142_v31  ;;  %v1185_v26 = vld [vmem:[%s9246_s25 + $0x1e40] sm:$0xff]  ;;  %v1186_v29 = vld [vmem:[%s9246_s25 + $0x1e48] sm:$0xff] }
 0x1d0   : > { %6751 = vmatprep.subr.bf16.mxu0 %v8918_v44  ;;  %7079 = vmatprep.subr.bf16.mxu1 %v8920_v46  ;;  %v8966_v44 = vcombine.high %v1145_v36, %v1149_v37  ;;  %v8968_v46 = vcombine.high %v1146_v40, %v1150_v41  ;;  %v1189_v27 = vld [vmem:[%s9246_s25 + $0x1e60] sm:$0xff]  ;;  %v1190_v31 = vld [vmem:[%s9246_s25 + $0x1e68] sm:$0xff] }
 0x1d3   : > { %6752 = vmatpush1.bf16.msra.mxu0 %v8917_v53  ;;  %7080 = vmatpush1.bf16.msra.mxu1 %v8919_v55  ;;  %v8965_v53 = vcombine.low %v1145_v36, %v1149_v37  ;;  %v8967_v55 = vcombine.low %v1146_v40, %v1150_v41  ;;  %v1193_v36 = vld [vmem:[%s9246_s25 + $0x1e80] sm:$0xff]  ;;  %v1194_v40 = vld [vmem:[%s9246_s25 + $0x1e88] sm:$0xff] }
 0x1d4   : > { %6753 = vmatprep.subr.bf16.mxu0 %v8926_v56  ;;  %7081 = vmatprep.subr.bf16.mxu1 %v8928_v57  ;;  %v8974_v56 = vcombine.high %v1153_v47, %v1157_v48  ;;  %v8976_v57 = vcombine.high %v1154_v50, %v1158_v51  ;;  %v1197_v37 = vld [vmem:[%s9246_s25 + $0x1ea0] sm:$0xff]  ;;  %v1198_v41 = vld [vmem:[%s9246_s25 + $0x1ea8] sm:$0xff] }
 0x1d7   : > { %6754 = vmatpush1.bf16.msra.mxu0 %v8925_v9  ;;  %7082 = vmatpush1.bf16.msra.mxu1 %v8927_v3  ;;  %v8973_v9 = vcombine.low %v1153_v47, %v1157_v48  ;;  %v8975_v3 = vcombine.low %v1154_v50, %v1158_v51  ;;  %v1201_v47 = vld [vmem:[%s9246_s25 + $0x1ec0] sm:$0xff]  ;;  %v1202_v50 = vld [vmem:[%s9246_s25 + $0x1ec8] sm:$0xff] }
 0x1d8   : > { %6764 = vmatprep.subr.bf16.mxu0 %v8934_v4  ;;  %7092 = vmatprep.subr.bf16.mxu1 %v8936_v5  ;;  %v8982_v4 = vcombine.high %v1161_v58, %v1165_v61  ;;  %v8984_v5 = vcombine.high %v1162_v62, %v1166_v63  ;;  %v1205_v48 = vld [vmem:[%s9246_s25 + $0x1ee0] sm:$0xff]  ;;  %v1206_v51 = vld [vmem:[%s9246_s25 + $0x1ee8] sm:$0xff] }
 0x1da   : > { %6756 = vmatmul.mubr.bf16.vlgmr.msra.gmra.mrb[0].mxu0 %v9822_v8  ;;  %7084 = vmatmul.mubr.bf16.vlgmr.msra.gmra.mrb[0].mxu1 %v9822_v8 }
 0x1db   : > { %6765 = vmatpush1.bf16.msra.mxu0 %v8933_v13  ;;  %7093 = vmatpush1.bf16.msra.mxu1 %v8935_v14  ;;  %v8981_v13 = vcombine.low %v1161_v58, %v1165_v61  ;;  %v8983_v14 = vcombine.low %v1162_v62, %v1166_v63  ;;  %v1209_v58 = vld [vmem:[%s9246_s25 + $0x1f00] sm:$0xff]  ;;  %v1210_v62 = vld [vmem:[%s9246_s25 + $0x1f08] sm:$0xff] }
 0x1dc   : > { %6766 = vmatprep.subr.bf16.mxu0 %v8942_v15  ;;  %7094 = vmatprep.subr.bf16.mxu1 %v8944_v16  ;;  %v8990_v15 = vcombine.high %v1169_v30, %v1173_v7  ;;  %v8992_v16 = vcombine.high %v1170_v11, %v1174_v12  ;;  %v1213_v61 = vld [vmem:[%s9246_s25 + $0x1f20] sm:$0xff]  ;;  %v1214_v63 = vld [vmem:[%s9246_s25 + $0x1f28] sm:$0xff] }
 0x1dd   : > { %6796 = vmatprep.mubr.bf16.mxu0 %v9830_v19  ;;  %7124 = vmatprep.mubr.bf16.mxu1 %v9830_v19 }
 0x1df   : > { %6767 = vmatpush1.bf16.msra.mxu0 %v8941_v21  ;;  %7095 = vmatpush1.bf16.msra.mxu1 %v8943_v22  ;;  %v8989_v21 = vcombine.low %v1169_v30, %v1173_v7  ;;  %v8991_v22 = vcombine.low %v1170_v11, %v1174_v12  ;;  %v1217_v30 = vld [vmem:[%s9246_s25 + $0x1f40] sm:$0xff]  ;;  %v1218_v11 = vld [vmem:[%s9246_s25 + $0x1f48] sm:$0xff] }
 0x1e0   : > { %6768 = vmatprep.subr.bf16.mxu0 %v8950_v23  ;;  %7096 = vmatprep.subr.bf16.mxu1 %v8952_v25  ;;  %v8998_v23 = vcombine.high %v1177_v2, %v1181_v18  ;;  %v9000_v25 = vcombine.high %v1178_v54, %v1182_v17  ;;  %v1221_v7 = vld [vmem:[%s9246_s25 + $0x1f60] sm:$0xff]  ;;  %v1222_v12 = vld [vmem:[%s9246_s25 + $0x1f68] sm:$0xff] }
 0x1e3   : > { %6769 = vmatpush1.bf16.msra.mxu0 %v8949_v32  ;;  %7097 = vmatpush1.bf16.msra.mxu1 %v8951_v0  ;;  %v8997_v32 = vcombine.low %v1177_v2, %v1181_v18  ;;  %v8999_v0 = vcombine.low %v1178_v54, %v1182_v17  ;;  %v1225_v2 = vld [vmem:[%s9246_s25 + $0x1f80] sm:$0xff]  ;;  %v1226_v54 = vld [vmem:[%s9246_s25 + $0x1f88] sm:$0xff] }
 0x1e4   : > { %6770 = vmatprep.subr.bf16.mxu0 %v8958_v34  ;;  %7098 = vmatprep.subr.bf16.mxu1 %v8960_v35  ;;  %v9006_v34 = vcombine.high %v1185_v26, %v1189_v27  ;;  %v9008_v35 = vcombine.high %v1186_v29, %v1190_v31  ;;  %v1229_v18 = vld [vmem:[%s9246_s25 + $0x1fa0] sm:$0xff]  ;;  %v1230_v17 = vld [vmem:[%s9246_s25 + $0x1fa8] sm:$0xff] }
 0x1e7   : > { %6771 = vmatpush1.bf16.msra.mxu0 %v8957_v42  ;;  %7099 = vmatpush1.bf16.msra.mxu1 %v8959_v43  ;;  %v9005_v42 = vcombine.low %v1185_v26, %v1189_v27  ;;  %v9007_v43 = vcombine.low %v1186_v29, %v1190_v31  ;;  %v1233_v26 = vld [vmem:[%s9246_s25 + $0x1fc0] sm:$0xff]  ;;  %v1234_v29 = vld [vmem:[%s9246_s25 + $0x1fc8] sm:$0xff] }
 0x1e8   : > { %6772 = vmatprep.subr.bf16.mxu0 %v8966_v44  ;;  %7100 = vmatprep.subr.bf16.mxu1 %v8968_v46  ;;  %v9014_v44 = vcombine.high %v1193_v36, %v1197_v37  ;;  %v9016_v46 = vcombine.high %v1194_v40, %v1198_v41  ;;  %v1237_v27 = vld [vmem:[%s9246_s25 + $0x1fe0] sm:$0xff]  ;;  %v1238_v31 = vld [vmem:[%s9246_s25 + $0x1fe8] sm:$0xff] }
 0x1eb   : > { %6773 = vmatpush1.bf16.msra.mxu0 %v8965_v53  ;;  %7101 = vmatpush1.bf16.msra.mxu1 %v8967_v55  ;;  %v9013_v53 = vcombine.low %v1193_v36, %v1197_v37  ;;  %v9015_v55 = vcombine.low %v1194_v40, %v1198_v41  ;;  %v219_v36 = vld [vmem:[%s9246_s25 + $0x10] sm:$0xff]  ;;  %v220_v40 = vld [vmem:[%s9246_s25 + $0x18] sm:$0xff] }
 0x1ec   : > { %6774 = vmatprep.subr.bf16.mxu0 %v8974_v56  ;;  %7102 = vmatprep.subr.bf16.mxu1 %v8976_v57  ;;  %v9022_v56 = vcombine.high %v1201_v47, %v1205_v48  ;;  %v9024_v57 = vcombine.high %v1202_v50, %v1206_v51  ;;  %v223_v37 = vld [vmem:[%s9246_s25 + $0x30] sm:$0xff]  ;;  %v224_v41 = vld [vmem:[%s9246_s25 + $0x38] sm:$0xff] }
 0x1ef   : > { %6775 = vmatpush1.bf16.msra.mxu0 %v8973_v9  ;;  %7103 = vmatpush1.bf16.msra.mxu1 %v8975_v3  ;;  %v9021_v9 = vcombine.low %v1201_v47, %v1205_v48  ;;  %v9023_v3 = vcombine.low %v1202_v50, %v1206_v51  ;;  %v227_v47 = vld [vmem:[%s9246_s25 + $0x50] sm:$0xff]  ;;  %v9898_v50 = vcombine.high %v9822_v8, %v9822_v8  ;;  %v228_v51 = vld [vmem:[%s9246_s25 + $0x58] sm:$0xff] }
 0x1f0   : > { %6776 = vmatprep.subr.bf16.mxu0 %v8982_v4  ;;  %7104 = vmatprep.subr.bf16.mxu1 %v8984_v5  ;;  %v9030_v4 = vcombine.high %v1209_v58, %v1213_v61  ;;  %v9032_v5 = vcombine.high %v1210_v62, %v1214_v63  ;;  %v231_v48 = vld [vmem:[%s9246_s25 + $0x70] sm:$0xff] }
 0x1f3   : > { %6777 = vmatpush1.bf16.msra.mxu0 %v8981_v13  ;;  %7105 = vmatpush1.bf16.msra.mxu1 %v8983_v14  ;;  %v9029_v13 = vcombine.low %v1209_v58, %v1213_v61  ;;  %v9031_v14 = vcombine.low %v1210_v62, %v1214_v63  ;;  %v235_v61 = vld [vmem:[%s9246_s25 + $0x90] sm:$0xff]  ;;  %v236_v63 = vld [vmem:[%s9246_s25 + $0x98] sm:$0xff] }
 0x1f4   : > { %6778 = vmatprep.subr.bf16.mxu0 %v8990_v15  ;;  %7106 = vmatprep.subr.bf16.mxu1 %v8992_v16  ;;  %v9038_v15 = vcombine.high %v1217_v30, %v1221_v7  ;;  %v9040_v16 = vcombine.high %v1218_v11, %v1222_v12  ;;  %v239_v62 = vld [vmem:[%s9246_s25 + $0xb0] sm:$0xff] }
 0x1f7   : > { %6779 = vmatpush1.bf16.msra.mxu0 %v8989_v21  ;;  %7107 = vmatpush1.bf16.msra.mxu1 %v8991_v22  ;;  %v9037_v21 = vcombine.low %v1217_v30, %v1221_v7  ;;  %v9039_v22 = vcombine.low %v1218_v11, %v1222_v12  ;;  %v243_v7 = vld [vmem:[%s9246_s25 + $0xd0] sm:$0xff]  ;;  %v244_v12 = vld [vmem:[%s9246_s25 + $0xd8] sm:$0xff] }
 0x1f8   : > { %6780 = vmatprep.subr.bf16.mxu0 %v8998_v23  ;;  %7108 = vmatprep.subr.bf16.mxu1 %v9000_v25  ;;  %v9046_v23 = vcombine.high %v1225_v2, %v1229_v18  ;;  %v9048_v25 = vcombine.high %v1226_v54, %v1230_v17  ;;  %v247_v11 = vld [vmem:[%s9246_s25 + $0xf0] sm:$0xff] }
 0x1fb   : > { %6781 = vmatpush1.bf16.msra.mxu0 %v8997_v32  ;;  %7109 = vmatpush1.bf16.msra.mxu1 %v8999_v0  ;;  %v9045_v32 = vcombine.low %v1225_v2, %v1229_v18  ;;  %v9047_v0 = vcombine.low %v1226_v54, %v1230_v17  ;;  %v251_v18 = vld [vmem:[%s9246_s25 + $0x110] sm:$0xff]  ;;  %v252_v17 = vld [vmem:[%s9246_s25 + $0x118] sm:$0xff] }
 0x1fc   : > { %6782 = vmatprep.subr.bf16.mxu0 %v9006_v34  ;;  %7110 = vmatprep.subr.bf16.mxu1 %v9008_v35  ;;  %v9054_v34 = vcombine.high %v1233_v26, %v1237_v27  ;;  %v9056_v35 = vcombine.high %v1234_v29, %v1238_v31  ;;  %v255_v54 = vld [vmem:[%s9246_s25 + $0x130] sm:$0xff] }
 0x1ff   : > { %6783 = vmatpush1.bf16.msra.mxu0 %v9005_v42  ;;  %7111 = vmatpush1.bf16.msra.mxu1 %v9007_v43  ;;  %v9053_v42 = vcombine.low %v1233_v26, %v1237_v27  ;;  %v9055_v43 = vcombine.low %v1234_v29, %v1238_v31  ;;  %v259_v26 = vld [vmem:[%s9246_s25 + $0x150] sm:$0xff]  ;;  %v260_v29 = vld [vmem:[%s9246_s25 + $0x158] sm:$0xff] }
 0x200   : > { %6784 = vmatprep.subr.bf16.mxu0 %v9014_v44  ;;  %7112 = vmatprep.subr.bf16.mxu1 %v9016_v46  ;;  %v8042_v44 = vcombine.high %v219_v36, %v223_v37  ;;  %v8044_v46 = vcombine.high %v220_v40, %v224_v41  ;;  %v263_v27 = vld [vmem:[%s9246_s25 + $0x170] sm:$0xff]  ;;  %v264_v31 = vld [vmem:[%s9246_s25 + $0x178] sm:$0xff] }
 0x203   : > { %6785 = vmatpush1.bf16.msra.mxu0 %v9013_v53  ;;  %7113 = vmatpush1.bf16.msra.mxu1 %v9015_v55  ;;  %v232_v53 = vld [vmem:[%s9246_s25 + $0x78] sm:$0xff]  ;;  %v8041_v55 = vcombine.low %v219_v36, %v223_v37  ;;  %v267_v36 = vld [vmem:[%s9246_s25 + $0x190] sm:$0xff] }
 0x204   : > { %6786 = vmatprep.subr.bf16.mxu0 %v9022_v56  ;;  %7114 = vmatprep.subr.bf16.mxu1 %v9024_v57  ;;  %v8043_v56 = vcombine.low %v220_v40, %v224_v41  ;;  %v8050_v57 = vcombine.high %v227_v47, %v231_v48  ;;  %v8052_v58 = vcombine.high %v228_v51, %v232_v53  ;;  %v271_v37 = vld [vmem:[%s9246_s25 + $0x1b0] sm:$0xff]  ;;  %v268_v40 = vld [vmem:[%s9246_s25 + $0x198] sm:$0xff] }
 0x205   : > { %v272_v41 = vld [vmem:[%s9246_s25 + $0x1b8] sm:$0xff] }
 0x207   : > { %6787 = vmatpush1.bf16.msra.mxu0 %v9021_v9  ;;  %7115 = vmatpush1.bf16.msra.mxu1 %v9023_v3  ;;  %v240_v9 = vld [vmem:[%s9246_s25 + $0xb8] sm:$0xff]  ;;  %v8049_v3 = vcombine.low %v227_v47, %v231_v48  ;;  %v275_v47 = vld [vmem:[%s9246_s25 + $0x1d0] sm:$0xff] }
 0x208   : > { %6788 = vmatprep.subr.bf16.mxu0 %v9030_v4  ;;  %7116 = vmatprep.subr.bf16.mxu1 %v9032_v5  ;;  %v8051_v4 = vcombine.low %v228_v51, %v232_v53  ;;  %v8058_v5 = vcombine.high %v235_v61, %v239_v62  ;;  %v8060_v30 = vcombine.high %v236_v63, %v240_v9  ;;  %v279_v48 = vld [vmem:[%s9246_s25 + $0x1f0] sm:$0xff]  ;;  %v276_v51 = vld [vmem:[%s9246_s25 + $0x1d8] sm:$0xff] }
 0x209   : > { %v280_v53 = vld [vmem:[%s9246_s25 + $0x1f8] sm:$0xff] }
 0x20b   : > { %6789 = vmatpush1.bf16.msra.mxu0 %v9029_v13  ;;  %7117 = vmatpush1.bf16.msra.mxu1 %v9031_v14  ;;  %v248_v13 = vld [vmem:[%s9246_s25 + $0xf8] sm:$0xff]  ;;  %v8057_v14 = vcombine.low %v235_v61, %v239_v62  ;;  %v283_v61 = vld [vmem:[%s9246_s25 + $0x210] sm:$0xff] }
 0x20c   : > { %6790 = vmatprep.subr.bf16.mxu0 %v9038_v15  ;;  %7118 = vmatprep.subr.bf16.mxu1 %v9040_v16  ;;  %v8059_v15 = vcombine.low %v236_v63, %v240_v9  ;;  %v8066_v16 = vcombine.high %v243_v7, %v247_v11  ;;  %v8068_v2 = vcombine.high %v244_v12, %v248_v13  ;;  %v287_v62 = vld [vmem:[%s9246_s25 + $0x230] sm:$0xff]  ;;  %v284_v63 = vld [vmem:[%s9246_s25 + $0x218] sm:$0xff] }
 0x20d   : > { %v288_v9 = vld [vmem:[%s9246_s25 + $0x238] sm:$0xff] }
 0x20f   : > { %6791 = vmatpush1.bf16.msra.mxu0 %v9037_v21  ;;  %7119 = vmatpush1.bf16.msra.mxu1 %v9039_v22  ;;  %v256_v21 = vld [vmem:[%s9246_s25 + $0x138] sm:$0xff]  ;;  %v8065_v22 = vcombine.low %v243_v7, %v247_v11  ;;  %v291_v7 = vld [vmem:[%s9246_s25 + $0x250] sm:$0xff] }
 0x210   : > { %6792 = vmatprep.subr.bf16.mxu0 %v9046_v23  ;;  %7120 = vmatprep.subr.bf16.mxu1 %v9048_v25  ;;  %v8074_v23 = vcombine.high %v251_v18, %v255_v54  ;;  %v8076_v25 = vcombine.high %v252_v17, %v256_v21  ;;  %v295_v11 = vld [vmem:[%s9246_s25 + $0x270] sm:$0xff] }
 0x213   : > { %6793 = vmatpush1.bf16.msra.mxu0 %v9045_v32  ;;  %7121 = vmatpush1.bf16.msra.mxu1 %v9047_v0  ;;  %v8073_v32 = vcombine.low %v251_v18, %v255_v54  ;;  %v8075_v0 = vcombine.low %v252_v17, %v256_v21  ;;  %v299_v18 = vld [vmem:[%s9246_s25 + $0x290] sm:$0xff]  ;;  %v300_v17 = vld [vmem:[%s9246_s25 + $0x298] sm:$0xff] }
 0x214   : > { %6794 = vmatprep.subr.bf16.mxu0 %v9054_v34  ;;  %7122 = vmatprep.subr.bf16.mxu1 %v9056_v35  ;;  %v8082_v34 = vcombine.high %v259_v26, %v263_v27  ;;  %v8084_v35 = vcombine.high %v260_v29, %v264_v31  ;;  %v303_v54 = vld [vmem:[%s9246_s25 + $0x2b0] sm:$0xff]  ;;  %v304_v21 = vld [vmem:[%s9246_s25 + $0x2b8] sm:$0xff] }
 0x217   : > { %6795 = vmatpush1.bf16.msra.mxu0 %v9053_v42  ;;  %7123 = vmatpush1.bf16.msra.mxu1 %v9055_v43  ;;  %v8081_v42 = vcombine.low %v259_v26, %v263_v27  ;;  %v8083_v43 = vcombine.low %v260_v29, %v264_v31  ;;  %v307_v26 = vld [vmem:[%s9246_s25 + $0x2d0] sm:$0xff]  ;;  %v308_v29 = vld [vmem:[%s9246_s25 + $0x2d8] sm:$0xff] }
 0x218   : > { %7133 = vmatprep.subr.bf16.mxu0 %v8042_v44  ;;  %7461 = vmatprep.subr.bf16.mxu1 %v8044_v46  ;;  %v8090_v44 = vcombine.high %v267_v36, %v271_v37  ;;  %v8092_v46 = vcombine.high %v268_v40, %v272_v41  ;;  %v311_v27 = vld [vmem:[%s9246_s25 + $0x2f0] sm:$0xff]  ;;  %v312_v31 = vld [vmem:[%s9246_s25 + $0x2f8] sm:$0xff] }
 0x21a   : > { %6797 = vmatmul.mubr.bf16.vlgmr.msra.gmra.mrb[0].mxu0 %v9898_v50  ;;  %7125 = vmatmul.mubr.bf16.vlgmr.msra.gmra.mrb[0].mxu1 %v9898_v50 }
 0x21b   : > { %7134 = vmatpush1.bf16.msra.mxu0 %v8041_v55  ;;  %7462 = vmatpush1.bf16.msra.mxu1 %v8043_v56  ;;  %v8089_v55 = vcombine.low %v267_v36, %v271_v37  ;;  %v8091_v56 = vcombine.low %v268_v40, %v272_v41  ;;  %v315_v36 = vld [vmem:[%s9246_s25 + $0x310] sm:$0xff]  ;;  %v316_v40 = vld [vmem:[%s9246_s25 + $0x318] sm:$0xff] }
 0x21c   : > { %7135 = vmatprep.subr.bf16.mxu0 %v8050_v57  ;;  %7463 = vmatprep.subr.bf16.mxu1 %v8052_v58  ;;  %v8098_v57 = vcombine.high %v275_v47, %v279_v48  ;;  %v8100_v58 = vcombine.high %v276_v51, %v280_v53  ;;  %v319_v37 = vld [vmem:[%s9246_s25 + $0x330] sm:$0xff]  ;;  %v320_v41 = vld [vmem:[%s9246_s25 + $0x338] sm:$0xff] }
 0x21d   : > { %7165 = vmatprep.mubr.bf16.mxu0 %v9304_v10  ;;  %7493 = vmatprep.mubr.bf16.mxu1 %v9304_v10  ;;  %v8067_v10 = vcombine.low %v244_v12, %v248_v13  ;;  %v292_v12 = vld [vmem:[%s9246_s25 + $0x258] sm:$0xff] }
 0x21e   : > { %v296_v13 = vld [vmem:[%s9246_s25 + $0x278] sm:$0xff] }
 0x21f   : > { %7136 = vmatpush1.bf16.msra.mxu0 %v8049_v3  ;;  %7464 = vmatpush1.bf16.msra.mxu1 %v8051_v4  ;;  %v8097_v3 = vcombine.low %v275_v47, %v279_v48  ;;  %v8099_v4 = vcombine.low %v276_v51, %v280_v53  ;;  %v323_v47 = vld [vmem:[%s9246_s25 + $0x350] sm:$0xff]  ;;  %v324_v51 = vld [vmem:[%s9246_s25 + $0x358] sm:$0xff] }
 0x220   : > { %7137 = vmatprep.subr.bf16.mxu0 %v8058_v5  ;;  %7465 = vmatprep.subr.bf16.mxu1 %v8060_v30  ;;  %v8106_v5 = vcombine.high %v283_v61, %v287_v62  ;;  %v8108_v30 = vcombine.high %v284_v63, %v288_v9  ;;  %v327_v48 = vld [vmem:[%s9246_s25 + $0x370] sm:$0xff]  ;;  %v328_v53 = vld [vmem:[%s9246_s25 + $0x378] sm:$0xff] }
 0x223   : > { %7138 = vmatpush1.bf16.msra.mxu0 %v8057_v14  ;;  %7466 = vmatpush1.bf16.msra.mxu1 %v8059_v15  ;;  %v8105_v14 = vcombine.low %v283_v61, %v287_v62  ;;  %v8107_v15 = vcombine.low %v284_v63, %v288_v9  ;;  %v331_v61 = vld [vmem:[%s9246_s25 + $0x390] sm:$0xff]  ;;  %v332_v63 = vld [vmem:[%s9246_s25 + $0x398] sm:$0xff] }
 0x224   : > { %7139 = vmatprep.subr.bf16.mxu0 %v8066_v16  ;;  %7467 = vmatprep.subr.bf16.mxu1 %v8068_v2  ;;  %v8114_v16 = vcombine.high %v291_v7, %v295_v11  ;;  %v8116_v2 = vcombine.high %v292_v12, %v296_v13  ;;  %v335_v62 = vld [vmem:[%s9246_s25 + $0x3b0] sm:$0xff]  ;;  %v336_v9 = vld [vmem:[%s9246_s25 + $0x3b8] sm:$0xff] }
 0x227   : > { %7140 = vmatpush1.bf16.msra.mxu0 %v8065_v22  ;;  %7468 = vmatpush1.bf16.msra.mxu1 %v8067_v10  ;;  %v8113_v22 = vcombine.low %v291_v7, %v295_v11  ;;  %v8115_v10 = vcombine.low %v292_v12, %v296_v13  ;;  %v339_v7 = vld [vmem:[%s9246_s25 + $0x3d0] sm:$0xff]  ;;  %v340_v12 = vld [vmem:[%s9246_s25 + $0x3d8] sm:$0xff] }
 0x228   : > { %7141 = vmatprep.subr.bf16.mxu0 %v8074_v23  ;;  %7469 = vmatprep.subr.bf16.mxu1 %v8076_v25  ;;  %v8122_v23 = vcombine.high %v299_v18, %v303_v54  ;;  %v8124_v25 = vcombine.high %v300_v17, %v304_v21  ;;  %v343_v11 = vld [vmem:[%s9246_s25 + $0x3f0] sm:$0xff]  ;;  %v344_v13 = vld [vmem:[%s9246_s25 + $0x3f8] sm:$0xff] }
 0x22b   : > { %7142 = vmatpush1.bf16.msra.mxu0 %v8073_v32  ;;  %7470 = vmatpush1.bf16.msra.mxu1 %v8075_v0  ;;  %v8121_v32 = vcombine.low %v299_v18, %v303_v54  ;;  %v8123_v0 = vcombine.low %v300_v17, %v304_v21  ;;  %v347_v18 = vld [vmem:[%s9246_s25 + $0x410] sm:$0xff]  ;;  %v348_v17 = vld [vmem:[%s9246_s25 + $0x418] sm:$0xff] }
 0x22c   : > { %7143 = vmatprep.subr.bf16.mxu0 %v8082_v34  ;;  %7471 = vmatprep.subr.bf16.mxu1 %v8084_v35  ;;  %v8130_v34 = vcombine.high %v307_v26, %v311_v27  ;;  %v8132_v35 = vcombine.high %v308_v29, %v312_v31  ;;  %v351_v54 = vld [vmem:[%s9246_s25 + $0x430] sm:$0xff]  ;;  %v352_v21 = vld [vmem:[%s9246_s25 + $0x438] sm:$0xff] }
 0x22f   : > { %7144 = vmatpush1.bf16.msra.mxu0 %v8081_v42  ;;  %7472 = vmatpush1.bf16.msra.mxu1 %v8083_v43  ;;  %v8129_v42 = vcombine.low %v307_v26, %v311_v27  ;;  %v8131_v43 = vcombine.low %v308_v29, %v312_v31  ;;  %v355_v26 = vld [vmem:[%s9246_s25 + $0x450] sm:$0xff]  ;;  %v356_v29 = vld [vmem:[%s9246_s25 + $0x458] sm:$0xff] }
 0x230   : > { %7145 = vmatprep.subr.bf16.mxu0 %v8090_v44  ;;  %7473 = vmatprep.subr.bf16.mxu1 %v8092_v46  ;;  %v8138_v44 = vcombine.high %v315_v36, %v319_v37  ;;  %v8140_v46 = vcombine.high %v316_v40, %v320_v41  ;;  %v359_v27 = vld [vmem:[%s9246_s25 + $0x470] sm:$0xff]  ;;  %v360_v31 = vld [vmem:[%s9246_s25 + $0x478] sm:$0xff] }
 0x233   : > { %7146 = vmatpush1.bf16.msra.mxu0 %v8089_v55  ;;  %7474 = vmatpush1.bf16.msra.mxu1 %v8091_v56  ;;  %v8137_v55 = vcombine.low %v315_v36, %v319_v37  ;;  %v8139_v56 = vcombine.low %v316_v40, %v320_v41  ;;  %v363_v36 = vld [vmem:[%s9246_s25 + $0x490] sm:$0xff]  ;;  %v364_v40 = vld [vmem:[%s9246_s25 + $0x498] sm:$0xff] }
 0x234   : > { %7147 = vmatprep.subr.bf16.mxu0 %v8098_v57  ;;  %7475 = vmatprep.subr.bf16.mxu1 %v8100_v58  ;;  %v8146_v57 = vcombine.high %v323_v47, %v327_v48  ;;  %v8148_v58 = vcombine.high %v324_v51, %v328_v53  ;;  %v367_v37 = vld [vmem:[%s9246_s25 + $0x4b0] sm:$0xff]  ;;  %v368_v41 = vld [vmem:[%s9246_s25 + $0x4b8] sm:$0xff] }
 0x237   : > { %7148 = vmatpush1.bf16.msra.mxu0 %v8097_v3  ;;  %7476 = vmatpush1.bf16.msra.mxu1 %v8099_v4  ;;  %v8145_v3 = vcombine.low %v323_v47, %v327_v48  ;;  %v8147_v4 = vcombine.low %v324_v51, %v328_v53  ;;  %v371_v47 = vld [vmem:[%s9246_s25 + $0x4d0] sm:$0xff]  ;;  %v372_v51 = vld [vmem:[%s9246_s25 + $0x4d8] sm:$0xff] }
 0x238   : > { %7149 = vmatprep.subr.bf16.mxu0 %v8106_v5  ;;  %7477 = vmatprep.subr.bf16.mxu1 %v8108_v30  ;;  %v8154_v5 = vcombine.high %v331_v61, %v335_v62  ;;  %v8156_v30 = vcombine.high %v332_v63, %v336_v9  ;;  %v375_v48 = vld [vmem:[%s9246_s25 + $0x4f0] sm:$0xff]  ;;  %v376_v53 = vld [vmem:[%s9246_s25 + $0x4f8] sm:$0xff] }
 0x23b   : > { %7150 = vmatpush1.bf16.msra.mxu0 %v8105_v14  ;;  %7478 = vmatpush1.bf16.msra.mxu1 %v8107_v15  ;;  %v8153_v14 = vcombine.low %v331_v61, %v335_v62  ;;  %v8155_v15 = vcombine.low %v332_v63, %v336_v9  ;;  %v383_v61 = vld [vmem:[%s9246_s25 + $0x530] sm:$0xff]  ;;  %v380_v62 = vld [vmem:[%s9246_s25 + $0x518] sm:$0xff]  ;;  %v8193_v9 = vcombine.low %v371_v47, %v375_v48 }
 0x23c   : > { %7151 = vmatprep.subr.bf16.mxu0 %v8114_v16  ;;  %7479 = vmatprep.subr.bf16.mxu1 %v8116_v2  ;;  %v8162_v16 = vcombine.high %v339_v7, %v343_v11  ;;  %v8164_v2 = vcombine.high %v340_v12, %v344_v13  ;;  %v384_v63 = vld [vmem:[%s9246_s25 + $0x538] sm:$0xff] }
 0x23f   : > { %7152 = vmatpush1.bf16.msra.mxu0 %v8113_v22  ;;  %7480 = vmatpush1.bf16.msra.mxu1 %v8115_v10  ;;  %v8161_v22 = vcombine.low %v339_v7, %v343_v11  ;;  %v8163_v10 = vcombine.low %v340_v12, %v344_v13  ;;  %v388_v7 = vld [vmem:[%s9246_s25 + $0x558] sm:$0xff]  ;;  %v8203_v13 = vcombine.low %v380_v62, %v384_v63 }
 0x240   : > { %7153 = vmatprep.subr.bf16.mxu0 %v8122_v23  ;;  %7481 = vmatprep.subr.bf16.mxu1 %v8124_v25  ;;  %v8170_v23 = vcombine.high %v347_v18, %v351_v54  ;;  %v8172_v25 = vcombine.high %v348_v17, %v352_v21  ;;  %v392_v11 = vld [vmem:[%s9246_s25 + $0x578] sm:$0xff] }
 0x243   : > { %7154 = vmatpush1.bf16.msra.mxu0 %v8121_v32  ;;  %7482 = vmatpush1.bf16.msra.mxu1 %v8123_v0  ;;  %v8169_v32 = vcombine.low %v347_v18, %v351_v54  ;;  %v8171_v0 = vcombine.low %v348_v17, %v352_v21  ;;  %v396_v18 = vld [vmem:[%s9246_s25 + $0x598] sm:$0xff]  ;;  %v8211_v21 = vcombine.low %v388_v7, %v392_v11 }
 0x244   : > { %7155 = vmatprep.subr.bf16.mxu0 %v8130_v34  ;;  %7483 = vmatprep.subr.bf16.mxu1 %v8132_v35  ;;  %v8178_v34 = vcombine.high %v355_v26, %v359_v27  ;;  %v8180_v35 = vcombine.high %v356_v29, %v360_v31  ;;  %v400_v54 = vld [vmem:[%s9246_s25 + $0x5b8] sm:$0xff] }
 0x247   : > { %7156 = vmatpush1.bf16.msra.mxu0 %v8129_v42  ;;  %7484 = vmatpush1.bf16.msra.mxu1 %v8131_v43  ;;  %v8177_v42 = vcombine.low %v355_v26, %v359_v27  ;;  %v8179_v43 = vcombine.low %v356_v29, %v360_v31  ;;  %v404_v26 = vld [vmem:[%s9246_s25 + $0x5d8] sm:$0xff]  ;;  %v8219_v31 = vcombine.low %v396_v18, %v400_v54 }
 0x248   : > { %7157 = vmatprep.subr.bf16.mxu0 %v8138_v44  ;;  %7485 = vmatprep.subr.bf16.mxu1 %v8140_v46  ;;  %v8186_v44 = vcombine.high %v363_v36, %v367_v37  ;;  %v8188_v46 = vcombine.high %v364_v40, %v368_v41  ;;  %v408_v27 = vld [vmem:[%s9246_s25 + $0x5f8] sm:$0xff] }
 0x24b   : > { %7158 = vmatpush1.bf16.msra.mxu0 %v8137_v55  ;;  %7486 = vmatpush1.bf16.msra.mxu1 %v8139_v56  ;;  %v8187_v55 = vcombine.low %v364_v40, %v368_v41  ;;  %v8194_v56 = vcombine.high %v371_v47, %v375_v48  ;;  %v8227_v41 = vcombine.low %v404_v26, %v408_v27  ;;  %v420_v47 = vld [vmem:[%s9246_s25 + $0x658] sm:$0xff] }
 0x24c   : > { %7159 = vmatprep.subr.bf16.mxu0 %v8146_v57  ;;  %7487 = vmatprep.subr.bf16.mxu1 %v8148_v58  ;;  %v8196_v57 = vcombine.high %v372_v51, %v376_v53  ;;  %v379_v58 = vld [vmem:[%s9246_s25 + $0x510] sm:$0xff]  ;;  %v424_v48 = vld [vmem:[%s9246_s25 + $0x678] sm:$0xff] }
 0x24d   : > { %v8201_v12 = vcombine.low %v379_v58, %v383_v61 }
 0x24f   : > { %7160 = vmatpush1.bf16.msra.mxu0 %v8145_v3  ;;  %7488 = vmatpush1.bf16.msra.mxu1 %v8147_v4  ;;  %v8202_v3 = vcombine.high %v379_v58, %v383_v61  ;;  %v8204_v4 = vcombine.high %v380_v62, %v384_v63  ;;  %v428_v58 = vld [vmem:[%s9246_s25 + $0x698] sm:$0xff]  ;;  %v8243_v63 = vcombine.low %v420_v47, %v424_v48 }
 0x250   : > { %7161 = vmatprep.subr.bf16.mxu0 %v8154_v5  ;;  %7489 = vmatprep.subr.bf16.mxu1 %v8156_v30  ;;  %v387_v5 = vld [vmem:[%s9246_s25 + $0x550] sm:$0xff]  ;;  %v432_v61 = vld [vmem:[%s9246_s25 + $0x6b8] sm:$0xff] }
 0x251   : > { %v391_v30 = vld [vmem:[%s9246_s25 + $0x570] sm:$0xff] }
 0x252   : > { %v8209_v17 = vcombine.low %v387_v5, %v391_v30 }
 0x253   : > { %7162 = vmatpush1.bf16.msra.mxu0 %v8153_v14  ;;  %7490 = vmatpush1.bf16.msra.mxu1 %v8155_v15  ;;  %v8210_v14 = vcombine.high %v387_v5, %v391_v30  ;;  %v8212_v15 = vcombine.high %v388_v7, %v392_v11  ;;  %v436_v5 = vld [vmem:[%s9246_s25 + $0x6d8] sm:$0xff]  ;;  %v8251_v11 = vcombine.low %v428_v58, %v432_v61 }
 0x254   : > { %7163 = vmatprep.subr.bf16.mxu0 %v8162_v16  ;;  %7491 = vmatprep.subr.bf16.mxu1 %v8164_v2  ;;  %v395_v16 = vld [vmem:[%s9246_s25 + $0x590] sm:$0xff]  ;;  %v440_v30 = vld [vmem:[%s9246_s25 + $0x6f8] sm:$0xff] }
 0x255   : > { %v399_v2 = vld [vmem:[%s9246_s25 + $0x5b0] sm:$0xff] }
 0x256   : > { %v8217_v29 = vcombine.low %v395_v16, %v399_v2 }
 0x257   : > { %7164 = vmatpush1.bf16.msra.mxu0 %v8161_v22  ;;  %7492 = vmatpush1.bf16.msra.mxu1 %v8163_v10  ;;  %v8218_v22 = vcombine.high %v395_v16, %v399_v2  ;;  %v8220_v10 = vcombine.high %v396_v18, %v400_v54  ;;  %v444_v16 = vld [vmem:[%s9246_s25 + $0x718] sm:$0xff]  ;;  %v8259_v54 = vcombine.low %v436_v5, %v440_v30 }
 0x258   : > { %7174 = vmatprep.subr.bf16.mxu0 %v8170_v23  ;;  %7502 = vmatprep.subr.bf16.mxu1 %v8172_v25  ;;  %v403_v23 = vld [vmem:[%s9246_s25 + $0x5d0] sm:$0xff]  ;;  %v448_v2 = vld [vmem:[%s9246_s25 + $0x738] sm:$0xff] }
 0x259   : > { %v407_v25 = vld [vmem:[%s9246_s25 + $0x5f0] sm:$0xff] }
 0x25a   : > { %7166 = vmatmul.mubr.bf16.vlgmr.msra.gmra.mrb[4].mxu0 %v9346_v24  ;;  %7494 = vmatmul.mubr.bf16.vlgmr.msra.gmra.mrb[4].mxu1 %v9346_v24  ;;  %v8185_v24 = vcombine.low %v363_v36, %v367_v37  ;;  %v412_v36 = vld [vmem:[%s9246_s25 + $0x618] sm:$0xff]  ;;  %v8225_v40 = vcombine.low %v403_v23, %v407_v25 }
 0x25b   : > { %7175 = vmatpush1.bf16.msra.mxu0 %v8169_v32  ;;  %7503 = vmatpush1.bf16.msra.mxu1 %v8171_v0  ;;  %v8226_v32 = vcombine.high %v403_v23, %v407_v25  ;;  %v8228_v0 = vcombine.high %v404_v26, %v408_v27  ;;  %v416_v37 = vld [vmem:[%s9246_s25 + $0x638] sm:$0xff]  ;;  %v8267_v27 = vcombine.low %v444_v16, %v448_v2 }
 0x25c   : > { %7176 = vmatprep.subr.bf16.mxu0 %v8178_v34  ;;  %7504 = vmatprep.subr.bf16.mxu1 %v8180_v35  ;;  %v411_v34 = vld [vmem:[%s9246_s25 + $0x610] sm:$0xff]  ;;  %v452_v23 = vld [vmem:[%s9246_s25 + $0x758] sm:$0xff] }
 0x25d   : > { %7206 = vmatprep.mubr.bf16.mxu0 %v9354_v33  ;;  %7534 = vmatprep.mubr.bf16.mxu1 %v9354_v33  ;;  %v8195_v33 = vcombine.low %v372_v51, %v376_v53  ;;  %v415_v35 = vld [vmem:[%s9246_s25 + $0x630] sm:$0xff]  ;;  %v8235_v53 = vcombine.low %v412_v36, %v416_v37  ;;  %v456_v25 = vld [vmem:[%s9246_s25 + $0x778] sm:$0xff] }
 0x25e   : > { %v8233_v51 = vcombine.low %v411_v34, %v415_v35 }
 0x25f   : > { %7177 = vmatpush1.bf16.msra.mxu0 %v8177_v42  ;;  %7505 = vmatpush1.bf16.msra.mxu1 %v8179_v43  ;;  %v8234_v42 = vcombine.high %v411_v34, %v415_v35  ;;  %v8236_v43 = vcombine.high %v412_v36, %v416_v37  ;;  %v460_v34 = vld [vmem:[%s9246_s25 + $0x798] sm:$0xff]  ;;  %v8275_v37 = vcombine.low %v452_v23, %v456_v25 }
 0x260   : > { %7178 = vmatprep.subr.bf16.mxu0 %v8186_v44  ;;  %7506 = vmatprep.subr.bf16.mxu1 %v8188_v46  ;;  %v419_v44 = vld [vmem:[%s9246_s25 + $0x650] sm:$0xff]  ;;  %v464_v35 = vld [vmem:[%s9246_s25 + $0x7b8] sm:$0xff] }
 0x261   : > { %v423_v46 = vld [vmem:[%s9246_s25 + $0x670] sm:$0xff] }
 0x262   : > { %v8241_v62 = vcombine.low %v419_v44, %v423_v46 }
 0x263   : > { %7179 = vmatpush1.bf16.msra.mxu0 %v8185_v24  ;;  %7507 = vmatpush1.bf16.msra.mxu1 %v8187_v55  ;;  %v8242_v24 = vcombine.high %v419_v44, %v423_v46  ;;  %v8244_v55 = vcombine.high %v420_v47, %v424_v48  ;;  %v468_v44 = vld [vmem:[%s9246_s25 + $0x7d8] sm:$0xff]  ;;  %v8283_v48 = vcombine.low %v460_v34, %v464_v35 }
 0x264   : > { %7180 = vmatprep.subr.bf16.mxu0 %v8194_v56  ;;  %7508 = vmatprep.subr.bf16.mxu1 %v8196_v57  ;;  %v427_v56 = vld [vmem:[%s9246_s25 + $0x690] sm:$0xff]  ;;  %v472_v46 = vld [vmem:[%s9246_s25 + $0x7f8] sm:$0xff] }
 0x265   : > { %v431_v57 = vld [vmem:[%s9246_s25 + $0x6b0] sm:$0xff] }
 0x266   : > { %v8249_v7 = vcombine.low %v427_v56, %v431_v57 }
 0x267   : > { %7181 = vmatpush1.bf16.msra.mxu0 %v8193_v9  ;;  %7509 = vmatpush1.bf16.msra.mxu1 %v8195_v33  ;;  %v8250_v9 = vcombine.high %v427_v56, %v431_v57  ;;  %v8252_v33 = vcombine.high %v428_v58, %v432_v61  ;;  %v476_v56 = vld [vmem:[%s9246_s25 + $0x818] sm:$0xff]  ;;  %v8291_v61 = vcombine.low %v468_v44, %v472_v46 }
 0x268   : > { %7182 = vmatprep.subr.bf16.mxu0 %v8202_v3  ;;  %7510 = vmatprep.subr.bf16.mxu1 %v8204_v4  ;;  %v435_v3 = vld [vmem:[%s9246_s25 + $0x6d0] sm:$0xff]  ;;  %v480_v57 = vld [vmem:[%s9246_s25 + $0x838] sm:$0xff] }
 0x269   : > { %v439_v4 = vld [vmem:[%s9246_s25 + $0x6f0] sm:$0xff] }
 0x26a   : > { %v8257_v18 = vcombine.low %v435_v3, %v439_v4 }
 0x26b   : > { %7183 = vmatpush1.bf16.msra.mxu0 %v8201_v12  ;;  %7511 = vmatpush1.bf16.msra.mxu1 %v8203_v13  ;;  %v8258_v12 = vcombine.high %v435_v3, %v439_v4  ;;  %v8260_v13 = vcombine.high %v436_v5, %v440_v30  ;;  %v484_v3 = vld [vmem:[%s9246_s25 + $0x858] sm:$0xff]  ;;  %v8299_v30 = vcombine.low %v476_v56, %v480_v57 }
 0x26c   : > { %7184 = vmatprep.subr.bf16.mxu0 %v8210_v14  ;;  %7512 = vmatprep.subr.bf16.mxu1 %v8212_v15  ;;  %v443_v14 = vld [vmem:[%s9246_s25 + $0x710] sm:$0xff]  ;;  %v488_v4 = vld [vmem:[%s9246_s25 + $0x878] sm:$0xff] }
 0x26d   : > { %v447_v15 = vld [vmem:[%s9246_s25 + $0x730] sm:$0xff] }
 0x26e   : > { %v8265_v26 = vcombine.low %v443_v14, %v447_v15 }
 0x26f   : > { %7185 = vmatpush1.bf16.msra.mxu0 %v8209_v17  ;;  %7513 = vmatpush1.bf16.msra.mxu1 %v8211_v21  ;;  %v8266_v17 = vcombine.high %v443_v14, %v447_v15  ;;  %v8268_v21 = vcombine.high %v444_v16, %v448_v2  ;;  %v492_v14 = vld [vmem:[%s9246_s25 + $0x898] sm:$0xff]  ;;  %v8307_v2 = vcombine.low %v484_v3, %v488_v4 }
 0x270   : > { %7186 = vmatprep.subr.bf16.mxu0 %v8218_v22  ;;  %7514 = vmatprep.subr.bf16.mxu1 %v8220_v10  ;;  %v451_v22 = vld [vmem:[%s9246_s25 + $0x750] sm:$0xff]  ;;  %v496_v15 = vld [vmem:[%s9246_s25 + $0x8b8] sm:$0xff] }
 0x271   : > { %v455_v10 = vld [vmem:[%s9246_s25 + $0x770] sm:$0xff] }
 0x272   : > { %v8273_v36 = vcombine.low %v451_v22, %v455_v10 }
 0x273   : > { %7187 = vmatpush1.bf16.msra.mxu0 %v8217_v29  ;;  %7515 = vmatpush1.bf16.msra.mxu1 %v8219_v31  ;;  %v8274_v29 = vcombine.high %v451_v22, %v455_v10  ;;  %v8276_v31 = vcombine.high %v452_v23, %v456_v25  ;;  %v500_v22 = vld [vmem:[%s9246_s25 + $0x8d8] sm:$0xff]  ;;  %v8315_v23 = vcombine.low %v492_v14, %v496_v15 }
 0x274   : > { %7188 = vmatprep.subr.bf16.mxu0 %v8226_v32  ;;  %7516 = vmatprep.subr.bf16.mxu1 %v8228_v0  ;;  %v459_v32 = vld [vmem:[%s9246_s25 + $0x790] sm:$0xff]  ;;  %v504_v10 = vld [vmem:[%s9246_s25 + $0x8f8] sm:$0xff] }
 0x275   : > { %v463_v0 = vld [vmem:[%s9246_s25 + $0x7b0] sm:$0xff] }
 0x276   : > { %v8281_v47 = vcombine.low %v459_v32, %v463_v0 }
 0x277   : > { %7189 = vmatpush1.bf16.msra.mxu0 %v8225_v40  ;;  %7517 = vmatpush1.bf16.msra.mxu1 %v8227_v41  ;;  %v8282_v40 = vcombine.high %v459_v32, %v463_v0  ;;  %v8284_v41 = vcombine.high %v460_v34, %v464_v35  ;;  %v512_v32 = vld [vmem:[%s9246_s25 + $0x938] sm:$0xff] }
 0x278   : > { %7190 = vmatprep.subr.bf16.mxu0 %v8234_v42  ;;  %7518 = vmatprep.subr.bf16.mxu1 %v8236_v43  ;;  %v467_v42 = vld [vmem:[%s9246_s25 + $0x7d0] sm:$0xff] }
 0x279   : > { %v471_v43 = vld [vmem:[%s9246_s25 + $0x7f0] sm:$0xff] }
 0x27a   : > { %v8289_v58 = vcombine.low %v467_v42, %v471_v43 }
 0x27b   : > { %7191 = vmatpush1.bf16.msra.mxu0 %v8233_v51  ;;  %7519 = vmatpush1.bf16.msra.mxu1 %v8235_v53  ;;  %v8290_v51 = vcombine.high %v467_v42, %v471_v43  ;;  %v8292_v53 = vcombine.high %v468_v44, %v472_v46 }
 0x27c   : > { %7192 = vmatprep.subr.bf16.mxu0 %v8242_v24  ;;  %7520 = vmatprep.subr.bf16.mxu1 %v8244_v55  ;;  %v475_v24 = vld [vmem:[%s9246_s25 + $0x810] sm:$0xff] }
 0x27d   : > { %v479_v55 = vld [vmem:[%s9246_s25 + $0x830] sm:$0xff] }
 0x27e   : > { %v8297_v5 = vcombine.low %v475_v24, %v479_v55 }
 0x27f   : > { %7193 = vmatpush1.bf16.msra.mxu0 %v8241_v62  ;;  %7521 = vmatpush1.bf16.msra.mxu1 %v8243_v63  ;;  %v8298_v62 = vcombine.high %v475_v24, %v479_v55  ;;  %v8300_v63 = vcombine.high %v476_v56, %v480_v57 }
 0x280   : > { %7194 = vmatprep.subr.bf16.mxu0 %v8250_v9  ;;  %7522 = vmatprep.subr.bf16.mxu1 %v8252_v33  ;;  %v483_v9 = vld [vmem:[%s9246_s25 + $0x850] sm:$0xff] }
 0x281   : > { %v487_v33 = vld [vmem:[%s9246_s25 + $0x870] sm:$0xff] }
 0x282   : > { %v8305_v16 = vcombine.low %v483_v9, %v487_v33 }
 0x283   : > { %7195 = vmatpush1.bf16.msra.mxu0 %v8249_v7  ;;  %7523 = vmatpush1.bf16.msra.mxu1 %v8251_v11  ;;  %v8306_v7 = vcombine.high %v483_v9, %v487_v33  ;;  %v8308_v11 = vcombine.high %v484_v3, %v488_v4 }
 0x284   : > { %7196 = vmatprep.subr.bf16.mxu0 %v8258_v12  ;;  %7524 = vmatprep.subr.bf16.mxu1 %v8260_v13  ;;  %v491_v12 = vld [vmem:[%s9246_s25 + $0x890] sm:$0xff] }
 0x285   : > { %v495_v13 = vld [vmem:[%s9246_s25 + $0x8b0] sm:$0xff] }
 0x287   : > { %7197 = vmatpush1.bf16.msra.mxu0 %v8257_v18  ;;  %7525 = vmatpush1.bf16.msra.mxu1 %v8259_v54  ;;  %v8314_v18 = vcombine.high %v491_v12, %v495_v13  ;;  %v8316_v54 = vcombine.high %v492_v14, %v496_v15 }
 0x288   : > { %7198 = vmatprep.subr.bf16.mxu0 %v8266_v17  ;;  %7526 = vmatprep.subr.bf16.mxu1 %v8268_v21  ;;  %v499_v17 = vld [vmem:[%s9246_s25 + $0x8d0] sm:$0xff] }
 0x289   : > { %v503_v21 = vld [vmem:[%s9246_s25 + $0x8f0] sm:$0xff] }
 0x28a   : > { %v8322_v25 = vcombine.high %v499_v17, %v503_v21  ;;  %v8321_v0 = vcombine.low %v499_v17, %v503_v21 }
 0x28b   : > { %7199 = vmatpush1.bf16.msra.mxu0 %v8265_v26  ;;  %7527 = vmatpush1.bf16.msra.mxu1 %v8267_v27  ;;  %v8324_v26 = vcombine.high %v500_v22, %v504_v10  ;;  %v507_v27 = vld [vmem:[%s9246_s25 + $0x910] sm:$0xff] }
 0x28c   : > { %7200 = vmatprep.subr.bf16.mxu0 %v8274_v29  ;;  %7528 = vmatprep.subr.bf16.mxu1 %v8276_v31  ;;  %v511_v29 = vld [vmem:[%s9246_s25 + $0x930] sm:$0xff]  ;;  %v508_v31 = vld [vmem:[%s9246_s25 + $0x918] sm:$0xff] }
 0x28d   : > { %v8330_v34 = vcombine.high %v507_v27, %v511_v29  ;;  %v8332_v35 = vcombine.high %v508_v31, %v512_v32  ;;  %v8329_v42 = vcombine.low %v507_v27, %v511_v29  ;;  %v8331_v43 = vcombine.low %v508_v31, %v512_v32 }
 0x28f   : > { %7201 = vmatpush1.bf16.msra.mxu0 %v8273_v36  ;;  %7529 = vmatpush1.bf16.msra.mxu1 %v8275_v37  ;;  %v515_v36 = vld [vmem:[%s9246_s25 + $0x950] sm:$0xff] }
 0x290   : > { %7202 = vmatprep.subr.bf16.mxu0 %v8282_v40  ;;  %7530 = vmatprep.subr.bf16.mxu1 %v8284_v41  ;;  %v519_v37 = vld [vmem:[%s9246_s25 + $0x970] sm:$0xff]  ;;  %v516_v40 = vld [vmem:[%s9246_s25 + $0x958] sm:$0xff] }
 0x291   : > { %v520_v41 = vld [vmem:[%s9246_s25 + $0x978] sm:$0xff]  ;;  %v8338_v44 = vcombine.high %v515_v36, %v519_v37  ;;  %v8337_v24 = vcombine.low %v515_v36, %v519_v37 }
 0x292   : > { %v8340_v46 = vcombine.high %v516_v40, %v520_v41  ;;  %v8339_v55 = vcombine.low %v516_v40, %v520_v41 }
 0x293   : > { %7203 = vmatpush1.bf16.msra.mxu0 %v8281_v47  ;;  %7531 = vmatpush1.bf16.msra.mxu1 %v8283_v48  ;;  %v523_v47 = vld [vmem:[%s9246_s25 + $0x990] sm:$0xff] }
 0x294   : > { %7204 = vmatprep.subr.bf16.mxu0 %v8290_v51  ;;  %7532 = vmatprep.subr.bf16.mxu1 %v8292_v53  ;;  %v527_v48 = vld [vmem:[%s9246_s25 + $0x9b0] sm:$0xff]  ;;  %v524_v51 = vld [vmem:[%s9246_s25 + $0x998] sm:$0xff] }
 0x295   : > { %v528_v53 = vld [vmem:[%s9246_s25 + $0x9b8] sm:$0xff]  ;;  %v8346_v56 = vcombine.high %v523_v47, %v527_v48  ;;  %v8345_v9 = vcombine.low %v523_v47, %v527_v48 }
 0x296   : > { %v8348_v57 = vcombine.high %v524_v51, %v528_v53  ;;  %v8347_v33 = vcombine.low %v524_v51, %v528_v53 }
 0x297   : > { %7205 = vmatpush1.bf16.msra.mxu0 %v8289_v58  ;;  %7533 = vmatpush1.bf16.msra.mxu1 %v8291_v61  ;;  %v531_v58 = vld [vmem:[%s9246_s25 + $0x9d0] sm:$0xff] }
 0x298   : > { %7215 = vmatprep.subr.bf16.mxu0 %v8298_v62  ;;  %7543 = vmatprep.subr.bf16.mxu1 %v8300_v63  ;;  %v535_v61 = vld [vmem:[%s9246_s25 + $0x9f0] sm:$0xff]  ;;  %v532_v62 = vld [vmem:[%s9246_s25 + $0x9d8] sm:$0xff] }
 0x299   : > { %v536_v63 = vld [vmem:[%s9246_s25 + $0x9f8] sm:$0xff]  ;;  %v8354_v3 = vcombine.high %v531_v58, %v535_v61 }
 0x29a   : > { %7207 = vmatmul.mubr.bf16.vlgmr.msra.gmra.mrb[4].mxu0 %v9429_v39  ;;  %7535 = vmatmul.mubr.bf16.vlgmr.msra.gmra.mrb[4].mxu1 %v9429_v39  ;;  %v8313_v39 = vcombine.low %v491_v12, %v495_v13  ;;  %v8356_v4 = vcombine.high %v532_v62, %v536_v63  ;;  %v8353_v12 = vcombine.low %v531_v58, %v535_v61 }
 0x29b   : > { %7216 = vmatpush1.bf16.msra.mxu0 %v8297_v5  ;;  %7544 = vmatpush1.bf16.msra.mxu1 %v8299_v30  ;;  %v539_v5 = vld [vmem:[%s9246_s25 + $0xa10] sm:$0xff]  ;;  %v8355_v13 = vcombine.low %v532_v62, %v536_v63 }
 0x29c   : > { %7217 = vmatprep.subr.bf16.mxu0 %v8306_v7  ;;  %7545 = vmatprep.subr.bf16.mxu1 %v8308_v11  ;;  %v543_v30 = vld [vmem:[%s9246_s25 + $0xa30] sm:$0xff]  ;;  %v540_v7 = vld [vmem:[%s9246_s25 + $0xa18] sm:$0xff] }
 0x29d   : > { %7247 = vmatprep.mubr.bf16.mxu0 %v9436_v49  ;;  %7575 = vmatprep.mubr.bf16.mxu1 %v9436_v49  ;;  %v8323_v49 = vcombine.low %v500_v22, %v504_v10  ;;  %v544_v11 = vld [vmem:[%s9246_s25 + $0xa38] sm:$0xff]  ;;  %v8362_v14 = vcombine.high %v539_v5, %v543_v30  ;;  %v8361_v17 = vcombine.low %v539_v5, %v543_v30 }
 0x29e   : > { %v8364_v15 = vcombine.high %v540_v7, %v544_v11  ;;  %v8363_v21 = vcombine.low %v540_v7, %v544_v11 }
 0x29f   : > { %7218 = vmatpush1.bf16.msra.mxu0 %v8305_v16  ;;  %7546 = vmatpush1.bf16.msra.mxu1 %v8307_v2  ;;  %v547_v16 = vld [vmem:[%s9246_s25 + $0xa50] sm:$0xff] }
 0x2a0   : > { %7219 = vmatprep.subr.bf16.mxu0 %v8314_v18  ;;  %7547 = vmatprep.subr.bf16.mxu1 %v8316_v54  ;;  %v551_v2 = vld [vmem:[%s9246_s25 + $0xa70] sm:$0xff]  ;;  %v548_v18 = vld [vmem:[%s9246_s25 + $0xa58] sm:$0xff] }
 0x2a1   : > { %v552_v54 = vld [vmem:[%s9246_s25 + $0xa78] sm:$0xff]  ;;  %v8370_v22 = vcombine.high %v547_v16, %v551_v2  ;;  %v8369_v27 = vcombine.low %v547_v16, %v551_v2 }
 0x2a2   : > { %v8372_v10 = vcombine.high %v548_v18, %v552_v54  ;;  %v8371_v29 = vcombine.low %v548_v18, %v552_v54 }
 0x2a3   : > { %7220 = vmatpush1.bf16.msra.mxu0 %v8313_v39  ;;  %7548 = vmatpush1.bf16.msra.mxu1 %v8315_v23  ;;  %v555_v39 = vld [vmem:[%s9246_s25 + $0xa90] sm:$0xff] }
 0x2a4   : > { %7221 = vmatprep.subr.bf16.mxu0 %v8322_v25  ;;  %7549 = vmatprep.subr.bf16.mxu1 %v8324_v26  ;;  %v559_v23 = vld [vmem:[%s9246_s25 + $0xab0] sm:$0xff]  ;;  %v556_v25 = vld [vmem:[%s9246_s25 + $0xa98] sm:$0xff] }
 0x2a5   : > { %v560_v26 = vld [vmem:[%s9246_s25 + $0xab8] sm:$0xff]  ;;  %v8378_v31 = vcombine.high %v555_v39, %v559_v23  ;;  %v8377_v36 = vcombine.low %v555_v39, %v559_v23 }
 0x2a6   : > { %v8380_v32 = vcombine.high %v556_v25, %v560_v26  ;;  %v8379_v37 = vcombine.low %v556_v25, %v560_v26 }
 0x2a7   : > { %7222 = vmatpush1.bf16.msra.mxu0 %v8321_v0  ;;  %7550 = vmatpush1.bf16.msra.mxu1 %v8323_v49  ;;  %v563_v0 = vld [vmem:[%s9246_s25 + $0xad0] sm:$0xff] }
 0x2a8   : > { %7223 = vmatprep.subr.bf16.mxu0 %v8330_v34  ;;  %7551 = vmatprep.subr.bf16.mxu1 %v8332_v35  ;;  %v567_v49 = vld [vmem:[%s9246_s25 + $0xaf0] sm:$0xff]  ;;  %v564_v34 = vld [vmem:[%s9246_s25 + $0xad8] sm:$0xff] }
 0x2a9   : > { %v568_v35 = vld [vmem:[%s9246_s25 + $0xaf8] sm:$0xff]  ;;  %v8386_v40 = vcombine.high %v563_v0, %v567_v49  ;;  %v8385_v47 = vcombine.low %v563_v0, %v567_v49 }
 0x2aa   : > { %v8388_v41 = vcombine.high %v564_v34, %v568_v35  ;;  %v8387_v48 = vcombine.low %v564_v34, %v568_v35 }
 0x2ab   : > { %7224 = vmatpush1.bf16.msra.mxu0 %v8329_v42  ;;  %7552 = vmatpush1.bf16.msra.mxu1 %v8331_v43  ;;  %v571_v42 = vld [vmem:[%s9246_s25 + $0xb10] sm:$0xff] }
 0x2ac   : > { %7225 = vmatprep.subr.bf16.mxu0 %v8338_v44  ;;  %7553 = vmatprep.subr.bf16.mxu1 %v8340_v46  ;;  %v575_v43 = vld [vmem:[%s9246_s25 + $0xb30] sm:$0xff]  ;;  %v572_v44 = vld [vmem:[%s9246_s25 + $0xb18] sm:$0xff] }
 0x2ad   : > { %v576_v46 = vld [vmem:[%s9246_s25 + $0xb38] sm:$0xff]  ;;  %v8394_v51 = vcombine.high %v571_v42, %v575_v43  ;;  %v8393_v58 = vcombine.low %v571_v42, %v575_v43 }
 0x2ae   : > { %v8396_v53 = vcombine.high %v572_v44, %v576_v46  ;;  %v8395_v61 = vcombine.low %v572_v44, %v576_v46 }
 0x2af   : > { %7226 = vmatpush1.bf16.msra.mxu0 %v8337_v24  ;;  %7554 = vmatpush1.bf16.msra.mxu1 %v8339_v55  ;;  %v579_v24 = vld [vmem:[%s9246_s25 + $0xb50] sm:$0xff] }
 0x2b0   : > { %7227 = vmatprep.subr.bf16.mxu0 %v8346_v56  ;;  %7555 = vmatprep.subr.bf16.mxu1 %v8348_v57  ;;  %v583_v55 = vld [vmem:[%s9246_s25 + $0xb70] sm:$0xff]  ;;  %v580_v56 = vld [vmem:[%s9246_s25 + $0xb58] sm:$0xff] }
 0x2b1   : > { %v584_v57 = vld [vmem:[%s9246_s25 + $0xb78] sm:$0xff]  ;;  %v8402_v62 = vcombine.high %v579_v24, %v583_v55  ;;  %v8401_v5 = vcombine.low %v579_v24, %v583_v55 }
 0x2b2   : > { %v8404_v63 = vcombine.high %v580_v56, %v584_v57  ;;  %v8403_v30 = vcombine.low %v580_v56, %v584_v57  ;;  %v635_v57 = vld [vmem:[%s9246_s25 + $0xd10] sm:$0xff] }
 0x2b3   : > { %7228 = vmatpush1.bf16.msra.mxu0 %v8345_v9  ;;  %7556 = vmatpush1.bf16.msra.mxu1 %v8347_v33  ;;  %v587_v9 = vld [vmem:[%s9246_s25 + $0xb90] sm:$0xff] }
 0x2b4   : > { %7229 = vmatprep.subr.bf16.mxu0 %v8354_v3  ;;  %7557 = vmatprep.subr.bf16.mxu1 %v8356_v4  ;;  %v591_v33 = vld [vmem:[%s9246_s25 + $0xbb0] sm:$0xff]  ;;  %v588_v3 = vld [vmem:[%s9246_s25 + $0xb98] sm:$0xff] }
 0x2b5   : > { %v592_v4 = vld [vmem:[%s9246_s25 + $0xbb8] sm:$0xff]  ;;  %v8410_v7 = vcombine.high %v587_v9, %v591_v33  ;;  %v8409_v16 = vcombine.low %v587_v9, %v591_v33 }
 0x2b6   : > { %v8412_v11 = vcombine.high %v588_v3, %v592_v4  ;;  %v8411_v2 = vcombine.low %v588_v3, %v592_v4  ;;  %v9200_v3 = vmov 1983009808  }
 0x2b7   : > { %7230 = vmatpush1.bf16.msra.mxu0 %v8353_v12  ;;  %7558 = vmatpush1.bf16.msra.mxu1 %v8355_v13  ;;  %v595_v12 = vld [vmem:[%s9246_s25 + $0xbd0] sm:$0xff]  ;;  %v7800_v4 = vunpack.c.l.s4 %v9200_v3  ;;  %v680_v3 = vld [vmem:[%s9246_s25 + $0xe78] sm:$0xff] }
 0x2b8   : > { %7231 = vmatprep.subr.bf16.mxu0 %v8362_v14  ;;  %7559 = vmatprep.subr.bf16.mxu1 %v8364_v15  ;;  %v599_v13 = vld [vmem:[%s9246_s25 + $0xbf0] sm:$0xff]  ;;  %v596_v14 = vld [vmem:[%s9246_s25 + $0xbd8] sm:$0xff] }
 0x2b9   : > { %v600_v15 = vld [vmem:[%s9246_s25 + $0xbf8] sm:$0xff]  ;;  %v8418_v18 = vcombine.high %v595_v12, %v599_v13  ;;  %v8417_v39 = vcombine.low %v595_v12, %v599_v13 }
 0x2ba   : > { %v8420_v54 = vcombine.high %v596_v14, %v600_v15  ;;  %v8419_v23 = vcombine.low %v596_v14, %v600_v15  ;;  %v7801_v15 = vunpack.c.0.s8 %v7800_v4 }
 0x2bb   : > { %7232 = vmatpush1.bf16.msra.mxu0 %v8361_v17  ;;  %7560 = vmatpush1.bf16.msra.mxu1 %v8363_v21  ;;  %v603_v17 = vld [vmem:[%s9246_s25 + $0xc10] sm:$0xff] }
 0x2bc   : > { %7233 = vmatprep.subr.bf16.mxu0 %v8370_v22  ;;  %7561 = vmatprep.subr.bf16.mxu1 %v8372_v10  ;;  %v607_v21 = vld [vmem:[%s9246_s25 + $0xc30] sm:$0xff]  ;;  %v604_v22 = vld [vmem:[%s9246_s25 + $0xc18] sm:$0xff] }
 0x2bd   : > { %v608_v10 = vld [vmem:[%s9246_s25 + $0xc38] sm:$0xff]  ;;  %v8426_v25 = vcombine.high %v603_v17, %v607_v21  ;;  %v8425_v0 = vcombine.low %v603_v17, %v607_v21 }
 0x2be   : > { %v8428_v26 = vcombine.high %v604_v22, %v608_v10  ;;  %v8427_v49 = vcombine.low %v604_v22, %v608_v10  ;;  %v656_v17 = vld [vmem:[%s9246_s25 + $0xdb8] sm:$0xff] }
 0x2bf   : > { %7234 = vmatpush1.bf16.msra.mxu0 %v8369_v27  ;;  %7562 = vmatpush1.bf16.msra.mxu1 %v8371_v29  ;;  %v611_v27 = vld [vmem:[%s9246_s25 + $0xc50] sm:$0xff] }
 0x2c0   : > { %7235 = vmatprep.subr.bf16.mxu0 %v8378_v31  ;;  %7563 = vmatprep.subr.bf16.mxu1 %v8380_v32  ;;  %v615_v29 = vld [vmem:[%s9246_s25 + $0xc70] sm:$0xff]  ;;  %v612_v31 = vld [vmem:[%s9246_s25 + $0xc58] sm:$0xff] }
 0x2c1   : > { %v616_v32 = vld [vmem:[%s9246_s25 + $0xc78] sm:$0xff]  ;;  %v8434_v34 = vcombine.high %v611_v27, %v615_v29  ;;  %v8433_v42 = vcombine.low %v611_v27, %v615_v29  ;;  %v663_v27 = vld [vmem:[%s9246_s25 + $0xdf0] sm:$0xff] }
 0x2c2   : > { %v8436_v35 = vcombine.high %v612_v31, %v616_v32  ;;  %v8435_v43 = vcombine.low %v612_v31, %v616_v32  ;;  %v660_v32 = vld [vmem:[%s9246_s25 + $0xdd8] sm:$0xff] }
 0x2c3   : > { %7236 = vmatpush1.bf16.msra.mxu0 %v8377_v36  ;;  %7564 = vmatpush1.bf16.msra.mxu1 %v8379_v37  ;;  %v619_v36 = vld [vmem:[%s9246_s25 + $0xc90] sm:$0xff] }
 0x2c4   : > { %7237 = vmatprep.subr.bf16.mxu0 %v8386_v40  ;;  %7565 = vmatprep.subr.bf16.mxu1 %v8388_v41  ;;  %v623_v37 = vld [vmem:[%s9246_s25 + $0xcb0] sm:$0xff]  ;;  %v620_v40 = vld [vmem:[%s9246_s25 + $0xc98] sm:$0xff] }
 0x2c5   : > { %v624_v41 = vld [vmem:[%s9246_s25 + $0xcb8] sm:$0xff]  ;;  %v8442_v44 = vcombine.high %v619_v36, %v623_v37 }
 0x2c6   : > { %v8444_v46 = vcombine.high %v620_v40, %v624_v41  ;;  %v8443_v24 = vcombine.low %v620_v40, %v624_v41 }
 0x2c7   : > { %7238 = vmatpush1.bf16.msra.mxu0 %v8385_v47  ;;  %7566 = vmatpush1.bf16.msra.mxu1 %v8387_v48  ;;  %v627_v47 = vld [vmem:[%s9246_s25 + $0xcd0] sm:$0xff] }
 0x2c8   : > { %7239 = vmatprep.subr.bf16.mxu0 %v8394_v51  ;;  %7567 = vmatprep.subr.bf16.mxu1 %v8396_v53  ;;  %v631_v48 = vld [vmem:[%s9246_s25 + $0xcf0] sm:$0xff]  ;;  %v628_v51 = vld [vmem:[%s9246_s25 + $0xcd8] sm:$0xff] }
 0x2c9   : > { %v632_v53 = vld [vmem:[%s9246_s25 + $0xcf8] sm:$0xff]  ;;  %v8450_v55 = vcombine.high %v627_v47, %v631_v48 }
 0x2ca   : > { %v8452_v56 = vcombine.high %v628_v51, %v632_v53 }
 0x2cb   : > { %7240 = vmatpush1.bf16.msra.mxu0 %v8393_v58  ;;  %7568 = vmatpush1.bf16.msra.mxu1 %v8395_v61  ;;  %v639_v58 = vld [vmem:[%s9246_s25 + $0xd30] sm:$0xff]  ;;  %v636_v61 = vld [vmem:[%s9246_s25 + $0xd18] sm:$0xff] }
 0x2cc   : > { %7241 = vmatprep.subr.bf16.mxu0 %v8402_v62  ;;  %7569 = vmatprep.subr.bf16.mxu1 %v8404_v63  ;;  %v640_v62 = vld [vmem:[%s9246_s25 + $0xd38] sm:$0xff]  ;;  %v8449_v63 = vcombine.low %v627_v47, %v631_v48  ;;  %v8458_v9 = vcombine.high %v635_v57, %v639_v58  ;;  %v8457_v12 = vcombine.low %v635_v57, %v639_v58  ;;  %v667_v48 = vld [vmem:[%s9246_s25 + $0xe10] sm:$0xff] }
 0x2cd   : > { %v8460_v33 = vcombine.high %v636_v61, %v640_v62  ;;  %v8459_v13 = vcombine.low %v636_v61, %v640_v62 }
 0x2cf   : > { %7242 = vmatpush1.bf16.msra.mxu0 %v8401_v5  ;;  %7570 = vmatpush1.bf16.msra.mxu1 %v8403_v30  ;;  %v643_v5 = vld [vmem:[%s9246_s25 + $0xd50] sm:$0xff] }
 0x2d0   : > { %7243 = vmatprep.subr.bf16.mxu0 %v8410_v7  ;;  %7571 = vmatprep.subr.bf16.mxu1 %v8412_v11  ;;  %v647_v30 = vld [vmem:[%s9246_s25 + $0xd70] sm:$0xff]  ;;  %v644_v7 = vld [vmem:[%s9246_s25 + $0xd58] sm:$0xff] }
 0x2d1   : > { %v648_v11 = vld [vmem:[%s9246_s25 + $0xd78] sm:$0xff]  ;;  %v8466_v14 = vcombine.high %v643_v5, %v647_v30  ;;  %v8465_v21 = vcombine.low %v643_v5, %v647_v30 }
 0x2d2   : > { %v8467_v22 = vcombine.low %v644_v7, %v648_v11 }
 0x2d3   : > { %7244 = vmatpush1.bf16.msra.mxu0 %v8409_v16  ;;  %7572 = vmatpush1.bf16.msra.mxu1 %v8411_v2  ;;  %v8468_v16 = vcombine.high %v644_v7, %v648_v11  ;;  %v651_v2 = vld [vmem:[%s9246_s25 + $0xd90] sm:$0xff] }
 0x2d4   : > { %7245 = vmatprep.subr.bf16.mxu0 %v8418_v18  ;;  %7573 = vmatprep.subr.bf16.mxu1 %v8420_v54  ;;  %v655_v18 = vld [vmem:[%s9246_s25 + $0xdb0] sm:$0xff]  ;;  %v652_v54 = vld [vmem:[%s9246_s25 + $0xd98] sm:$0xff] }
 0x2d5   : > { %v8474_v10 = vcombine.high %v651_v2, %v655_v18  ;;  %v683_v11 = vld [vmem:[%s9246_s25 + $0xe90] sm:$0xff] }
 0x2d7   : > { %7246 = vmatpush1.bf16.msra.mxu0 %v8417_v39  ;;  %7574 = vmatpush1.bf16.msra.mxu1 %v8419_v23  ;;  %v10131_v23 = vsub.s32 %v7801_v15, %v9277_v45 }
 0x2d8   : > { %7256 = vmatprep.subr.bf16.mxu0 %v8426_v25  ;;  %7584 = vmatprep.subr.bf16.mxu1 %v8428_v26  ;;  %v8476_v25 = vcombine.high %v652_v54, %v656_v17  ;;  %v659_v26 = vld [vmem:[%s9246_s25 + $0xdd0] sm:$0xff] }
 0x2da   : > { %7248 = vmatmul.mubr.bf16.vlgmr.msra.gmra.mrb[4].mxu0 %v9504_v59  ;;  %7576 = vmatmul.mubr.bf16.vlgmr.msra.gmra.mrb[4].mxu1 %v9504_v59  ;;  %v8441_v59 = vcombine.low %v619_v36, %v623_v37  ;;  %v8473_v36 = vcombine.low %v651_v2, %v655_v18 }
 0x2db   : > { %7257 = vmatpush1.bf16.msra.mxu0 %v8425_v0  ;;  %7585 = vmatpush1.bf16.msra.mxu1 %v8427_v49  ;;  %v664_v0 = vld [vmem:[%s9246_s25 + $0xdf8] sm:$0xff] }
 0x2dc   : > { %7258 = vmatprep.subr.bf16.mxu0 %v8434_v34  ;;  %7586 = vmatprep.subr.bf16.mxu1 %v8436_v35  ;;  %v8484_v47 = vcombine.high %v660_v32, %v664_v0  ;;  %v8483_v58 = vcombine.low %v660_v32, %v664_v0  ;;  %v704_v32 = vld [vmem:[%s9246_s25 + $0xf38] sm:$0xff] }
 0x2dd   : > { %7288 = vmatprep.mubr.bf16.mxu0 %v9512_v6  ;;  %7616 = vmatprep.mubr.bf16.mxu1 %v9512_v6  ;;  %v8451_v6 = vcombine.low %v628_v51, %v632_v53  ;;  %v671_v51 = vld [vmem:[%s9246_s25 + $0xe30] sm:$0xff] }
 0x2de   : > { %v8490_v61 = vcombine.high %v667_v48, %v671_v51  ;;  %v8489_v4 = vcombine.low %v667_v48, %v671_v51  ;;  %v719_v48 = vld [vmem:[%s9246_s25 + $0xfb0] sm:$0xff]  ;;  %v716_v51 = vld [vmem:[%s9246_s25 + $0xf98] sm:$0xff] }
 0x2df   : > { %7259 = vmatpush1.bf16.msra.mxu0 %v8433_v42  ;;  %7587 = vmatpush1.bf16.msra.mxu1 %v8435_v43  ;;  %v8475_v42 = vcombine.low %v652_v54, %v656_v17  ;;  %v8482_v43 = vcombine.high %v659_v26, %v663_v27  ;;  %v691_v54 = vld [vmem:[%s9246_s25 + $0xed0] sm:$0xff] }
 0x2e0   : > { %7260 = vmatprep.subr.bf16.mxu0 %v8442_v44  ;;  %7588 = vmatprep.subr.bf16.mxu1 %v8444_v46  ;;  %v695_v17 = vld [vmem:[%s9246_s25 + $0xef0] sm:$0xff] }
 0x2e1   : > { %v8513_v0 = vcombine.low %v691_v54, %v695_v17 }
 0x2e3   : > { %7261 = vmatpush1.bf16.msra.mxu0 %v8441_v59  ;;  %7589 = vmatpush1.bf16.msra.mxu1 %v8443_v24  ;;  %v668_v59 = vld [vmem:[%s9246_s25 + $0xe18] sm:$0xff] }
 0x2e4   : > { %7262 = vmatprep.subr.bf16.mxu0 %v8450_v55  ;;  %7590 = vmatprep.subr.bf16.mxu1 %v8452_v56  ;;  %v672_v24 = vld [vmem:[%s9246_s25 + $0xe38] sm:$0xff]  ;;  %v213_v55 = vld [vmem:[%s10501_s4] sm:$0xff]  ;;  %v8481_v56 = vcombine.low %v659_v26, %v663_v27  ;;  %v699_v27 = vld [vmem:[%s9246_s25 + $0xf10] sm:$0xff] }
 0x2e5   : > { %v8492_v62 = vcombine.high %v668_v59, %v672_v24  ;;  %v8491_v5 = vcombine.low %v668_v59, %v672_v24 }
 0x2e7   : > { %7263 = vmatpush1.bf16.msra.mxu0 %v8449_v63  ;;  %7591 = vmatpush1.bf16.msra.mxu1 %v8451_v6  ;;  %v675_v63 = vld [vmem:[%s9246_s25 + $0xe50] sm:$0xff] }
 0x2e8   : > { %7264 = vmatprep.subr.bf16.mxu0 %v8458_v9  ;;  %7592 = vmatprep.subr.bf16.mxu1 %v8460_v33  ;;  %v679_v6 = vld [vmem:[%s9246_s25 + $0xe70] sm:$0xff]  ;;  %v676_v33 = vld [vmem:[%s9246_s25 + $0xe58] sm:$0xff] }
 0x2e9   : > { %v8498_v30 = vcombine.high %v675_v63, %v679_v6  ;;  %v8500_v7 = vcombine.high %v676_v33, %v680_v3  ;;  %v8497_v15 = vcombine.low %v675_v63, %v679_v6 }
 0x2eb   : > { %7265 = vmatpush1.bf16.msra.mxu0 %v8457_v12  ;;  %7593 = vmatpush1.bf16.msra.mxu1 %v8459_v13  ;;  %v687_v12 = vld [vmem:[%s9246_s25 + $0xeb0] sm:$0xff]  ;;  %v684_v13 = vld [vmem:[%s9246_s25 + $0xe98] sm:$0xff] }
 0x2ec   : > { %7266 = vmatprep.subr.bf16.mxu0 %v8466_v14  ;;  %7594 = vmatprep.subr.bf16.mxu1 %v8468_v16  ;;  %v688_v14 = vld [vmem:[%s9246_s25 + $0xeb8] sm:$0xff]  ;;  %v8499_v16 = vcombine.low %v676_v33, %v680_v3  ;;  %v8506_v2 = vcombine.high %v683_v11, %v687_v12  ;;  %v731_v3 = vld [vmem:[%s9246_s25 + $0x1010] sm:$0xff] }
 0x2ed   : > { %v6798_v39 = vpop.f32.mrb[0].mxu0  ;;  %v7126_v29 = vpop.f32.mrb[0].mxu1  ;;  %v8508_v18 = vcombine.high %v684_v13, %v688_v14 }
 0x2ee   : > { %v6800_v31 = vpop.f32.mrb[1].mxu0  ;;  %v7128_v34 = vpop.f32.mrb[1].mxu1 }
 0x2ef   : > { %v7797_v49 = vcombine.low %v6798_v39, %v6800_v31  ;;  %v6802_v35 = vpop.f32.mrb[2].mxu0  ;;  %7267 = vmatpush1.bf16.msra.mxu0 %v8465_v21  ;;  %v7798_v37 = vcombine.low %v7126_v29, %v7128_v34  ;;  %v7130_v40 = vpop.f32.mrb[2].mxu1  ;;  %7595 = vmatpush1.bf16.msra.mxu1 %v8467_v22  ;;  %v692_v21 = vld [vmem:[%s9246_s25 + $0xed8] sm:$0xff]  ;;  %v8507_v39 = vcombine.low %v684_v13, %v688_v14  ;;  %v703_v29 = vld [vmem:[%s9246_s25 + $0xf30] sm:$0xff] }
 0x2f0   : > { %v6803_v41 = vpop.f32.mrb[3].mxu0  ;;  %7268 = vmatprep.subr.bf16.mxu0 %v8474_v10  ;;  %v7131_v46 = vpop.f32.mrb[3].mxu1  ;;  %7596 = vmatprep.subr.bf16.mxu1 %v8476_v25  ;;  %v696_v22 = vld [vmem:[%s9246_s25 + $0xef8] sm:$0xff]  ;;  %v8505_v10 = vcombine.low %v683_v11, %v687_v12  ;;  %v8514_v25 = vcombine.high %v691_v54, %v695_v17  ;;  %v8522_v34 = vcombine.high %v699_v27, %v703_v29  ;;  %v739_v14 = vld [vmem:[%s9246_s25 + $0x1050] sm:$0xff] }
 0x2f1   : > { %v7805_v44 = vrot.slane %v7797_v49, %v10131_v23  ;;  %v7812_v53 = vrot.slane %v7798_v37, %v10131_v23  ;;  %v8516_v26 = vcombine.high %v692_v21, %v696_v22  ;;  %v700_v31 = vld [vmem:[%s9246_s25 + $0xf18] sm:$0xff]  ;;  %v8515_v49 = vcombine.low %v692_v21, %v696_v22  ;;  %v711_v37 = vld [vmem:[%s9246_s25 + $0xf70] sm:$0xff] }
 0x2f2   : > { %v8524_v35 = vcombine.high %v700_v31, %v704_v32  ;;  %v708_v40 = vld [vmem:[%s9246_s25 + $0xf58] sm:$0xff]  ;;  %v747_v22 = vld [vmem:[%s9246_s25 + $0x1090] sm:$0xff] }
 0x2f3   : > { %7269 = vmatpush1.bf16.msra.mxu0 %v8473_v36  ;;  %v7813_v57 = vcombine.low %v7805_v44, %v7812_v53  ;;  %7597 = vmatpush1.bf16.msra.mxu1 %v8475_v42  ;;  %v707_v36 = vld [vmem:[%s9246_s25 + $0xf50] sm:$0xff]  ;;  %v712_v41 = vld [vmem:[%s9246_s25 + $0xf78] sm:$0xff]  ;;  %v8521_v42 = vcombine.low %v699_v27, %v703_v29 }
 0x2f4   : > { %7270 = vmatprep.subr.bf16.mxu0 %v8482_v43  ;;  %7598 = vmatprep.subr.bf16.mxu1 %v8484_v47  ;;  %v8523_v43 = vcombine.low %v700_v31, %v704_v32  ;;  %v8530_v44 = vcombine.high %v707_v36, %v711_v37  ;;  %v8532_v46 = vcombine.high %v708_v40, %v712_v41  ;;  %v715_v47 = vld [vmem:[%s9246_s25 + $0xf90] sm:$0xff]  ;;  %v720_v53 = vld [vmem:[%s9246_s25 + $0xfb8] sm:$0xff] }
 0x2f5   : > { %v7833_v9 = vadd.f32 %v7813_v57, %v213_v55  ;;  %v8529_v59 = vcombine.low %v707_v36, %v711_v37  ;;  %v8531_v24 = vcombine.low %v708_v40, %v712_v41  ;;  %v8538_v55 = vcombine.high %v715_v47, %v719_v48  ;;  %v723_v57 = vld [vmem:[%s9246_s25 + $0xfd0] sm:$0xff] }
 0x2f6   : > { %v8537_v63 = vcombine.low %v715_v47, %v719_v48  ;;  %v8539_v6 = vcombine.low %v716_v51, %v720_v53  ;;  %v755_v32 = vld [vmem:[%s9246_s25 + $0x10d0] sm:$0xff] }
 0x2f7   : > { %7271 = vmatpush1.bf16.msra.mxu0 %v8481_v56  ;;  %7835 = vst [vmem:[%s10501_s4] sm:$0xff] %v7833_v9  ;;  %7599 = vmatpush1.bf16.msra.mxu1 %v8483_v58  ;;  %v8540_v56 = vcombine.high %v716_v51, %v720_v53  ;;  %v727_v58 = vld [vmem:[%s9246_s25 + $0xff0] sm:$0xff]  ;;  %v772_v53 = vld [vmem:[%s9246_s25 + $0x1158] sm:$0xff] }
 0x2f8   : > { %7272 = vmatprep.subr.bf16.mxu0 %v8490_v61  ;;  %7600 = vmatprep.subr.bf16.mxu1 %v8492_v62  ;;  %v724_v61 = vld [vmem:[%s9246_s25 + $0xfd8] sm:$0xff]  ;;  %v8546_v9 = vcombine.high %v723_v57, %v727_v58  ;;  %v763_v40 = vld [vmem:[%s9246_s25 + $0x1110] sm:$0xff] }
 0x2f9   : > { %v728_v62 = vld [vmem:[%s9246_s25 + $0xff8] sm:$0xff]  ;;  %v767_v41 = vld [vmem:[%s9246_s25 + $0x1130] sm:$0xff] }
 0x2fa   : > { %v8548_v33 = vcombine.high %v724_v61, %v728_v62  ;;  %v8547_v11 = vcombine.low %v724_v61, %v728_v62  ;;  %v771_v48 = vld [vmem:[%s9246_s25 + $0x1150] sm:$0xff]  ;;  %v780_v62 = vld [vmem:[%s9246_s25 + $0x1198] sm:$0xff] }
 0x2fb   : > { %7273 = vmatpush1.bf16.msra.mxu0 %v8489_v4  ;;  %7601 = vmatpush1.bf16.msra.mxu1 %v8491_v5  ;;  %v735_v4 = vld [vmem:[%s9246_s25 + $0x1030] sm:$0xff]  ;;  %v732_v5 = vld [vmem:[%s9246_s25 + $0x1018] sm:$0xff] }
 0x2fc   : > { %7274 = vmatprep.subr.bf16.mxu0 %v8498_v30  ;;  %7602 = vmatprep.subr.bf16.mxu1 %v8500_v7  ;;  %v736_v30 = vld [vmem:[%s9246_s25 + $0x1038] sm:$0xff]  ;;  %v8545_v7 = vcombine.low %v723_v57, %v727_v58  ;;  %v8554_v12 = vcombine.high %v731_v3, %v735_v4  ;;  %v775_v51 = vld [vmem:[%s9246_s25 + $0x1170] sm:$0xff] }
 0x2fd   : > { %v8556_v13 = vcombine.high %v732_v5, %v736_v30  ;;  %v8555_v54 = vcombine.low %v732_v5, %v736_v30  ;;  %v779_v58 = vld [vmem:[%s9246_s25 + $0x1190] sm:$0xff]  ;;  %v788_v30 = vld [vmem:[%s9246_s25 + $0x11d8] sm:$0xff] }
 0x2fe   : > { %v783_v61 = vld [vmem:[%s9246_s25 + $0x11b0] sm:$0xff] }
 0x2ff   : > { %7275 = vmatpush1.bf16.msra.mxu0 %v8497_v15  ;;  %7603 = vmatpush1.bf16.msra.mxu1 %v8499_v16  ;;  %v743_v15 = vld [vmem:[%s9246_s25 + $0x1070] sm:$0xff]  ;;  %v740_v16 = vld [vmem:[%s9246_s25 + $0x1058] sm:$0xff] }
 0x300   : > { %7276 = vmatprep.subr.bf16.mxu0 %v8506_v2  ;;  %7604 = vmatprep.subr.bf16.mxu1 %v8508_v18  ;;  %v744_v2 = vld [vmem:[%s9246_s25 + $0x1078] sm:$0xff]  ;;  %v8553_v18 = vcombine.low %v731_v3, %v735_v4  ;;  %v8562_v17 = vcombine.high %v739_v14, %v743_v15  ;;  %v787_v4 = vld [vmem:[%s9246_s25 + $0x11d0] sm:$0xff] }
 0x301   : > { %v8564_v21 = vcombine.high %v740_v16, %v744_v2  ;;  %v8563_v27 = vcombine.low %v740_v16, %v744_v2  ;;  %v791_v5 = vld [vmem:[%s9246_s25 + $0x11f0] sm:$0xff]  ;;  %v796_v2 = vld [vmem:[%s9246_s25 + $0x1218] sm:$0xff] }
 0x302   : > { %v799_v16 = vld [vmem:[%s9246_s25 + $0x1230] sm:$0xff] }
 0x303   : > { %7277 = vmatpush1.bf16.msra.mxu0 %v8505_v10  ;;  %7605 = vmatpush1.bf16.msra.mxu1 %v8507_v39  ;;  %v751_v10 = vld [vmem:[%s9246_s25 + $0x10b0] sm:$0xff]  ;;  %v748_v39 = vld [vmem:[%s9246_s25 + $0x1098] sm:$0xff] }
 0x304   : > { %7278 = vmatprep.subr.bf16.mxu0 %v8514_v25  ;;  %7606 = vmatprep.subr.bf16.mxu1 %v8516_v26  ;;  %v752_v25 = vld [vmem:[%s9246_s25 + $0x10b8] sm:$0xff]  ;;  %v8561_v26 = vcombine.low %v739_v14, %v743_v15  ;;  %v8570_v29 = vcombine.high %v747_v22, %v751_v10  ;;  %v795_v15 = vld [vmem:[%s9246_s25 + $0x1210] sm:$0xff] }
 0x305   : > { %v8572_v31 = vcombine.high %v748_v39, %v752_v25 }
 0x307   : > { %7279 = vmatpush1.bf16.msra.mxu0 %v8513_v0  ;;  %7607 = vmatpush1.bf16.msra.mxu1 %v8515_v49  ;;  %v759_v0 = vld [vmem:[%s9246_s25 + $0x10f0] sm:$0xff]  ;;  %v756_v49 = vld [vmem:[%s9246_s25 + $0x10d8] sm:$0xff] }
 0x308   : > { %7280 = vmatprep.subr.bf16.mxu0 %v8522_v34  ;;  %7608 = vmatprep.subr.bf16.mxu1 %v8524_v35  ;;  %v760_v34 = vld [vmem:[%s9246_s25 + $0x10f8] sm:$0xff]  ;;  %v8571_v35 = vcombine.low %v748_v39, %v752_v25  ;;  %v8578_v36 = vcombine.high %v755_v32, %v759_v0  ;;  %v807_v39 = vld [vmem:[%s9246_s25 + $0x1270] sm:$0xff] }
 0x309   : > { %v8580_v37 = vcombine.high %v756_v49, %v760_v34  ;;  %v804_v25 = vld [vmem:[%s9246_s25 + $0x1258] sm:$0xff] }
 0x30b   : > { %7281 = vmatpush1.bf16.msra.mxu0 %v8521_v42  ;;  %7609 = vmatpush1.bf16.msra.mxu1 %v8523_v43  ;;  %v764_v42 = vld [vmem:[%s9246_s25 + $0x1118] sm:$0xff] }
 0x30c   : > { %7282 = vmatprep.subr.bf16.mxu0 %v8530_v44  ;;  %7610 = vmatprep.subr.bf16.mxu1 %v8532_v46  ;;  %v768_v43 = vld [vmem:[%s9246_s25 + $0x1138] sm:$0xff]  ;;  %v8577_v44 = vcombine.low %v755_v32, %v759_v0  ;;  %v8586_v46 = vcombine.high %v763_v40, %v767_v41  ;;  %v811_v0 = vld [vmem:[%s9246_s25 + $0x1290] sm:$0xff] }
 0x30d   : > { %v8588_v47 = vcombine.high %v764_v42, %v768_v43 }
 0x30f   : > { %7283 = vmatpush1.bf16.msra.mxu0 %v8529_v59  ;;  %7611 = vmatpush1.bf16.msra.mxu1 %v8531_v24  ;;  %v776_v59 = vld [vmem:[%s9246_s25 + $0x1178] sm:$0xff]  ;;  %v8585_v24 = vcombine.low %v763_v40, %v767_v41  ;;  %v819_v41 = vld [vmem:[%s9246_s25 + $0x12d0] sm:$0xff] }
 0x310   : > { %7284 = vmatprep.subr.bf16.mxu0 %v8538_v55  ;;  %7612 = vmatprep.subr.bf16.mxu1 %v8540_v56  ;;  %v8587_v55 = vcombine.low %v764_v42, %v768_v43  ;;  %v8594_v56 = vcombine.high %v771_v48, %v775_v51  ;;  %v8596_v57 = vcombine.high %v772_v53, %v776_v59  ;;  %v823_v42 = vld [vmem:[%s9246_s25 + $0x12f0] sm:$0xff]  ;;  %v820_v43 = vld [vmem:[%s9246_s25 + $0x12d8] sm:$0xff] }
 0x313   : > { %7285 = vmatpush1.bf16.msra.mxu0 %v8537_v63  ;;  %7613 = vmatpush1.bf16.msra.mxu1 %v8539_v6  ;;  %v784_v63 = vld [vmem:[%s9246_s25 + $0x11b8] sm:$0xff]  ;;  %v8593_v6 = vcombine.low %v771_v48, %v775_v51  ;;  %v827_v51 = vld [vmem:[%s9246_s25 + $0x1310] sm:$0xff] }
 0x314   : > { %7286 = vmatprep.subr.bf16.mxu0 %v8546_v9  ;;  %7614 = vmatprep.subr.bf16.mxu1 %v8548_v33  ;;  %v8595_v9 = vcombine.low %v772_v53, %v776_v59  ;;  %v8602_v33 = vcombine.high %v779_v58, %v783_v61  ;;  %v8604_v3 = vcombine.high %v780_v62, %v784_v63  ;;  %v831_v53 = vld [vmem:[%s9246_s25 + $0x1330] sm:$0xff]  ;;  %v828_v59 = vld [vmem:[%s9246_s25 + $0x1318] sm:$0xff] }
 0x317   : > { %7287 = vmatpush1.bf16.msra.mxu0 %v8545_v7  ;;  %7615 = vmatpush1.bf16.msra.mxu1 %v8547_v11  ;;  %v792_v7 = vld [vmem:[%s9246_s25 + $0x11f8] sm:$0xff]  ;;  %v8601_v11 = vcombine.low %v779_v58, %v783_v61  ;;  %v835_v61 = vld [vmem:[%s9246_s25 + $0x1350] sm:$0xff] }
 0x318   : > { %7297 = vmatprep.subr.bf16.mxu0 %v8554_v12  ;;  %7625 = vmatprep.subr.bf16.mxu1 %v8556_v13  ;;  %v8603_v12 = vcombine.low %v780_v62, %v784_v63  ;;  %v8610_v13 = vcombine.high %v787_v4, %v791_v5  ;;  %v8612_v14 = vcombine.high %v788_v30, %v792_v7  ;;  %v839_v62 = vld [vmem:[%s9246_s25 + $0x1370] sm:$0xff]  ;;  %v836_v63 = vld [vmem:[%s9246_s25 + $0x1358] sm:$0xff] }
 0x31a   : > { %7289 = vmatmul.mubr.bf16.vlgmr.msra.gmra.mrb[4].mxu0 %v9589_v20  ;;  %7617 = vmatmul.mubr.bf16.vlgmr.msra.gmra.mrb[4].mxu1 %v9589_v20  ;;  %v8569_v20 = vcombine.low %v747_v22, %v751_v10  ;;  %v803_v10 = vld [vmem:[%s9246_s25 + $0x1250] sm:$0xff] }
 0x31b   : > { %7298 = vmatpush1.bf16.msra.mxu0 %v8553_v18  ;;  %7626 = vmatpush1.bf16.msra.mxu1 %v8555_v54  ;;  %v800_v18 = vld [vmem:[%s9246_s25 + $0x1238] sm:$0xff]  ;;  %v8609_v54 = vcombine.low %v787_v4, %v791_v5  ;;  %v843_v5 = vld [vmem:[%s9246_s25 + $0x1390] sm:$0xff] }
 0x31c   : > { %7299 = vmatprep.subr.bf16.mxu0 %v8562_v17  ;;  %7627 = vmatprep.subr.bf16.mxu1 %v8564_v21  ;;  %v8611_v17 = vcombine.low %v788_v30, %v792_v7  ;;  %v8618_v21 = vcombine.high %v795_v15, %v799_v16  ;;  %v8620_v22 = vcombine.high %v796_v2, %v800_v18  ;;  %v847_v30 = vld [vmem:[%s9246_s25 + $0x13b0] sm:$0xff]  ;;  %v844_v7 = vld [vmem:[%s9246_s25 + $0x1398] sm:$0xff] }
 0x31d   : > { %7329 = vmatprep.mubr.bf16.mxu0 %v9596_v60  ;;  %7657 = vmatprep.mubr.bf16.mxu1 %v9596_v60  ;;  %v8579_v60 = vcombine.low %v756_v49, %v760_v34  ;;  %v815_v49 = vld [vmem:[%s9246_s25 + $0x12b0] sm:$0xff]  ;;  %v812_v34 = vld [vmem:[%s9246_s25 + $0x1298] sm:$0xff] }
 0x31f   : > { %7300 = vmatpush1.bf16.msra.mxu0 %v8561_v26  ;;  %7628 = vmatpush1.bf16.msra.mxu1 %v8563_v27  ;;  %v808_v26 = vld [vmem:[%s9246_s25 + $0x1278] sm:$0xff]  ;;  %v8617_v27 = vcombine.low %v795_v15, %v799_v16  ;;  %v851_v16 = vld [vmem:[%s9246_s25 + $0x13d0] sm:$0xff] }
 0x320   : > { %7301 = vmatprep.subr.bf16.mxu0 %v8570_v29  ;;  %7629 = vmatprep.subr.bf16.mxu1 %v8572_v31  ;;  %v8619_v29 = vcombine.low %v796_v2, %v800_v18  ;;  %v8626_v31 = vcombine.high %v803_v10, %v807_v39  ;;  %v8628_v32 = vcombine.high %v804_v25, %v808_v26  ;;  %v855_v2 = vld [vmem:[%s9246_s25 + $0x13f0] sm:$0xff]  ;;  %v852_v18 = vld [vmem:[%s9246_s25 + $0x13d8] sm:$0xff] }
 0x323   : > { %7302 = vmatpush1.bf16.msra.mxu0 %v8569_v20  ;;  %7630 = vmatpush1.bf16.msra.mxu1 %v8571_v35  ;;  %v816_v20 = vld [vmem:[%s9246_s25 + $0x12b8] sm:$0xff]  ;;  %v8625_v35 = vcombine.low %v803_v10, %v807_v39  ;;  %v859_v39 = vld [vmem:[%s9246_s25 + $0x1410] sm:$0xff] }
 0x324   : > { %7303 = vmatprep.subr.bf16.mxu0 %v8578_v36  ;;  %7631 = vmatprep.subr.bf16.mxu1 %v8580_v37  ;;  %v8627_v36 = vcombine.low %v804_v25, %v808_v26  ;;  %v8634_v37 = vcombine.high %v811_v0, %v815_v49  ;;  %v8636_v40 = vcombine.high %v812_v34, %v816_v20  ;;  %v863_v25 = vld [vmem:[%s9246_s25 + $0x1430] sm:$0xff]  ;;  %v860_v26 = vld [vmem:[%s9246_s25 + $0x1418] sm:$0xff] }
 0x327   : > { %7304 = vmatpush1.bf16.msra.mxu0 %v8577_v44  ;;  %7632 = vmatpush1.bf16.msra.mxu1 %v8579_v60  ;;  %v824_v44 = vld [vmem:[%s9246_s25 + $0x12f8] sm:$0xff]  ;;  %v8633_v60 = vcombine.low %v811_v0, %v815_v49  ;;  %v867_v49 = vld [vmem:[%s9246_s25 + $0x1450] sm:$0xff] }
 0x328   : > { %7305 = vmatprep.subr.bf16.mxu0 %v8586_v46  ;;  %7633 = vmatprep.subr.bf16.mxu1 %v8588_v47  ;;  %v8635_v46 = vcombine.low %v812_v34, %v816_v20  ;;  %v8642_v47 = vcombine.high %v819_v41, %v823_v42  ;;  %v8644_v48 = vcombine.high %v820_v43, %v824_v44  ;;  %v871_v34 = vld [vmem:[%s9246_s25 + $0x1470] sm:$0xff]  ;;  %v868_v20 = vld [vmem:[%s9246_s25 + $0x1458] sm:$0xff] }
 0x32b   : > { %7306 = vmatpush1.bf16.msra.mxu0 %v8585_v24  ;;  %7634 = vmatpush1.bf16.msra.mxu1 %v8587_v55  ;;  %v832_v24 = vld [vmem:[%s9246_s25 + $0x1338] sm:$0xff]  ;;  %v8641_v55 = vcombine.low %v819_v41, %v823_v42  ;;  %v875_v42 = vld [vmem:[%s9246_s25 + $0x1490] sm:$0xff] }
 0x32c   : > { %7307 = vmatprep.subr.bf16.mxu0 %v8594_v56  ;;  %7635 = vmatprep.subr.bf16.mxu1 %v8596_v57  ;;  %v8643_v56 = vcombine.low %v820_v43, %v824_v44  ;;  %v8650_v57 = vcombine.high %v827_v51, %v831_v53  ;;  %v8652_v58 = vcombine.high %v828_v59, %v832_v24  ;;  %v879_v43 = vld [vmem:[%s9246_s25 + $0x14b0] sm:$0xff]  ;;  %v876_v44 = vld [vmem:[%s9246_s25 + $0x1498] sm:$0xff] }
 0x32f   : > { %7308 = vmatpush1.bf16.msra.mxu0 %v8593_v6  ;;  %7636 = vmatpush1.bf16.msra.mxu1 %v8595_v9  ;;  %v840_v6 = vld [vmem:[%s9246_s25 + $0x1378] sm:$0xff]  ;;  %v8649_v9 = vcombine.low %v827_v51, %v831_v53  ;;  %v883_v53 = vld [vmem:[%s9246_s25 + $0x14d0] sm:$0xff] }
 0x330   : > { %7309 = vmatprep.subr.bf16.mxu0 %v8602_v33  ;;  %7637 = vmatprep.subr.bf16.mxu1 %v8604_v3  ;;  %v8651_v33 = vcombine.low %v828_v59, %v832_v24  ;;  %v8658_v3 = vcombine.high %v835_v61, %v839_v62  ;;  %v8660_v4 = vcombine.high %v836_v63, %v840_v6  ;;  %v887_v59 = vld [vmem:[%s9246_s25 + $0x14f0] sm:$0xff]  ;;  %v884_v24 = vld [vmem:[%s9246_s25 + $0x14d8] sm:$0xff] }
 0x333   : > { %7310 = vmatpush1.bf16.msra.mxu0 %v8601_v11  ;;  %7638 = vmatpush1.bf16.msra.mxu1 %v8603_v12  ;;  %v848_v11 = vld [vmem:[%s9246_s25 + $0x13b8] sm:$0xff]  ;;  %v8657_v12 = vcombine.low %v835_v61, %v839_v62  ;;  %v891_v61 = vld [vmem:[%s9246_s25 + $0x1510] sm:$0xff] }
 0x334   : > { %7311 = vmatprep.subr.bf16.mxu0 %v8610_v13  ;;  %7639 = vmatprep.subr.bf16.mxu1 %v8612_v14  ;;  %v8659_v13 = vcombine.low %v836_v63, %v840_v6  ;;  %v8666_v14 = vcombine.high %v843_v5, %v847_v30  ;;  %v8668_v15 = vcombine.high %v844_v7, %v848_v11  ;;  %v895_v62 = vld [vmem:[%s9246_s25 + $0x1530] sm:$0xff]  ;;  %v892_v63 = vld [vmem:[%s9246_s25 + $0x1518] sm:$0xff] }
 0x335   : > { %v896_v6 = vld [vmem:[%s9246_s25 + $0x1538] sm:$0xff] }
 0x337   : > { %7312 = vmatpush1.bf16.msra.mxu0 %v8609_v54  ;;  %7640 = vmatpush1.bf16.msra.mxu1 %v8611_v17  ;;  %v856_v54 = vld [vmem:[%s9246_s25 + $0x13f8] sm:$0xff]  ;;  %v8665_v17 = vcombine.low %v843_v5, %v847_v30  ;;  %v903_v5 = vld [vmem:[%s9246_s25 + $0x1570] sm:$0xff] }
 0x338   : > { %7313 = vmatprep.subr.bf16.mxu0 %v8618_v21  ;;  %7641 = vmatprep.subr.bf16.mxu1 %v8620_v22  ;;  %v8667_v21 = vcombine.low %v844_v7, %v848_v11  ;;  %v8674_v22 = vcombine.high %v851_v16, %v855_v2  ;;  %v8676_v10 = vcombine.high %v852_v18, %v856_v54  ;;  %v900_v30 = vld [vmem:[%s9246_s25 + $0x1558] sm:$0xff] }
 0x339   : > { %v904_v7 = vld [vmem:[%s9246_s25 + $0x1578] sm:$0xff]  ;;  %v8713_v11 = vcombine.low %v891_v61, %v895_v62 }
 0x33b   : > { %7314 = vmatpush1.bf16.msra.mxu0 %v8617_v27  ;;  %7642 = vmatpush1.bf16.msra.mxu1 %v8619_v29  ;;  %v864_v27 = vld [vmem:[%s9246_s25 + $0x1438] sm:$0xff]  ;;  %v8673_v29 = vcombine.low %v851_v16, %v855_v2  ;;  %v911_v16 = vld [vmem:[%s9246_s25 + $0x15b0] sm:$0xff] }
 0x33c   : > { %7315 = vmatprep.subr.bf16.mxu0 %v8626_v31  ;;  %7643 = vmatprep.subr.bf16.mxu1 %v8628_v32  ;;  %v8675_v31 = vcombine.low %v852_v18, %v856_v54  ;;  %v8682_v32 = vcombine.high %v859_v39, %v863_v25  ;;  %v8684_v0 = vcombine.high %v860_v26, %v864_v27  ;;  %v908_v2 = vld [vmem:[%s9246_s25 + $0x1598] sm:$0xff] }
 0x33d   : > { %v912_v18 = vld [vmem:[%s9246_s25 + $0x15b8] sm:$0xff] }
 0x33f   : > { %7316 = vmatpush1.bf16.msra.mxu0 %v8625_v35  ;;  %7644 = vmatpush1.bf16.msra.mxu1 %v8627_v36  ;;  %v872_v35 = vld [vmem:[%s9246_s25 + $0x1478] sm:$0xff]  ;;  %v8681_v36 = vcombine.low %v859_v39, %v863_v25  ;;  %v919_v39 = vld [vmem:[%s9246_s25 + $0x15f0] sm:$0xff] }
 0x340   : > { %7317 = vmatprep.subr.bf16.mxu0 %v8634_v37  ;;  %7645 = vmatprep.subr.bf16.mxu1 %v8636_v40  ;;  %v8683_v37 = vcombine.low %v860_v26, %v864_v27  ;;  %v8690_v40 = vcombine.high %v867_v49, %v871_v34  ;;  %v8692_v41 = vcombine.high %v868_v20, %v872_v35  ;;  %v916_v25 = vld [vmem:[%s9246_s25 + $0x15d8] sm:$0xff] }
 0x341   : > { %v920_v26 = vld [vmem:[%s9246_s25 + $0x15f8] sm:$0xff] }
 0x343   : > { %7318 = vmatpush1.bf16.msra.mxu0 %v8633_v60  ;;  %7646 = vmatpush1.bf16.msra.mxu1 %v8635_v46  ;;  %v880_v60 = vld [vmem:[%s9246_s25 + $0x14b8] sm:$0xff]  ;;  %v8689_v46 = vcombine.low %v867_v49, %v871_v34  ;;  %v927_v49 = vld [vmem:[%s9246_s25 + $0x1630] sm:$0xff] }
 0x344   : > { %7319 = vmatprep.subr.bf16.mxu0 %v8642_v47  ;;  %7647 = vmatprep.subr.bf16.mxu1 %v8644_v48  ;;  %v8691_v47 = vcombine.low %v868_v20, %v872_v35  ;;  %v8698_v48 = vcombine.high %v875_v42, %v879_v43  ;;  %v8700_v51 = vcombine.high %v876_v44, %v880_v60  ;;  %v924_v34 = vld [vmem:[%s9246_s25 + $0x1618] sm:$0xff] }
 0x345   : > { %v928_v20 = vld [vmem:[%s9246_s25 + $0x1638] sm:$0xff] }
 0x347   : > { %7320 = vmatpush1.bf16.msra.mxu0 %v8641_v55  ;;  %7648 = vmatpush1.bf16.msra.mxu1 %v8643_v56  ;;  %v888_v55 = vld [vmem:[%s9246_s25 + $0x14f8] sm:$0xff]  ;;  %v8699_v56 = vcombine.low %v876_v44, %v880_v60 }
 0x348   : > { %7321 = vmatprep.subr.bf16.mxu0 %v8650_v57  ;;  %7649 = vmatprep.subr.bf16.mxu1 %v8652_v58  ;;  %v8706_v57 = vcombine.high %v883_v53, %v887_v59  ;;  %v8708_v58 = vcombine.high %v884_v24, %v888_v55  ;;  %v936_v44 = vld [vmem:[%s9246_s25 + $0x1678] sm:$0xff] }
 0x34b   : > { %7322 = vmatpush1.bf16.msra.mxu0 %v8649_v9  ;;  %7650 = vmatpush1.bf16.msra.mxu1 %v8651_v33  ;;  %v8705_v9 = vcombine.low %v883_v53, %v887_v59  ;;  %v8714_v33 = vcombine.high %v891_v61, %v895_v62  ;;  %v943_v53 = vld [vmem:[%s9246_s25 + $0x16b0] sm:$0xff]  ;;  %v940_v59 = vld [vmem:[%s9246_s25 + $0x1698] sm:$0xff] }
 0x34c   : > { %7323 = vmatprep.subr.bf16.mxu0 %v8658_v3  ;;  %7651 = vmatprep.subr.bf16.mxu1 %v8660_v4  ;;  %v8716_v3 = vcombine.high %v892_v63, %v896_v6  ;;  %v899_v4 = vld [vmem:[%s9246_s25 + $0x1550] sm:$0xff]  ;;  %v948_v62 = vld [vmem:[%s9246_s25 + $0x16d8] sm:$0xff] }
 0x34d   : > { %v8721_v54 = vcombine.low %v899_v4, %v903_v5  ;;  %v951_v61 = vld [vmem:[%s9246_s25 + $0x16f0] sm:$0xff] }
 0x34f   : > { %7324 = vmatpush1.bf16.msra.mxu0 %v8657_v12  ;;  %7652 = vmatpush1.bf16.msra.mxu1 %v8659_v13  ;;  %v8715_v12 = vcombine.low %v892_v63, %v896_v6  ;;  %v8722_v13 = vcombine.high %v899_v4, %v903_v5  ;;  %v952_v63 = vld [vmem:[%s9246_s25 + $0x16f8] sm:$0xff]  ;;  %v959_v4 = vld [vmem:[%s9246_s25 + $0x1730] sm:$0xff] }
 0x350   : > { %7325 = vmatprep.subr.bf16.mxu0 %v8666_v14  ;;  %7653 = vmatprep.subr.bf16.mxu1 %v8668_v15  ;;  %v8724_v14 = vcombine.high %v900_v30, %v904_v7  ;;  %v907_v15 = vld [vmem:[%s9246_s25 + $0x1590] sm:$0xff]  ;;  %v956_v5 = vld [vmem:[%s9246_s25 + $0x1718] sm:$0xff] }
 0x351   : > { %v8729_v27 = vcombine.low %v907_v15, %v911_v16 }
 0x353   : > { %7326 = vmatpush1.bf16.msra.mxu0 %v8665_v17  ;;  %7654 = vmatpush1.bf16.msra.mxu1 %v8667_v21  ;;  %v8723_v17 = vcombine.low %v900_v30, %v904_v7  ;;  %v8730_v21 = vcombine.high %v907_v15, %v911_v16  ;;  %v960_v30 = vld [vmem:[%s9246_s25 + $0x1738] sm:$0xff]  ;;  %v967_v15 = vld [vmem:[%s9246_s25 + $0x1770] sm:$0xff] }
 0x354   : > { %7327 = vmatprep.subr.bf16.mxu0 %v8674_v22  ;;  %7655 = vmatprep.subr.bf16.mxu1 %v8676_v10  ;;  %v8732_v22 = vcombine.high %v908_v2, %v912_v18  ;;  %v915_v10 = vld [vmem:[%s9246_s25 + $0x15d0] sm:$0xff]  ;;  %v964_v16 = vld [vmem:[%s9246_s25 + $0x1758] sm:$0xff] }
 0x355   : > { %v8737_v35 = vcombine.low %v915_v10, %v919_v39 }
 0x357   : > { %7328 = vmatpush1.bf16.msra.mxu0 %v8673_v29  ;;  %7656 = vmatpush1.bf16.msra.mxu1 %v8675_v31  ;;  %v8731_v29 = vcombine.low %v908_v2, %v912_v18  ;;  %v8738_v31 = vcombine.high %v915_v10, %v919_v39  ;;  %v968_v2 = vld [vmem:[%s9246_s25 + $0x1778] sm:$0xff]  ;;  %v975_v10 = vld [vmem:[%s9246_s25 + $0x17b0] sm:$0xff] }
 0x358   : > { %7338 = vmatprep.subr.bf16.mxu0 %v8682_v32  ;;  %7666 = vmatprep.subr.bf16.mxu1 %v8684_v0  ;;  %v8740_v32 = vcombine.high %v916_v25, %v920_v26  ;;  %v923_v0 = vld [vmem:[%s9246_s25 + $0x1610] sm:$0xff]  ;;  %v972_v39 = vld [vmem:[%s9246_s25 + $0x1798] sm:$0xff] }
 0x359   : > { %v8745_v60 = vcombine.low %v923_v0, %v927_v49 }
 0x35a   : > { %7330 = vmatmul.mubr.bf16.vlgmr.msra.gmra.mrb[4].mxu0 %v9664_v52  ;;  %7658 = vmatmul.mubr.bf16.vlgmr.msra.gmra.mrb[4].mxu1 %v9664_v52  ;;  %v8697_v52 = vcombine.low %v875_v42, %v879_v43  ;;  %v935_v42 = vld [vmem:[%s9246_s25 + $0x1670] sm:$0xff]  ;;  %v932_v43 = vld [vmem:[%s9246_s25 + $0x1658] sm:$0xff] }
 0x35b   : > { %7339 = vmatpush1.bf16.msra.mxu0 %v8681_v36  ;;  %7667 = vmatpush1.bf16.msra.mxu1 %v8683_v37  ;;  %v8739_v36 = vcombine.low %v916_v25, %v920_v26  ;;  %v8746_v37 = vcombine.high %v923_v0, %v927_v49  ;;  %v976_v25 = vld [vmem:[%s9246_s25 + $0x17b8] sm:$0xff]  ;;  %v983_v0 = vld [vmem:[%s9246_s25 + $0x17f0] sm:$0xff] }
 0x35c   : > { %7340 = vmatprep.subr.bf16.mxu0 %v8690_v40  ;;  %7668 = vmatprep.subr.bf16.mxu1 %v8692_v41  ;;  %v8748_v40 = vcombine.high %v924_v34, %v928_v20  ;;  %v931_v41 = vld [vmem:[%s9246_s25 + $0x1650] sm:$0xff]  ;;  %v980_v49 = vld [vmem:[%s9246_s25 + $0x17d8] sm:$0xff] }
 0x35d   : > { %7370 = vmatprep.mubr.bf16.mxu0 %v9672_v1  ;;  %7698 = vmatprep.mubr.bf16.mxu1 %v9672_v1  ;;  %v8707_v1 = vcombine.low %v884_v24, %v888_v55  ;;  %v944_v24 = vld [vmem:[%s9246_s25 + $0x16b8] sm:$0xff]  ;;  %v8753_v55 = vcombine.low %v931_v41, %v935_v42 }
 0x35f   : > { %7341 = vmatpush1.bf16.msra.mxu0 %v8689_v46  ;;  %7669 = vmatpush1.bf16.msra.mxu1 %v8691_v47  ;;  %v8747_v46 = vcombine.low %v924_v34, %v928_v20  ;;  %v8754_v47 = vcombine.high %v931_v41, %v935_v42  ;;  %v984_v34 = vld [vmem:[%s9246_s25 + $0x17f8] sm:$0xff]  ;;  %v991_v41 = vld [vmem:[%s9246_s25 + $0x1830] sm:$0xff] }
 0x360   : > { %7342 = vmatprep.subr.bf16.mxu0 %v8698_v48  ;;  %7670 = vmatprep.subr.bf16.mxu1 %v8700_v51  ;;  %v8756_v48 = vcombine.high %v932_v43, %v936_v44  ;;  %v939_v51 = vld [vmem:[%s9246_s25 + $0x1690] sm:$0xff]  ;;  %v988_v42 = vld [vmem:[%s9246_s25 + $0x1818] sm:$0xff] }
 0x361   : > { %v8761_v6 = vcombine.low %v939_v51, %v943_v53 }
 0x363   : > { %7343 = vmatpush1.bf16.msra.mxu0 %v8697_v52  ;;  %7671 = vmatpush1.bf16.msra.mxu1 %v8699_v56  ;;  %v8755_v52 = vcombine.low %v932_v43, %v936_v44  ;;  %v8762_v56 = vcombine.high %v939_v51, %v943_v53  ;;  %v992_v43 = vld [vmem:[%s9246_s25 + $0x1838] sm:$0xff]  ;;  %v999_v51 = vld [vmem:[%s9246_s25 + $0x1870] sm:$0xff] }
 0x364   : > { %7344 = vmatprep.subr.bf16.mxu0 %v8706_v57  ;;  %7672 = vmatprep.subr.bf16.mxu1 %v8708_v58  ;;  %v8764_v57 = vcombine.high %v940_v59, %v944_v24  ;;  %v947_v58 = vld [vmem:[%s9246_s25 + $0x16d0] sm:$0xff]  ;;  %v996_v53 = vld [vmem:[%s9246_s25 + $0x1858] sm:$0xff] }
 0x365   : > { %v8769_v7 = vcombine.low %v947_v58, %v951_v61 }
 0x367   : > { %7345 = vmatpush1.bf16.msra.mxu0 %v8705_v9  ;;  %7673 = vmatpush1.bf16.msra.mxu1 %v8707_v1  ;;  %v8763_v9 = vcombine.low %v940_v59, %v944_v24  ;;  %v8770_v1 = vcombine.high %v947_v58, %v951_v61  ;;  %v1000_v59 = vld [vmem:[%s9246_s25 + $0x1878] sm:$0xff]  ;;  %v1007_v58 = vld [vmem:[%s9246_s25 + $0x18b0] sm:$0xff] }
 0x368   : > { %7346 = vmatprep.subr.bf16.mxu0 %v8714_v33  ;;  %7674 = vmatprep.subr.bf16.mxu1 %v8716_v3  ;;  %v8772_v33 = vcombine.high %v948_v62, %v952_v63  ;;  %v955_v3 = vld [vmem:[%s9246_s25 + $0x1710] sm:$0xff]  ;;  %v1004_v61 = vld [vmem:[%s9246_s25 + $0x1898] sm:$0xff] }
 0x369   : > { %v8777_v18 = vcombine.low %v955_v3, %v959_v4 }
 0x36b   : > { %7347 = vmatpush1.bf16.msra.mxu0 %v8713_v11  ;;  %7675 = vmatpush1.bf16.msra.mxu1 %v8715_v12  ;;  %v8771_v11 = vcombine.low %v948_v62, %v952_v63  ;;  %v8778_v12 = vcombine.high %v955_v3, %v959_v4  ;;  %v1008_v62 = vld [vmem:[%s9246_s25 + $0x18b8] sm:$0xff]  ;;  %v1015_v3 = vld [vmem:[%s9246_s25 + $0x18f0] sm:$0xff] }
 0x36c   : > { %7348 = vmatprep.subr.bf16.mxu0 %v8722_v13  ;;  %7676 = vmatprep.subr.bf16.mxu1 %v8724_v14  ;;  %v8780_v13 = vcombine.high %v956_v5, %v960_v30  ;;  %v963_v14 = vld [vmem:[%s9246_s25 + $0x1750] sm:$0xff]  ;;  %v1012_v4 = vld [vmem:[%s9246_s25 + $0x18d8] sm:$0xff] }
 0x36d   : > { %v8785_v26 = vcombine.low %v963_v14, %v967_v15 }
 0x36f   : > { %7349 = vmatpush1.bf16.msra.mxu0 %v8721_v54  ;;  %7677 = vmatpush1.bf16.msra.mxu1 %v8723_v17  ;;  %v8779_v54 = vcombine.low %v956_v5, %v960_v30  ;;  %v8786_v17 = vcombine.high %v963_v14, %v967_v15  ;;  %v1016_v5 = vld [vmem:[%s9246_s25 + $0x18f8] sm:$0xff]  ;;  %v8827_v30 = vcombine.low %v1004_v61, %v1008_v62 }
 0x370   : > { %7350 = vmatprep.subr.bf16.mxu0 %v8730_v21  ;;  %7678 = vmatprep.subr.bf16.mxu1 %v8732_v22  ;;  %v8788_v21 = vcombine.high %v964_v16, %v968_v2  ;;  %v971_v22 = vld [vmem:[%s9246_s25 + $0x1790] sm:$0xff]  ;;  %v1020_v14 = vld [vmem:[%s9246_s25 + $0x1918] sm:$0xff] }
 0x371   : > { %v8793_v20 = vcombine.low %v971_v22, %v975_v10  ;;  %v1024_v15 = vld [vmem:[%s9246_s25 + $0x1938] sm:$0xff] }
 0x373   : > { %7351 = vmatpush1.bf16.msra.mxu0 %v8729_v27  ;;  %7679 = vmatpush1.bf16.msra.mxu1 %v8731_v29  ;;  %v8787_v27 = vcombine.low %v964_v16, %v968_v2  ;;  %v8794_v29 = vcombine.high %v971_v22, %v975_v10  ;;  %v1032_v22 = vld [vmem:[%s9246_s25 + $0x1978] sm:$0xff] }
 0x374   : > { %7352 = vmatprep.subr.bf16.mxu0 %v8738_v31  ;;  %7680 = vmatprep.subr.bf16.mxu1 %v8740_v32  ;;  %v8796_v31 = vcombine.high %v972_v39, %v976_v25  ;;  %v979_v32 = vld [vmem:[%s9246_s25 + $0x17d0] sm:$0xff] }
 0x375   : > { %v8801_v44 = vcombine.low %v979_v32, %v983_v0 }
 0x377   : > { %7353 = vmatpush1.bf16.msra.mxu0 %v8737_v35  ;;  %7681 = vmatpush1.bf16.msra.mxu1 %v8739_v36  ;;  %v8795_v35 = vcombine.low %v972_v39, %v976_v25  ;;  %v8802_v36 = vcombine.high %v979_v32, %v983_v0  ;;  %v8843_v39 = vcombine.low %v1020_v14, %v1024_v15  ;;  %v1040_v32 = vld [vmem:[%s9246_s25 + $0x19b8] sm:$0xff] }
 0x378   : > { %7354 = vmatprep.subr.bf16.mxu0 %v8746_v37  ;;  %7682 = vmatprep.subr.bf16.mxu1 %v8748_v40  ;;  %v8804_v37 = vcombine.high %v980_v49, %v984_v34  ;;  %v987_v40 = vld [vmem:[%s9246_s25 + $0x1810] sm:$0xff] }
 0x379   : > { %v8809_v24 = vcombine.low %v987_v40, %v991_v41 }
 0x37b   : > { %7355 = vmatpush1.bf16.msra.mxu0 %v8745_v60  ;;  %7683 = vmatpush1.bf16.msra.mxu1 %v8747_v46  ;;  %v8803_v60 = vcombine.low %v980_v49, %v984_v34  ;;  %v8810_v46 = vcombine.high %v987_v40, %v991_v41  ;;  %v1048_v40 = vld [vmem:[%s9246_s25 + $0x19f8] sm:$0xff] }
 0x37c   : > { %7356 = vmatprep.subr.bf16.mxu0 %v8754_v47  ;;  %7684 = vmatprep.subr.bf16.mxu1 %v8756_v48  ;;  %v8812_v47 = vcombine.high %v988_v42, %v992_v43  ;;  %v995_v48 = vld [vmem:[%s9246_s25 + $0x1850] sm:$0xff] }
 0x37d   : > { %v8817_v63 = vcombine.low %v995_v48, %v999_v51 }
 0x37f   : > { %7357 = vmatpush1.bf16.msra.mxu0 %v8753_v55  ;;  %7685 = vmatpush1.bf16.msra.mxu1 %v8755_v52  ;;  %v8811_v55 = vcombine.low %v988_v42, %v992_v43  ;;  %v8818_v52 = vcombine.high %v995_v48, %v999_v51  ;;  %v1056_v48 = vld [vmem:[%s9246_s25 + $0x1a38] sm:$0xff] }
 0x380   : > { %7358 = vmatprep.subr.bf16.mxu0 %v8762_v56  ;;  %7686 = vmatprep.subr.bf16.mxu1 %v8764_v57  ;;  %v8820_v56 = vcombine.high %v996_v53, %v1000_v59  ;;  %v1003_v57 = vld [vmem:[%s9246_s25 + $0x1890] sm:$0xff] }
 0x383   : > { %7359 = vmatpush1.bf16.msra.mxu0 %v8761_v6  ;;  %7687 = vmatpush1.bf16.msra.mxu1 %v8763_v9  ;;  %v8819_v6 = vcombine.low %v996_v53, %v1000_v59  ;;  %v8826_v9 = vcombine.high %v1003_v57, %v1007_v58 }
 0x384   : > { %7360 = vmatprep.subr.bf16.mxu0 %v8770_v1  ;;  %7688 = vmatprep.subr.bf16.mxu1 %v8772_v33  ;;  %v8828_v1 = vcombine.high %v1004_v61, %v1008_v62  ;;  %v1011_v33 = vld [vmem:[%s9246_s25 + $0x18d0] sm:$0xff] }
 0x385   : > { %v8833_v16 = vcombine.low %v1011_v33, %v1015_v3 }
 0x387   : > { %7361 = vmatpush1.bf16.msra.mxu0 %v8769_v7  ;;  %7689 = vmatpush1.bf16.msra.mxu1 %v8771_v11  ;;  %v8834_v7 = vcombine.high %v1011_v33, %v1015_v3  ;;  %v8836_v11 = vcombine.high %v1012_v4, %v1016_v5  ;;  %v1072_v33 = vld [vmem:[%s9246_s25 + $0x1ab8] sm:$0xff] }
 0x388   : > { %7362 = vmatprep.subr.bf16.mxu0 %v8778_v12  ;;  %7690 = vmatprep.subr.bf16.mxu1 %v8780_v13  ;;  %v1019_v12 = vld [vmem:[%s9246_s25 + $0x1910] sm:$0xff] }
 0x389   : > { %v1023_v13 = vld [vmem:[%s9246_s25 + $0x1930] sm:$0xff] }
 0x38a   : > { %v8842_v2 = vcombine.high %v1019_v12, %v1023_v13  ;;  %v8841_v10 = vcombine.low %v1019_v12, %v1023_v13  ;;  %v1080_v12 = vld [vmem:[%s9246_s25 + $0x1af8] sm:$0xff] }
 0x38b   : > { %7363 = vmatpush1.bf16.msra.mxu0 %v8777_v18  ;;  %7691 = vmatpush1.bf16.msra.mxu1 %v8779_v54  ;;  %v8844_v18 = vcombine.high %v1020_v14, %v1024_v15  ;;  %v1027_v54 = vld [vmem:[%s9246_s25 + $0x1950] sm:$0xff] }
 0x38c   : > { %7364 = vmatprep.subr.bf16.mxu0 %v8786_v17  ;;  %7692 = vmatprep.subr.bf16.mxu1 %v8788_v21  ;;  %v1031_v17 = vld [vmem:[%s9246_s25 + $0x1970] sm:$0xff]  ;;  %v1028_v21 = vld [vmem:[%s9246_s25 + $0x1958] sm:$0xff] }
 0x38d   : > { %v8850_v25 = vcombine.high %v1027_v54, %v1031_v17  ;;  %v8849_v0 = vcombine.low %v1027_v54, %v1031_v17  ;;  %v8851_v49 = vcombine.low %v1028_v21, %v1032_v22  ;;  %v1088_v54 = vld [vmem:[%s9246_s25 + $0x1b38] sm:$0xff] }
 0x38f   : > { %7365 = vmatpush1.bf16.msra.mxu0 %v8785_v26  ;;  %7693 = vmatpush1.bf16.msra.mxu1 %v8787_v27  ;;  %v8852_v26 = vcombine.high %v1028_v21, %v1032_v22  ;;  %v1035_v27 = vld [vmem:[%s9246_s25 + $0x1990] sm:$0xff] }
 0x390   : > { %7366 = vmatprep.subr.bf16.mxu0 %v8794_v29  ;;  %7694 = vmatprep.subr.bf16.mxu1 %v8796_v31  ;;  %v1039_v29 = vld [vmem:[%s9246_s25 + $0x19b0] sm:$0xff]  ;;  %v1036_v31 = vld [vmem:[%s9246_s25 + $0x1998] sm:$0xff] }
 0x391   : > { %v8858_v34 = vcombine.high %v1035_v27, %v1039_v29  ;;  %v8857_v41 = vcombine.low %v1035_v27, %v1039_v29  ;;  %v8859_v42 = vcombine.low %v1036_v31, %v1040_v32  ;;  %v1096_v27 = vld [vmem:[%s9246_s25 + $0x1b78] sm:$0xff] }
 0x393   : > { %7367 = vmatpush1.bf16.msra.mxu0 %v8793_v20  ;;  %7695 = vmatpush1.bf16.msra.mxu1 %v8795_v35  ;;  %v8860_v20 = vcombine.high %v1036_v31, %v1040_v32  ;;  %v1043_v35 = vld [vmem:[%s9246_s25 + $0x19d0] sm:$0xff] }
 0x394   : > { %7368 = vmatprep.subr.bf16.mxu0 %v8802_v36  ;;  %7696 = vmatprep.subr.bf16.mxu1 %v8804_v37  ;;  %v1047_v36 = vld [vmem:[%s9246_s25 + $0x19f0] sm:$0xff]  ;;  %v1044_v37 = vld [vmem:[%s9246_s25 + $0x19d8] sm:$0xff] }
 0x395   : > { %v8866_v43 = vcombine.high %v1043_v35, %v1047_v36  ;;  %v8865_v51 = vcombine.low %v1043_v35, %v1047_v36  ;;  %v8867_v53 = vcombine.low %v1044_v37, %v1048_v40  ;;  %v1104_v35 = vld [vmem:[%s9246_s25 + $0x1bb8] sm:$0xff] }
 0x397   : > { %7369 = vmatpush1.bf16.msra.mxu0 %v8801_v44  ;;  %7697 = vmatpush1.bf16.msra.mxu1 %v8803_v60  ;;  %v8868_v44 = vcombine.high %v1044_v37, %v1048_v40  ;;  %v1051_v60 = vld [vmem:[%s9246_s25 + $0x1a10] sm:$0xff] }
 0x398   : > { %7379 = vmatprep.subr.bf16.mxu0 %v8810_v46  ;;  %7707 = vmatprep.subr.bf16.mxu1 %v8812_v47  ;;  %v1055_v46 = vld [vmem:[%s9246_s25 + $0x1a30] sm:$0xff]  ;;  %v1052_v47 = vld [vmem:[%s9246_s25 + $0x1a18] sm:$0xff] }
 0x399   : > { %v8874_v59 = vcombine.high %v1051_v60, %v1055_v46  ;;  %v8875_v61 = vcombine.low %v1052_v47, %v1056_v48 }
 0x39a   : > { %7371 = vmatmul.mubr.bf16.vlgmr.msra.gmra.mrb[4].mxu0 %v9747_v28  ;;  %7699 = vmatmul.mubr.bf16.vlgmr.msra.gmra.mrb[4].mxu1 %v9747_v28  ;;  %v8825_v28 = vcombine.low %v1003_v57, %v1007_v58  ;;  %v1064_v57 = vld [vmem:[%s9246_s25 + $0x1a78] sm:$0xff]  ;;  %v8873_v58 = vcombine.low %v1051_v60, %v1055_v46 }
 0x39b   : > { %7380 = vmatpush1.bf16.msra.mxu0 %v8809_v24  ;;  %7708 = vmatpush1.bf16.msra.mxu1 %v8811_v55  ;;  %v8876_v24 = vcombine.high %v1052_v47, %v1056_v48  ;;  %v1059_v55 = vld [vmem:[%s9246_s25 + $0x1a50] sm:$0xff]  ;;  %v1112_v60 = vld [vmem:[%s9246_s25 + $0x1bf8] sm:$0xff] }
 0x39c   : > { %7381 = vmatprep.subr.bf16.mxu0 %v8818_v52  ;;  %7709 = vmatprep.subr.bf16.mxu1 %v8820_v56  ;;  %v1063_v52 = vld [vmem:[%s9246_s25 + $0x1a70] sm:$0xff]  ;;  %v1060_v56 = vld [vmem:[%s9246_s25 + $0x1a58] sm:$0xff] }
 0x39d   : > { %7411 = vmatprep.mubr.bf16.mxu0 %v9754_v38  ;;  %7739 = vmatprep.mubr.bf16.mxu1 %v9754_v38  ;;  %v8835_v38 = vcombine.low %v1012_v4, %v1016_v5  ;;  %v8882_v62 = vcombine.high %v1059_v55, %v1063_v52  ;;  %v8881_v3 = vcombine.low %v1059_v55, %v1063_v52  ;;  %v1120_v55 = vld [vmem:[%s9246_s25 + $0x1c38] sm:$0xff] }
 0x39e   : > { %v8883_v4 = vcombine.low %v1060_v56, %v1064_v57 }
 0x39f   : > { %7382 = vmatpush1.bf16.msra.mxu0 %v8817_v63  ;;  %7710 = vmatpush1.bf16.msra.mxu1 %v8819_v6  ;;  %v8884_v63 = vcombine.high %v1060_v56, %v1064_v57  ;;  %v1067_v6 = vld [vmem:[%s9246_s25 + $0x1a90] sm:$0xff] }
 0x3a0   : > { %7383 = vmatprep.subr.bf16.mxu0 %v8826_v9  ;;  %7711 = vmatprep.subr.bf16.mxu1 %v8828_v1  ;;  %v1071_v9 = vld [vmem:[%s9246_s25 + $0x1ab0] sm:$0xff]  ;;  %v1068_v1 = vld [vmem:[%s9246_s25 + $0x1a98] sm:$0xff] }
 0x3a1   : > { %v8890_v5 = vcombine.high %v1067_v6, %v1071_v9  ;;  %v8889_v13 = vcombine.low %v1067_v6, %v1071_v9  ;;  %v8891_v14 = vcombine.low %v1068_v1, %v1072_v33  ;;  %v1128_v6 = vld [vmem:[%s9246_s25 + $0x1c78] sm:$0xff] }
 0x3a3   : > { %7384 = vmatpush1.bf16.msra.mxu0 %v8825_v28  ;;  %7712 = vmatpush1.bf16.msra.mxu1 %v8827_v30  ;;  %v8892_v28 = vcombine.high %v1068_v1, %v1072_v33  ;;  %v1075_v30 = vld [vmem:[%s9246_s25 + $0x1ad0] sm:$0xff] }
 0x3a4   : > { %7385 = vmatprep.subr.bf16.mxu0 %v8834_v7  ;;  %7713 = vmatprep.subr.bf16.mxu1 %v8836_v11  ;;  %v1079_v7 = vld [vmem:[%s9246_s25 + $0x1af0] sm:$0xff]  ;;  %v1076_v11 = vld [vmem:[%s9246_s25 + $0x1ad8] sm:$0xff] }
 0x3a5   : > { %v8898_v15 = vcombine.high %v1075_v30, %v1079_v7  ;;  %v8897_v17 = vcombine.low %v1075_v30, %v1079_v7  ;;  %v8899_v21 = vcombine.low %v1076_v11, %v1080_v12  ;;  %v1136_v30 = vld [vmem:[%s9246_s25 + $0x1cb8] sm:$0xff] }
 0x3a7   : > { %7386 = vmatpush1.bf16.msra.mxu0 %v8833_v16  ;;  %7714 = vmatpush1.bf16.msra.mxu1 %v8835_v38  ;;  %v8900_v16 = vcombine.high %v1076_v11, %v1080_v12  ;;  %v1083_v38 = vld [vmem:[%s9246_s25 + $0x1b10] sm:$0xff] }
 0x3a8   : > { %7387 = vmatprep.subr.bf16.mxu0 %v8842_v2  ;;  %7715 = vmatprep.subr.bf16.mxu1 %v8844_v18  ;;  %v1087_v2 = vld [vmem:[%s9246_s25 + $0x1b30] sm:$0xff]  ;;  %v1084_v18 = vld [vmem:[%s9246_s25 + $0x1b18] sm:$0xff] }
 0x3a9   : > { %v8906_v22 = vcombine.high %v1083_v38, %v1087_v2  ;;  %v8905_v29 = vcombine.low %v1083_v38, %v1087_v2  ;;  %v8907_v31 = vcombine.low %v1084_v18, %v1088_v54  ;;  %v1144_v38 = vld [vmem:[%s9246_s25 + $0x1cf8] sm:$0xff] }
 0x3ab   : > { %7388 = vmatpush1.bf16.msra.mxu0 %v8841_v10  ;;  %7716 = vmatpush1.bf16.msra.mxu1 %v8843_v39  ;;  %v8908_v10 = vcombine.high %v1084_v18, %v1088_v54  ;;  %v1091_v39 = vld [vmem:[%s9246_s25 + $0x1b50] sm:$0xff] }
 0x3ac   : > { %7389 = vmatprep.subr.bf16.mxu0 %v8850_v25  ;;  %7717 = vmatprep.subr.bf16.mxu1 %v8852_v26  ;;  %v1095_v25 = vld [vmem:[%s9246_s25 + $0x1b70] sm:$0xff]  ;;  %v1092_v26 = vld [vmem:[%s9246_s25 + $0x1b58] sm:$0xff] }
 0x3ad   : > { %v8914_v32 = vcombine.high %v1091_v39, %v1095_v25  ;;  %v8913_v36 = vcombine.low %v1091_v39, %v1095_v25  ;;  %v8915_v37 = vcombine.low %v1092_v26, %v1096_v27 }
 0x3af   : > { %7390 = vmatpush1.bf16.msra.mxu0 %v8849_v0  ;;  %7718 = vmatpush1.bf16.msra.mxu1 %v8851_v49  ;;  %v8916_v0 = vcombine.high %v1092_v26, %v1096_v27  ;;  %v1099_v49 = vld [vmem:[%s9246_s25 + $0x1b90] sm:$0xff] }
 0x3b0   : > { %7391 = vmatprep.subr.bf16.mxu0 %v8858_v34  ;;  %7719 = vmatprep.subr.bf16.mxu1 %v8860_v20  ;;  %v1103_v34 = vld [vmem:[%s9246_s25 + $0x1bb0] sm:$0xff]  ;;  %v1100_v20 = vld [vmem:[%s9246_s25 + $0x1b98] sm:$0xff] }
 0x3b1   : > { %v8922_v40 = vcombine.high %v1099_v49, %v1103_v34  ;;  %v8921_v46 = vcombine.low %v1099_v49, %v1103_v34  ;;  %v8923_v47 = vcombine.low %v1100_v20, %v1104_v35  ;;  %v1155_v27 = vld [vmem:[%s9246_s25 + $0x1d50] sm:$0xff] }
 0x3b3   : > { %7392 = vmatpush1.bf16.msra.mxu0 %v8857_v41  ;;  %7720 = vmatpush1.bf16.msra.mxu1 %v8859_v42  ;;  %v8924_v41 = vcombine.high %v1100_v20, %v1104_v35  ;;  %v1107_v42 = vld [vmem:[%s9246_s25 + $0x1bd0] sm:$0xff] }
 0x3b4   : > { %7393 = vmatprep.subr.bf16.mxu0 %v8866_v43  ;;  %7721 = vmatprep.subr.bf16.mxu1 %v8868_v44  ;;  %v1111_v43 = vld [vmem:[%s9246_s25 + $0x1bf0] sm:$0xff]  ;;  %v1108_v44 = vld [vmem:[%s9246_s25 + $0x1bd8] sm:$0xff] }
 0x3b5   : > { %v8930_v48 = vcombine.high %v1107_v42, %v1111_v43  ;;  %v8929_v52 = vcombine.low %v1107_v42, %v1111_v43  ;;  %v8931_v56 = vcombine.low %v1108_v44, %v1112_v60  ;;  %v1163_v35 = vld [vmem:[%s9246_s25 + $0x1d90] sm:$0xff] }
 0x3b7   : > { %7394 = vmatpush1.bf16.msra.mxu0 %v8865_v51  ;;  %7722 = vmatpush1.bf16.msra.mxu1 %v8867_v53  ;;  %v8932_v51 = vcombine.high %v1108_v44, %v1112_v60  ;;  %v1115_v53 = vld [vmem:[%s9246_s25 + $0x1c10] sm:$0xff] }
 0x3b8   : > { %7395 = vmatprep.subr.bf16.mxu0 %v8874_v59  ;;  %7723 = vmatprep.subr.bf16.mxu1 %v8876_v24  ;;  %v1119_v59 = vld [vmem:[%s9246_s25 + $0x1c30] sm:$0xff]  ;;  %v1116_v24 = vld [vmem:[%s9246_s25 + $0x1c18] sm:$0xff] }
 0x3b9   : > { %v8938_v57 = vcombine.high %v1115_v53, %v1119_v59  ;;  %v8937_v9 = vcombine.low %v1115_v53, %v1119_v59  ;;  %v8939_v1 = vcombine.low %v1116_v24, %v1120_v55  ;;  %v1171_v60 = vld [vmem:[%s9246_s25 + $0x1dd0] sm:$0xff] }
 0x3bb   : > { %7396 = vmatpush1.bf16.msra.mxu0 %v8873_v58  ;;  %7724 = vmatpush1.bf16.msra.mxu1 %v8875_v61  ;;  %v8940_v58 = vcombine.high %v1116_v24, %v1120_v55  ;;  %v1123_v61 = vld [vmem:[%s9246_s25 + $0x1c50] sm:$0xff] }
 0x3bc   : > { %7397 = vmatprep.subr.bf16.mxu0 %v8882_v62  ;;  %7725 = vmatprep.subr.bf16.mxu1 %v8884_v63  ;;  %v1127_v62 = vld [vmem:[%s9246_s25 + $0x1c70] sm:$0xff]  ;;  %v1124_v63 = vld [vmem:[%s9246_s25 + $0x1c58] sm:$0xff] }
 0x3bd   : > { %v8946_v33 = vcombine.high %v1123_v61, %v1127_v62  ;;  %v8945_v7 = vcombine.low %v1123_v61, %v1127_v62  ;;  %v8947_v11 = vcombine.low %v1124_v63, %v1128_v6  ;;  %v1179_v55 = vld [vmem:[%s9246_s25 + $0x1e10] sm:$0xff] }
 0x3bf   : > { %7398 = vmatpush1.bf16.msra.mxu0 %v8881_v3  ;;  %7726 = vmatpush1.bf16.msra.mxu1 %v8883_v4  ;;  %v8948_v3 = vcombine.high %v1124_v63, %v1128_v6  ;;  %v1131_v4 = vld [vmem:[%s9246_s25 + $0x1c90] sm:$0xff] }
 0x3c0   : > { %7399 = vmatprep.subr.bf16.mxu0 %v8890_v5  ;;  %7727 = vmatprep.subr.bf16.mxu1 %v8892_v28  ;;  %v1135_v5 = vld [vmem:[%s9246_s25 + $0x1cb0] sm:$0xff]  ;;  %v1132_v28 = vld [vmem:[%s9246_s25 + $0x1c98] sm:$0xff] }
 0x3c1   : > { %v8954_v12 = vcombine.high %v1131_v4, %v1135_v5  ;;  %v8955_v2 = vcombine.low %v1132_v28, %v1136_v30  ;;  %v1187_v6 = vld [vmem:[%s9246_s25 + $0x1e50] sm:$0xff] }
 0x3c3   : > { %7400 = vmatpush1.bf16.msra.mxu0 %v8889_v13  ;;  %7728 = vmatpush1.bf16.msra.mxu1 %v8891_v14  ;;  %v8956_v13 = vcombine.high %v1132_v28, %v1136_v30  ;;  %v1139_v14 = vld [vmem:[%s9246_s25 + $0x1cd0] sm:$0xff] }
 0x3c4   : > { %7401 = vmatprep.subr.bf16.mxu0 %v8898_v15  ;;  %7729 = vmatprep.subr.bf16.mxu1 %v8900_v16  ;;  %v1143_v15 = vld [vmem:[%s9246_s25 + $0x1cf0] sm:$0xff]  ;;  %v1140_v16 = vld [vmem:[%s9246_s25 + $0x1cd8] sm:$0xff] }
 0x3c5   : > { %v8962_v18 = vcombine.high %v1139_v14, %v1143_v15  ;;  %v8964_v54 = vcombine.high %v1140_v16, %v1144_v38  ;;  %v8961_v39 = vcombine.low %v1139_v14, %v1143_v15  ;;  %v1195_v30 = vld [vmem:[%s9246_s25 + $0x1e90] sm:$0xff] }
 0x3c7   : > { %7402 = vmatpush1.bf16.msra.mxu0 %v8897_v17  ;;  %7730 = vmatpush1.bf16.msra.mxu1 %v8899_v21  ;;  %v1147_v17 = vld [vmem:[%s9246_s25 + $0x1d10] sm:$0xff] }
 0x3c8   : > { %7403 = vmatprep.subr.bf16.mxu0 %v8906_v22  ;;  %7731 = vmatprep.subr.bf16.mxu1 %v8908_v10  ;;  %v1151_v21 = vld [vmem:[%s9246_s25 + $0x1d30] sm:$0xff]  ;;  %v1148_v22 = vld [vmem:[%s9246_s25 + $0x1d18] sm:$0xff] }
 0x3c9   : > { %v1152_v10 = vld [vmem:[%s9246_s25 + $0x1d38] sm:$0xff]  ;;  %v8970_v25 = vcombine.high %v1147_v17, %v1151_v21 }
 0x3ca   : > { %v8972_v26 = vcombine.high %v1148_v22, %v1152_v10  ;;  %v8971_v49 = vcombine.low %v1148_v22, %v1152_v10  ;;  %v1211_v10 = vld [vmem:[%s9246_s25 + $0x1f10] sm:$0xff] }
 0x3cb   : > { %7404 = vmatpush1.bf16.msra.mxu0 %v8905_v29  ;;  %7732 = vmatpush1.bf16.msra.mxu1 %v8907_v31  ;;  %v1159_v29 = vld [vmem:[%s9246_s25 + $0x1d70] sm:$0xff]  ;;  %v1156_v31 = vld [vmem:[%s9246_s25 + $0x1d58] sm:$0xff] }
 0x3cc   : > { %7405 = vmatprep.subr.bf16.mxu0 %v8914_v32  ;;  %7733 = vmatprep.subr.bf16.mxu1 %v8916_v0  ;;  %v1160_v32 = vld [vmem:[%s9246_s25 + $0x1d78] sm:$0xff]  ;;  %v8969_v0 = vcombine.low %v1147_v17, %v1151_v21  ;;  %v8978_v34 = vcombine.high %v1155_v27, %v1159_v29 }
 0x3cd   : > { %v8980_v20 = vcombine.high %v1156_v31, %v1160_v32  ;;  %v8979_v42 = vcombine.low %v1156_v31, %v1160_v32  ;;  %v1219_v32 = vld [vmem:[%s9246_s25 + $0x1f50] sm:$0xff] }
 0x3cf   : > { %7406 = vmatpush1.bf16.msra.mxu0 %v8913_v36  ;;  %7734 = vmatpush1.bf16.msra.mxu1 %v8915_v37  ;;  %v1167_v36 = vld [vmem:[%s9246_s25 + $0x1db0] sm:$0xff]  ;;  %v1164_v37 = vld [vmem:[%s9246_s25 + $0x1d98] sm:$0xff] }
 0x3d0   : > { %7407 = vmatprep.subr.bf16.mxu0 %v8922_v40  ;;  %7735 = vmatprep.subr.bf16.mxu1 %v8924_v41  ;;  %v1168_v40 = vld [vmem:[%s9246_s25 + $0x1db8] sm:$0xff]  ;;  %v8977_v41 = vcombine.low %v1155_v27, %v1159_v29  ;;  %v8986_v43 = vcombine.high %v1163_v35, %v1167_v36 }
 0x3d1   : > { %v8988_v44 = vcombine.high %v1164_v37, %v1168_v40  ;;  %v8987_v53 = vcombine.low %v1164_v37, %v1168_v40  ;;  %v1227_v40 = vld [vmem:[%s9246_s25 + $0x1f90] sm:$0xff] }
 0x3d3   : > { %7408 = vmatpush1.bf16.msra.mxu0 %v8921_v46  ;;  %7736 = vmatpush1.bf16.msra.mxu1 %v8923_v47  ;;  %v1175_v46 = vld [vmem:[%s9246_s25 + $0x1df0] sm:$0xff]  ;;  %v1172_v47 = vld [vmem:[%s9246_s25 + $0x1dd8] sm:$0xff] }
 0x3d4   : > { %7409 = vmatprep.subr.bf16.mxu0 %v8930_v48  ;;  %7737 = vmatprep.subr.bf16.mxu1 %v8932_v51  ;;  %v1176_v48 = vld [vmem:[%s9246_s25 + $0x1df8] sm:$0xff]  ;;  %v8985_v51 = vcombine.low %v1163_v35, %v1167_v36  ;;  %v8994_v59 = vcombine.high %v1171_v60, %v1175_v46 }
 0x3d5   : > { %v8996_v24 = vcombine.high %v1172_v47, %v1176_v48  ;;  %v8995_v61 = vcombine.low %v1172_v47, %v1176_v48  ;;  %v1235_v48 = vld [vmem:[%s9246_s25 + $0x1fd0] sm:$0xff] }
 0x3d7   : > { %7410 = vmatpush1.bf16.msra.mxu0 %v8929_v52  ;;  %7738 = vmatpush1.bf16.msra.mxu1 %v8931_v56  ;;  %v1183_v52 = vld [vmem:[%s9246_s25 + $0x1e30] sm:$0xff]  ;;  %v1180_v56 = vld [vmem:[%s9246_s25 + $0x1e18] sm:$0xff] }
 0x3d8   : > { %7420 = vmatprep.subr.bf16.mxu0 %v8938_v57  ;;  %7748 = vmatprep.subr.bf16.mxu1 %v8940_v58  ;;  %v1184_v57 = vld [vmem:[%s9246_s25 + $0x1e38] sm:$0xff]  ;;  %v8993_v58 = vcombine.low %v1171_v60, %v1175_v46  ;;  %v9002_v62 = vcombine.high %v1179_v55, %v1183_v52 }
 0x3d9   : > { %v9004_v63 = vcombine.high %v1180_v56, %v1184_v57 }
 0x3da   : > { %7412 = vmatmul.mubr.bf16.vlgmr.msra.gmra.mrb[4].mxu0 %v9822_v8  ;;  %7740 = vmatmul.mubr.bf16.vlgmr.msra.gmra.mrb[4].mxu1 %v9822_v8  ;;  %v8953_v8 = vcombine.low %v1131_v4, %v1135_v5  ;;  %v9003_v4 = vcombine.low %v1180_v56, %v1184_v57 }
 0x3db   : > { %7421 = vmatpush1.bf16.msra.mxu0 %v8937_v9  ;;  %7749 = vmatpush1.bf16.msra.mxu1 %v8939_v1  ;;  %v1191_v9 = vld [vmem:[%s9246_s25 + $0x1e70] sm:$0xff]  ;;  %v1188_v1 = vld [vmem:[%s9246_s25 + $0x1e58] sm:$0xff] }
 0x3dc   : > { %7422 = vmatprep.subr.bf16.mxu0 %v8946_v33  ;;  %7750 = vmatprep.subr.bf16.mxu1 %v8948_v3  ;;  %v1192_v33 = vld [vmem:[%s9246_s25 + $0x1e78] sm:$0xff]  ;;  %v9001_v3 = vcombine.low %v1179_v55, %v1183_v52  ;;  %v9010_v5 = vcombine.high %v1187_v6, %v1191_v9 }
 0x3dd   : > { %7452 = vmatprep.mubr.bf16.mxu0 %v9830_v19  ;;  %7780 = vmatprep.mubr.bf16.mxu1 %v9830_v19  ;;  %v8963_v19 = vcombine.low %v1140_v16, %v1144_v38  ;;  %v9012_v28 = vcombine.high %v1188_v1, %v1192_v33  ;;  %v9011_v14 = vcombine.low %v1188_v1, %v1192_v33  ;;  %v1203_v38 = vld [vmem:[%s9246_s25 + $0x1ed0] sm:$0xff] }
 0x3df   : > { %7423 = vmatpush1.bf16.msra.mxu0 %v8945_v7  ;;  %7751 = vmatpush1.bf16.msra.mxu1 %v8947_v11  ;;  %v1199_v7 = vld [vmem:[%s9246_s25 + $0x1eb0] sm:$0xff]  ;;  %v1196_v11 = vld [vmem:[%s9246_s25 + $0x1e98] sm:$0xff] }
 0x3e0   : > { %7424 = vmatprep.subr.bf16.mxu0 %v8954_v12  ;;  %7752 = vmatprep.subr.bf16.mxu1 %v8956_v13  ;;  %v1200_v12 = vld [vmem:[%s9246_s25 + $0x1eb8] sm:$0xff]  ;;  %v9009_v13 = vcombine.low %v1187_v6, %v1191_v9  ;;  %v9018_v15 = vcombine.high %v1195_v30, %v1199_v7 }
 0x3e1   : > { %v9020_v16 = vcombine.high %v1196_v11, %v1200_v12  ;;  %v9019_v17 = vcombine.low %v1196_v11, %v1200_v12  ;;  %v7843_v12 = vld [vmem:[%s10499_s2] sm:$0xff] (!%p9061_p6) }
 0x3e3   : > { %7425 = vmatpush1.bf16.msra.mxu0 %v8953_v8  ;;  %7753 = vmatpush1.bf16.msra.mxu1 %v8955_v2  ;;  %v1207_v8 = vld [vmem:[%s9246_s25 + $0x1ef0] sm:$0xff]  ;;  %v1204_v2 = vld [vmem:[%s9246_s25 + $0x1ed8] sm:$0xff] }
 0x3e4   : > { %7426 = vmatprep.subr.bf16.mxu0 %v8962_v18  ;;  %7754 = vmatprep.subr.bf16.mxu1 %v8964_v54  ;;  %v1208_v18 = vld [vmem:[%s9246_s25 + $0x1ef8] sm:$0xff]  ;;  %v9017_v54 = vcombine.low %v1195_v30, %v1199_v7  ;;  %v9026_v21 = vcombine.high %v1203_v38, %v1207_v8  ;;  %v214_v7 = vld [vmem:[%s10501_s4 + $0x8] sm:$0xff] }
 0x3e5   : > { %v9028_v22 = vcombine.high %v1204_v2, %v1208_v18  ;;  %v9027_v27 = vcombine.low %v1204_v2, %v1208_v18  ;;  %v7867_v2 = vsub.s32 (!%p9061_p6), 5, %v9277_v45  ;;  %v7871_v18 = vsub.s32 (!%p9061_p6), 6, %v9277_v45 }
 0x3e7   : > { %7427 = vmatpush1.bf16.msra.mxu0 %v8961_v39  ;;  %7755 = vmatpush1.bf16.msra.mxu1 %v8963_v19  ;;  %v1215_v39 = vld [vmem:[%s9246_s25 + $0x1f30] sm:$0xff]  ;;  %v1212_v19 = vld [vmem:[%s9246_s25 + $0x1f18] sm:$0xff] }
 0x3e8   : > { %7428 = vmatprep.subr.bf16.mxu0 %v8970_v25  ;;  %7756 = vmatprep.subr.bf16.mxu1 %v8972_v26  ;;  %v1216_v25 = vld [vmem:[%s9246_s25 + $0x1f38] sm:$0xff]  ;;  %v9025_v26 = vcombine.low %v1203_v38, %v1207_v8  ;;  %v9034_v29 = vcombine.high %v1211_v10, %v1215_v39  ;;  %v7915_v38 = vld [vmem:[%s10500_s3] sm:$0xff] (!%p9061_p6)  ;;  %v7863_v8 = vsub.s32 (!%p9061_p6), 4, %v9277_v45 }
 0x3e9   : > { %v9036_v31 = vcombine.high %v1212_v19, %v1216_v25  ;;  %v9035_v35 = vcombine.low %v1212_v19, %v1216_v25 }
 0x3eb   : > { %7429 = vmatpush1.bf16.msra.mxu0 %v8969_v0  ;;  %7757 = vmatpush1.bf16.msra.mxu1 %v8971_v49  ;;  %v1223_v0 = vld [vmem:[%s9246_s25 + $0x1f70] sm:$0xff]  ;;  %v1220_v49 = vld [vmem:[%s9246_s25 + $0x1f58] sm:$0xff] }
 0x3ec   : > { %7430 = vmatprep.subr.bf16.mxu0 %v8978_v34  ;;  %7758 = vmatprep.subr.bf16.mxu1 %v8980_v20  ;;  %v1224_v34 = vld [vmem:[%s9246_s25 + $0x1f78] sm:$0xff]  ;;  %v9033_v20 = vcombine.low %v1211_v10, %v1215_v39  ;;  %v9042_v36 = vcombine.high %v1219_v32, %v1223_v0 }
 0x3ed   : > { %v9044_v37 = vcombine.high %v1220_v49, %v1224_v34  ;;  %v9043_v60 = vcombine.low %v1220_v49, %v1224_v34  ;;  %v7872_v34 = vrot.slane (!%p9061_p6), %v7843_v12, %v7871_v18 }
 0x3ef   : > { %7431 = vmatpush1.bf16.msra.mxu0 %v8977_v41  ;;  %7759 = vmatpush1.bf16.msra.mxu1 %v8979_v42  ;;  %v1231_v41 = vld [vmem:[%s9246_s25 + $0x1fb0] sm:$0xff]  ;;  %v1228_v42 = vld [vmem:[%s9246_s25 + $0x1f98] sm:$0xff] }
 0x3f0   : > { %7432 = vmatprep.subr.bf16.mxu0 %v8986_v43  ;;  %7760 = vmatprep.subr.bf16.mxu1 %v8988_v44  ;;  %v1232_v43 = vld [vmem:[%s9246_s25 + $0x1fb8] sm:$0xff]  ;;  %v9041_v44 = vcombine.low %v1219_v32, %v1223_v0  ;;  %v9050_v46 = vcombine.high %v1227_v40, %v1231_v41  ;;  %v7868_v32 = vrot.slane (!%p9061_p6), %v7843_v12, %v7867_v2 }
 0x3f1   : > { %v9052_v47 = vcombine.high %v1228_v42, %v1232_v43  ;;  %v9051_v55 = vcombine.low %v1228_v42, %v1232_v43 }
 0x3f3   : > { %7433 = vmatpush1.bf16.msra.mxu0 %v8985_v51  ;;  %7761 = vmatpush1.bf16.msra.mxu1 %v8987_v53  ;;  %v1239_v51 = vld [vmem:[%s9246_s25 + $0x1ff0] sm:$0xff]  ;;  %v1236_v53 = vld [vmem:[%s9246_s25 + $0x1fd8] sm:$0xff] }
 0x3f4   : > { %7434 = vmatprep.subr.bf16.mxu0 %v8994_v59  ;;  %7762 = vmatprep.subr.bf16.mxu1 %v8996_v24  ;;  %v1240_v59 = vld [vmem:[%s9246_s25 + $0x1ff8] sm:$0xff]  ;;  %v9049_v24 = vcombine.low %v1227_v40, %v1231_v41  ;;  %v9058_v52 = vcombine.high %v1235_v48, %v1239_v51  ;;  %v9057_v57 = vcombine.low %v1235_v48, %v1239_v51  ;;  %v7841_v40 = vld [vmem:[%s10501_s4] sm:$0xff] (!%p9061_p6) }
 0x3f5   : > { %v9060_v56 = vcombine.high %v1236_v53, %v1240_v59 }
 0x3f7   : > { %7435 = vmatpush1.bf16.msra.mxu0 %v8993_v58  ;;  %7763 = vmatpush1.bf16.msra.mxu1 %v8995_v61  ;;  %v9059_v58 = vcombine.low %v1236_v53, %v1240_v59 }
 0x3f8   : > { %7436 = vmatprep.subr.bf16.mxu0 %v9002_v62  ;;  %7764 = vmatprep.subr.bf16.mxu1 %v9004_v63 }
 0x3fb   : > { %7437 = vmatpush1.bf16.msra.mxu0 %v9001_v3  ;;  %7765 = vmatpush1.bf16.msra.mxu1 %v9003_v4 }
 0x3fc   : > { %7438 = vmatprep.subr.bf16.mxu0 %v9010_v5  ;;  %7766 = vmatprep.subr.bf16.mxu1 %v9012_v28 }
 0x3ff   : > { %7439 = vmatpush1.bf16.msra.mxu0 %v9009_v13  ;;  %7767 = vmatpush1.bf16.msra.mxu1 %v9011_v14  ;;  %v7847_v13 = vsub.s32 (!%p9061_p6), 0, %v9277_v45  ;;  %v7851_v14 = vsub.s32 (!%p9061_p6), 1, %v9277_v45 }
 0x400   : > { %7440 = vmatprep.subr.bf16.mxu0 %v9018_v15  ;;  %7768 = vmatprep.subr.bf16.mxu1 %v9020_v16  ;;  %v7855_v15 = vsub.s32 (!%p9061_p6), 2, %v9277_v45  ;;  %v7859_v16 = vsub.s32 (!%p9061_p6), 3, %v9277_v45 }
 0x401   : > { %v7920_v39 = vrot.slane (!%p9061_p6), %v7915_v38, %v7847_v13  ;;  %v7924_v19 = vrot.slane (!%p9061_p6), %v7915_v38, %v7851_v14 }
 0x402   : > { %v7860_v10 = vrot.slane (!%p9061_p6), %v7843_v12, %v7859_v16  ;;  %v7928_v25 = vrot.slane (!%p9061_p6), %v7915_v38, %v7855_v15 }
 0x403   : > { %7441 = vmatpush1.bf16.msra.mxu0 %v9017_v54  ;;  %7769 = vmatpush1.bf16.msra.mxu1 %v9019_v17  ;;  %v7875_v54 = vsub.s32 (!%p9061_p6), 7, %v9277_v45  ;;  %v7848_v17 = vrot.slane (!%p9061_p6), %v7843_v12, %v7847_v13  ;;  %v7949_v0 = vcombine.low (!%p9061_p6), %v7920_v39, %v7924_v19 }
 0x404   : > { %7442 = vmatprep.subr.bf16.mxu0 %v9026_v21  ;;  %7770 = vmatprep.subr.bf16.mxu1 %v9028_v22  ;;  %v7852_v21 = vrot.slane (!%p9061_p6), %v7843_v12, %v7851_v14  ;;  %v7856_v22 = vrot.slane (!%p9061_p6), %v7843_v12, %v7855_v15 }
 0x405   : > { %v7957_v41 = vrot.slane (!%p9061_p6), %v7949_v0, %v10131_v23  ;;  %v7948_v48 = vrot.slane (!%p9061_p6), %v7915_v38, %v7875_v54 }
 0x407   : > { %7443 = vmatpush1.bf16.msra.mxu0 %v9025_v26  ;;  %7771 = vmatpush1.bf16.msra.mxu1 %v9027_v27  ;;  %v7932_v26 = vrot.slane (!%p9061_p6), %v7915_v38, %v7859_v16  ;;  %v7877_v27 = vcombine.low (!%p9061_p6), %v7848_v17, %v7852_v21 }
 0x408   : > { %7444 = vmatprep.subr.bf16.mxu0 %v9034_v29  ;;  %7772 = vmatprep.subr.bf16.mxu1 %v9036_v31  ;;  %v7878_v29 = vcombine.low (!%p9061_p6), %v7856_v22, %v7860_v10  ;;  %v7864_v31 = vrot.slane (!%p9061_p6), %v7843_v12, %v7863_v8 }
 0x409   : > { %v7950_v49 = vcombine.low (!%p9061_p6), %v7928_v25, %v7932_v26 }
 0x40a   : > { %v7892_v45 = vrot.slane (!%p9061_p6), %v7878_v29, %v10131_v23 }
 0x40b   : > { %7445 = vmatpush1.bf16.msra.mxu0 %v9033_v20  ;;  %7773 = vmatpush1.bf16.msra.mxu1 %v9035_v35  ;;  %v7876_v20 = vrot.slane (!%p9061_p6), %v7843_v12, %v7875_v54  ;;  %v7885_v35 = vrot.slane (!%p9061_p6), %v7877_v27, %v10131_v23  ;;  %v7964_v42 = vrot.slane (!%p9061_p6), %v7950_v49, %v10131_v23 }
 0x40c   : > { %7446 = vmatprep.subr.bf16.mxu0 %v9042_v36  ;;  %7774 = vmatprep.subr.bf16.mxu1 %v9044_v37  ;;  %v7894_v36 = vcombine.low (!%p9061_p6), %v7864_v31, %v7868_v32  ;;  %v7936_v37 = vrot.slane (!%p9061_p6), %v7915_v38, %v7863_v8 }
 0x40d   : > { %v7895_v43 = vcombine.low (!%p9061_p6), %v7872_v34, %v7876_v20  ;;  %v7965_v51 = vcombine.low (!%p9061_p6), %v7957_v41, %v7964_v42 }
 0x40f   : > { %7447 = vmatpush1.bf16.msra.mxu0 %v9041_v44  ;;  %7775 = vmatpush1.bf16.msra.mxu1 %v9043_v60  ;;  %v7940_v44 = vrot.slane (!%p9061_p6), %v7915_v38, %v7867_v2  ;;  %v7893_v60 = vcombine.low (!%p9061_p6), %v7885_v35, %v7892_v45  ;;  %v7909_v53 = vrot.slane (!%p9061_p6), %v7895_v43, %v10131_v23 }
 0x410   : > { %7448 = vmatprep.subr.bf16.mxu0 %v9050_v46  ;;  %7776 = vmatprep.subr.bf16.mxu1 %v9052_v47  ;;  %v7902_v46 = vrot.slane (!%p9061_p6), %v7894_v36, %v10131_v23  ;;  %v7944_v47 = vrot.slane (!%p9061_p6), %v7915_v38, %v7871_v18 }
 0x411   : > { %v7966_v59 = vcombine.low (!%p9061_p6), %v7936_v37, %v7940_v44 }
 0x413   : > { %7449 = vmatpush1.bf16.msra.mxu0 %v9049_v24  ;;  %7777 = vmatpush1.bf16.msra.mxu1 %v9051_v55  ;;  %v7913_v24 = vmul.f32 (!%p9061_p6), %v7893_v60, %v7841_v40 }
 0x414   : > { %7450 = vmatprep.subr.bf16.mxu0 %v9058_v52  ;;  %7778 = vmatprep.subr.bf16.mxu1 %v9060_v56  ;;  %v7967_v52 = vcombine.low (!%p9061_p6), %v7944_v47, %v7948_v48  ;;  %v7910_v56 = vcombine.low (!%p9061_p6), %v7902_v46, %v7909_v53 }
 0x417   : > { %7451 = vmatpush1.bf16.msra.mxu0 %v9057_v57  ;;  %7779 = vmatpush1.bf16.msra.mxu1 %v9059_v58  ;;  %v7974_v57 = vrot.slane (!%p9061_p6), %v7966_v59, %v10131_v23  ;;  %v7985_v58 = vadd.f32 (!%p9061_p6), %v7965_v51, %v7913_v24 }
 0x41a   : > { %7453 = vmatmul.mubr.bf16.vlgmr.msra.gmra.mrb[4].mxu0 %v9898_v50  ;;  %7781 = vmatmul.mubr.bf16.vlgmr.msra.gmra.mrb[4].mxu1 %v9898_v50 }
 0x4ed   : > { %v7454_v61 = vpop.f32.mrb[4].mxu0  ;;  %v7782_v62 = vpop.f32.mrb[4].mxu1 }
 0x4ee   : > { %v7456_v63 = vpop.f32.mrb[5].mxu0  ;;  %v7784_v9 = vpop.f32.mrb[5].mxu1 }
 0x4ef   : > { %v7814_v6 = vcombine.low %v7454_v61, %v7456_v63  ;;  %v7458_v1 = vpop.f32.mrb[6].mxu0  ;;  %v7815_v33 = vcombine.low %v7782_v62, %v7784_v9  ;;  %v7786_v3 = vpop.f32.mrb[6].mxu1  ;;  %v7981_v61 = vrot.slane (!%p9061_p6), %v7967_v52, %v10131_v23  ;;  %v7987_v63 = vmax.f32 (!%p9061_p6), %v7985_v58, 0.0 }
 0x4f0   : > { %v7459_v4 = vpop.f32.mrb[7].mxu0  ;;  %v7787_v28 = vpop.f32.mrb[7].mxu1 }
 0x4f1   : > { %v7822_v5 = vrot.slane %v7814_v6, %v10131_v23  ;;  %v7829_v30 = vrot.slane %v7815_v33, %v10131_v23  ;;  %7840 = sbr.rel (%p9061_p6) target bundleno = 1286 (0x506), region = 44  ;;  %v7982_v6 = vcombine.low (!%p9061_p6), %v7974_v57, %v7981_v61  ;;  %7989 = vst [vmem:[%s10501_s4] sm:$0xff] (!%p9061_p6), %v7987_v63 }
 0x4f3   : > { %v7830_v11 = vcombine.low %v7822_v5, %v7829_v30 }
 0x4f5   : > { %v7834_v50 = vadd.f32 %v7830_v11, %v214_v7 }
 0x4f7   : > { %7836 = vst [vmem:[%s10501_s4 + $0x8] sm:$0xff] %v7834_v50 }
 0x4fe   : > { %v7842_v55 = vld [vmem:[%s10501_s4 + $0x8] sm:$0xff] }
 0x4ff   : > { %v7914_v62 = vmul.f32 %v7910_v56, %v7842_v55 }
 0x501   : > { %v7986_v9 = vadd.f32 %v7982_v6, %v7914_v62 }
 0x503   : > { %v7988_v1 = vmax.f32 %v7986_v9, 0.0 }
 0x505   : > { %7990 = vst [vmem:[%s10501_s4 + $0x8] sm:$0xff] %v7988_v1 }
 0x506 PF: > { %s14_s15 = sadd.s32 1, %s9196_s15  }
 0x507   : > { %p11_p7 = scmp.ge.s32.totalorder %s14_s15, 4  }
 0x509   :  { %13 = sbr.rel (!%p11_p7) target bundleno = 1 (0x1), region = 73 }

</bundles_post_ra>
